<compile_context>
chip_gen: v6e
topology: v6e:2x2x1
jax: 0.10.0
libtpu: 0.0.40
codegen_flags: <defaults>
</compile_context>

<pallas_src>
import jax
import jax.numpy as jnp
from jax import lax
from jax.experimental import pallas as pl
from jax.experimental.pallas import tpu as pltpu

_VMEM = pl.BlockSpec(memory_space=pltpu.MemorySpace.VMEM)


def _round_up(x, m):
    return ((x + m - 1) // m) * m


def _pick_tile(m, cap=512):
    """Largest multiple of 16 dividing m, <= cap (m is always a multiple of 16 here)."""
    assert m % 16 == 0
    best = 16
    d = 16
    while d <= min(m, cap):
        if m % d == 0:
            best = d
        d += 16
    return best


# ----------------------------------------------------------------------------
# Kernel: conv (im2col GEMM) + 2x2 maxpool + bias + ReLU, lane-dense output
# ----------------------------------------------------------------------------
def conv_relu_pool_kernel(pat_ref, w_ref, b_ref, out_ref):
    """pat_ref: (4, TM, K) bf16 -- 4 pool candidates x TM pooled locations x K taps.
    w_ref: (K, 128) bf16.  b_ref: (1, 128) f32.  out_ref: (TM, 128) f32.
    out = relu(max_p(pat[p] @ w) + b); bias/ReLU hoisted out of the max (monotone)."""
    _, tm, k = pat_ref.shape
    # One long MXU stream (single RHS push) instead of 4 short dots.
    y = jnp.dot(pat_ref[...].reshape(4 * tm, k), w_ref[...],
                preferred_element_type=jnp.float32)             # (4*TM, 128) f32
    m = jnp.maximum(jnp.maximum(y[0:tm], y[tm:2 * tm]),
                    jnp.maximum(y[2 * tm:3 * tm], y[3 * tm:4 * tm]))
    out_ref[...] = jnp.maximum(m + b_ref[...], 0.0)


def conv_relu_pool(patches, w, b):
    """patches: (4, M, K) bf16, w: (K, 128) bf16, b: (1, 128) f32 -> (M, 128) f32."""
    _, M, K = patches.shape
    CP = w.shape[1]
    TM = _pick_tile(M)
    return pl.pallas_call(
        conv_relu_pool_kernel,
        out_shape=jax.ShapeDtypeStruct((M, CP), jnp.float32),
        grid=(M // TM,),
        in_specs=[pl.BlockSpec((4, TM, K), lambda i: (0, i, 0)),
                  pl.BlockSpec((K, CP), lambda i: (0, 0)),
                  pl.BlockSpec((1, CP), lambda i: (0, 0))],
        out_specs=pl.BlockSpec((TM, CP), lambda i: (i, 0)),
        compiler_params=pltpu.CompilerParams(
            dimension_semantics=("parallel",)),   # v7x: shard M across 2 TCs
    )(patches, w, b)


# ----------------------------------------------------------------------------
# Kernel: fused multi-layer LSTM + final Linear (bf16 matmuls, f32 gate math)
# ----------------------------------------------------------------------------
def make_lstm_fc_kernel(T, BP, HP, num_layers):
    def kernel(*refs):
        feats_ref = refs[0]                                # (T*BP, DP)   bf16
        layer_refs = refs[1:1 + 3 * num_layers]
        fcw_ref = refs[1 + 3 * num_layers]                 # (HP, OP)     bf16
        fcb_ref = refs[2 + 3 * num_layers]                 # (1, OP)      f32
        out_ref = refs[3 + 3 * num_layers]                 # (BP, OP)     f32
        xproj_ref = refs[4 + 3 * num_layers]               # (T*BP, 4*HP) f32 scratch
        seq_ref = refs[5 + 3 * num_layers]                 # (T*BP, HP)   bf16 scratch

        h = None
        for l in range(num_layers):
            wih_ref = layer_refs[3 * l]        # (Din_pad, 4*HP) bf16, pre-transposed
            whh_ref = layer_refs[3 * l + 1]    # (HP, 4*HP)      bf16, pre-transposed
            b_ref = layer_refs[3 * l + 2]      # (1, 4*HP)       f32, b_ih + b_hh
            src_ref = feats_ref if l == 0 else seq_ref

            # Hoisted input projection: one big bf16 GEMM over all T timesteps,
            # bias broadcast folded in once (outside the recurrence).
            xproj_ref[...] = (
                jnp.dot(src_ref[...], wih_ref[...],
                        preferred_element_type=jnp.float32) + b_ref[...])

            h = jnp.zeros((BP, HP), jnp.float32)
            c = jnp.zeros((BP, HP), jnp.float32)
            # Recurrence, fully unrolled (T static, small).  Padded gate lanes stay
            # exactly zero (zero weight/bias columns => i=f=o=0.5, g=0, c=h=0), so
            # they never pollute real lanes of the next layer / FC.
            # TODO(synk): for large T use lax.fori_loop(unroll=8) and keep W_hh
            # stationary via pltpu.matmul_push_rhs/matmul_acc_lhs/matmul_pop.
            for t in range(T):
                gates = (xproj_ref[pl.ds(t * BP, BP), :]
                         + jnp.dot(h.astype(jnp.bfloat16), whh_ref[...],
                                   preferred_element_type=jnp.float32))
                i_g = jax.nn.sigmoid(gates[:, 0:HP])
                f_g = jax.nn.sigmoid(gates[:, HP:2 * HP])
                g_g = jnp.tanh(gates[:, 2 * HP:3 * HP])
                o_g = jax.nn.sigmoid(gates[:, 3 * HP:4 * HP])
                c = f_g * c + i_g * g_g
                h = o_g * jnp.tanh(c)
                if l + 1 < num_layers:        # last layer: only h_T is needed
                    seq_ref[pl.ds(t * BP, BP), :] = h.astype(jnp.bfloat16)

        # Final Linear on h_T of the last layer (fused: no extra pallas_call,
        # hidden sequence never round-trips HBM).
        out_ref[...] = (jnp.dot(h.astype(jnp.bfloat16), fcw_ref[...],
                                preferred_element_type=jnp.float32)
                        + fcb_ref[...])

    return kernel


def lstm_fc_forward(feats, params):
    """feats: (B, T, D) f32 in (h, w, c) flatten order -> (B, output_dim) f32."""
    B, T, D = feats.shape
    H = params["lstm"][0][1].shape[1]
    O = params["fc_w"].shape[0]
    BP = _round_up(B, 16)      # sublane-dense batch (16 => aligned for bf16 tiles too)
    HP = _round_up(H, 128)     # lane-dense hidden -> vreg-aligned gate slices
    OP = _round_up(O, 128)
    DP = _round_up(D, 128)

    # time-major, batch padded to BP, flattened to (T*BP, DP), bf16 activations
    feats_tm = jnp.transpose(feats, (1, 0, 2))
    feats_pad = jnp.zeros((T, BP, DP), jnp.float32).at[:, :B, :D].set(feats_tm)
    feats_pad = feats_pad.reshape(T * BP, DP).astype(jnp.bfloat16)

    inputs = [feats_pad]
    num_layers = len(params["lstm"])
    for l, (w_ih, w_hh, b_ih, b_hh) in enumerate(params["lstm"]):
        Din = w_ih.shape[1]
        DinP = DP if l == 0 else HP
        if l == 0:
            # Fold the (c,h,w)->(h,w,c) CNN-feature layout change into W_ih (once),
            # instead of transposing the activations every forward.
            w_ih = w_ih.reshape(4 * H, 32, 4, 4).transpose(0, 2, 3, 1).reshape(4 * H, Din)
        wih_t = jnp.zeros((DinP, 4 * HP), jnp.bfloat16)
        whh_t = jnp.zeros((HP, 4 * HP), jnp.bfloat16)
        bias = jnp.zeros((1, 4 * HP), jnp.float32)
        for g in range(4):  # PyTorch gate order: i, f, g, o
            wih_t = wih_t.at[:Din, g * HP:g * HP + H].set(
                w_ih[g * H:(g + 1) * H, :].T.astype(jnp.bfloat16))
            whh_t = whh_t.at[:H, g * HP:g * HP + H].set(
                w_hh[g * H:(g + 1) * H, :].T.astype(jnp.bfloat16))
            bias = bias.at[0, g * HP:g * HP + H].set(
                b_ih[g * H:(g + 1) * H] + b_hh[g * H:(g + 1) * H])
        inputs += [wih_t, whh_t, bias]

    fc_wt = jnp.zeros((HP, OP), jnp.bfloat16).at[:H, :O].set(
        params["fc_w"].T.astype(jnp.bfloat16))
    fc_b = jnp.zeros((1, OP), jnp.float32).at[0, :O].set(params["fc_b"])
    inputs += [fc_wt, fc_b]

    out = pl.pallas_call(
        make_lstm_fc_kernel(T, BP, HP, num_layers),
        out_shape=jax.ShapeDtypeStruct((BP, OP), jnp.float32),
        in_specs=[_VMEM] * len(inputs),
        out_specs=_VMEM,
        scratch_shapes=[pltpu.VMEM((T * BP, 4 * HP), jnp.float32),
                        pltpu.VMEM((T * BP, HP), jnp.bfloat16)],
    )(*inputs)
    return out[:B, :O]


# ----------------------------------------------------------------------------
# CNN feature extractor (per-timestep); wrapper builds im2col patches (layout only)
# ----------------------------------------------------------------------------
def cnn_features(x, params):
    """x: (B, T, 28, 28) -> (B, T, 32*4*4) features in (h, w, c) flatten order."""
    B, T = x.shape[0], x.shape[1]
    N = B * T
    imgs = x.reshape(N, 28, 28).astype(jnp.bfloat16)

    # ---- stage 1: conv1(1->16, 5x5, valid) + relu + maxpool(2) : 28 -> 24 -> 12 ----
    taps = [imgs[:, dy:dy + 24, dx:dx + 24] for dy in range(5) for dx in range(5)]
    pat = jnp.stack(taps, axis=-1)                                    # (N,24,24,25)
    pat = jnp.stack([pat[:, a::2, b::2, :] for a in (0, 1) for b in (0, 1)], axis=0)
    pat = pat.reshape(4, N * 144, 25)
    pat = jnp.pad(pat, ((0, 0), (0, 0), (0, 7)))                      # K: 25 -> 32
    w1m = jnp.zeros((32, 128), jnp.bfloat16).at[:25, :16].set(
        params["w1"].reshape(16, 25).T.astype(jnp.bfloat16))
    b1 = jnp.zeros((1, 128), jnp.float32).at[0, :16].set(params["b1"])
    pooled1 = conv_relu_pool(pat, w1m, b1)[:, :16]                    # (N*144, 16) f32
    pooled1 = pooled1.reshape(N, 12, 12, 16).astype(jnp.bfloat16)

    # ---- stage 2: conv2(16->32, 5x5, valid) + relu + maxpool(2) : 12 -> 8 -> 4 ----
    taps2 = [pooled1[:, dy:dy + 8, dx:dx + 8, :] for dy in range(5) for dx in range(5)]
    pat2 = jnp.concatenate(taps2, axis=-1)                            # (N,8,8,400)
    pat2 = jnp.stack([pat2[:, a::2, b::2, :] for a in (0, 1) for b in (0, 1)], axis=0)
    pat2 = pat2.reshape(4, N * 16, 400)
    w2m = jnp.zeros((400, 128), jnp.bfloat16).at[:, :32].set(         # K order (dy,dx,ic)
        jnp.transpose(params["w2"], (2, 3, 1, 0)).reshape(400, 32).astype(jnp.bfloat16))
    b2 = jnp.zeros((1, 128), jnp.float32).at[0, :32].set(params["b2"])
    pooled2 = conv_relu_pool(pat2, w2m, b2)[:, :32]                   # (N*16, 32) f32

    # Keep (h, w, c) flatten order; the permutation to PyTorch's (c, h, w) order is
    # folded into layer-0 W_ih in lstm_fc_forward.
    return pooled2.reshape(B, T, 4 * 4 * 32)


def crnn_forward(x, params):
    feats = cnn_features(x, params)        # gridded Pallas conv+relu+pool kernels
    return lstm_fc_forward(feats, params)  # single fused Pallas LSTM+FC kernel


# ----------------------------------------------------------------------------
# Pure-JAX reference (mirrors the kernels' bf16-operand / f32-accumulate matmuls)
# ----------------------------------------------------------------------------
def crnn_reference(x, params):
    B, T = x.shape[0], x.shape[1]
    bf = jnp.bfloat16
    dn = ("NCHW", "OIHW", "NCHW")
    y = lax.conv_general_dilated(
        x.reshape(B * T, 1, 28, 28).astype(bf), params["w1"].astype(bf), (1, 1),
        "VALID", dimension_numbers=dn, preferred_element_type=jnp.float32)
    y = jnp.maximum(y + params["b1"][None, :, None, None], 0.0)
    y = lax.reduce_window(y, -jnp.inf, lax.max, (1, 1, 2, 2), (1, 1, 2, 2), "VALID")
    y = lax.conv_general_dilated(
        y.astype(bf), params["w2"].astype(bf), (1, 1), "VALID",
        dimension_numbers=dn, preferred_element_type=jnp.float32)
    y = jnp.maximum(y + params["b2"][None, :, None, None], 0.0)
    y = lax.reduce_window(y, -jnp.inf, lax.max, (1, 1, 2, 2), (1, 1, 2, 2), "VALID")
    feats = y.reshape(B, T, 32 * 4 * 4)    # PyTorch (c, h, w) flatten order

    h_in = feats
    for (w_ih, w_hh, b_ih, b_hh) in params["lstm"]:
        H = w_hh.shape[1]
        b = b_ih + b_hh
        wih_bf = w_ih.astype(bf).T
        whh_bf = w_hh.astype(bf).T

        def cell(carry, x_t, wih_bf=wih_bf, whh_bf=whh_bf, b=b, H=H):
            h, c = carry
            gates = (jnp.dot(x_t.astype(bf), wih_bf, preferred_element_type=jnp.float32)
                     + jnp.dot(h.astype(bf), whh_bf, preferred_element_type=jnp.float32)
                     + b)
            i = jax.nn.sigmoid(gates[:, 0:H])
            f = jax.nn.sigmoid(gates[:, H:2 * H])
            g = jnp.tanh(gates[:, 2 * H:3 * H])
            o = jax.nn.sigmoid(gates[:, 3 * H:4 * H])
            c_new = f * c + i * g
            h_new = o * jnp.tanh(c_new)
            return (h_new, c_new), h_new

        init = (jnp.zeros((B, H), jnp.float32), jnp.zeros((B, H), jnp.float32))
        _, h_seq = lax.scan(cell, init, jnp.transpose(h_in, (1, 0, 2)))
        h_in = jnp.transpose(h_seq, (1, 0, 2))
    return (jnp.dot(h_in[:, -1, :].astype(bf), params["fc_w"].astype(bf).T,
                    preferred_element_type=jnp.float32) + params["fc_b"])


# ----------------------------------------------------------------------------
# Deterministic parameter init (matches nn.Conv2d / nn.LSTM / nn.Linear shapes)
# ----------------------------------------------------------------------------
def init_params(key, hidden_dim, layer_dim, output_dim):
    def u(k, shape, bound):
        return jax.random.uniform(k, shape, jnp.float32, -bound, bound)

    keys = jax.random.split(key, 6 + 4 * layer_dim)
    ki = iter(keys)
    bc1 = 1.0 / float(jnp.sqrt(jnp.float32(1 * 5 * 5)))
    bc2 = 1.0 / float(jnp.sqrt(jnp.float32(16 * 5 * 5)))
    bl = 1.0 / float(jnp.sqrt(jnp.float32(hidden_dim)))
    params = {
        "w1": u(next(ki), (16, 1, 5, 5), bc1), "b1": u(next(ki), (16,), bc1),
        "w2": u(next(ki), (32, 16, 5, 5), bc2), "b2": u(next(ki), (32,), bc2),
        "fc_w": u(next(ki), (output_dim, hidden_dim), bl),
        "fc_b": u(next(ki), (output_dim,), bl),
    }
    lstm = []
    lstm_in = 32 * 4 * 4
    for l in range(layer_dim):
        d_in = lstm_in if l == 0 else hidden_dim
        lstm.append((u(next(ki), (4 * hidden_dim, d_in), bl),
                     u(next(ki), (4 * hidden_dim, hidden_dim), bl),
                     u(next(ki), (4 * hidden_dim,), bl),
                     u(next(ki), (4 * hidden_dim,), bl)))
    params["lstm"] = lstm
    return params


# ----------------------------------------------------------------------------
if __name__ == "__main__":
    batch, seq_len = 2, 8                        # x: (B, T, 28, 28)
    hidden_dim, layer_dim, output_dim = 32, 2, 10

    key = jax.random.PRNGKey(0)
    key, kx = jax.random.split(key)
    x = jax.random.uniform(kx, (batch, seq_len, 28, 28), jnp.float32)
    params = init_params(key, hidden_dim, layer_dim, output_dim)

    out = jax.jit(crnn_forward)(x, params)
    out = jax.block_until_ready(out)

    ref = jax.block_until_ready(crnn_reference(x, params))
    assert out.shape == (batch, output_dim)
    assert jnp.allclose(out, ref, atol=1e-2, rtol=1e-2), (out, ref)

    print("KERNEL_OK")
</pallas_src>

<mosaic_0001>
module attributes {stable_mosaic.version = 11 : i64} {
  func.func @conv_relu_pool_kernel(%arg0: i32, %arg1: memref<4x384x32xbf16, #tpu.memory_space<vmem>>, %arg2: memref<32x128xbf16, #tpu.memory_space<vmem>>, %arg3: memref<1x128xf32, #tpu.memory_space<vmem>>, %arg4: memref<384x128xf32, #tpu.memory_space<vmem>>) attributes {dimension_semantics = [#tpu.dimension_semantics<parallel>], iteration_bounds = array<i64: 6>, scalar_prefetch = 0 : i64, scratch_operands = 0 : i64, tpu.core_type = #tpu.core_type<tc>, window_params = [{transform_indices = @transform_0, window_bounds = array<i64: 4, 384, 32>}, {pipeline_mode = #tpu.pipeline_mode<synchronous>, transform_indices = @transform_1, window_bounds = array<i64: 32, 128>}, {pipeline_mode = #tpu.pipeline_mode<synchronous>, transform_indices = @transform_2, window_bounds = array<i64: 1, 128>}, {transform_indices = @transform_3, window_bounds = array<i64: 384, 128>}]} {
    %c0 = arith.constant 0 : index
    %c0_0 = arith.constant 0 : index
    %c0_1 = arith.constant 0 : index
    %0 = vector.load %arg1[%c0, %c0_0, %c0_1] : memref<4x384x32xbf16, #tpu.memory_space<vmem>>, vector<4x384x32xbf16>
    %1 = vector.shape_cast %0 : vector<4x384x32xbf16> to vector<1536x32xbf16>
    %c0_2 = arith.constant 0 : index
    %c0_3 = arith.constant 0 : index
    %2 = vector.load %arg2[%c0_2, %c0_3] : memref<32x128xbf16, #tpu.memory_space<vmem>>, vector<32x128xbf16>
    %cst = arith.constant dense<0.000000e+00> : vector<1536x128xf32>
    %3 = tpu.matmul %1, %2, %cst {dimension_numbers = #tpu.dot_dimension_numbers<[1], [0], [0], [1], [0, 0, 1, 1], [], []>} : vector<1536x32xbf16>, vector<32x128xbf16>, vector<1536x128xf32> -> vector<1536x128xf32>
    %4 = vector.extract_strided_slice %3 {offsets = [0, 0], sizes = [384, 128], strides = [1, 1]} : vector<1536x128xf32> to vector<384x128xf32>
    %5 = vector.extract_strided_slice %3 {offsets = [384, 0], sizes = [384, 128], strides = [1, 1]} : vector<1536x128xf32> to vector<384x128xf32>
    %6 = arith.maximumf %4, %5 : vector<384x128xf32>
    %7 = vector.extract_strided_slice %3 {offsets = [768, 0], sizes = [384, 128], strides = [1, 1]} : vector<1536x128xf32> to vector<384x128xf32>
    %8 = vector.extract_strided_slice %3 {offsets = [1152, 0], sizes = [384, 128], strides = [1, 1]} : vector<1536x128xf32> to vector<384x128xf32>
    %9 = arith.maximumf %7, %8 : vector<384x128xf32>
    %10 = arith.maximumf %6, %9 : vector<384x128xf32>
    %c0_4 = arith.constant 0 : index
    %c0_5 = arith.constant 0 : index
    %11 = vector.load %arg3[%c0_4, %c0_5] : memref<1x128xf32, #tpu.memory_space<vmem>>, vector<1x128xf32>
    %12 = vector.broadcast %11 : vector<1x128xf32> to vector<384x128xf32>
    %13 = arith.addf %10, %12 : vector<384x128xf32>
    %cst_6 = arith.constant 0.000000e+00 : f32
    %14 = vector.broadcast %cst_6 : f32 to vector<384x128xf32>
    %15 = arith.maximumf %13, %14 : vector<384x128xf32>
    %c0_7 = arith.constant 0 : index
    %c0_8 = arith.constant 0 : index
    %16 = vector.load %arg4[%c0_7, %c0_8] : memref<384x128xf32, #tpu.memory_space<vmem>>, vector<384x128xf32>
    tpu.vector_store %arg4[%c0_7, %c0_8], %15 {strides = array<i32>} : memref<384x128xf32, #tpu.memory_space<vmem>>, vector<384x128xf32>,
    return
  }
  func.func @transform_0(%arg0: i32) -> (i32, i32, i32) {
    %c0_i32 = arith.constant 0 : i32
    %c0_i32_0 = arith.constant 0 : i32
    %c0_i32_1 = arith.constant 0 : i32
    return %c0_i32, %arg0, %c0_i32_0 : i32, i32, i32
  }
  func.func @transform_1(%arg0: i32) -> (i32, i32) {
    %c0_i32 = arith.constant 0 : i32
    %c0_i32_0 = arith.constant 0 : i32
    %c0_i32_1 = arith.constant 0 : i32
    return %c0_i32, %c0_i32_0 : i32, i32
  }
  func.func @transform_2(%arg0: i32) -> (i32, i32) {
    %c0_i32 = arith.constant 0 : i32
    %c0_i32_0 = arith.constant 0 : i32
    %c0_i32_1 = arith.constant 0 : i32
    return %c0_i32, %c0_i32_0 : i32, i32
  }
  func.func @transform_3(%arg0: i32) -> (i32, i32) {
    %c0_i32 = arith.constant 0 : i32
    %c0_i32_0 = arith.constant 0 : i32
    return %arg0, %c0_i32 : i32, i32
  }
}

module attributes {stable_mosaic.version = 11 : i64} {
  func.func @conv_relu_pool_kernel(%arg0: i32, %arg1: memref<4x256x400xbf16, #tpu.memory_space<vmem>>, %arg2: memref<400x128xbf16, #tpu.memory_space<vmem>>, %arg3: memref<1x128xf32, #tpu.memory_space<vmem>>, %arg4: memref<256x128xf32, #tpu.memory_space<vmem>>) attributes {dimension_semantics = [#tpu.dimension_semantics<parallel>], iteration_bounds = array<i64: 1>, scalar_prefetch = 0 : i64, scratch_operands = 0 : i64, tpu.core_type = #tpu.core_type<tc>, window_params = [{transform_indices = @transform_0, window_bounds = array<i64: 4, 256, 400>}, {pipeline_mode = #tpu.pipeline_mode<synchronous>, transform_indices = @transform_1, window_bounds = array<i64: 400, 128>}, {pipeline_mode = #tpu.pipeline_mode<synchronous>, transform_indices = @transform_2, window_bounds = array<i64: 1, 128>}, {transform_indices = @transform_3, window_bounds = array<i64: 256, 128>}]} {
    %c0 = arith.constant 0 : index
    %c0_0 = arith.constant 0 : index
    %c0_1 = arith.constant 0 : index
    %0 = vector.load %arg1[%c0, %c0_0, %c0_1] : memref<4x256x400xbf16, #tpu.memory_space<vmem>>, vector<4x256x400xbf16>
    %1 = vector.shape_cast %0 : vector<4x256x400xbf16> to vector<1024x400xbf16>
    %c0_2 = arith.constant 0 : index
    %c0_3 = arith.constant 0 : index
    %2 = vector.load %arg2[%c0_2, %c0_3] : memref<400x128xbf16, #tpu.memory_space<vmem>>, vector<400x128xbf16>
    %cst = arith.constant dense<0.000000e+00> : vector<1024x128xf32>
    %3 = tpu.matmul %1, %2, %cst {dimension_numbers = #tpu.dot_dimension_numbers<[1], [0], [0], [1], [0, 0, 1, 1], [], []>} : vector<1024x400xbf16>, vector<400x128xbf16>, vector<1024x128xf32> -> vector<1024x128xf32>
    %4 = vector.extract_strided_slice %3 {offsets = [0, 0], sizes = [256, 128], strides = [1, 1]} : vector<1024x128xf32> to vector<256x128xf32>
    %5 = vector.extract_strided_slice %3 {offsets = [256, 0], sizes = [256, 128], strides = [1, 1]} : vector<1024x128xf32> to vector<256x128xf32>
    %6 = arith.maximumf %4, %5 : vector<256x128xf32>
    %7 = vector.extract_strided_slice %3 {offsets = [512, 0], sizes = [256, 128], strides = [1, 1]} : vector<1024x128xf32> to vector<256x128xf32>
    %8 = vector.extract_strided_slice %3 {offsets = [768, 0], sizes = [256, 128], strides = [1, 1]} : vector<1024x128xf32> to vector<256x128xf32>
    %9 = arith.maximumf %7, %8 : vector<256x128xf32>
    %10 = arith.maximumf %6, %9 : vector<256x128xf32>
    %c0_4 = arith.constant 0 : index
    %c0_5 = arith.constant 0 : index
    %11 = vector.load %arg3[%c0_4, %c0_5] : memref<1x128xf32, #tpu.memory_space<vmem>>, vector<1x128xf32>
    %12 = vector.broadcast %11 : vector<1x128xf32> to vector<256x128xf32>
    %13 = arith.addf %10, %12 : vector<256x128xf32>
    %cst_6 = arith.constant 0.000000e+00 : f32
    %14 = vector.broadcast %cst_6 : f32 to vector<256x128xf32>
    %15 = arith.maximumf %13, %14 : vector<256x128xf32>
    %c0_7 = arith.constant 0 : index
    %c0_8 = arith.constant 0 : index
    %16 = vector.load %arg4[%c0_7, %c0_8] : memref<256x128xf32, #tpu.memory_space<vmem>>, vector<256x128xf32>
    tpu.vector_store %arg4[%c0_7, %c0_8], %15 {strides = array<i32>} : memref<256x128xf32, #tpu.memory_space<vmem>>, vector<256x128xf32>,
    return
  }
  func.func @transform_0(%arg0: i32) -> (i32, i32, i32) {
    %c0_i32 = arith.constant 0 : i32
    %c0_i32_0 = arith.constant 0 : i32
    %c0_i32_1 = arith.constant 0 : i32
    return %c0_i32, %arg0, %c0_i32_0 : i32, i32, i32
  }
  func.func @transform_1(%arg0: i32) -> (i32, i32) {
    %c0_i32 = arith.constant 0 : i32
    %c0_i32_0 = arith.constant 0 : i32
    %c0_i32_1 = arith.constant 0 : i32
    return %c0_i32, %c0_i32_0 : i32, i32
  }
  func.func @transform_2(%arg0: i32) -> (i32, i32) {
    %c0_i32 = arith.constant 0 : i32
    %c0_i32_0 = arith.constant 0 : i32
    %c0_i32_1 = arith.constant 0 : i32
    return %c0_i32, %c0_i32_0 : i32, i32
  }
  func.func @transform_3(%arg0: i32) -> (i32, i32) {
    %c0_i32 = arith.constant 0 : i32
    %c0_i32_0 = arith.constant 0 : i32
    return %arg0, %c0_i32 : i32, i32
  }
}

module attributes {stable_mosaic.version = 11 : i64} {
  func.func @kernel(%arg0: memref<128x512xbf16, #tpu.memory_space<vmem>>, %arg1: memref<512x512xbf16, #tpu.memory_space<vmem>>, %arg2: memref<128x512xbf16, #tpu.memory_space<vmem>>, %arg3: memref<1x512xf32, #tpu.memory_space<vmem>>, %arg4: memref<128x512xbf16, #tpu.memory_space<vmem>>, %arg5: memref<128x512xbf16, #tpu.memory_space<vmem>>, %arg6: memref<1x512xf32, #tpu.memory_space<vmem>>, %arg7: memref<128x128xbf16, #tpu.memory_space<vmem>>, %arg8: memref<1x128xf32, #tpu.memory_space<vmem>>, %arg9: memref<16x128xf32, #tpu.memory_space<vmem>>, %arg10: memref<128x512xf32, #tpu.memory_space<vmem>>, %arg11: memref<128x128xbf16, #tpu.memory_space<vmem>>) attributes {dimension_semantics = [], scalar_prefetch = 0 : i64, scratch_operands = 2 : i64, tpu.core_type = #tpu.core_type<tc>} {
    %c0 = arith.constant 0 : index
    %c0_0 = arith.constant 0 : index
    %0 = vector.load %arg0[%c0, %c0_0] : memref<128x512xbf16, #tpu.memory_space<vmem>>, vector<128x512xbf16>
    %c0_1 = arith.constant 0 : index
    %c0_2 = arith.constant 0 : index
    %1 = vector.load %arg1[%c0_1, %c0_2] : memref<512x512xbf16, #tpu.memory_space<vmem>>, vector<512x512xbf16>
    %cst = arith.constant dense<0.000000e+00> : vector<128x512xf32>
    %2 = tpu.matmul %0, %1, %cst {dimension_numbers = #tpu.dot_dimension_numbers<[1], [0], [0], [1], [0, 0, 1, 1], [], []>} : vector<128x512xbf16>, vector<512x512xbf16>, vector<128x512xf32> -> vector<128x512xf32>
    %c0_3 = arith.constant 0 : index
    %c0_4 = arith.constant 0 : index
    %3 = vector.load %arg3[%c0_3, %c0_4] : memref<1x512xf32, #tpu.memory_space<vmem>>, vector<1x512xf32>
    %4 = vector.broadcast %3 : vector<1x512xf32> to vector<128x512xf32>
    %5 = arith.addf %2, %4 : vector<128x512xf32>
    %c0_5 = arith.constant 0 : index
    %c0_6 = arith.constant 0 : index
    %6 = vector.load %arg10[%c0_5, %c0_6] : memref<128x512xf32, #tpu.memory_space<vmem>>, vector<128x512xf32>
    tpu.vector_store %arg10[%c0_5, %c0_6], %5 {strides = array<i32>} : memref<128x512xf32, #tpu.memory_space<vmem>>, vector<128x512xf32>,
    %cst_7 = arith.constant 0.000000e+00 : f32
    %7 = vector.broadcast %cst_7 : f32 to vector<16x128xf32>
    %cst_8 = arith.constant 0.000000e+00 : f32
    %8 = vector.broadcast %cst_8 : f32 to vector<16x128xf32>
    %c0_9 = arith.constant 0 : index
    %c0_10 = arith.constant 0 : index
    %9 = vector.load %arg10[%c0_9, %c0_10] : memref<128x512xf32, #tpu.memory_space<vmem>>, vector<16x512xf32>
    %10 = arith.truncf %7 : vector<16x128xf32> to vector<16x128xbf16>
    %c0_11 = arith.constant 0 : index
    %c0_12 = arith.constant 0 : index
    %11 = vector.load %arg2[%c0_11, %c0_12] : memref<128x512xbf16, #tpu.memory_space<vmem>>, vector<128x512xbf16>
    %cst_13 = arith.constant dense<0.000000e+00> : vector<16x512xf32>
    %12 = tpu.matmul %10, %11, %cst_13 {dimension_numbers = #tpu.dot_dimension_numbers<[1], [0], [0], [1], [0, 0, 1, 1], [], []>} : vector<16x128xbf16>, vector<128x512xbf16>, vector<16x512xf32> -> vector<16x512xf32>
    %13 = arith.addf %9, %12 : vector<16x512xf32>
    %14 = vector.extract_strided_slice %13 {offsets = [0, 0], sizes = [16, 128], strides = [1, 1]} : vector<16x512xf32> to vector<16x128xf32>
    %15 = arith.negf %14 : vector<16x128xf32>
    %16 = math.exp %15 : vector<16x128xf32>
    %cst_14 = arith.constant 1.000000e+00 : f32
    %17 = vector.broadcast %cst_14 : f32 to vector<16x128xf32>
    %18 = arith.addf %17, %16 : vector<16x128xf32>
    %19 = arith.divf %17, %18 : vector<16x128xf32>
    %20 = vector.extract_strided_slice %13 {offsets = [0, 128], sizes = [16, 128], strides = [1, 1]} : vector<16x512xf32> to vector<16x128xf32>
    %21 = arith.negf %20 : vector<16x128xf32>
    %22 = math.exp %21 : vector<16x128xf32>
    %cst_15 = arith.constant 1.000000e+00 : f32
    %23 = vector.broadcast %cst_15 : f32 to vector<16x128xf32>
    %24 = arith.addf %23, %22 : vector<16x128xf32>
    %25 = arith.divf %23, %24 : vector<16x128xf32>
    %26 = vector.extract_strided_slice %13 {offsets = [0, 256], sizes = [16, 128], strides = [1, 1]} : vector<16x512xf32> to vector<16x128xf32>
    %27 = math.tanh %26 : vector<16x128xf32>
    %28 = vector.extract_strided_slice %13 {offsets = [0, 384], sizes = [16, 128], strides = [1, 1]} : vector<16x512xf32> to vector<16x128xf32>
    %29 = arith.negf %28 : vector<16x128xf32>
    %30 = math.exp %29 : vector<16x128xf32>
    %cst_16 = arith.constant 1.000000e+00 : f32
    %31 = vector.broadcast %cst_16 : f32 to vector<16x128xf32>
    %32 = arith.addf %31, %30 : vector<16x128xf32>
    %33 = arith.divf %31, %32 : vector<16x128xf32>
    %34 = arith.mulf %25, %8 : vector<16x128xf32>
    %35 = arith.mulf %19, %27 : vector<16x128xf32>
    %36 = arith.addf %34, %35 : vector<16x128xf32>
    %37 = math.tanh %36 : vector<16x128xf32>
    %38 = arith.mulf %33, %37 : vector<16x128xf32>
    %39 = arith.truncf %38 : vector<16x128xf32> to vector<16x128xbf16>
    %c0_17 = arith.constant 0 : index
    %c0_18 = arith.constant 0 : index
    %40 = vector.load %arg11[%c0_17, %c0_18] : memref<128x128xbf16, #tpu.memory_space<vmem>>, vector<16x128xbf16>
    tpu.vector_store %arg11[%c0_17, %c0_18], %39 {strides = array<i32>} : memref<128x128xbf16, #tpu.memory_space<vmem>>, vector<16x128xbf16>,
    %c16 = arith.constant 16 : index
    %c0_19 = arith.constant 0 : index
    %41 = vector.load %arg10[%c16, %c0_19] : memref<128x512xf32, #tpu.memory_space<vmem>>, vector<16x512xf32>
    %42 = arith.truncf %38 : vector<16x128xf32> to vector<16x128xbf16>
    %c0_20 = arith.constant 0 : index
    %c0_21 = arith.constant 0 : index
    %43 = vector.load %arg2[%c0_20, %c0_21] : memref<128x512xbf16, #tpu.memory_space<vmem>>, vector<128x512xbf16>
    %cst_22 = arith.constant dense<0.000000e+00> : vector<16x512xf32>
    %44 = tpu.matmul %42, %43, %cst_22 {dimension_numbers = #tpu.dot_dimension_numbers<[1], [0], [0], [1], [0, 0, 1, 1], [], []>} : vector<16x128xbf16>, vector<128x512xbf16>, vector<16x512xf32> -> vector<16x512xf32>
    %45 = arith.addf %41, %44 : vector<16x512xf32>
    %46 = vector.extract_strided_slice %45 {offsets = [0, 0], sizes = [16, 128], strides = [1, 1]} : vector<16x512xf32> to vector<16x128xf32>
    %47 = arith.negf %46 : vector<16x128xf32>
    %48 = math.exp %47 : vector<16x128xf32>
    %cst_23 = arith.constant 1.000000e+00 : f32
    %49 = vector.broadcast %cst_23 : f32 to vector<16x128xf32>
    %50 = arith.addf %49, %48 : vector<16x128xf32>
    %51 = arith.divf %49, %50 : vector<16x128xf32>
    %52 = vector.extract_strided_slice %45 {offsets = [0, 128], sizes = [16, 128], strides = [1, 1]} : vector<16x512xf32> to vector<16x128xf32>
    %53 = arith.negf %52 : vector<16x128xf32>
    %54 = math.exp %53 : vector<16x128xf32>
    %cst_24 = arith.constant 1.000000e+00 : f32
    %55 = vector.broadcast %cst_24 : f32 to vector<16x128xf32>
    %56 = arith.addf %55, %54 : vector<16x128xf32>
    %57 = arith.divf %55, %56 : vector<16x128xf32>
    %58 = vector.extract_strided_slice %45 {offsets = [0, 256], sizes = [16, 128], strides = [1, 1]} : vector<16x512xf32> to vector<16x128xf32>
    %59 = math.tanh %58 : vector<16x128xf32>
    %60 = vector.extract_strided_slice %45 {offsets = [0, 384], sizes = [16, 128], strides = [1, 1]} : vector<16x512xf32> to vector<16x128xf32>
    %61 = arith.negf %60 : vector<16x128xf32>
    %62 = math.exp %61 : vector<16x128xf32>
    %cst_25 = arith.constant 1.000000e+00 : f32
    %63 = vector.broadcast %cst_25 : f32 to vector<16x128xf32>
    %64 = arith.addf %63, %62 : vector<16x128xf32>
    %65 = arith.divf %63, %64 : vector<16x128xf32>
    %66 = arith.mulf %57, %36 : vector<16x128xf32>
    %67 = arith.mulf %51, %59 : vector<16x128xf32>
    %68 = arith.addf %66, %67 : vector<16x128xf32>
    %69 = math.tanh %68 : vector<16x128xf32>
    %70 = arith.mulf %65, %69 : vector<16x128xf32>
    %71 = arith.truncf %70 : vector<16x128xf32> to vector<16x128xbf16>
    %c16_26 = arith.constant 16 : index
    %c0_27 = arith.constant 0 : index
    %72 = vector.load %arg11[%c16_26, %c0_27] : memref<128x128xbf16, #tpu.memory_space<vmem>>, vector<16x128xbf16>
    tpu.vector_store %arg11[%c16_26, %c0_27], %71 {strides = array<i32>} : memref<128x128xbf16, #tpu.memory_space<vmem>>, vector<16x128xbf16>,
    %c32 = arith.constant 32 : index
    %c0_28 = arith.constant 0 : index
    %73 = vector.load %arg10[%c32, %c0_28] : memref<128x512xf32, #tpu.memory_space<vmem>>, vector<16x512xf32>
    %74 = arith.truncf %70 : vector<16x128xf32> to vector<16x128xbf16>
    %c0_29 = arith.constant 0 : index
    %c0_30 = arith.constant 0 : index
    %75 = vector.load %arg2[%c0_29, %c0_30] : memref<128x512xbf16, #tpu.memory_space<vmem>>, vector<128x512xbf16>
    %cst_31 = arith.constant dense<0.000000e+00> : vector<16x512xf32>
    %76 = tpu.matmul %74, %75, %cst_31 {dimension_numbers = #tpu.dot_dimension_numbers<[1], [0], [0], [1], [0, 0, 1, 1], [], []>} : vector<16x128xbf16>, vector<128x512xbf16>, vector<16x512xf32> -> vector<16x512xf32>
    %77 = arith.addf %73, %76 : vector<16x512xf32>
    %78 = vector.extract_strided_slice %77 {offsets = [0, 0], sizes = [16, 128], strides = [1, 1]} : vector<16x512xf32> to vector<16x128xf32>
    %79 = arith.negf %78 : vector<16x128xf32>
    %80 = math.exp %79 : vector<16x128xf32>
    %cst_32 = arith.constant 1.000000e+00 : f32
    %81 = vector.broadcast %cst_32 : f32 to vector<16x128xf32>
    %82 = arith.addf %81, %80 : vector<16x128xf32>
    %83 = arith.divf %81, %82 : vector<16x128xf32>
    %84 = vector.extract_strided_slice %77 {offsets = [0, 128], sizes = [16, 128], strides = [1, 1]} : vector<16x512xf32> to vector<16x128xf32>
    %85 = arith.negf %84 : vector<16x128xf32>
    %86 = math.exp %85 : vector<16x128xf32>
    %cst_33 = arith.constant 1.000000e+00 : f32
    %87 = vector.broadcast %cst_33 : f32 to vector<16x128xf32>
    %88 = arith.addf %87, %86 : vector<16x128xf32>
    %89 = arith.divf %87, %88 : vector<16x128xf32>
    %90 = vector.extract_strided_slice %77 {offsets = [0, 256], sizes = [16, 128], strides = [1, 1]} : vector<16x512xf32> to vector<16x128xf32>
    %91 = math.tanh %90 : vector<16x128xf32>
    %92 = vector.extract_strided_slice %77 {offsets = [0, 384], sizes = [16, 128], strides = [1, 1]} : vector<16x512xf32> to vector<16x128xf32>
    %93 = arith.negf %92 : vector<16x128xf32>
    %94 = math.exp %93 : vector<16x128xf32>
    %cst_34 = arith.constant 1.000000e+00 : f32
    %95 = vector.broadcast %cst_34 : f32 to vector<16x128xf32>
    %96 = arith.addf %95, %94 : vector<16x128xf32>
    %97 = arith.divf %95, %96 : vector<16x128xf32>
    %98 = arith.mulf %89, %68 : vector<16x128xf32>
    %99 = arith.mulf %83, %91 : vector<16x128xf32>
    %100 = arith.addf %98, %99 : vector<16x128xf32>
    %101 = math.tanh %100 : vector<16x128xf32>
    %102 = arith.mulf %97, %101 : vector<16x128xf32>
    %103 = arith.truncf %102 : vector<16x128xf32> to vector<16x128xbf16>
    %c32_35 = arith.constant 32 : index
    %c0_36 = arith.constant 0 : index
    %104 = vector.load %arg11[%c32_35, %c0_36] : memref<128x128xbf16, #tpu.memory_space<vmem>>, vector<16x128xbf16>
    tpu.vector_store %arg11[%c32_35, %c0_36], %103 {strides = array<i32>} : memref<128x128xbf16, #tpu.memory_space<vmem>>, vector<16x128xbf16>,
    %c48 = arith.constant 48 : index
    %c0_37 = arith.constant 0 : index
    %105 = vector.load %arg10[%c48, %c0_37] : memref<128x512xf32, #tpu.memory_space<vmem>>, vector<16x512xf32>
    %106 = arith.truncf %102 : vector<16x128xf32> to vector<16x128xbf16>
    %c0_38 = arith.constant 0 : index
    %c0_39 = arith.constant 0 : index
    %107 = vector.load %arg2[%c0_38, %c0_39] : memref<128x512xbf16, #tpu.memory_space<vmem>>, vector<128x512xbf16>
    %cst_40 = arith.constant dense<0.000000e+00> : vector<16x512xf32>
    %108 = tpu.matmul %106, %107, %cst_40 {dimension_numbers = #tpu.dot_dimension_numbers<[1], [0], [0], [1], [0, 0, 1, 1], [], []>} : vector<16x128xbf16>, vector<128x512xbf16>, vector<16x512xf32> -> vector<16x512xf32>
    %109 = arith.addf %105, %108 : vector<16x512xf32>
    %110 = vector.extract_strided_slice %109 {offsets = [0, 0], sizes = [16, 128], strides = [1, 1]} : vector<16x512xf32> to vector<16x128xf32>
    %111 = arith.negf %110 : vector<16x128xf32>
    %112 = math.exp %111 : vector<16x128xf32>
    %cst_41 = arith.constant 1.000000e+00 : f32
    %113 = vector.broadcast %cst_41 : f32 to vector<16x128xf32>
    %114 = arith.addf %113, %112 : vector<16x128xf32>
    %115 = arith.divf %113, %114 : vector<16x128xf32>
    %116 = vector.extract_strided_slice %109 {offsets = [0, 128], sizes = [16, 128], strides = [1, 1]} : vector<16x512xf32> to vector<16x128xf32>
    %117 = arith.negf %116 : vector<16x128xf32>
    %118 = math.exp %117 : vector<16x128xf32>
    %cst_42 = arith.constant 1.000000e+00 : f32
    %119 = vector.broadcast %cst_42 : f32 to vector<16x128xf32>
    %120 = arith.addf %119, %118 : vector<16x128xf32>
    %121 = arith.divf %119, %120 : vector<16x128xf32>
    %122 = vector.extract_strided_slice %109 {offsets = [0, 256], sizes = [16, 128], strides = [1, 1]} : vector<16x512xf32> to vector<16x128xf32>
    %123 = math.tanh %122 : vector<16x128xf32>
    %124 = vector.extract_strided_slice %109 {offsets = [0, 384], sizes = [16, 128], strides = [1, 1]} : vector<16x512xf32> to vector<16x128xf32>
    %125 = arith.negf %124 : vector<16x128xf32>
    %126 = math.exp %125 : vector<16x128xf32>
    %cst_43 = arith.constant 1.000000e+00 : f32
    %127 = vector.broadcast %cst_43 : f32 to vector<16x128xf32>
    %128 = arith.addf %127, %126 : vector<16x128xf32>
    %129 = arith.divf %127, %128 : vector<16x128xf32>
    %130 = arith.mulf %121, %100 : vector<16x128xf32>
    %131 = arith.mulf %115, %123 : vector<16x128xf32>
    %132 = arith.addf %130, %131 : vector<16x128xf32>
    %133 = math.tanh %132 : vector<16x128xf32>
    %134 = arith.mulf %129, %133 : vector<16x128xf32>
    %135 = arith.truncf %134 : vector<16x128xf32> to vector<16x128xbf16>
    %c48_44 = arith.constant 48 : index
    %c0_45 = arith.constant 0 : index
    %136 = vector.load %arg11[%c48_44, %c0_45] : memref<128x128xbf16, #tpu.memory_space<vmem>>, vector<16x128xbf16>
    tpu.vector_store %arg11[%c48_44, %c0_45], %135 {strides = array<i32>} : memref<128x128xbf16, #tpu.memory_space<vmem>>, vector<16x128xbf16>,
    %c64 = arith.constant 64 : index
    %c0_46 = arith.constant 0 : index
    %137 = vector.load %arg10[%c64, %c0_46] : memref<128x512xf32, #tpu.memory_space<vmem>>, vector<16x512xf32>
    %138 = arith.truncf %134 : vector<16x128xf32> to vector<16x128xbf16>
    %c0_47 = arith.constant 0 : index
    %c0_48 = arith.constant 0 : index
    %139 = vector.load %arg2[%c0_47, %c0_48] : memref<128x512xbf16, #tpu.memory_space<vmem>>, vector<128x512xbf16>
    %cst_49 = arith.constant dense<0.000000e+00> : vector<16x512xf32>
    %140 = tpu.matmul %138, %139, %cst_49 {dimension_numbers = #tpu.dot_dimension_numbers<[1], [0], [0], [1], [0, 0, 1, 1], [], []>} : vector<16x128xbf16>, vector<128x512xbf16>, vector<16x512xf32> -> vector<16x512xf32>
    %141 = arith.addf %137, %140 : vector<16x512xf32>
    %142 = vector.extract_strided_slice %141 {offsets = [0, 0], sizes = [16, 128], strides = [1, 1]} : vector<16x512xf32> to vector<16x128xf32>
    %143 = arith.negf %142 : vector<16x128xf32>
    %144 = math.exp %143 : vector<16x128xf32>
    %cst_50 = arith.constant 1.000000e+00 : f32
    %145 = vector.broadcast %cst_50 : f32 to vector<16x128xf32>
    %146 = arith.addf %145, %144 : vector<16x128xf32>
    %147 = arith.divf %145, %146 : vector<16x128xf32>
    %148 = vector.extract_strided_slice %141 {offsets = [0, 128], sizes = [16, 128], strides = [1, 1]} : vector<16x512xf32> to vector<16x128xf32>
    %149 = arith.negf %148 : vector<16x128xf32>
    %150 = math.exp %149 : vector<16x128xf32>
    %cst_51 = arith.constant 1.000000e+00 : f32
    %151 = vector.broadcast %cst_51 : f32 to vector<16x128xf32>
    %152 = arith.addf %151, %150 : vector<16x128xf32>
    %153 = arith.divf %151, %152 : vector<16x128xf32>
    %154 = vector.extract_strided_slice %141 {offsets = [0, 256], sizes = [16, 128], strides = [1, 1]} : vector<16x512xf32> to vector<16x128xf32>
    %155 = math.tanh %154 : vector<16x128xf32>
    %156 = vector.extract_strided_slice %141 {offsets = [0, 384], sizes = [16, 128], strides = [1, 1]} : vector<16x512xf32> to vector<16x128xf32>
    %157 = arith.negf %156 : vector<16x128xf32>
    %158 = math.exp %157 : vector<16x128xf32>
    %cst_52 = arith.constant 1.000000e+00 : f32
    %159 = vector.broadcast %cst_52 : f32 to vector<16x128xf32>
    %160 = arith.addf %159, %158 : vector<16x128xf32>
    %161 = arith.divf %159, %160 : vector<16x128xf32>
    %162 = arith.mulf %153, %132 : vector<16x128xf32>
    %163 = arith.mulf %147, %155 : vector<16x128xf32>
    %164 = arith.addf %162, %163 : vector<16x128xf32>
    %165 = math.tanh %164 : vector<16x128xf32>
    %166 = arith.mulf %161, %165 : vector<16x128xf32>
    %167 = arith.truncf %166 : vector<16x128xf32> to vector<16x128xbf16>
    %c64_53 = arith.constant 64 : index
    %c0_54 = arith.constant 0 : index
    %168 = vector.load %arg11[%c64_53, %c0_54] : memref<128x128xbf16, #tpu.memory_space<vmem>>, vector<16x128xbf16>
    tpu.vector_store %arg11[%c64_53, %c0_54], %167 {strides = array<i32>} : memref<128x128xbf16, #tpu.memory_space<vmem>>, vector<16x128xbf16>,
    %c80 = arith.constant 80 : index
    %c0_55 = arith.constant 0 : index
    %169 = vector.load %arg10[%c80, %c0_55] : memref<128x512xf32, #tpu.memory_space<vmem>>, vector<16x512xf32>
    %170 = arith.truncf %166 : vector<16x128xf32> to vector<16x128xbf16>
    %c0_56 = arith.constant 0 : index
    %c0_57 = arith.constant 0 : index
    %171 = vector.load %arg2[%c0_56, %c0_57] : memref<128x512xbf16, #tpu.memory_space<vmem>>, vector<128x512xbf16>
    %cst_58 = arith.constant dense<0.000000e+00> : vector<16x512xf32>
    %172 = tpu.matmul %170, %171, %cst_58 {dimension_numbers = #tpu.dot_dimension_numbers<[1], [0], [0], [1], [0, 0, 1, 1], [], []>} : vector<16x128xbf16>, vector<128x512xbf16>, vector<16x512xf32> -> vector<16x512xf32>
    %173 = arith.addf %169, %172 : vector<16x512xf32>
    %174 = vector.extract_strided_slice %173 {offsets = [0, 0], sizes = [16, 128], strides = [1, 1]} : vector<16x512xf32> to vector<16x128xf32>
    %175 = arith.negf %174 : vector<16x128xf32>
    %176 = math.exp %175 : vector<16x128xf32>
    %cst_59 = arith.constant 1.000000e+00 : f32
    %177 = vector.broadcast %cst_59 : f32 to vector<16x128xf32>
    %178 = arith.addf %177, %176 : vector<16x128xf32>
    %179 = arith.divf %177, %178 : vector<16x128xf32>
    %180 = vector.extract_strided_slice %173 {offsets = [0, 128], sizes = [16, 128], strides = [1, 1]} : vector<16x512xf32> to vector<16x128xf32>
    %181 = arith.negf %180 : vector<16x128xf32>
    %182 = math.exp %181 : vector<16x128xf32>
    %cst_60 = arith.constant 1.000000e+00 : f32
    %183 = vector.broadcast %cst_60 : f32 to vector<16x128xf32>
    %184 = arith.addf %183, %182 : vector<16x128xf32>
    %185 = arith.divf %183, %184 : vector<16x128xf32>
    %186 = vector.extract_strided_slice %173 {offsets = [0, 256], sizes = [16, 128], strides = [1, 1]} : vector<16x512xf32> to vector<16x128xf32>
    %187 = math.tanh %186 : vector<16x128xf32>
    %188 = vector.extract_strided_slice %173 {offsets = [0, 384], sizes = [16, 128], strides = [1, 1]} : vector<16x512xf32> to vector<16x128xf32>
    %189 = arith.negf %188 : vector<16x128xf32>
    %190 = math.exp %189 : vector<16x128xf32>
    %cst_61 = arith.constant 1.000000e+00 : f32
    %191 = vector.broadcast %cst_61 : f32 to vector<16x128xf32>
    %192 = arith.addf %191, %190 : vector<16x128xf32>
    %193 = arith.divf %191, %192 : vector<16x128xf32>
    %194 = arith.mulf %185, %164 : vector<16x128xf32>
    %195 = arith.mulf %179, %187 : vector<16x128xf32>
    %196 = arith.addf %194, %195 : vector<16x128xf32>
    %197 = math.tanh %196 : vector<16x128xf32>
    %198 = arith.mulf %193, %197 : vector<16x128xf32>
    %199 = arith.truncf %198 : vector<16x128xf32> to vector<16x128xbf16>
    %c80_62 = arith.constant 80 : index
    %c0_63 = arith.constant 0 : index
    %200 = vector.load %arg11[%c80_62, %c0_63] : memref<128x128xbf16, #tpu.memory_space<vmem>>, vector<16x128xbf16>
    tpu.vector_store %arg11[%c80_62, %c0_63], %199 {strides = array<i32>} : memref<128x128xbf16, #tpu.memory_space<vmem>>, vector<16x128xbf16>,
    %c96 = arith.constant 96 : index
    %c0_64 = arith.constant 0 : index
    %201 = vector.load %arg10[%c96, %c0_64] : memref<128x512xf32, #tpu.memory_space<vmem>>, vector<16x512xf32>
    %202 = arith.truncf %198 : vector<16x128xf32> to vector<16x128xbf16>
    %c0_65 = arith.constant 0 : index
    %c0_66 = arith.constant 0 : index
    %203 = vector.load %arg2[%c0_65, %c0_66] : memref<128x512xbf16, #tpu.memory_space<vmem>>, vector<128x512xbf16>
    %cst_67 = arith.constant dense<0.000000e+00> : vector<16x512xf32>
    %204 = tpu.matmul %202, %203, %cst_67 {dimension_numbers = #tpu.dot_dimension_numbers<[1], [0], [0], [1], [0, 0, 1, 1], [], []>} : vector<16x128xbf16>, vector<128x512xbf16>, vector<16x512xf32> -> vector<16x512xf32>
    %205 = arith.addf %201, %204 : vector<16x512xf32>
    %206 = vector.extract_strided_slice %205 {offsets = [0, 0], sizes = [16, 128], strides = [1, 1]} : vector<16x512xf32> to vector<16x128xf32>
    %207 = arith.negf %206 : vector<16x128xf32>
    %208 = math.exp %207 : vector<16x128xf32>
    %cst_68 = arith.constant 1.000000e+00 : f32
    %209 = vector.broadcast %cst_68 : f32 to vector<16x128xf32>
    %210 = arith.addf %209, %208 : vector<16x128xf32>
    %211 = arith.divf %209, %210 : vector<16x128xf32>
    %212 = vector.extract_strided_slice %205 {offsets = [0, 128], sizes = [16, 128], strides = [1, 1]} : vector<16x512xf32> to vector<16x128xf32>
    %213 = arith.negf %212 : vector<16x128xf32>
    %214 = math.exp %213 : vector<16x128xf32>
    %cst_69 = arith.constant 1.000000e+00 : f32
    %215 = vector.broadcast %cst_69 : f32 to vector<16x128xf32>
    %216 = arith.addf %215, %214 : vector<16x128xf32>
    %217 = arith.divf %215, %216 : vector<16x128xf32>
    %218 = vector.extract_strided_slice %205 {offsets = [0, 256], sizes = [16, 128], strides = [1, 1]} : vector<16x512xf32> to vector<16x128xf32>
    %219 = math.tanh %218 : vector<16x128xf32>
    %220 = vector.extract_strided_slice %205 {offsets = [0, 384], sizes = [16, 128], strides = [1, 1]} : vector<16x512xf32> to vector<16x128xf32>
    %221 = arith.negf %220 : vector<16x128xf32>
    %222 = math.exp %221 : vector<16x128xf32>
    %cst_70 = arith.constant 1.000000e+00 : f32
    %223 = vector.broadcast %cst_70 : f32 to vector<16x128xf32>
    %224 = arith.addf %223, %222 : vector<16x128xf32>
    %225 = arith.divf %223, %224 : vector<16x128xf32>
    %226 = arith.mulf %217, %196 : vector<16x128xf32>
    %227 = arith.mulf %211, %219 : vector<16x128xf32>
    %228 = arith.addf %226, %227 : vector<16x128xf32>
    %229 = math.tanh %228 : vector<16x128xf32>
    %230 = arith.mulf %225, %229 : vector<16x128xf32>
    %231 = arith.truncf %230 : vector<16x128xf32> to vector<16x128xbf16>
    %c96_71 = arith.constant 96 : index
    %c0_72 = arith.constant 0 : index
    %232 = vector.load %arg11[%c96_71, %c0_72] : memref<128x128xbf16, #tpu.memory_space<vmem>>, vector<16x128xbf16>
    tpu.vector_store %arg11[%c96_71, %c0_72], %231 {strides = array<i32>} : memref<128x128xbf16, #tpu.memory_space<vmem>>, vector<16x128xbf16>,
    %c112 = arith.constant 112 : index
    %c0_73 = arith.constant 0 : index
    %233 = vector.load %arg10[%c112, %c0_73] : memref<128x512xf32, #tpu.memory_space<vmem>>, vector<16x512xf32>
    %234 = arith.truncf %230 : vector<16x128xf32> to vector<16x128xbf16>
    %c0_74 = arith.constant 0 : index
    %c0_75 = arith.constant 0 : index
    %235 = vector.load %arg2[%c0_74, %c0_75] : memref<128x512xbf16, #tpu.memory_space<vmem>>, vector<128x512xbf16>
    %cst_76 = arith.constant dense<0.000000e+00> : vector<16x512xf32>
    %236 = tpu.matmul %234, %235, %cst_76 {dimension_numbers = #tpu.dot_dimension_numbers<[1], [0], [0], [1], [0, 0, 1, 1], [], []>} : vector<16x128xbf16>, vector<128x512xbf16>, vector<16x512xf32> -> vector<16x512xf32>
    %237 = arith.addf %233, %236 : vector<16x512xf32>
    %238 = vector.extract_strided_slice %237 {offsets = [0, 0], sizes = [16, 128], strides = [1, 1]} : vector<16x512xf32> to vector<16x128xf32>
    %239 = arith.negf %238 : vector<16x128xf32>
    %240 = math.exp %239 : vector<16x128xf32>
    %cst_77 = arith.constant 1.000000e+00 : f32
    %241 = vector.broadcast %cst_77 : f32 to vector<16x128xf32>
    %242 = arith.addf %241, %240 : vector<16x128xf32>
    %243 = arith.divf %241, %242 : vector<16x128xf32>
    %244 = vector.extract_strided_slice %237 {offsets = [0, 128], sizes = [16, 128], strides = [1, 1]} : vector<16x512xf32> to vector<16x128xf32>
    %245 = arith.negf %244 : vector<16x128xf32>
    %246 = math.exp %245 : vector<16x128xf32>
    %cst_78 = arith.constant 1.000000e+00 : f32
    %247 = vector.broadcast %cst_78 : f32 to vector<16x128xf32>
    %248 = arith.addf %247, %246 : vector<16x128xf32>
    %249 = arith.divf %247, %248 : vector<16x128xf32>
    %250 = vector.extract_strided_slice %237 {offsets = [0, 256], sizes = [16, 128], strides = [1, 1]} : vector<16x512xf32> to vector<16x128xf32>
    %251 = math.tanh %250 : vector<16x128xf32>
    %252 = vector.extract_strided_slice %237 {offsets = [0, 384], sizes = [16, 128], strides = [1, 1]} : vector<16x512xf32> to vector<16x128xf32>
    %253 = arith.negf %252 : vector<16x128xf32>
    %254 = math.exp %253 : vector<16x128xf32>
    %cst_79 = arith.constant 1.000000e+00 : f32
    %255 = vector.broadcast %cst_79 : f32 to vector<16x128xf32>
    %256 = arith.addf %255, %254 : vector<16x128xf32>
    %257 = arith.divf %255, %256 : vector<16x128xf32>
    %258 = arith.mulf %249, %228 : vector<16x128xf32>
    %259 = arith.mulf %243, %251 : vector<16x128xf32>
    %260 = arith.addf %258, %259 : vector<16x128xf32>
    %261 = math.tanh %260 : vector<16x128xf32>
    %262 = arith.mulf %257, %261 : vector<16x128xf32>
    %263 = arith.truncf %262 : vector<16x128xf32> to vector<16x128xbf16>
    %c112_80 = arith.constant 112 : index
    %c0_81 = arith.constant 0 : index
    %264 = vector.load %arg11[%c112_80, %c0_81] : memref<128x128xbf16, #tpu.memory_space<vmem>>, vector<16x128xbf16>
    tpu.vector_store %arg11[%c112_80, %c0_81], %263 {strides = array<i32>} : memref<128x128xbf16, #tpu.memory_space<vmem>>, vector<16x128xbf16>,
    %c0_82 = arith.constant 0 : index
    %c0_83 = arith.constant 0 : index
    %265 = vector.load %arg11[%c0_82, %c0_83] : memref<128x128xbf16, #tpu.memory_space<vmem>>, vector<128x128xbf16>
    %c0_84 = arith.constant 0 : index
    %c0_85 = arith.constant 0 : index
    %266 = vector.load %arg4[%c0_84, %c0_85] : memref<128x512xbf16, #tpu.memory_space<vmem>>, vector<128x512xbf16>
    %cst_86 = arith.constant dense<0.000000e+00> : vector<128x512xf32>
    %267 = tpu.matmul %265, %266, %cst_86 {dimension_numbers = #tpu.dot_dimension_numbers<[1], [0], [0], [1], [0, 0, 1, 1], [], []>} : vector<128x128xbf16>, vector<128x512xbf16>, vector<128x512xf32> -> vector<128x512xf32>
    %c0_87 = arith.constant 0 : index
    %c0_88 = arith.constant 0 : index
    %268 = vector.load %arg6[%c0_87, %c0_88] : memref<1x512xf32, #tpu.memory_space<vmem>>, vector<1x512xf32>
    %269 = vector.broadcast %268 : vector<1x512xf32> to vector<128x512xf32>
    %270 = arith.addf %267, %269 : vector<128x512xf32>
    %c0_89 = arith.constant 0 : index
    %c0_90 = arith.constant 0 : index
    %271 = vector.load %arg10[%c0_89, %c0_90] : memref<128x512xf32, #tpu.memory_space<vmem>>, vector<128x512xf32>
    tpu.vector_store %arg10[%c0_89, %c0_90], %270 {strides = array<i32>} : memref<128x512xf32, #tpu.memory_space<vmem>>, vector<128x512xf32>,
    %cst_91 = arith.constant 0.000000e+00 : f32
    %272 = vector.broadcast %cst_91 : f32 to vector<16x128xf32>
    %cst_92 = arith.constant 0.000000e+00 : f32
    %273 = vector.broadcast %cst_92 : f32 to vector<16x128xf32>
    %c0_93 = arith.constant 0 : index
    %c0_94 = arith.constant 0 : index
    %274 = vector.load %arg10[%c0_93, %c0_94] : memref<128x512xf32, #tpu.memory_space<vmem>>, vector<16x512xf32>
    %275 = arith.truncf %272 : vector<16x128xf32> to vector<16x128xbf16>
    %c0_95 = arith.constant 0 : index
    %c0_96 = arith.constant 0 : index
    %276 = vector.load %arg5[%c0_95, %c0_96] : memref<128x512xbf16, #tpu.memory_space<vmem>>, vector<128x512xbf16>
    %cst_97 = arith.constant dense<0.000000e+00> : vector<16x512xf32>
    %277 = tpu.matmul %275, %276, %cst_97 {dimension_numbers = #tpu.dot_dimension_numbers<[1], [0], [0], [1], [0, 0, 1, 1], [], []>} : vector<16x128xbf16>, vector<128x512xbf16>, vector<16x512xf32> -> vector<16x512xf32>
    %278 = arith.addf %274, %277 : vector<16x512xf32>
    %279 = vector.extract_strided_slice %278 {offsets = [0, 0], sizes = [16, 128], strides = [1, 1]} : vector<16x512xf32> to vector<16x128xf32>
    %280 = arith.negf %279 : vector<16x128xf32>
    %281 = math.exp %280 : vector<16x128xf32>
    %cst_98 = arith.constant 1.000000e+00 : f32
    %282 = vector.broadcast %cst_98 : f32 to vector<16x128xf32>
    %283 = arith.addf %282, %281 : vector<16x128xf32>
    %284 = arith.divf %282, %283 : vector<16x128xf32>
    %285 = vector.extract_strided_slice %278 {offsets = [0, 128], sizes = [16, 128], strides = [1, 1]} : vector<16x512xf32> to vector<16x128xf32>
    %286 = arith.negf %285 : vector<16x128xf32>
    %287 = math.exp %286 : vector<16x128xf32>
    %cst_99 = arith.constant 1.000000e+00 : f32
    %288 = vector.broadcast %cst_99 : f32 to vector<16x128xf32>
    %289 = arith.addf %288, %287 : vector<16x128xf32>
    %290 = arith.divf %288, %289 : vector<16x128xf32>
    %291 = vector.extract_strided_slice %278 {offsets = [0, 256], sizes = [16, 128], strides = [1, 1]} : vector<16x512xf32> to vector<16x128xf32>
    %292 = math.tanh %291 : vector<16x128xf32>
    %293 = vector.extract_strided_slice %278 {offsets = [0, 384], sizes = [16, 128], strides = [1, 1]} : vector<16x512xf32> to vector<16x128xf32>
    %294 = arith.negf %293 : vector<16x128xf32>
    %295 = math.exp %294 : vector<16x128xf32>
    %cst_100 = arith.constant 1.000000e+00 : f32
    %296 = vector.broadcast %cst_100 : f32 to vector<16x128xf32>
    %297 = arith.addf %296, %295 : vector<16x128xf32>
    %298 = arith.divf %296, %297 : vector<16x128xf32>
    %299 = arith.mulf %290, %273 : vector<16x128xf32>
    %300 = arith.mulf %284, %292 : vector<16x128xf32>
    %301 = arith.addf %299, %300 : vector<16x128xf32>
    %302 = math.tanh %301 : vector<16x128xf32>
    %303 = arith.mulf %298, %302 : vector<16x128xf32>
    %c16_101 = arith.constant 16 : index
    %c0_102 = arith.constant 0 : index
    %304 = vector.load %arg10[%c16_101, %c0_102] : memref<128x512xf32, #tpu.memory_space<vmem>>, vector<16x512xf32>
    %305 = arith.truncf %303 : vector<16x128xf32> to vector<16x128xbf16>
    %c0_103 = arith.constant 0 : index
    %c0_104 = arith.constant 0 : index
    %306 = vector.load %arg5[%c0_103, %c0_104] : memref<128x512xbf16, #tpu.memory_space<vmem>>, vector<128x512xbf16>
    %cst_105 = arith.constant dense<0.000000e+00> : vector<16x512xf32>
    %307 = tpu.matmul %305, %306, %cst_105 {dimension_numbers = #tpu.dot_dimension_numbers<[1], [0], [0], [1], [0, 0, 1, 1], [], []>} : vector<16x128xbf16>, vector<128x512xbf16>, vector<16x512xf32> -> vector<16x512xf32>
    %308 = arith.addf %304, %307 : vector<16x512xf32>
    %309 = vector.extract_strided_slice %308 {offsets = [0, 0], sizes = [16, 128], strides = [1, 1]} : vector<16x512xf32> to vector<16x128xf32>
    %310 = arith.negf %309 : vector<16x128xf32>
    %311 = math.exp %310 : vector<16x128xf32>
    %cst_106 = arith.constant 1.000000e+00 : f32
    %312 = vector.broadcast %cst_106 : f32 to vector<16x128xf32>
    %313 = arith.addf %312, %311 : vector<16x128xf32>
    %314 = arith.divf %312, %313 : vector<16x128xf32>
    %315 = vector.extract_strided_slice %308 {offsets = [0, 128], sizes = [16, 128], strides = [1, 1]} : vector<16x512xf32> to vector<16x128xf32>
    %316 = arith.negf %315 : vector<16x128xf32>
    %317 = math.exp %316 : vector<16x128xf32>
    %cst_107 = arith.constant 1.000000e+00 : f32
    %318 = vector.broadcast %cst_107 : f32 to vector<16x128xf32>
    %319 = arith.addf %318, %317 : vector<16x128xf32>
    %320 = arith.divf %318, %319 : vector<16x128xf32>
    %321 = vector.extract_strided_slice %308 {offsets = [0, 256], sizes = [16, 128], strides = [1, 1]} : vector<16x512xf32> to vector<16x128xf32>
    %322 = math.tanh %321 : vector<16x128xf32>
    %323 = vector.extract_strided_slice %308 {offsets = [0, 384], sizes = [16, 128], strides = [1, 1]} : vector<16x512xf32> to vector<16x128xf32>
    %324 = arith.negf %323 : vector<16x128xf32>
    %325 = math.exp %324 : vector<16x128xf32>
    %cst_108 = arith.constant 1.000000e+00 : f32
    %326 = vector.broadcast %cst_108 : f32 to vector<16x128xf32>
    %327 = arith.addf %326, %325 : vector<16x128xf32>
    %328 = arith.divf %326, %327 : vector<16x128xf32>
    %329 = arith.mulf %320, %301 : vector<16x128xf32>
    %330 = arith.mulf %314, %322 : vector<16x128xf32>
    %331 = arith.addf %329, %330 : vector<16x128xf32>
    %332 = math.tanh %331 : vector<16x128xf32>
    %333 = arith.mulf %328, %332 : vector<16x128xf32>
    %c32_109 = arith.constant 32 : index
    %c0_110 = arith.constant 0 : index
    %334 = vector.load %arg10[%c32_109, %c0_110] : memref<128x512xf32, #tpu.memory_space<vmem>>, vector<16x512xf32>
    %335 = arith.truncf %333 : vector<16x128xf32> to vector<16x128xbf16>
    %c0_111 = arith.constant 0 : index
    %c0_112 = arith.constant 0 : index
    %336 = vector.load %arg5[%c0_111, %c0_112] : memref<128x512xbf16, #tpu.memory_space<vmem>>, vector<128x512xbf16>
    %cst_113 = arith.constant dense<0.000000e+00> : vector<16x512xf32>
    %337 = tpu.matmul %335, %336, %cst_113 {dimension_numbers = #tpu.dot_dimension_numbers<[1], [0], [0], [1], [0, 0, 1, 1], [], []>} : vector<16x128xbf16>, vector<128x512xbf16>, vector<16x512xf32> -> vector<16x512xf32>
    %338 = arith.addf %334, %337 : vector<16x512xf32>
    %339 = vector.extract_strided_slice %338 {offsets = [0, 0], sizes = [16, 128], strides = [1, 1]} : vector<16x512xf32> to vector<16x128xf32>
    %340 = arith.negf %339 : vector<16x128xf32>
    %341 = math.exp %340 : vector<16x128xf32>
    %cst_114 = arith.constant 1.000000e+00 : f32
    %342 = vector.broadcast %cst_114 : f32 to vector<16x128xf32>
    %343 = arith.addf %342, %341 : vector<16x128xf32>
    %344 = arith.divf %342, %343 : vector<16x128xf32>
    %345 = vector.extract_strided_slice %338 {offsets = [0, 128], sizes = [16, 128], strides = [1, 1]} : vector<16x512xf32> to vector<16x128xf32>
    %346 = arith.negf %345 : vector<16x128xf32>
    %347 = math.exp %346 : vector<16x128xf32>
    %cst_115 = arith.constant 1.000000e+00 : f32
    %348 = vector.broadcast %cst_115 : f32 to vector<16x128xf32>
    %349 = arith.addf %348, %347 : vector<16x128xf32>
    %350 = arith.divf %348, %349 : vector<16x128xf32>
    %351 = vector.extract_strided_slice %338 {offsets = [0, 256], sizes = [16, 128], strides = [1, 1]} : vector<16x512xf32> to vector<16x128xf32>
    %352 = math.tanh %351 : vector<16x128xf32>
    %353 = vector.extract_strided_slice %338 {offsets = [0, 384], sizes = [16, 128], strides = [1, 1]} : vector<16x512xf32> to vector<16x128xf32>
    %354 = arith.negf %353 : vector<16x128xf32>
    %355 = math.exp %354 : vector<16x128xf32>
    %cst_116 = arith.constant 1.000000e+00 : f32
    %356 = vector.broadcast %cst_116 : f32 to vector<16x128xf32>
    %357 = arith.addf %356, %355 : vector<16x128xf32>
    %358 = arith.divf %356, %357 : vector<16x128xf32>
    %359 = arith.mulf %350, %331 : vector<16x128xf32>
    %360 = arith.mulf %344, %352 : vector<16x128xf32>
    %361 = arith.addf %359, %360 : vector<16x128xf32>
    %362 = math.tanh %361 : vector<16x128xf32>
    %363 = arith.mulf %358, %362 : vector<16x128xf32>
    %c48_117 = arith.constant 48 : index
    %c0_118 = arith.constant 0 : index
    %364 = vector.load %arg10[%c48_117, %c0_118] : memref<128x512xf32, #tpu.memory_space<vmem>>, vector<16x512xf32>
    %365 = arith.truncf %363 : vector<16x128xf32> to vector<16x128xbf16>
    %c0_119 = arith.constant 0 : index
    %c0_120 = arith.constant 0 : index
    %366 = vector.load %arg5[%c0_119, %c0_120] : memref<128x512xbf16, #tpu.memory_space<vmem>>, vector<128x512xbf16>
    %cst_121 = arith.constant dense<0.000000e+00> : vector<16x512xf32>
    %367 = tpu.matmul %365, %366, %cst_121 {dimension_numbers = #tpu.dot_dimension_numbers<[1], [0], [0], [1], [0, 0, 1, 1], [], []>} : vector<16x128xbf16>, vector<128x512xbf16>, vector<16x512xf32> -> vector<16x512xf32>
    %368 = arith.addf %364, %367 : vector<16x512xf32>
    %369 = vector.extract_strided_slice %368 {offsets = [0, 0], sizes = [16, 128], strides = [1, 1]} : vector<16x512xf32> to vector<16x128xf32>
    %370 = arith.negf %369 : vector<16x128xf32>
    %371 = math.exp %370 : vector<16x128xf32>
    %cst_122 = arith.constant 1.000000e+00 : f32
    %372 = vector.broadcast %cst_122 : f32 to vector<16x128xf32>
    %373 = arith.addf %372, %371 : vector<16x128xf32>
    %374 = arith.divf %372, %373 : vector<16x128xf32>
    %375 = vector.extract_strided_slice %368 {offsets = [0, 128], sizes = [16, 128], strides = [1, 1]} : vector<16x512xf32> to vector<16x128xf32>
    %376 = arith.negf %375 : vector<16x128xf32>
    %377 = math.exp %376 : vector<16x128xf32>
    %cst_123 = arith.constant 1.000000e+00 : f32
    %378 = vector.broadcast %cst_123 : f32 to vector<16x128xf32>
    %379 = arith.addf %378, %377 : vector<16x128xf32>
    %380 = arith.divf %378, %379 : vector<16x128xf32>
    %381 = vector.extract_strided_slice %368 {offsets = [0, 256], sizes = [16, 128], strides = [1, 1]} : vector<16x512xf32> to vector<16x128xf32>
    %382 = math.tanh %381 : vector<16x128xf32>
    %383 = vector.extract_strided_slice %368 {offsets = [0, 384], sizes = [16, 128], strides = [1, 1]} : vector<16x512xf32> to vector<16x128xf32>
    %384 = arith.negf %383 : vector<16x128xf32>
    %385 = math.exp %384 : vector<16x128xf32>
    %cst_124 = arith.constant 1.000000e+00 : f32
    %386 = vector.broadcast %cst_124 : f32 to vector<16x128xf32>
    %387 = arith.addf %386, %385 : vector<16x128xf32>
    %388 = arith.divf %386, %387 : vector<16x128xf32>
    %389 = arith.mulf %380, %361 : vector<16x128xf32>
    %390 = arith.mulf %374, %382 : vector<16x128xf32>
    %391 = arith.addf %389, %390 : vector<16x128xf32>
    %392 = math.tanh %391 : vector<16x128xf32>
    %393 = arith.mulf %388, %392 : vector<16x128xf32>
    %c64_125 = arith.constant 64 : index
    %c0_126 = arith.constant 0 : index
    %394 = vector.load %arg10[%c64_125, %c0_126] : memref<128x512xf32, #tpu.memory_space<vmem>>, vector<16x512xf32>
    %395 = arith.truncf %393 : vector<16x128xf32> to vector<16x128xbf16>
    %c0_127 = arith.constant 0 : index
    %c0_128 = arith.constant 0 : index
    %396 = vector.load %arg5[%c0_127, %c0_128] : memref<128x512xbf16, #tpu.memory_space<vmem>>, vector<128x512xbf16>
    %cst_129 = arith.constant dense<0.000000e+00> : vector<16x512xf32>
    %397 = tpu.matmul %395, %396, %cst_129 {dimension_numbers = #tpu.dot_dimension_numbers<[1], [0], [0], [1], [0, 0, 1, 1], [], []>} : vector<16x128xbf16>, vector<128x512xbf16>, vector<16x512xf32> -> vector<16x512xf32>
    %398 = arith.addf %394, %397 : vector<16x512xf32>
    %399 = vector.extract_strided_slice %398 {offsets = [0, 0], sizes = [16, 128], strides = [1, 1]} : vector<16x512xf32> to vector<16x128xf32>
    %400 = arith.negf %399 : vector<16x128xf32>
    %401 = math.exp %400 : vector<16x128xf32>
    %cst_130 = arith.constant 1.000000e+00 : f32
    %402 = vector.broadcast %cst_130 : f32 to vector<16x128xf32>
    %403 = arith.addf %402, %401 : vector<16x128xf32>
    %404 = arith.divf %402, %403 : vector<16x128xf32>
    %405 = vector.extract_strided_slice %398 {offsets = [0, 128], sizes = [16, 128], strides = [1, 1]} : vector<16x512xf32> to vector<16x128xf32>
    %406 = arith.negf %405 : vector<16x128xf32>
    %407 = math.exp %406 : vector<16x128xf32>
    %cst_131 = arith.constant 1.000000e+00 : f32
    %408 = vector.broadcast %cst_131 : f32 to vector<16x128xf32>
    %409 = arith.addf %408, %407 : vector<16x128xf32>
    %410 = arith.divf %408, %409 : vector<16x128xf32>
    %411 = vector.extract_strided_slice %398 {offsets = [0, 256], sizes = [16, 128], strides = [1, 1]} : vector<16x512xf32> to vector<16x128xf32>
    %412 = math.tanh %411 : vector<16x128xf32>
    %413 = vector.extract_strided_slice %398 {offsets = [0, 384], sizes = [16, 128], strides = [1, 1]} : vector<16x512xf32> to vector<16x128xf32>
    %414 = arith.negf %413 : vector<16x128xf32>
    %415 = math.exp %414 : vector<16x128xf32>
    %cst_132 = arith.constant 1.000000e+00 : f32
    %416 = vector.broadcast %cst_132 : f32 to vector<16x128xf32>
    %417 = arith.addf %416, %415 : vector<16x128xf32>
    %418 = arith.divf %416, %417 : vector<16x128xf32>
    %419 = arith.mulf %410, %391 : vector<16x128xf32>
    %420 = arith.mulf %404, %412 : vector<16x128xf32>
    %421 = arith.addf %419, %420 : vector<16x128xf32>
    %422 = math.tanh %421 : vector<16x128xf32>
    %423 = arith.mulf %418, %422 : vector<16x128xf32>
    %c80_133 = arith.constant 80 : index
    %c0_134 = arith.constant 0 : index
    %424 = vector.load %arg10[%c80_133, %c0_134] : memref<128x512xf32, #tpu.memory_space<vmem>>, vector<16x512xf32>
    %425 = arith.truncf %423 : vector<16x128xf32> to vector<16x128xbf16>
    %c0_135 = arith.constant 0 : index
    %c0_136 = arith.constant 0 : index
    %426 = vector.load %arg5[%c0_135, %c0_136] : memref<128x512xbf16, #tpu.memory_space<vmem>>, vector<128x512xbf16>
    %cst_137 = arith.constant dense<0.000000e+00> : vector<16x512xf32>
    %427 = tpu.matmul %425, %426, %cst_137 {dimension_numbers = #tpu.dot_dimension_numbers<[1], [0], [0], [1], [0, 0, 1, 1], [], []>} : vector<16x128xbf16>, vector<128x512xbf16>, vector<16x512xf32> -> vector<16x512xf32>
    %428 = arith.addf %424, %427 : vector<16x512xf32>
    %429 = vector.extract_strided_slice %428 {offsets = [0, 0], sizes = [16, 128], strides = [1, 1]} : vector<16x512xf32> to vector<16x128xf32>
    %430 = arith.negf %429 : vector<16x128xf32>
    %431 = math.exp %430 : vector<16x128xf32>
    %cst_138 = arith.constant 1.000000e+00 : f32
    %432 = vector.broadcast %cst_138 : f32 to vector<16x128xf32>
    %433 = arith.addf %432, %431 : vector<16x128xf32>
    %434 = arith.divf %432, %433 : vector<16x128xf32>
    %435 = vector.extract_strided_slice %428 {offsets = [0, 128], sizes = [16, 128], strides = [1, 1]} : vector<16x512xf32> to vector<16x128xf32>
    %436 = arith.negf %435 : vector<16x128xf32>
    %437 = math.exp %436 : vector<16x128xf32>
    %cst_139 = arith.constant 1.000000e+00 : f32
    %438 = vector.broadcast %cst_139 : f32 to vector<16x128xf32>
    %439 = arith.addf %438, %437 : vector<16x128xf32>
    %440 = arith.divf %438, %439 : vector<16x128xf32>
    %441 = vector.extract_strided_slice %428 {offsets = [0, 256], sizes = [16, 128], strides = [1, 1]} : vector<16x512xf32> to vector<16x128xf32>
    %442 = math.tanh %441 : vector<16x128xf32>
    %443 = vector.extract_strided_slice %428 {offsets = [0, 384], sizes = [16, 128], strides = [1, 1]} : vector<16x512xf32> to vector<16x128xf32>
    %444 = arith.negf %443 : vector<16x128xf32>
    %445 = math.exp %444 : vector<16x128xf32>
    %cst_140 = arith.constant 1.000000e+00 : f32
    %446 = vector.broadcast %cst_140 : f32 to vector<16x128xf32>
    %447 = arith.addf %446, %445 : vector<16x128xf32>
    %448 = arith.divf %446, %447 : vector<16x128xf32>
    %449 = arith.mulf %440, %421 : vector<16x128xf32>
    %450 = arith.mulf %434, %442 : vector<16x128xf32>
    %451 = arith.addf %449, %450 : vector<16x128xf32>
    %452 = math.tanh %451 : vector<16x128xf32>
    %453 = arith.mulf %448, %452 : vector<16x128xf32>
    %c96_141 = arith.constant 96 : index
    %c0_142 = arith.constant 0 : index
    %454 = vector.load %arg10[%c96_141, %c0_142] : memref<128x512xf32, #tpu.memory_space<vmem>>, vector<16x512xf32>
    %455 = arith.truncf %453 : vector<16x128xf32> to vector<16x128xbf16>
    %c0_143 = arith.constant 0 : index
    %c0_144 = arith.constant 0 : index
    %456 = vector.load %arg5[%c0_143, %c0_144] : memref<128x512xbf16, #tpu.memory_space<vmem>>, vector<128x512xbf16>
    %cst_145 = arith.constant dense<0.000000e+00> : vector<16x512xf32>
    %457 = tpu.matmul %455, %456, %cst_145 {dimension_numbers = #tpu.dot_dimension_numbers<[1], [0], [0], [1], [0, 0, 1, 1], [], []>} : vector<16x128xbf16>, vector<128x512xbf16>, vector<16x512xf32> -> vector<16x512xf32>
    %458 = arith.addf %454, %457 : vector<16x512xf32>
    %459 = vector.extract_strided_slice %458 {offsets = [0, 0], sizes = [16, 128], strides = [1, 1]} : vector<16x512xf32> to vector<16x128xf32>
    %460 = arith.negf %459 : vector<16x128xf32>
    %461 = math.exp %460 : vector<16x128xf32>
    %cst_146 = arith.constant 1.000000e+00 : f32
    %462 = vector.broadcast %cst_146 : f32 to vector<16x128xf32>
    %463 = arith.addf %462, %461 : vector<16x128xf32>
    %464 = arith.divf %462, %463 : vector<16x128xf32>
    %465 = vector.extract_strided_slice %458 {offsets = [0, 128], sizes = [16, 128], strides = [1, 1]} : vector<16x512xf32> to vector<16x128xf32>
    %466 = arith.negf %465 : vector<16x128xf32>
    %467 = math.exp %466 : vector<16x128xf32>
    %cst_147 = arith.constant 1.000000e+00 : f32
    %468 = vector.broadcast %cst_147 : f32 to vector<16x128xf32>
    %469 = arith.addf %468, %467 : vector<16x128xf32>
    %470 = arith.divf %468, %469 : vector<16x128xf32>
    %471 = vector.extract_strided_slice %458 {offsets = [0, 256], sizes = [16, 128], strides = [1, 1]} : vector<16x512xf32> to vector<16x128xf32>
    %472 = math.tanh %471 : vector<16x128xf32>
    %473 = vector.extract_strided_slice %458 {offsets = [0, 384], sizes = [16, 128], strides = [1, 1]} : vector<16x512xf32> to vector<16x128xf32>
    %474 = arith.negf %473 : vector<16x128xf32>
    %475 = math.exp %474 : vector<16x128xf32>
    %cst_148 = arith.constant 1.000000e+00 : f32
    %476 = vector.broadcast %cst_148 : f32 to vector<16x128xf32>
    %477 = arith.addf %476, %475 : vector<16x128xf32>
    %478 = arith.divf %476, %477 : vector<16x128xf32>
    %479 = arith.mulf %470, %451 : vector<16x128xf32>
    %480 = arith.mulf %464, %472 : vector<16x128xf32>
    %481 = arith.addf %479, %480 : vector<16x128xf32>
    %482 = math.tanh %481 : vector<16x128xf32>
    %483 = arith.mulf %478, %482 : vector<16x128xf32>
    %c112_149 = arith.constant 112 : index
    %c0_150 = arith.constant 0 : index
    %484 = vector.load %arg10[%c112_149, %c0_150] : memref<128x512xf32, #tpu.memory_space<vmem>>, vector<16x512xf32>
    %485 = arith.truncf %483 : vector<16x128xf32> to vector<16x128xbf16>
    %c0_151 = arith.constant 0 : index
    %c0_152 = arith.constant 0 : index
    %486 = vector.load %arg5[%c0_151, %c0_152] : memref<128x512xbf16, #tpu.memory_space<vmem>>, vector<128x512xbf16>
    %cst_153 = arith.constant dense<0.000000e+00> : vector<16x512xf32>
    %487 = tpu.matmul %485, %486, %cst_153 {dimension_numbers = #tpu.dot_dimension_numbers<[1], [0], [0], [1], [0, 0, 1, 1], [], []>} : vector<16x128xbf16>, vector<128x512xbf16>, vector<16x512xf32> -> vector<16x512xf32>
    %488 = arith.addf %484, %487 : vector<16x512xf32>
    %489 = vector.extract_strided_slice %488 {offsets = [0, 0], sizes = [16, 128], strides = [1, 1]} : vector<16x512xf32> to vector<16x128xf32>
    %490 = arith.negf %489 : vector<16x128xf32>
    %491 = math.exp %490 : vector<16x128xf32>
    %cst_154 = arith.constant 1.000000e+00 : f32
    %492 = vector.broadcast %cst_154 : f32 to vector<16x128xf32>
    %493 = arith.addf %492, %491 : vector<16x128xf32>
    %494 = arith.divf %492, %493 : vector<16x128xf32>
    %495 = vector.extract_strided_slice %488 {offsets = [0, 128], sizes = [16, 128], strides = [1, 1]} : vector<16x512xf32> to vector<16x128xf32>
    %496 = arith.negf %495 : vector<16x128xf32>
    %497 = math.exp %496 : vector<16x128xf32>
    %cst_155 = arith.constant 1.000000e+00 : f32
    %498 = vector.broadcast %cst_155 : f32 to vector<16x128xf32>
    %499 = arith.addf %498, %497 : vector<16x128xf32>
    %500 = arith.divf %498, %499 : vector<16x128xf32>
    %501 = vector.extract_strided_slice %488 {offsets = [0, 256], sizes = [16, 128], strides = [1, 1]} : vector<16x512xf32> to vector<16x128xf32>
    %502 = math.tanh %501 : vector<16x128xf32>
    %503 = vector.extract_strided_slice %488 {offsets = [0, 384], sizes = [16, 128], strides = [1, 1]} : vector<16x512xf32> to vector<16x128xf32>
    %504 = arith.negf %503 : vector<16x128xf32>
    %505 = math.exp %504 : vector<16x128xf32>
    %cst_156 = arith.constant 1.000000e+00 : f32
    %506 = vector.broadcast %cst_156 : f32 to vector<16x128xf32>
    %507 = arith.addf %506, %505 : vector<16x128xf32>
    %508 = arith.divf %506, %507 : vector<16x128xf32>
    %509 = arith.mulf %500, %481 : vector<16x128xf32>
    %510 = arith.mulf %494, %502 : vector<16x128xf32>
    %511 = arith.addf %509, %510 : vector<16x128xf32>
    %512 = math.tanh %511 : vector<16x128xf32>
    %513 = arith.mulf %508, %512 : vector<16x128xf32>
    %514 = arith.truncf %513 : vector<16x128xf32> to vector<16x128xbf16>
    %c0_157 = arith.constant 0 : index
    %c0_158 = arith.constant 0 : index
    %515 = vector.load %arg7[%c0_157, %c0_158] : memref<128x128xbf16, #tpu.memory_space<vmem>>, vector<128x128xbf16>
    %cst_159 = arith.constant dense<0.000000e+00> : vector<16x128xf32>
    %516 = tpu.matmul %514, %515, %cst_159 {dimension_numbers = #tpu.dot_dimension_numbers<[1], [0], [0], [1], [0, 0, 1, 1], [], []>} : vector<16x128xbf16>, vector<128x128xbf16>, vector<16x128xf32> -> vector<16x128xf32>
    %c0_160 = arith.constant 0 : index
    %c0_161 = arith.constant 0 : index
    %517 = vector.load %arg8[%c0_160, %c0_161] : memref<1x128xf32, #tpu.memory_space<vmem>>, vector<1x128xf32>
    %518 = vector.broadcast %517 : vector<1x128xf32> to vector<16x128xf32>
    %519 = arith.addf %516, %518 : vector<16x128xf32>
    %c0_162 = arith.constant 0 : index
    %c0_163 = arith.constant 0 : index
    %520 = vector.load %arg9[%c0_162, %c0_163] : memref<16x128xf32, #tpu.memory_space<vmem>>, vector<16x128xf32>
    tpu.vector_store %arg9[%c0_162, %c0_163], %519 {strides = array<i32>} : memref<16x128xf32, #tpu.memory_space<vmem>>, vector<16x128xf32>,
    return
  }
}

</mosaic_0001>

<bundles_post_ra>
// kernel: crnn_forward.3
= control target key start
LH: loop header
LB: loop body
LE: loop exit
PB: predicated region body
PF: predicated region fallthrough
CT: control target
= control target key end

     0   :  { %s3788_s12 = smov 0   ;;  %s3790_s13 = smov 0   ;;  %s4627_s0 = inlined_call_operand.vmem [shape: bf16[4,2304,32], index: 0, kind: input, shape index: {}]   ;;  %s4628_s1 = inlined_call_operand.vmem [shape: bf16[32,128], index: 1, kind: input, shape index: {}]   ;;  %s4629_s2 = inlined_call_operand.vmem [shape: f32[1,128], index: 2, kind: input, shape index: {}]   ;;  %s4630_s3 = inlined_call_operand.vmem [shape: f32[2304,128], index: 3, kind: output, shape index: {}]  }
   0x1   :  { %s3792_s14 = smov 0  }
   0x2 LB: > { %s3117_s15 = sadd.s32 4294967295, %s3766_s14   ;;  %s3805_s16 = sadd.s32 1, %s3766_s14   ;;  %s3766_s14 = sphi %s3792_s14, %s4725_s14   ;;  %s3762_s13 = sphi %s3790_s13, %s4724_s13   ;;  %s3758_s12 = sphi %s3788_s12, %s4723_s12  }
   0x3   : > { %s17_s17 = ssub.s32 %s3766_s14, %s3805_s16  ;;  %s20_s18 = sadd.s32 1, %s3762_s13 }
   0x4   : > { %p18_p0 = scmp.eq.s32.totalorder %s17_s17, 0  ;;  %p27_p1 = scmp.ne.s32.totalorder %s3762_s13, %s3758_s12 }
   0x5   : > { %p28_p2 = scmp.eq.s32.totalorder %s3766_s14, 0  ;;  %p3120_p4 = scmp.ge.s32.totalorder %s3766_s14, 6 }
   0x6   : > { %s3814_s19 = scalar_select %p18_p0, %s3762_s13, %s20_s18  }
   0x7   : > { %p29_p3 = por %p28_p2, %p27_p1  ;;  %127 = sbr.rel (%p3120_p4) target bundleno = 65 (0x41), region = 24 }
   0xc   : > { %130 = sbr.rel (!%p29_p3) target bundleno = 65 (0x41), region = 28  ;;  %s132_s20 = sand.u32 (%p29_p3), 1, %s3762_s13  }
   0xd   : > { %s3321_s21 = smul.u32 (%p29_p3), 192, %s3766_s14 }
   0xe   : > { %s3620_s22 = smul.u32 (%p29_p3), 768, %s132_s20 }
   0xf   : > { %s3822_s25 = scalar_lea.vmem (%p29_p3), %s4627_s0, %s3321_s21 }
  0x10   : > { %v154_v0 = vld [vmem:[%s3822_s25] sm:$0xff] (%p29_p3)   ;;  %v158_v1 = vld [vmem:[%s3822_s25 + $0x8] sm:$0xff] (%p29_p3)   ;;  %v162_v2 = vld [vmem:[%s3822_s25 + $0x10] sm:$0xff] (%p29_p3)   ;;  %s3827_s26 = scalar_lea.vmem (%p29_p3), [#allocation2], %s3620_s22 }
  0x11   : > { %155 = vst [vmem:[%s3827_s26] sm:$0xff] %v154_v0   ;;  %159 = vst [vmem:[%s3827_s26 + $0x8] sm:$0xff] %v158_v1   ;;  %v166_v3 = vld [vmem:[%s3822_s25 + $0x18] sm:$0xff]   ;;  %v170_v4 = vld [vmem:[%s3822_s25 + $0x20] sm:$0xff]  }
  0x12   : > { %163 = vst [vmem:[%s3827_s26 + $0x10] sm:$0xff] %v162_v2   ;;  %v174_v5 = vld [vmem:[%s3822_s25 + $0x28] sm:$0xff]   ;;  %167 = vst [vmem:[%s3827_s26 + $0x18] sm:$0xff] %v166_v3   ;;  %v178_v6 = vld [vmem:[%s3822_s25 + $0x30] sm:$0xff]  }
  0x13   : > { %171 = vst [vmem:[%s3827_s26 + $0x20] sm:$0xff] %v170_v4   ;;  %175 = vst [vmem:[%s3827_s26 + $0x28] sm:$0xff] %v174_v5   ;;  %v182_v7 = vld [vmem:[%s3822_s25 + $0x38] sm:$0xff]   ;;  %v186_v8 = vld [vmem:[%s3822_s25 + $0x40] sm:$0xff]  }
  0x14   : > { %179 = vst [vmem:[%s3827_s26 + $0x30] sm:$0xff] %v178_v6   ;;  %183 = vst [vmem:[%s3827_s26 + $0x38] sm:$0xff] %v182_v7   ;;  %v190_v9 = vld [vmem:[%s3822_s25 + $0x48] sm:$0xff]   ;;  %v194_v10 = vld [vmem:[%s3822_s25 + $0x50] sm:$0xff]  }
  0x15   : > { %187 = vst [vmem:[%s3827_s26 + $0x40] sm:$0xff] %v186_v8   ;;  %v198_v11 = vld [vmem:[%s3822_s25 + $0x58] sm:$0xff]   ;;  %191 = vst [vmem:[%s3827_s26 + $0x48] sm:$0xff] %v190_v9   ;;  %v202_v12 = vld [vmem:[%s3822_s25 + $0x60] sm:$0xff]  }
  0x16   : > { %195 = vst [vmem:[%s3827_s26 + $0x50] sm:$0xff] %v194_v10   ;;  %199 = vst [vmem:[%s3827_s26 + $0x58] sm:$0xff] %v198_v11   ;;  %v206_v13 = vld [vmem:[%s3822_s25 + $0x68] sm:$0xff]   ;;  %v210_v14 = vld [vmem:[%s3822_s25 + $0x70] sm:$0xff]  }
  0x17   : > { %203 = vst [vmem:[%s3827_s26 + $0x60] sm:$0xff] %v202_v12   ;;  %207 = vst [vmem:[%s3827_s26 + $0x68] sm:$0xff] %v206_v13   ;;  %v214_v15 = vld [vmem:[%s3822_s25 + $0x78] sm:$0xff]   ;;  %v218_v16 = vld [vmem:[%s3822_s25 + $0x80] sm:$0xff]  }
  0x18   : > { %211 = vst [vmem:[%s3827_s26 + $0x70] sm:$0xff] %v210_v14   ;;  %v222_v17 = vld [vmem:[%s3822_s25 + $0x88] sm:$0xff]   ;;  %215 = vst [vmem:[%s3827_s26 + $0x78] sm:$0xff] %v214_v15   ;;  %v226_v18 = vld [vmem:[%s3822_s25 + $0x90] sm:$0xff]  }
  0x19   : > { %219 = vst [vmem:[%s3827_s26 + $0x80] sm:$0xff] %v218_v16   ;;  %223 = vst [vmem:[%s3827_s26 + $0x88] sm:$0xff] %v222_v17   ;;  %v230_v19 = vld [vmem:[%s3822_s25 + $0x98] sm:$0xff]   ;;  %v234_v20 = vld [vmem:[%s3822_s25 + $0xa0] sm:$0xff]  }
  0x1a   : > { %227 = vst [vmem:[%s3827_s26 + $0x90] sm:$0xff] %v226_v18   ;;  %231 = vst [vmem:[%s3827_s26 + $0x98] sm:$0xff] %v230_v19   ;;  %v238_v21 = vld [vmem:[%s3822_s25 + $0xa8] sm:$0xff]   ;;  %v242_v22 = vld [vmem:[%s3822_s25 + $0xb0] sm:$0xff]  }
  0x1b   : > { %235 = vst [vmem:[%s3827_s26 + $0xa0] sm:$0xff] %v234_v20   ;;  %v246_v23 = vld [vmem:[%s3822_s25 + $0xb8] sm:$0xff]   ;;  %239 = vst [vmem:[%s3827_s26 + $0xa8] sm:$0xff] %v238_v21   ;;  %v250_v24 = vld [vmem:[%s3822_s25 + $0x480] sm:$0xff]  }
  0x1c   : > { %243 = vst [vmem:[%s3827_s26 + $0xb0] sm:$0xff] %v242_v22   ;;  %247 = vst [vmem:[%s3827_s26 + $0xb8] sm:$0xff] %v246_v23   ;;  %v254_v25 = vld [vmem:[%s3822_s25 + $0x488] sm:$0xff]   ;;  %v258_v26 = vld [vmem:[%s3822_s25 + $0x490] sm:$0xff]  }
  0x1d   : > { %251 = vst [vmem:[%s3827_s26 + $0xc0] sm:$0xff] %v250_v24   ;;  %255 = vst [vmem:[%s3827_s26 + $0xc8] sm:$0xff] %v254_v25   ;;  %v262_v27 = vld [vmem:[%s3822_s25 + $0x498] sm:$0xff]   ;;  %v266_v28 = vld [vmem:[%s3822_s25 + $0x4a0] sm:$0xff]  }
  0x1e   : > { %259 = vst [vmem:[%s3827_s26 + $0xd0] sm:$0xff] %v258_v26   ;;  %v270_v29 = vld [vmem:[%s3822_s25 + $0x4a8] sm:$0xff]   ;;  %263 = vst [vmem:[%s3827_s26 + $0xd8] sm:$0xff] %v262_v27   ;;  %v274_v30 = vld [vmem:[%s3822_s25 + $0x4b0] sm:$0xff]  }
  0x1f   : > { %267 = vst [vmem:[%s3827_s26 + $0xe0] sm:$0xff] %v266_v28   ;;  %271 = vst [vmem:[%s3827_s26 + $0xe8] sm:$0xff] %v270_v29   ;;  %v278_v31 = vld [vmem:[%s3822_s25 + $0x4b8] sm:$0xff]   ;;  %v282_v32 = vld [vmem:[%s3822_s25 + $0x4c0] sm:$0xff]  }
  0x20   : > { %275 = vst [vmem:[%s3827_s26 + $0xf0] sm:$0xff] %v274_v30   ;;  %279 = vst [vmem:[%s3827_s26 + $0xf8] sm:$0xff] %v278_v31   ;;  %v286_v33 = vld [vmem:[%s3822_s25 + $0x4c8] sm:$0xff]   ;;  %v290_v34 = vld [vmem:[%s3822_s25 + $0x4d0] sm:$0xff]  }
  0x21   : > { %283 = vst [vmem:[%s3827_s26 + $0x100] sm:$0xff] %v282_v32   ;;  %v294_v35 = vld [vmem:[%s3822_s25 + $0x4d8] sm:$0xff]   ;;  %287 = vst [vmem:[%s3827_s26 + $0x108] sm:$0xff] %v286_v33   ;;  %v298_v36 = vld [vmem:[%s3822_s25 + $0x4e0] sm:$0xff]  }
  0x22   : > { %291 = vst [vmem:[%s3827_s26 + $0x110] sm:$0xff] %v290_v34   ;;  %295 = vst [vmem:[%s3827_s26 + $0x118] sm:$0xff] %v294_v35   ;;  %v302_v37 = vld [vmem:[%s3822_s25 + $0x4e8] sm:$0xff]   ;;  %v306_v38 = vld [vmem:[%s3822_s25 + $0x4f0] sm:$0xff]  }
  0x23   : > { %299 = vst [vmem:[%s3827_s26 + $0x120] sm:$0xff] %v298_v36   ;;  %303 = vst [vmem:[%s3827_s26 + $0x128] sm:$0xff] %v302_v37   ;;  %v310_v39 = vld [vmem:[%s3822_s25 + $0x4f8] sm:$0xff]   ;;  %v314_v40 = vld [vmem:[%s3822_s25 + $0x500] sm:$0xff]  }
  0x24   : > { %307 = vst [vmem:[%s3827_s26 + $0x130] sm:$0xff] %v306_v38   ;;  %v318_v41 = vld [vmem:[%s3822_s25 + $0x508] sm:$0xff]   ;;  %311 = vst [vmem:[%s3827_s26 + $0x138] sm:$0xff] %v310_v39   ;;  %v322_v42 = vld [vmem:[%s3822_s25 + $0x510] sm:$0xff]  }
  0x25   : > { %315 = vst [vmem:[%s3827_s26 + $0x140] sm:$0xff] %v314_v40   ;;  %319 = vst [vmem:[%s3827_s26 + $0x148] sm:$0xff] %v318_v41   ;;  %v326_v43 = vld [vmem:[%s3822_s25 + $0x518] sm:$0xff]   ;;  %v330_v44 = vld [vmem:[%s3822_s25 + $0x520] sm:$0xff]  }
  0x26   : > { %323 = vst [vmem:[%s3827_s26 + $0x150] sm:$0xff] %v322_v42   ;;  %327 = vst [vmem:[%s3827_s26 + $0x158] sm:$0xff] %v326_v43   ;;  %v334_v45 = vld [vmem:[%s3822_s25 + $0x528] sm:$0xff]   ;;  %v338_v46 = vld [vmem:[%s3822_s25 + $0x530] sm:$0xff]  }
  0x27   : > { %331 = vst [vmem:[%s3827_s26 + $0x160] sm:$0xff] %v330_v44   ;;  %v342_v47 = vld [vmem:[%s3822_s25 + $0x538] sm:$0xff]   ;;  %335 = vst [vmem:[%s3827_s26 + $0x168] sm:$0xff] %v334_v45   ;;  %v346_v48 = vld [vmem:[%s3822_s25 + $0x900] sm:$0xff]  }
  0x28   : > { %339 = vst [vmem:[%s3827_s26 + $0x170] sm:$0xff] %v338_v46   ;;  %343 = vst [vmem:[%s3827_s26 + $0x178] sm:$0xff] %v342_v47   ;;  %v350_v49 = vld [vmem:[%s3822_s25 + $0x908] sm:$0xff]   ;;  %v354_v50 = vld [vmem:[%s3822_s25 + $0x910] sm:$0xff]  }
  0x29   : > { %347 = vst [vmem:[%s3827_s26 + $0x180] sm:$0xff] %v346_v48   ;;  %351 = vst [vmem:[%s3827_s26 + $0x188] sm:$0xff] %v350_v49   ;;  %v358_v51 = vld [vmem:[%s3822_s25 + $0x918] sm:$0xff]   ;;  %v362_v52 = vld [vmem:[%s3822_s25 + $0x920] sm:$0xff]  }
  0x2a   : > { %355 = vst [vmem:[%s3827_s26 + $0x190] sm:$0xff] %v354_v50   ;;  %v366_v53 = vld [vmem:[%s3822_s25 + $0x928] sm:$0xff]   ;;  %359 = vst [vmem:[%s3827_s26 + $0x198] sm:$0xff] %v358_v51   ;;  %v370_v54 = vld [vmem:[%s3822_s25 + $0x930] sm:$0xff]  }
  0x2b   : > { %363 = vst [vmem:[%s3827_s26 + $0x1a0] sm:$0xff] %v362_v52   ;;  %367 = vst [vmem:[%s3827_s26 + $0x1a8] sm:$0xff] %v366_v53   ;;  %v374_v55 = vld [vmem:[%s3822_s25 + $0x938] sm:$0xff]   ;;  %v378_v56 = vld [vmem:[%s3822_s25 + $0x940] sm:$0xff]  }
  0x2c   : > { %371 = vst [vmem:[%s3827_s26 + $0x1b0] sm:$0xff] %v370_v54   ;;  %375 = vst [vmem:[%s3827_s26 + $0x1b8] sm:$0xff] %v374_v55   ;;  %v382_v57 = vld [vmem:[%s3822_s25 + $0x948] sm:$0xff]   ;;  %v386_v58 = vld [vmem:[%s3822_s25 + $0x950] sm:$0xff]  }
  0x2d   : > { %379 = vst [vmem:[%s3827_s26 + $0x1c0] sm:$0xff] %v378_v56   ;;  %v390_v59 = vld [vmem:[%s3822_s25 + $0x958] sm:$0xff]   ;;  %383 = vst [vmem:[%s3827_s26 + $0x1c8] sm:$0xff] %v382_v57   ;;  %v394_v60 = vld [vmem:[%s3822_s25 + $0x960] sm:$0xff]  }
  0x2e   : > { %387 = vst [vmem:[%s3827_s26 + $0x1d0] sm:$0xff] %v386_v58   ;;  %391 = vst [vmem:[%s3827_s26 + $0x1d8] sm:$0xff] %v390_v59   ;;  %v398_v61 = vld [vmem:[%s3822_s25 + $0x968] sm:$0xff]   ;;  %v402_v62 = vld [vmem:[%s3822_s25 + $0x970] sm:$0xff]  }
  0x2f   : > { %395 = vst [vmem:[%s3827_s26 + $0x1e0] sm:$0xff] %v394_v60   ;;  %399 = vst [vmem:[%s3827_s26 + $0x1e8] sm:$0xff] %v398_v61   ;;  %v406_v63 = vld [vmem:[%s3822_s25 + $0x978] sm:$0xff]   ;;  %v410_v0 = vld [vmem:[%s3822_s25 + $0x980] sm:$0xff]  }
  0x30   : > { %403 = vst [vmem:[%s3827_s26 + $0x1f0] sm:$0xff] %v402_v62   ;;  %v414_v1 = vld [vmem:[%s3822_s25 + $0x988] sm:$0xff]   ;;  %407 = vst [vmem:[%s3827_s26 + $0x1f8] sm:$0xff] %v406_v63   ;;  %v418_v2 = vld [vmem:[%s3822_s25 + $0x990] sm:$0xff]  }
  0x31   : > { %411 = vst [vmem:[%s3827_s26 + $0x200] sm:$0xff] %v410_v0   ;;  %415 = vst [vmem:[%s3827_s26 + $0x208] sm:$0xff] %v414_v1   ;;  %v422_v3 = vld [vmem:[%s3822_s25 + $0x998] sm:$0xff]   ;;  %v426_v4 = vld [vmem:[%s3822_s25 + $0x9a0] sm:$0xff]  }
  0x32   : > { %419 = vst [vmem:[%s3827_s26 + $0x210] sm:$0xff] %v418_v2   ;;  %423 = vst [vmem:[%s3827_s26 + $0x218] sm:$0xff] %v422_v3   ;;  %v430_v5 = vld [vmem:[%s3822_s25 + $0x9a8] sm:$0xff]   ;;  %v434_v6 = vld [vmem:[%s3822_s25 + $0x9b0] sm:$0xff]  }
  0x33   : > { %427 = vst [vmem:[%s3827_s26 + $0x220] sm:$0xff] %v426_v4   ;;  %v438_v7 = vld [vmem:[%s3822_s25 + $0x9b8] sm:$0xff]   ;;  %431 = vst [vmem:[%s3827_s26 + $0x228] sm:$0xff] %v430_v5   ;;  %v442_v8 = vld [vmem:[%s3822_s25 + $0xd80] sm:$0xff]  }
  0x34   : > { %435 = vst [vmem:[%s3827_s26 + $0x230] sm:$0xff] %v434_v6   ;;  %439 = vst [vmem:[%s3827_s26 + $0x238] sm:$0xff] %v438_v7   ;;  %v446_v9 = vld [vmem:[%s3822_s25 + $0xd88] sm:$0xff]   ;;  %v450_v10 = vld [vmem:[%s3822_s25 + $0xd90] sm:$0xff]  }
  0x35   : > { %443 = vst [vmem:[%s3827_s26 + $0x240] sm:$0xff] %v442_v8   ;;  %447 = vst [vmem:[%s3827_s26 + $0x248] sm:$0xff] %v446_v9   ;;  %v454_v11 = vld [vmem:[%s3822_s25 + $0xd98] sm:$0xff]   ;;  %v458_v12 = vld [vmem:[%s3822_s25 + $0xda0] sm:$0xff]  }
  0x36   : > { %451 = vst [vmem:[%s3827_s26 + $0x250] sm:$0xff] %v450_v10   ;;  %v462_v13 = vld [vmem:[%s3822_s25 + $0xda8] sm:$0xff]   ;;  %455 = vst [vmem:[%s3827_s26 + $0x258] sm:$0xff] %v454_v11   ;;  %v466_v14 = vld [vmem:[%s3822_s25 + $0xdb0] sm:$0xff]  }
  0x37   : > { %459 = vst [vmem:[%s3827_s26 + $0x260] sm:$0xff] %v458_v12   ;;  %463 = vst [vmem:[%s3827_s26 + $0x268] sm:$0xff] %v462_v13   ;;  %v470_v15 = vld [vmem:[%s3822_s25 + $0xdb8] sm:$0xff]   ;;  %v474_v16 = vld [vmem:[%s3822_s25 + $0xdc0] sm:$0xff]  }
  0x38   : > { %467 = vst [vmem:[%s3827_s26 + $0x270] sm:$0xff] %v466_v14   ;;  %471 = vst [vmem:[%s3827_s26 + $0x278] sm:$0xff] %v470_v15   ;;  %v478_v17 = vld [vmem:[%s3822_s25 + $0xdc8] sm:$0xff]   ;;  %v482_v18 = vld [vmem:[%s3822_s25 + $0xdd0] sm:$0xff]  }
  0x39   : > { %475 = vst [vmem:[%s3827_s26 + $0x280] sm:$0xff] %v474_v16   ;;  %v486_v19 = vld [vmem:[%s3822_s25 + $0xdd8] sm:$0xff]   ;;  %479 = vst [vmem:[%s3827_s26 + $0x288] sm:$0xff] %v478_v17   ;;  %v490_v20 = vld [vmem:[%s3822_s25 + $0xde0] sm:$0xff]  }
  0x3a   : > { %483 = vst [vmem:[%s3827_s26 + $0x290] sm:$0xff] %v482_v18   ;;  %487 = vst [vmem:[%s3827_s26 + $0x298] sm:$0xff] %v486_v19   ;;  %v494_v21 = vld [vmem:[%s3822_s25 + $0xde8] sm:$0xff]   ;;  %v498_v22 = vld [vmem:[%s3822_s25 + $0xdf0] sm:$0xff]  }
  0x3b   : > { %491 = vst [vmem:[%s3827_s26 + $0x2a0] sm:$0xff] %v490_v20   ;;  %495 = vst [vmem:[%s3827_s26 + $0x2a8] sm:$0xff] %v494_v21   ;;  %v502_v23 = vld [vmem:[%s3822_s25 + $0xdf8] sm:$0xff]   ;;  %v506_v24 = vld [vmem:[%s3822_s25 + $0xe00] sm:$0xff]  }
  0x3c   : > { %499 = vst [vmem:[%s3827_s26 + $0x2b0] sm:$0xff] %v498_v22   ;;  %v510_v25 = vld [vmem:[%s3822_s25 + $0xe08] sm:$0xff]   ;;  %503 = vst [vmem:[%s3827_s26 + $0x2b8] sm:$0xff] %v502_v23   ;;  %v514_v26 = vld [vmem:[%s3822_s25 + $0xe10] sm:$0xff]  }
  0x3d   : > { %507 = vst [vmem:[%s3827_s26 + $0x2c0] sm:$0xff] %v506_v24   ;;  %511 = vst [vmem:[%s3827_s26 + $0x2c8] sm:$0xff] %v510_v25   ;;  %v518_v27 = vld [vmem:[%s3822_s25 + $0xe18] sm:$0xff]   ;;  %v522_v28 = vld [vmem:[%s3822_s25 + $0xe20] sm:$0xff]  }
  0x3e   : > { %515 = vst [vmem:[%s3827_s26 + $0x2d0] sm:$0xff] %v514_v26   ;;  %519 = vst [vmem:[%s3827_s26 + $0x2d8] sm:$0xff] %v518_v27   ;;  %v526_v29 = vld [vmem:[%s3822_s25 + $0xe28] sm:$0xff]   ;;  %v530_v30 = vld [vmem:[%s3822_s25 + $0xe30] sm:$0xff]  }
  0x3f   : > { %523 = vst [vmem:[%s3827_s26 + $0x2e0] sm:$0xff] %v522_v28   ;;  %v534_v31 = vld [vmem:[%s3822_s25 + $0xe38] sm:$0xff]   ;;  %527 = vst [vmem:[%s3827_s26 + $0x2e8] sm:$0xff] %v526_v29  }
  0x40   : > { %531 = vst [vmem:[%s3827_s26 + $0x2f0] sm:$0xff] %v530_v30   ;;  %535 = vst [vmem:[%s3827_s26 + $0x2f8] sm:$0xff] %v534_v31  }
  0x41 PF: > { %p3122_p5 = scmp.ge.s32.totalorder %s3766_s14, 1  ;;  %p944_p6 = scmp.lt.s32.totalorder %s3766_s14, 7 }
  0x43   : > { %p945_p7 = pnand %p3122_p5, %p944_p6 }
  0x45   : > { %948 = sbr.rel (%p945_p7) target bundleno = 476 (0x1dc), region = 69 }
  0x4a   : > { %v3646_v32 = vld [vmem:[%s4628_s1 + $0x8] sm:$0xff]   ;;  %s951_s29 = sand.u32 1, %s3758_s12   ;;  %v3647_v33 = vld [vmem:[%s4628_s1] sm:$0xff]   ;;  %vm1670_vm0 = vcmask 261120   ;;  %s975_s7 = smul.u32 48, %s3117_s15 }
  0x4b   : > { %s3621_s5 = smul.u32 768, %s951_s29  ;;  %3420 = vmatprep.subr.bf16.mxu0 %v3646_v32  ;;  %3616 = vmatprep.subr.bf16.mxu1 %v3646_v32 }
  0x4c   : > { %3421 = vmatpush3.bf16.msra.mxu0 %v3646_v32  ;;  %3618 = vmatpush3.bf16.msra.mxu1 %v3646_v32  ;;  %p976_p8 = scmp.lt.s32.totalorder %s975_s7, 287 }
  0x4d   : > { %3422 = vmatprep.subr.bf16.mxu0 %v3647_v33  ;;  %3617 = vmatprep.subr.bf16.mxu1 %v3647_v33  ;;  %s4027_s6 = scalar_lea.vmem [#allocation2], %s3621_s5 }
  0x4e   : > { %v3648_v34 = vld [vmem:[%s4027_s6] sm:$0xff]   ;;  %v3650_v36 = vld [vmem:[%s4027_s6 + $0x8] sm:$0xff]   ;;  %v3652_v38 = vld [vmem:[%s4027_s6 + $0x10] sm:$0xff]   ;;  %s4727_s7 = smov (!%p976_p8, %s975_s7), 287 }
  0x4f   : > { %v3649_v35 = vld [vmem:[%s4027_s6 + $0x180] sm:$0xff]   ;;  %3424 = vmatprep.mubr.msk.bf16.mxu0 %vm1670_vm0, %v3648_v34  ;;  %v3651_v37 = vld [vmem:[%s4027_s6 + $0x188] sm:$0xff]   ;;  %v3653_v39 = vld [vmem:[%s4027_s6 + $0x190] sm:$0xff]   ;;  %s3123_s10 = sshll.u32 %s4727_s7, 3 }
  0x50   : > { %3423 = vmatpush3.bf16.msra.mxu0 %v3647_v33  ;;  %3619 = vmatpush3.bf16.msra.mxu1 %v3647_v33  ;;  %v3654_v40 = vld [vmem:[%s4027_s6 + $0x18] sm:$0xff]   ;;  %v3656_v42 = vld [vmem:[%s4027_s6 + $0x20] sm:$0xff]   ;;  %v3658_v44 = vld [vmem:[%s4027_s6 + $0x28] sm:$0xff]   ;;  %s4430_s14 = scalar_lea.vmem %s4630_s3, %s3123_s10 }
  0x51   : > { %3520 = vmatprep.mubr.msk.bf16.mxu1 %vm1670_vm0, %v3649_v35  ;;  %v3655_v41 = vld [vmem:[%s4027_s6 + $0x198] sm:$0xff]   ;;  %v3657_v43 = vld [vmem:[%s4027_s6 + $0x1a0] sm:$0xff]   ;;  %v3659_v45 = vld [vmem:[%s4027_s6 + $0x1a8] sm:$0xff]  }
  0x52   : > { %v3660_v46 = vld [vmem:[%s4027_s6 + $0x30] sm:$0xff]   ;;  %v3662_v48 = vld [vmem:[%s4027_s6 + $0x38] sm:$0xff]   ;;  %v3664_v50 = vld [vmem:[%s4027_s6 + $0x40] sm:$0xff]  }
  0x53   : > { %3425 = vmatmul.mubr.msk.bf16.vlgmr.msra.gmra.mxu0 %vm1670_vm0, %v3650_v36  ;;  %3521 = vmatmul.mubr.msk.bf16.vlgmr.msra.gmra.mxu1 %vm1670_vm0, %v3651_v37  ;;  %v3661_v47 = vld [vmem:[%s4027_s6 + $0x1b0] sm:$0xff]   ;;  %v3663_v49 = vld [vmem:[%s4027_s6 + $0x1b8] sm:$0xff]   ;;  %v3665_v51 = vld [vmem:[%s4027_s6 + $0x1c0] sm:$0xff]  }
  0x54   : > { %3428 = vmatprep.mubr.msk.bf16.mxu0 %vm1670_vm0, %v3652_v38  ;;  %3524 = vmatprep.mubr.msk.bf16.mxu1 %vm1670_vm0, %v3653_v39  ;;  %v3666_v52 = vld [vmem:[%s4027_s6 + $0x48] sm:$0xff]   ;;  %v3668_v54 = vld [vmem:[%s4027_s6 + $0x50] sm:$0xff]   ;;  %v3670_v56 = vld [vmem:[%s4027_s6 + $0x58] sm:$0xff]  }
  0x55   : > { %v3667_v53 = vld [vmem:[%s4027_s6 + $0x1c8] sm:$0xff]   ;;  %v3669_v55 = vld [vmem:[%s4027_s6 + $0x1d0] sm:$0xff]   ;;  %v3671_v57 = vld [vmem:[%s4027_s6 + $0x1d8] sm:$0xff]  }
  0x56   : > { %v3672_v58 = vld [vmem:[%s4027_s6 + $0x60] sm:$0xff]   ;;  %v3674_v60 = vld [vmem:[%s4027_s6 + $0x68] sm:$0xff]   ;;  %v3676_v62 = vld [vmem:[%s4027_s6 + $0x70] sm:$0xff]  }
  0x57   : > { %v3673_v59 = vld [vmem:[%s4027_s6 + $0x1e0] sm:$0xff]   ;;  %v3675_v61 = vld [vmem:[%s4027_s6 + $0x1e8] sm:$0xff]   ;;  %v3677_v63 = vld [vmem:[%s4027_s6 + $0x1f0] sm:$0xff]  }
  0x58   : > { %v3678_v0 = vld [vmem:[%s4027_s6 + $0x78] sm:$0xff]   ;;  %v3680_v2 = vld [vmem:[%s4027_s6 + $0x80] sm:$0xff]   ;;  %v3682_v4 = vld [vmem:[%s4027_s6 + $0x88] sm:$0xff]  }
  0x59   : > { %v3679_v1 = vld [vmem:[%s4027_s6 + $0x1f8] sm:$0xff]   ;;  %v3681_v3 = vld [vmem:[%s4027_s6 + $0x200] sm:$0xff]   ;;  %v3683_v5 = vld [vmem:[%s4027_s6 + $0x208] sm:$0xff]  }
  0x5a   : > { %v3684_v6 = vld [vmem:[%s4027_s6 + $0x90] sm:$0xff]   ;;  %v3686_v8 = vld [vmem:[%s4027_s6 + $0x98] sm:$0xff]   ;;  %v3688_v10 = vld [vmem:[%s4027_s6 + $0xa0] sm:$0xff]  }
  0x5b   : > { %3429 = vmatmul.mubr.msk.bf16.gmra.mxu0 %vm1670_vm0, %v3654_v40  ;;  %3525 = vmatmul.mubr.msk.bf16.gmra.mxu1 %vm1670_vm0, %v3655_v41  ;;  %v3685_v7 = vld [vmem:[%s4027_s6 + $0x210] sm:$0xff]   ;;  %v3687_v9 = vld [vmem:[%s4027_s6 + $0x218] sm:$0xff]   ;;  %v3689_v11 = vld [vmem:[%s4027_s6 + $0x220] sm:$0xff]  }
  0x5c   : > { %3432 = vmatprep.mubr.msk.bf16.mxu0 %vm1670_vm0, %v3656_v42  ;;  %3528 = vmatprep.mubr.msk.bf16.mxu1 %vm1670_vm0, %v3657_v43  ;;  %v3690_v12 = vld [vmem:[%s4027_s6 + $0xa8] sm:$0xff]   ;;  %v3692_v14 = vld [vmem:[%s4027_s6 + $0xb0] sm:$0xff]   ;;  %v3694_v16 = vld [vmem:[%s4027_s6 + $0xb8] sm:$0xff]  }
  0x5d   : > { %v3691_v13 = vld [vmem:[%s4027_s6 + $0x228] sm:$0xff]   ;;  %v3693_v15 = vld [vmem:[%s4027_s6 + $0x230] sm:$0xff]   ;;  %v3695_v17 = vld [vmem:[%s4027_s6 + $0x238] sm:$0xff]  }
  0x5e   : > { %v3696_v18 = vld [vmem:[%s4027_s6 + $0xc0] sm:$0xff]   ;;  %v3698_v20 = vld [vmem:[%s4027_s6 + $0xc8] sm:$0xff]   ;;  %v3700_v22 = vld [vmem:[%s4027_s6 + $0xd0] sm:$0xff]  }
  0x5f   : > { %v3697_v19 = vld [vmem:[%s4027_s6 + $0x240] sm:$0xff]   ;;  %v3699_v21 = vld [vmem:[%s4027_s6 + $0x248] sm:$0xff]   ;;  %v3701_v23 = vld [vmem:[%s4027_s6 + $0x250] sm:$0xff]  }
  0x60   : > { %v3702_v24 = vld [vmem:[%s4027_s6 + $0xd8] sm:$0xff]   ;;  %v3704_v26 = vld [vmem:[%s4027_s6 + $0xe0] sm:$0xff]   ;;  %v3706_v28 = vld [vmem:[%s4027_s6 + $0xe8] sm:$0xff]  }
  0x61   : > { %v3703_v25 = vld [vmem:[%s4027_s6 + $0x258] sm:$0xff]   ;;  %v3705_v27 = vld [vmem:[%s4027_s6 + $0x260] sm:$0xff]   ;;  %v3707_v29 = vld [vmem:[%s4027_s6 + $0x268] sm:$0xff]  }
  0x62   : > { %v3708_v30 = vld [vmem:[%s4027_s6 + $0xf0] sm:$0xff]   ;;  %v3710_v32 = vld [vmem:[%s4027_s6 + $0xf8] sm:$0xff]   ;;  %v3712_v34 = vld [vmem:[%s4027_s6 + $0x100] sm:$0xff]  }
  0x63   : > { %3433 = vmatmul.mubr.msk.bf16.gmra.mxu0 %vm1670_vm0, %v3658_v44  ;;  %3529 = vmatmul.mubr.msk.bf16.gmra.mxu1 %vm1670_vm0, %v3659_v45  ;;  %v3709_v31 = vld [vmem:[%s4027_s6 + $0x270] sm:$0xff]   ;;  %v3711_v33 = vld [vmem:[%s4027_s6 + $0x278] sm:$0xff]   ;;  %v3713_v35 = vld [vmem:[%s4027_s6 + $0x280] sm:$0xff]  }
  0x64   : > { %3436 = vmatprep.mubr.msk.bf16.mxu0 %vm1670_vm0, %v3660_v46  ;;  %3532 = vmatprep.mubr.msk.bf16.mxu1 %vm1670_vm0, %v3661_v47  ;;  %v3714_v36 = vld [vmem:[%s4027_s6 + $0x108] sm:$0xff]   ;;  %v3716_v38 = vld [vmem:[%s4027_s6 + $0x110] sm:$0xff]   ;;  %v3718_v40 = vld [vmem:[%s4027_s6 + $0x118] sm:$0xff]  }
  0x65   : > { %v3715_v37 = vld [vmem:[%s4027_s6 + $0x288] sm:$0xff]   ;;  %v3717_v39 = vld [vmem:[%s4027_s6 + $0x290] sm:$0xff]   ;;  %v3719_v41 = vld [vmem:[%s4027_s6 + $0x298] sm:$0xff]  }
  0x66   : > { %v3720_v42 = vld [vmem:[%s4027_s6 + $0x120] sm:$0xff]   ;;  %v3722_v44 = vld [vmem:[%s4027_s6 + $0x128] sm:$0xff]   ;;  %v3724_v46 = vld [vmem:[%s4027_s6 + $0x130] sm:$0xff]  }
  0x67   : > { %v3721_v43 = vld [vmem:[%s4027_s6 + $0x2a0] sm:$0xff]   ;;  %v3723_v45 = vld [vmem:[%s4027_s6 + $0x2a8] sm:$0xff]   ;;  %v3725_v47 = vld [vmem:[%s4027_s6 + $0x2b0] sm:$0xff]  }
  0x6b   : > { %3437 = vmatmul.mubr.msk.bf16.gmra.mxu0 %vm1670_vm0, %v3662_v48  ;;  %3533 = vmatmul.mubr.msk.bf16.gmra.mxu1 %vm1670_vm0, %v3663_v49  ;;  %v3726_v48 = vld [vmem:[%s4027_s6 + $0x138] sm:$0xff]  }
  0x6c   : > { %3440 = vmatprep.mubr.msk.bf16.mxu0 %vm1670_vm0, %v3664_v50  ;;  %3536 = vmatprep.mubr.msk.bf16.mxu1 %vm1670_vm0, %v3665_v51  ;;  %v3727_v49 = vld [vmem:[%s4027_s6 + $0x2b8] sm:$0xff]   ;;  %v3728_v50 = vld [vmem:[%s4027_s6 + $0x140] sm:$0xff]  }
  0x6d   : > { %v3729_v51 = vld [vmem:[%s4027_s6 + $0x2c0] sm:$0xff]  }
  0x73   : > { %3441 = vmatmul.mubr.msk.bf16.gmra.mxu0 %vm1670_vm0, %v3666_v52  ;;  %3537 = vmatmul.mubr.msk.bf16.gmra.mxu1 %vm1670_vm0, %v3667_v53  ;;  %v3730_v52 = vld [vmem:[%s4027_s6 + $0x148] sm:$0xff]  }
  0x74   : > { %3444 = vmatprep.mubr.msk.bf16.mxu0 %vm1670_vm0, %v3668_v54  ;;  %3540 = vmatprep.mubr.msk.bf16.mxu1 %vm1670_vm0, %v3669_v55  ;;  %v3731_v53 = vld [vmem:[%s4027_s6 + $0x2c8] sm:$0xff]   ;;  %v3732_v54 = vld [vmem:[%s4027_s6 + $0x150] sm:$0xff]  }
  0x75   : > { %v3733_v55 = vld [vmem:[%s4027_s6 + $0x2d0] sm:$0xff]  }
  0x7b   : > { %3445 = vmatmul.mubr.msk.bf16.gmra.mxu0 %vm1670_vm0, %v3670_v56  ;;  %3541 = vmatmul.mubr.msk.bf16.gmra.mxu1 %vm1670_vm0, %v3671_v57  ;;  %v3734_v56 = vld [vmem:[%s4027_s6 + $0x158] sm:$0xff]  }
  0x7c   : > { %3448 = vmatprep.mubr.msk.bf16.mxu0 %vm1670_vm0, %v3672_v58  ;;  %3544 = vmatprep.mubr.msk.bf16.mxu1 %vm1670_vm0, %v3673_v59  ;;  %v3735_v57 = vld [vmem:[%s4027_s6 + $0x2d8] sm:$0xff]   ;;  %v3736_v58 = vld [vmem:[%s4027_s6 + $0x160] sm:$0xff]  }
  0x7d   : > { %v3737_v59 = vld [vmem:[%s4027_s6 + $0x2e0] sm:$0xff]  }
  0x83   : > { %3449 = vmatmul.mubr.msk.bf16.gmra.mxu0 %vm1670_vm0, %v3674_v60  ;;  %3545 = vmatmul.mubr.msk.bf16.gmra.mxu1 %vm1670_vm0, %v3675_v61  ;;  %v3738_v60 = vld [vmem:[%s4027_s6 + $0x168] sm:$0xff]  }
  0x84   : > { %3452 = vmatprep.mubr.msk.bf16.mxu0 %vm1670_vm0, %v3676_v62  ;;  %3548 = vmatprep.mubr.msk.bf16.mxu1 %vm1670_vm0, %v3677_v63  ;;  %v3739_v61 = vld [vmem:[%s4027_s6 + $0x2e8] sm:$0xff]   ;;  %v3740_v62 = vld [vmem:[%s4027_s6 + $0x170] sm:$0xff]  }
  0x85   : > { %v3741_v63 = vld [vmem:[%s4027_s6 + $0x2f0] sm:$0xff]  }
  0x8b   : > { %3453 = vmatmul.mubr.msk.bf16.gmra.mxu0 %vm1670_vm0, %v3678_v0  ;;  %3549 = vmatmul.mubr.msk.bf16.gmra.mxu1 %vm1670_vm0, %v3679_v1  ;;  %v3742_v0 = vld [vmem:[%s4027_s6 + $0x178] sm:$0xff]  }
  0x8c   : > { %3456 = vmatprep.mubr.msk.bf16.mxu0 %vm1670_vm0, %v3680_v2  ;;  %3552 = vmatprep.mubr.msk.bf16.mxu1 %vm1670_vm0, %v3681_v3  ;;  %v3743_v1 = vld [vmem:[%s4027_s6 + $0x2f8] sm:$0xff]  }
  0x93   : > { %3457 = vmatmul.mubr.msk.bf16.gmra.mxu0 %vm1670_vm0, %v3682_v4  ;;  %3553 = vmatmul.mubr.msk.bf16.gmra.mxu1 %vm1670_vm0, %v3683_v5 }
  0x94   : > { %3460 = vmatprep.mubr.msk.bf16.mxu0 %vm1670_vm0, %v3684_v6  ;;  %3556 = vmatprep.mubr.msk.bf16.mxu1 %vm1670_vm0, %v3685_v7 }
  0x9b   : > { %3461 = vmatmul.mubr.msk.bf16.gmra.mxu0 %vm1670_vm0, %v3686_v8  ;;  %3557 = vmatmul.mubr.msk.bf16.gmra.mxu1 %vm1670_vm0, %v3687_v9 }
  0x9c   : > { %3464 = vmatprep.mubr.msk.bf16.mxu0 %vm1670_vm0, %v3688_v10  ;;  %3560 = vmatprep.mubr.msk.bf16.mxu1 %vm1670_vm0, %v3689_v11 }
  0xa3   : > { %3465 = vmatmul.mubr.msk.bf16.gmra.mxu0 %vm1670_vm0, %v3690_v12  ;;  %3561 = vmatmul.mubr.msk.bf16.gmra.mxu1 %vm1670_vm0, %v3691_v13 }
  0xa4   : > { %3468 = vmatprep.mubr.msk.bf16.mxu0 %vm1670_vm0, %v3692_v14  ;;  %3564 = vmatprep.mubr.msk.bf16.mxu1 %vm1670_vm0, %v3693_v15 }
  0xab   : > { %3469 = vmatmul.mubr.msk.bf16.gmra.mxu0 %vm1670_vm0, %v3694_v16  ;;  %3565 = vmatmul.mubr.msk.bf16.gmra.mxu1 %vm1670_vm0, %v3695_v17 }
  0xac   : > { %3472 = vmatprep.mubr.msk.bf16.mxu0 %vm1670_vm0, %v3696_v18  ;;  %3568 = vmatprep.mubr.msk.bf16.mxu1 %vm1670_vm0, %v3697_v19 }
  0xb3   : > { %3473 = vmatmul.mubr.msk.bf16.gmra.mxu0 %vm1670_vm0, %v3698_v20  ;;  %3569 = vmatmul.mubr.msk.bf16.gmra.mxu1 %vm1670_vm0, %v3699_v21 }
  0xb4   : > { %3476 = vmatprep.mubr.msk.bf16.mxu0 %vm1670_vm0, %v3700_v22  ;;  %3572 = vmatprep.mubr.msk.bf16.mxu1 %vm1670_vm0, %v3701_v23 }
  0xbb   : > { %3477 = vmatmul.mubr.msk.bf16.gmra.mxu0 %vm1670_vm0, %v3702_v24  ;;  %3573 = vmatmul.mubr.msk.bf16.gmra.mxu1 %vm1670_vm0, %v3703_v25 }
  0xbc   : > { %3480 = vmatprep.mubr.msk.bf16.mxu0 %vm1670_vm0, %v3704_v26  ;;  %3576 = vmatprep.mubr.msk.bf16.mxu1 %vm1670_vm0, %v3705_v27 }
  0xc3   : > { %3481 = vmatmul.mubr.msk.bf16.gmra.mxu0 %vm1670_vm0, %v3706_v28  ;;  %3577 = vmatmul.mubr.msk.bf16.gmra.mxu1 %vm1670_vm0, %v3707_v29 }
  0xc4   : > { %3484 = vmatprep.mubr.msk.bf16.mxu0 %vm1670_vm0, %v3708_v30  ;;  %3580 = vmatprep.mubr.msk.bf16.mxu1 %vm1670_vm0, %v3709_v31 }
  0xcb   : > { %3485 = vmatmul.mubr.msk.bf16.gmra.mxu0 %vm1670_vm0, %v3710_v32  ;;  %3581 = vmatmul.mubr.msk.bf16.gmra.mxu1 %vm1670_vm0, %v3711_v33 }
  0xcc   : > { %3488 = vmatprep.mubr.msk.bf16.mxu0 %vm1670_vm0, %v3712_v34  ;;  %3584 = vmatprep.mubr.msk.bf16.mxu1 %vm1670_vm0, %v3713_v35 }
  0xd3   : > { %3489 = vmatmul.mubr.msk.bf16.gmra.mxu0 %vm1670_vm0, %v3714_v36  ;;  %3585 = vmatmul.mubr.msk.bf16.gmra.mxu1 %vm1670_vm0, %v3715_v37 }
  0xd4   : > { %3492 = vmatprep.mubr.msk.bf16.mxu0 %vm1670_vm0, %v3716_v38  ;;  %3588 = vmatprep.mubr.msk.bf16.mxu1 %vm1670_vm0, %v3717_v39 }
  0xdb   : > { %3493 = vmatmul.mubr.msk.bf16.gmra.mxu0 %vm1670_vm0, %v3718_v40  ;;  %3589 = vmatmul.mubr.msk.bf16.gmra.mxu1 %vm1670_vm0, %v3719_v41 }
  0xdc   : > { %3496 = vmatprep.mubr.msk.bf16.mxu0 %vm1670_vm0, %v3720_v42  ;;  %3592 = vmatprep.mubr.msk.bf16.mxu1 %vm1670_vm0, %v3721_v43 }
  0xe3   : > { %3497 = vmatmul.mubr.msk.bf16.gmra.mxu0 %vm1670_vm0, %v3722_v44  ;;  %3593 = vmatmul.mubr.msk.bf16.gmra.mxu1 %vm1670_vm0, %v3723_v45 }
  0xe4   : > { %3500 = vmatprep.mubr.msk.bf16.mxu0 %vm1670_vm0, %v3724_v46  ;;  %3596 = vmatprep.mubr.msk.bf16.mxu1 %vm1670_vm0, %v3725_v47 }
  0xeb   : > { %3501 = vmatmul.mubr.msk.bf16.gmra.mxu0 %vm1670_vm0, %v3726_v48  ;;  %3597 = vmatmul.mubr.msk.bf16.gmra.mxu1 %vm1670_vm0, %v3727_v49 }
  0xec   : > { %3504 = vmatprep.mubr.msk.bf16.mxu0 %vm1670_vm0, %v3728_v50  ;;  %3600 = vmatprep.mubr.msk.bf16.mxu1 %vm1670_vm0, %v3729_v51 }
  0xf3   : > { %3505 = vmatmul.mubr.msk.bf16.gmra.mxu0 %vm1670_vm0, %v3730_v52  ;;  %3601 = vmatmul.mubr.msk.bf16.gmra.mxu1 %vm1670_vm0, %v3731_v53 }
  0xf4   : > { %3508 = vmatprep.mubr.msk.bf16.mxu0 %vm1670_vm0, %v3732_v54  ;;  %3604 = vmatprep.mubr.msk.bf16.mxu1 %vm1670_vm0, %v3733_v55 }
  0xfb   : > { %3509 = vmatmul.mubr.msk.bf16.gmra.mxu0 %vm1670_vm0, %v3734_v56  ;;  %3605 = vmatmul.mubr.msk.bf16.gmra.mxu1 %vm1670_vm0, %v3735_v57 }
  0xfc   : > { %3512 = vmatprep.mubr.msk.bf16.mxu0 %vm1670_vm0, %v3736_v58  ;;  %3608 = vmatprep.mubr.msk.bf16.mxu1 %vm1670_vm0, %v3737_v59 }
 0x103   : > { %3513 = vmatmul.mubr.msk.bf16.gmra.mxu0 %vm1670_vm0, %v3738_v60  ;;  %3609 = vmatmul.mubr.msk.bf16.gmra.mxu1 %vm1670_vm0, %v3739_v61 }
 0x104   : > { %3516 = vmatprep.mubr.msk.bf16.mxu0 %vm1670_vm0, %v3740_v62  ;;  %3612 = vmatprep.mubr.msk.bf16.mxu1 %vm1670_vm0, %v3741_v63 }
 0x10b   : > { %3517 = vmatmul.mubr.msk.bf16.gmra.mxu0 %vm1670_vm0, %v3742_v0  ;;  %3613 = vmatmul.mubr.msk.bf16.gmra.mxu1 %vm1670_vm0, %v3743_v1 }
 0x113   : > { %v4221_v2 = vpop.f32.mrf.mxu0  ;;  %v4223_v3 = vpop.f32.mrf.mxu1 }
 0x115   : > { %v4225_v4 = vpop.f32.mrf.mxu0  ;;  %v4227_v5 = vpop.f32.mrf.mxu1 }
 0x117   : > { %v4229_v6 = vpop.f32.mrf.mxu0  ;;  %v4231_v7 = vpop.f32.mrf.mxu1 }
 0x119   : > { %v4233_v8 = vpop.f32.mrf.mxu0  ;;  %v4235_v9 = vpop.f32.mrf.mxu1 }
 0x11b   : > { %v4237_v10 = vpop.f32.mrf.mxu0  ;;  %v4239_v11 = vpop.f32.mrf.mxu1 }
 0x11d   : > { %v4241_v12 = vpop.f32.mrf.mxu0  ;;  %v4243_v13 = vpop.f32.mrf.mxu1 }
 0x11f   : > { %v4245_v14 = vpop.f32.mrf.mxu0  ;;  %v4247_v15 = vpop.f32.mrf.mxu1 }
 0x121   : > { %v4249_v16 = vpop.f32.mrf.mxu0  ;;  %v4251_v17 = vpop.f32.mrf.mxu1 }
 0x123   : > { %v4253_v18 = vpop.f32.mrf.mxu0  ;;  %v4255_v19 = vpop.f32.mrf.mxu1 }
 0x125   : > { %v4257_v20 = vpop.f32.mrf.mxu0  ;;  %v4259_v21 = vpop.f32.mrf.mxu1 }
 0x127   : > { %v4261_v22 = vpop.f32.mrf.mxu0  ;;  %v4263_v23 = vpop.f32.mrf.mxu1 }
 0x129   : > { %v4265_v24 = vpop.f32.mrf.mxu0  ;;  %v4267_v25 = vpop.f32.mrf.mxu1 }
 0x12b   : > { %v4269_v26 = vpop.f32.mrf.mxu0  ;;  %v4271_v27 = vpop.f32.mrf.mxu1 }
 0x12d   : > { %v4273_v28 = vpop.f32.mrf.mxu0  ;;  %v4275_v29 = vpop.f32.mrf.mxu1 }
 0x12f   : > { %v4277_v30 = vpop.f32.mrf.mxu0  ;;  %v4279_v31 = vpop.f32.mrf.mxu1 }
 0x131   : > { %v4281_v32 = vpop.f32.mrf.mxu0  ;;  %v4283_v33 = vpop.f32.mrf.mxu1 }
 0x133   : > { %v4285_v34 = vpop.f32.mrf.mxu0  ;;  %v4287_v35 = vpop.f32.mrf.mxu1 }
 0x135   : > { %v4289_v36 = vpop.f32.mrf.mxu0  ;;  %v4291_v37 = vpop.f32.mrf.mxu1 }
 0x137   : > { %v4293_v38 = vpop.f32.mrf.mxu0  ;;  %v4295_v39 = vpop.f32.mrf.mxu1 }
 0x139   : > { %v4297_v40 = vpop.f32.mrf.mxu0  ;;  %v4299_v41 = vpop.f32.mrf.mxu1 }
 0x13b   : > { %v4301_v42 = vpop.f32.mrf.mxu0  ;;  %v4303_v43 = vpop.f32.mrf.mxu1 }
 0x13d   : > { %v4305_v44 = vpop.f32.mrf.mxu0  ;;  %v4307_v45 = vpop.f32.mrf.mxu1 }
 0x13f   : > { %v4309_v46 = vpop.f32.mrf.mxu0  ;;  %v4311_v47 = vpop.f32.mrf.mxu1 }
 0x141   : > { %v4313_v48 = vpop.f32.mrf.mxu0  ;;  %v4315_v49 = vpop.f32.mrf.mxu1 }
 0x143   : > { %v4317_v50 = vpop.f32.mrf.mxu0  ;;  %v4319_v51 = vpop.f32.mrf.mxu1 }
 0x145   : > { %v4321_v52 = vpop.f32.mrf.mxu0  ;;  %v4323_v53 = vpop.f32.mrf.mxu1 }
 0x146   : > { %4631 = vst [vmem:[#allocation3_spill] sm:$0xff] %v4321_v52  ;;  %4632 = vst [vmem:[#allocation4_spill] sm:$0xff] %v4323_v53 }
 0x147   : > { %v4325_v54 = vpop.f32.mrf.mxu0  ;;  %v4327_v55 = vpop.f32.mrf.mxu1 }
 0x148   : > { %4633 = vst [vmem:[#allocation5_spill] sm:$0xff] %v4325_v54  ;;  %4634 = vst [vmem:[#allocation6_spill] sm:$0xff] %v4327_v55 }
 0x149   : > { %v4329_v56 = vpop.f32.mrf.mxu0  ;;  %v4331_v57 = vpop.f32.mrf.mxu1 }
 0x14a   : > { %4635 = vst [vmem:[#allocation7_spill] sm:$0xff] %v4329_v56  ;;  %4636 = vst [vmem:[#allocation8_spill] sm:$0xff] %v4331_v57 }
 0x14b   : > { %v4333_v58 = vpop.f32.mrf.mxu0  ;;  %v4335_v59 = vpop.f32.mrf.mxu1 }
 0x14c   : > { %4637 = vst [vmem:[#allocation9_spill] sm:$0xff] %v4333_v58  ;;  %4638 = vst [vmem:[#allocation10_spill] sm:$0xff] %v4335_v59 }
 0x14d   : > { %v4337_v60 = vpop.f32.mrf.mxu0  ;;  %v4339_v61 = vpop.f32.mrf.mxu1 }
 0x14e   : > { %4639 = vst [vmem:[#allocation11_spill] sm:$0xff] %v4337_v60  ;;  %4640 = vst [vmem:[#allocation12_spill] sm:$0xff] %v4339_v61 }
 0x14f   : > { %v4341_v62 = vpop.f32.mrf.mxu0  ;;  %v4343_v63 = vpop.f32.mrf.mxu1 }
 0x150   : > { %4641 = vst [vmem:[#allocation13_spill] sm:$0xff] %v4341_v62  ;;  %4642 = vst [vmem:[#allocation14_spill] sm:$0xff] %v4343_v63 }
 0x151   : > { %v4345_v0 = vpop.f32.mrf.mxu0  ;;  %v4347_v1 = vpop.f32.mrf.mxu1 }
 0x152   : > { %4643 = vst [vmem:[#allocation15_spill] sm:$0xff] %v4345_v0  ;;  %4644 = vst [vmem:[#allocation16_spill] sm:$0xff] %v4347_v1 }
 0x153   : > { %v4349_v55 = vpop.f32.mrf.mxu0  ;;  %v4351_v56 = vpop.f32.mrf.mxu1 }
 0x154   : > { %4645 = vst [vmem:[#allocation17_spill] sm:$0xff] %v4349_v55  ;;  %4646 = vst [vmem:[#allocation18_spill] sm:$0xff] %v4351_v56 }
 0x155   : > { %v4353_v57 = vpop.f32.mrf.mxu0  ;;  %v4355_v58 = vpop.f32.mrf.mxu1 }
 0x156   : > { %4647 = vst [vmem:[#allocation19_spill] sm:$0xff] %v4353_v57  ;;  %4648 = vst [vmem:[#allocation20_spill] sm:$0xff] %v4355_v58 }
 0x157   : > { %v4357_v59 = vpop.f32.mrf.mxu0  ;;  %v4359_v60 = vpop.f32.mrf.mxu1 }
 0x158   : > { %4649 = vst [vmem:[#allocation21_spill] sm:$0xff] %v4357_v59  ;;  %4650 = vst [vmem:[#allocation22_spill] sm:$0xff] %v4359_v60 }
 0x159   : > { %v4361_v61 = vpop.f32.mrf.mxu0  ;;  %v4363_v62 = vpop.f32.mrf.mxu1 }
 0x15a   : > { %4651 = vst [vmem:[#allocation23_spill] sm:$0xff] %v4361_v61  ;;  %4652 = vst [vmem:[#allocation24_spill] sm:$0xff] %v4363_v62 }
 0x15b   : > { %v4365_v63 = vpop.f32.mrf.mxu0  ;;  %v4367_v1 = vpop.f32.mrf.mxu1 }
 0x15c   : > { %4653 = vst [vmem:[#allocation25_spill] sm:$0xff] %v4365_v63  ;;  %4654 = vst [vmem:[#allocation26_spill] sm:$0xff] %v4367_v1 }
 0x15d   : > { %v4369_v55 = vpop.f32.mrf.mxu0  ;;  %v4371_v56 = vpop.f32.mrf.mxu1 }
 0x15e   : > { %4655 = vst [vmem:[#allocation27_spill] sm:$0xff] %v4369_v55  ;;  %4656 = vst [vmem:[#allocation28_spill] sm:$0xff] %v4371_v56 }
 0x15f   : > { %v4373_v57 = vpop.f32.mrf.mxu0  ;;  %v4375_v58 = vpop.f32.mrf.mxu1 }
 0x160   : > { %4657 = vst [vmem:[#allocation29_spill] sm:$0xff] %v4373_v57  ;;  %4658 = vst [vmem:[#allocation30_spill] sm:$0xff] %v4375_v58 }
 0x161   : > { %v4377_v59 = vpop.f32.mrf.mxu0  ;;  %v4379_v60 = vpop.f32.mrf.mxu1 }
 0x162   : > { %4659 = vst [vmem:[#allocation31_spill] sm:$0xff] %v4377_v59  ;;  %4660 = vst [vmem:[#allocation32_spill] sm:$0xff] %v4379_v60 }
 0x163   : > { %v4381_v61 = vpop.f32.mrf.mxu0  ;;  %v4383_v62 = vpop.f32.mrf.mxu1 }
 0x164   : > { %4661 = vst [vmem:[#allocation33_spill] sm:$0xff] %v4381_v61  ;;  %4662 = vst [vmem:[#allocation34_spill] sm:$0xff] %v4383_v62 }
 0x165   : > { %v4385_v63 = vpop.f32.mrf.mxu0  ;;  %v4387_v0 = vpop.f32.mrf.mxu1 }
 0x166   : > { %4663 = vst [vmem:[#allocation35_spill] sm:$0xff] %v4385_v63  ;;  %4664 = vst [vmem:[#allocation36_spill] sm:$0xff] %v4387_v0 }
 0x167   : > { %v4389_v1 = vpop.f32.mrf.mxu0  ;;  %v4391_v55 = vpop.f32.mrf.mxu1 }
 0x168   : > { %4665 = vst [vmem:[#allocation37_spill] sm:$0xff] %v4389_v1  ;;  %4666 = vst [vmem:[#allocation38_spill] sm:$0xff] %v4391_v55 }
 0x169   : > { %v4393_v56 = vpop.f32.mrf.mxu0  ;;  %v4395_v57 = vpop.f32.mrf.mxu1 }
 0x16a   : > { %4667 = vst [vmem:[#allocation39_spill] sm:$0xff] %v4393_v56  ;;  %4668 = vst [vmem:[#allocation40_spill] sm:$0xff] %v4395_v57 }
 0x16b   : > { %v4399_v59 = vpop.f32.mrf.mxu0  ;;  %v4401_v60 = vpop.f32.mrf.mxu1 }
 0x16c   : > { %4669 = vst [vmem:[#allocation41_spill] sm:$0xff] %v4399_v59  ;;  %4670 = vst [vmem:[#allocation42_spill] sm:$0xff] %v4401_v60 }
 0x16d   : > { %v4403_v61 = vpop.f32.mrf.mxu0  ;;  %v4405_v62 = vpop.f32.mrf.mxu1 }
 0x16e   : > { %4671 = vst [vmem:[#allocation43_spill] sm:$0xff] %v4403_v61  ;;  %4672 = vst [vmem:[#allocation44_spill] sm:$0xff] %v4405_v62  ;;  %v4420_v62 = vld [vmem:[%s4629_s2] ss:$0 sm:$0xff] }
 0x16f   : > { %v4407_v0 = vpop.f32.mrf.mxu0  ;;  %v4409_v1 = vpop.f32.mrf.mxu1 }
 0x170   : > { %4673 = vst [vmem:[#allocation45_spill] sm:$0xff] %v4407_v0  ;;  %4674 = vst [vmem:[#allocation46_spill] sm:$0xff] %v4409_v1 }
 0x171   : > { %v4411_v55 = vpop.f32.mrf.mxu0  ;;  %v4413_v56 = vpop.f32.mrf.mxu1 }
 0x172   : > { %4675 = vst [vmem:[#allocation47_spill] sm:$0xff] %v4411_v55  ;;  %4676 = vst [vmem:[#allocation48_spill] sm:$0xff] %v4413_v56 }
 0x173   : > { %v3474_v57 = vpop.f32.mrf.mxu0  ;;  %v3570_v63 = vpop.f32.mrf.mxu1 }
 0x174   : > { %v2762_v59 = vmax.f32 %v4221_v2, %v3474_v57  ;;  %v2810_v60 = vmax.f32 %v4223_v3, %v3570_v63 }
 0x175   : > { %v2185_v61 = vpop.f32.mrf.mxu0  ;;  %v2569_v0 = vpop.f32.mrf.mxu1 }
 0x176   : > { %v2858_v1 = vmax.f32 %v2762_v59, %v2810_v60  ;;  %v2760_v55 = vmax.f32 %v4225_v4, %v2185_v61  ;;  %v2808_v56 = vmax.f32 %v4227_v5, %v2569_v0 }
 0x177   : > { %v3475_v58 = vpop.f32.mrf.mxu0  ;;  %v3571_v54 = vpop.f32.mrf.mxu1 }
 0x178   : > { %v2913_v53 = vadd.f32 %v4420_v62, %v2858_v1  ;;  %v2856_v2 = vmax.f32 %v2760_v55, %v2808_v56  ;;  %v2763_v3 = vmax.f32 %v4229_v6, %v3475_v58  ;;  %v2811_v57 = vmax.f32 %v4231_v7, %v3571_v54 }
 0x179   : > { %v2188_v59 = vpop.f32.mrf.mxu0  ;;  %v2572_v60 = vpop.f32.mrf.mxu1 }
 0x17a   : > { %v2961_v4 = vmax.f32 %v2913_v53, 0.0  ;;  %v2911_v5 = vadd.f32 %v4420_v62, %v2856_v2  ;;  %v2859_v61 = vmax.f32 %v2763_v3, %v2811_v57  ;;  %v2761_v63 = vmax.f32 %v4233_v8, %v2188_v59 }
 0x17b   : > { %v2809_v55 = vmax.f32 %v4235_v9, %v2572_v60  ;;  %v3478_v6 = vpop.f32.mrf.mxu0  ;;  %v3574_v56 = vpop.f32.mrf.mxu1 }
 0x17c   : > { %3009 = vst [vmem:[%s4430_s14 + $0x10] sm:$0xff] %v2961_v4  ;;  %v2959_v7 = vmax.f32 %v2911_v5, 0.0  ;;  %v2914_v54 = vadd.f32 %v4420_v62, %v2859_v61  ;;  %v2766_v58 = vmax.f32 %v4237_v10, %v3478_v6  ;;  %v2814_v0 = vmax.f32 %v4239_v11, %v3574_v56 }
 0x17d   : > { %v2857_v1 = vmax.f32 %v2761_v63, %v2809_v55  ;;  %v2201_v53 = vpop.f32.mrf.mxu0  ;;  %v2585_v52 = vpop.f32.mrf.mxu1 }
 0x17e   : > { %3007 = vst [vmem:[%s4430_s14] sm:$0xff] %v2959_v7  ;;  %v2962_v2 = vmax.f32 %v2914_v54, 0.0  ;;  %v2862_v3 = vmax.f32 %v2766_v58, %v2814_v0  ;;  %v2764_v8 = vmax.f32 %v4241_v12, %v2201_v53  ;;  %v2812_v9 = vmax.f32 %v4243_v13, %v2585_v52 }
 0x17f   : > { %v2912_v57 = vadd.f32 %v4420_v62, %v2857_v1  ;;  %v3479_v59 = vpop.f32.mrf.mxu0  ;;  %v3575_v60 = vpop.f32.mrf.mxu1 }
 0x180   : > { %3010 = vst [vmem:[%s4430_s14 + $0x18] sm:$0xff] %v2962_v2  ;;  %v2917_v10 = vadd.f32 %v4420_v62, %v2862_v3  ;;  %v2860_v11 = vmax.f32 %v2764_v8, %v2812_v9  ;;  %v2767_v4 = vmax.f32 %v4245_v14, %v3479_v59  ;;  %v2815_v5 = vmax.f32 %v4247_v15, %v3575_v60 }
 0x181   : > { %v2960_v61 = vmax.f32 %v2912_v57, 0.0  ;;  %v2204_v63 = vpop.f32.mrf.mxu0  ;;  %v2588_v55 = vpop.f32.mrf.mxu1 }
 0x182   : > { %v2965_v12 = vmax.f32 %v2917_v10, 0.0  ;;  %v2915_v13 = vadd.f32 %v4420_v62, %v2860_v11  ;;  %v2863_v52 = vmax.f32 %v2767_v4, %v2815_v5  ;;  %v2765_v6 = vmax.f32 %v4249_v16, %v2204_v63 }
 0x183   : > { %3008 = vst [vmem:[%s4430_s14 + $0x8] sm:$0xff] %v2960_v61  ;;  %v2813_v56 = vmax.f32 %v4251_v17, %v2588_v55  ;;  %v3482_v7 = vpop.f32.mrf.mxu0  ;;  %v3578_v54 = vpop.f32.mrf.mxu1 }
 0x184   : > { %3013 = vst [vmem:[%s4430_s14 + $0x30] sm:$0xff] %v2965_v12  ;;  %v2963_v14 = vmax.f32 %v2915_v13, 0.0  ;;  %v2918_v15 = vadd.f32 %v4420_v62, %v2863_v52  ;;  %v2770_v58 = vmax.f32 %v4253_v18, %v3482_v7  ;;  %v2818_v0 = vmax.f32 %v4255_v19, %v3578_v54 }
 0x185   : > { %v2861_v1 = vmax.f32 %v2765_v6, %v2813_v56  ;;  %v2217_v53 = vpop.f32.mrf.mxu0  ;;  %v2601_v2 = vpop.f32.mrf.mxu1 }
 0x186   : > { %3011 = vst [vmem:[%s4430_s14 + $0x20] sm:$0xff] %v2963_v14  ;;  %v2966_v3 = vmax.f32 %v2918_v15, 0.0  ;;  %v2866_v16 = vmax.f32 %v2770_v58, %v2818_v0  ;;  %v2768_v8 = vmax.f32 %v4257_v20, %v2217_v53  ;;  %v2816_v17 = vmax.f32 %v4259_v21, %v2601_v2 }
 0x187   : > { %v2916_v9 = vadd.f32 %v4420_v62, %v2861_v1  ;;  %v3483_v57 = vpop.f32.mrf.mxu0  ;;  %v3579_v59 = vpop.f32.mrf.mxu1 }
 0x188   : > { %3014 = vst [vmem:[%s4430_s14 + $0x38] sm:$0xff] %v2966_v3  ;;  %v2921_v18 = vadd.f32 %v4420_v62, %v2866_v16  ;;  %v2864_v19 = vmax.f32 %v2768_v8, %v2816_v17  ;;  %v2771_v60 = vmax.f32 %v4261_v22, %v3483_v57  ;;  %v2819_v10 = vmax.f32 %v4263_v23, %v3579_v59 }
 0x189   : > { %v2964_v11 = vmax.f32 %v2916_v9, 0.0  ;;  %v2220_v4 = vpop.f32.mrf.mxu0  ;;  %v2604_v5 = vpop.f32.mrf.mxu1 }
 0x18a   : > { %v2969_v20 = vmax.f32 %v2921_v18, 0.0  ;;  %v2919_v21 = vadd.f32 %v4420_v62, %v2864_v19  ;;  %v2867_v61 = vmax.f32 %v2771_v60, %v2819_v10  ;;  %v2769_v63 = vmax.f32 %v4265_v24, %v2220_v4 }
 0x18b   : > { %3012 = vst [vmem:[%s4430_s14 + $0x28] sm:$0xff] %v2964_v11  ;;  %v2817_v55 = vmax.f32 %v4267_v25, %v2604_v5  ;;  %v3486_v12 = vpop.f32.mrf.mxu0  ;;  %v3582_v13 = vpop.f32.mrf.mxu1 }
 0x18c   : > { %3017 = vst [vmem:[%s4430_s14 + $0x50] sm:$0xff] %v2969_v20  ;;  %v2967_v22 = vmax.f32 %v2919_v21, 0.0  ;;  %v2922_v23 = vadd.f32 %v4420_v62, %v2867_v61  ;;  %v2774_v52 = vmax.f32 %v4269_v26, %v3486_v12  ;;  %v2822_v6 = vmax.f32 %v4271_v27, %v3582_v13 }
 0x18d   : > { %v2865_v56 = vmax.f32 %v2769_v63, %v2817_v55  ;;  %v2233_v7 = vpop.f32.mrf.mxu0  ;;  %v2617_v54 = vpop.f32.mrf.mxu1 }
 0x18e   : > { %3015 = vst [vmem:[%s4430_s14 + $0x40] sm:$0xff] %v2967_v22  ;;  %v2970_v14 = vmax.f32 %v2922_v23, 0.0  ;;  %v2870_v24 = vmax.f32 %v2774_v52, %v2822_v6  ;;  %v2772_v15 = vmax.f32 %v4273_v28, %v2233_v7  ;;  %v2820_v25 = vmax.f32 %v4275_v29, %v2617_v54 }
 0x18f   : > { %v2920_v58 = vadd.f32 %v4420_v62, %v2865_v56  ;;  %v3487_v0 = vpop.f32.mrf.mxu0  ;;  %v3583_v1 = vpop.f32.mrf.mxu1 }
 0x190   : > { %3018 = vst [vmem:[%s4430_s14 + $0x58] sm:$0xff] %v2970_v14  ;;  %v2925_v26 = vadd.f32 %v4420_v62, %v2870_v24  ;;  %v2868_v27 = vmax.f32 %v2772_v15, %v2820_v25  ;;  %v2775_v53 = vmax.f32 %v4277_v30, %v3487_v0  ;;  %v2823_v2 = vmax.f32 %v4279_v31, %v3583_v1 }
 0x191   : > { %v2968_v3 = vmax.f32 %v2920_v58, 0.0  ;;  %v2236_v16 = vpop.f32.mrf.mxu0  ;;  %v2620_v8 = vpop.f32.mrf.mxu1 }
 0x192   : > { %v2973_v28 = vmax.f32 %v2925_v26, 0.0  ;;  %v2923_v29 = vadd.f32 %v4420_v62, %v2868_v27  ;;  %v2871_v17 = vmax.f32 %v2775_v53, %v2823_v2  ;;  %v2773_v9 = vmax.f32 %v4281_v32, %v2236_v16 }
 0x193   : > { %3016 = vst [vmem:[%s4430_s14 + $0x48] sm:$0xff] %v2968_v3  ;;  %v2821_v57 = vmax.f32 %v4283_v33, %v2620_v8  ;;  %v3490_v59 = vpop.f32.mrf.mxu0  ;;  %v3586_v18 = vpop.f32.mrf.mxu1 }
 0x194   : > { %3021 = vst [vmem:[%s4430_s14 + $0x70] sm:$0xff] %v2973_v28  ;;  %v2971_v30 = vmax.f32 %v2923_v29, 0.0  ;;  %v2926_v31 = vadd.f32 %v4420_v62, %v2871_v17  ;;  %v2778_v19 = vmax.f32 %v4285_v34, %v3490_v59  ;;  %v2826_v60 = vmax.f32 %v4287_v35, %v3586_v18 }
 0x195   : > { %v2869_v10 = vmax.f32 %v2773_v9, %v2821_v57  ;;  %v2249_v11 = vpop.f32.mrf.mxu0  ;;  %v2633_v4 = vpop.f32.mrf.mxu1 }
 0x196   : > { %3019 = vst [vmem:[%s4430_s14 + $0x60] sm:$0xff] %v2971_v30  ;;  %v2974_v5 = vmax.f32 %v2926_v31, 0.0  ;;  %v2874_v32 = vmax.f32 %v2778_v19, %v2826_v60  ;;  %v2776_v20 = vmax.f32 %v4289_v36, %v2249_v11  ;;  %v2824_v33 = vmax.f32 %v4291_v37, %v2633_v4  ;;  %v4677_v11 = vld [vmem:[#allocation3_spill] sm:$0xff] }
 0x197   : > { %v2924_v21 = vadd.f32 %v4420_v62, %v2869_v10  ;;  %v3491_v61 = vpop.f32.mrf.mxu0  ;;  %v3587_v63 = vpop.f32.mrf.mxu1 }
 0x198   : > { %3022 = vst [vmem:[%s4430_s14 + $0x78] sm:$0xff] %v2974_v5  ;;  %v2929_v34 = vadd.f32 %v4420_v62, %v2874_v32  ;;  %v2872_v35 = vmax.f32 %v2776_v20, %v2824_v33  ;;  %v2779_v55 = vmax.f32 %v4293_v38, %v3491_v61  ;;  %v2827_v12 = vmax.f32 %v4295_v39, %v3587_v63  ;;  %v4680_v63 = vld [vmem:[#allocation6_spill] sm:$0xff] }
 0x199   : > { %v2972_v13 = vmax.f32 %v2924_v21, 0.0  ;;  %v2252_v22 = vpop.f32.mrf.mxu0  ;;  %v2636_v23 = vpop.f32.mrf.mxu1  ;;  %v4679_v21 = vld [vmem:[#allocation5_spill] sm:$0xff] }
 0x19a   : > { %v2977_v36 = vmax.f32 %v2929_v34, 0.0  ;;  %v2927_v37 = vadd.f32 %v4420_v62, %v2872_v35  ;;  %v2875_v52 = vmax.f32 %v2779_v55, %v2827_v12  ;;  %v2777_v6 = vmax.f32 %v4297_v40, %v2252_v22 }
 0x19b   : > { %3020 = vst [vmem:[%s4430_s14 + $0x68] sm:$0xff] %v2972_v13  ;;  %v2825_v56 = vmax.f32 %v4299_v41, %v2636_v23  ;;  %v3494_v7 = vpop.f32.mrf.mxu0  ;;  %v3590_v54 = vpop.f32.mrf.mxu1 }
 0x19c   : > { %3025 = vst [vmem:[%s4430_s14 + $0x90] sm:$0xff] %v2977_v36  ;;  %v2975_v38 = vmax.f32 %v2927_v37, 0.0  ;;  %v2930_v39 = vadd.f32 %v4420_v62, %v2875_v52  ;;  %v2782_v14 = vmax.f32 %v4301_v42, %v3494_v7  ;;  %v2830_v24 = vmax.f32 %v4303_v43, %v3590_v54  ;;  %v4681_v36 = vld [vmem:[#allocation7_spill] sm:$0xff]  ;;  %v4682_v52 = vld [vmem:[#allocation8_spill] sm:$0xff] }
 0x19d   : > { %v2873_v15 = vmax.f32 %v2777_v6, %v2825_v56  ;;  %v2265_v25 = vpop.f32.mrf.mxu0  ;;  %v2649_v58 = vpop.f32.mrf.mxu1 }
 0x19e   : > { %3023 = vst [vmem:[%s4430_s14 + $0x80] sm:$0xff] %v2975_v38  ;;  %v2978_v0 = vmax.f32 %v2930_v39, 0.0  ;;  %v2878_v40 = vmax.f32 %v2782_v14, %v2830_v24  ;;  %v2780_v1 = vmax.f32 %v4305_v44, %v2265_v25  ;;  %v2828_v41 = vmax.f32 %v4307_v45, %v2649_v58  ;;  %v4683_v39 = vld [vmem:[#allocation9_spill] sm:$0xff]  ;;  %v4684_v24 = vld [vmem:[#allocation10_spill] sm:$0xff] }
 0x19f   : > { %v2928_v26 = vadd.f32 %v4420_v62, %v2873_v15  ;;  %v3495_v27 = vpop.f32.mrf.mxu0  ;;  %v3591_v53 = vpop.f32.mrf.mxu1 }
 0x1a0   : > { %3026 = vst [vmem:[%s4430_s14 + $0x98] sm:$0xff] %v2978_v0  ;;  %v2933_v42 = vadd.f32 %v4420_v62, %v2878_v40  ;;  %v2876_v43 = vmax.f32 %v2780_v1, %v2828_v41  ;;  %v2783_v2 = vmax.f32 %v4309_v46, %v3495_v27  ;;  %v2831_v3 = vmax.f32 %v4311_v47, %v3591_v53  ;;  %v4685_v41 = vld [vmem:[#allocation11_spill] sm:$0xff]  ;;  %v4686_v27 = vld [vmem:[#allocation12_spill] sm:$0xff] }
 0x1a1   : > { %v2976_v16 = vmax.f32 %v2928_v26, 0.0  ;;  %v2268_v8 = vpop.f32.mrf.mxu0  ;;  %v2652_v28 = vpop.f32.mrf.mxu1 }
 0x1a2   : > { %v2981_v44 = vmax.f32 %v2933_v42, 0.0  ;;  %v2931_v45 = vadd.f32 %v4420_v62, %v2876_v43  ;;  %v2879_v29 = vmax.f32 %v2783_v2, %v2831_v3  ;;  %v2781_v17 = vmax.f32 %v4313_v48, %v2268_v8  ;;  %v4687_v8 = vld [vmem:[#allocation13_spill] sm:$0xff] }
 0x1a3   : > { %3024 = vst [vmem:[%s4430_s14 + $0x88] sm:$0xff] %v2976_v16  ;;  %v2829_v9 = vmax.f32 %v4315_v49, %v2652_v28  ;;  %v3498_v57 = vpop.f32.mrf.mxu0  ;;  %v3594_v59 = vpop.f32.mrf.mxu1  ;;  %v4678_v49 = vld [vmem:[#allocation4_spill] sm:$0xff] }
 0x1a4   : > { %3029 = vst [vmem:[%s4430_s14 + $0xb0] sm:$0xff] %v2981_v44  ;;  %v2979_v46 = vmax.f32 %v2931_v45, 0.0  ;;  %v2934_v47 = vadd.f32 %v4420_v62, %v2879_v29  ;;  %v2786_v18 = vmax.f32 %v4317_v50, %v3498_v57  ;;  %v2834_v30 = vmax.f32 %v4319_v51, %v3594_v59  ;;  %v4688_v44 = vld [vmem:[#allocation14_spill] sm:$0xff] }
 0x1a5   : > { %v2877_v31 = vmax.f32 %v2781_v17, %v2829_v9  ;;  %v2281_v19 = vpop.f32.mrf.mxu0  ;;  %v2665_v60 = vpop.f32.mrf.mxu1 }
 0x1a6   : > { %3027 = vst [vmem:[%s4430_s14 + $0xa0] sm:$0xff] %v2979_v46  ;;  %v2982_v10 = vmax.f32 %v2934_v47, 0.0  ;;  %v2882_v48 = vmax.f32 %v2786_v18, %v2834_v30  ;;  %v2784_v4 = vmax.f32 %v4677_v11, %v2281_v19  ;;  %v2832_v5 = vmax.f32 %v4678_v49, %v2665_v60  ;;  %v4689_v47 = vld [vmem:[#allocation15_spill] sm:$0xff]  ;;  %v4690_v30 = vld [vmem:[#allocation16_spill] sm:$0xff]  ;;  %v4691_v11 = vld [vmem:[#allocation17_spill] sm:$0xff] }
 0x1a7   : > { %v2932_v32 = vadd.f32 %v4420_v62, %v2877_v31  ;;  %v3499_v20 = vpop.f32.mrf.mxu0  ;;  %v3595_v33 = vpop.f32.mrf.mxu1  ;;  %v4692_v49 = vld [vmem:[#allocation18_spill] sm:$0xff] }
 0x1a8   : > { %3030 = vst [vmem:[%s4430_s14 + $0xb8] sm:$0xff] %v2982_v10  ;;  %v2937_v50 = vadd.f32 %v4420_v62, %v2882_v48  ;;  %v2880_v51 = vmax.f32 %v2784_v4, %v2832_v5  ;;  %v2787_v61 = vmax.f32 %v4679_v21, %v3499_v20  ;;  %v2835_v34 = vmax.f32 %v4680_v63, %v3595_v33  ;;  %v4693_v21 = vld [vmem:[#allocation19_spill] sm:$0xff]  ;;  %v4694_v63 = vld [vmem:[#allocation20_spill] sm:$0xff] }
 0x1a9   : > { %v2980_v35 = vmax.f32 %v2932_v32, 0.0  ;;  %v2284_v55 = vpop.f32.mrf.mxu0  ;;  %v2668_v12 = vpop.f32.mrf.mxu1 }
 0x1aa   : > { %v2985_v13 = vmax.f32 %v2937_v50, 0.0  ;;  %v2935_v22 = vadd.f32 %v4420_v62, %v2880_v51  ;;  %v2883_v23 = vmax.f32 %v2787_v61, %v2835_v34  ;;  %v2785_v37 = vmax.f32 %v4681_v36, %v2284_v55 }
 0x1ab   : > { %3028 = vst [vmem:[%s4430_s14 + $0xa8] sm:$0xff] %v2980_v35  ;;  %v2833_v6 = vmax.f32 %v4682_v52, %v2668_v12  ;;  %v3502_v56 = vpop.f32.mrf.mxu0  ;;  %v3598_v7 = vpop.f32.mrf.mxu1 }
 0x1ac   : > { %3033 = vst [vmem:[%s4430_s14 + $0xd0] sm:$0xff] %v2985_v13  ;;  %v2983_v54 = vmax.f32 %v2935_v22, 0.0  ;;  %v2938_v38 = vadd.f32 %v4420_v62, %v2883_v23  ;;  %v2790_v14 = vmax.f32 %v4683_v39, %v3502_v56  ;;  %v2838_v15 = vmax.f32 %v4684_v24, %v3598_v7  ;;  %v4695_v23 = vld [vmem:[#allocation21_spill] sm:$0xff] }
 0x1ad   : > { %v2881_v25 = vmax.f32 %v2785_v37, %v2833_v6  ;;  %v2297_v58 = vpop.f32.mrf.mxu0  ;;  %v2681_v0 = vpop.f32.mrf.mxu1  ;;  %v4696_v37 = vld [vmem:[#allocation22_spill] sm:$0xff] }
 0x1ae   : > { %3031 = vst [vmem:[%s4430_s14 + $0xc0] sm:$0xff] %v2983_v54  ;;  %v2986_v40 = vmax.f32 %v2938_v38, 0.0  ;;  %v2886_v1 = vmax.f32 %v2790_v14, %v2838_v15  ;;  %v2788_v26 = vmax.f32 %v4685_v41, %v2297_v58  ;;  %v2836_v53 = vmax.f32 %v4686_v27, %v2681_v0  ;;  %v4697_v14 = vld [vmem:[#allocation23_spill] sm:$0xff]  ;;  %v4698_v15 = vld [vmem:[#allocation24_spill] sm:$0xff]  ;;  %v4699_v41 = vld [vmem:[#allocation25_spill] sm:$0xff] }
 0x1af   : > { %v2936_v42 = vadd.f32 %v4420_v62, %v2881_v25  ;;  %v3503_v43 = vpop.f32.mrf.mxu0  ;;  %v3599_v2 = vpop.f32.mrf.mxu1  ;;  %v4700_v27 = vld [vmem:[#allocation26_spill] sm:$0xff] }
 0x1b0   : > { %3034 = vst [vmem:[%s4430_s14 + $0xd8] sm:$0xff] %v2986_v40  ;;  %v2941_v3 = vadd.f32 %v4420_v62, %v2886_v1  ;;  %v2884_v16 = vmax.f32 %v2788_v26, %v2836_v53  ;;  %v2791_v28 = vmax.f32 %v4687_v8, %v3503_v43  ;;  %v2839_v45 = vmax.f32 %v4688_v44, %v3599_v2  ;;  %v4701_v8 = vld [vmem:[#allocation27_spill] sm:$0xff]  ;;  %v4702_v44 = vld [vmem:[#allocation28_spill] sm:$0xff] }
 0x1b1   : > { %v2984_v29 = vmax.f32 %v2936_v42, 0.0  ;;  %v2300_v17 = vpop.f32.mrf.mxu0  ;;  %v2684_v9 = vpop.f32.mrf.mxu1 }
 0x1b2   : > { %v2989_v57 = vmax.f32 %v2941_v3, 0.0  ;;  %v2939_v59 = vadd.f32 %v4420_v62, %v2884_v16  ;;  %v2887_v46 = vmax.f32 %v2791_v28, %v2839_v45  ;;  %v2789_v18 = vmax.f32 %v4689_v47, %v2300_v17 }
 0x1b3   : > { %3032 = vst [vmem:[%s4430_s14 + $0xc8] sm:$0xff] %v2984_v29  ;;  %v2837_v31 = vmax.f32 %v4690_v30, %v2684_v9  ;;  %v3506_v19 = vpop.f32.mrf.mxu0  ;;  %v3602_v60 = vpop.f32.mrf.mxu1 }
 0x1b4   : > { %3037 = vst [vmem:[%s4430_s14 + $0xf0] sm:$0xff] %v2989_v57  ;;  %v2987_v10 = vmax.f32 %v2939_v59, 0.0  ;;  %v2942_v48 = vadd.f32 %v4420_v62, %v2887_v46  ;;  %v2794_v4 = vmax.f32 %v4691_v11, %v3506_v19  ;;  %v2842_v5 = vmax.f32 %v4692_v49, %v3602_v60  ;;  %v4703_v46 = vld [vmem:[#allocation29_spill] sm:$0xff] }
 0x1b5   : > { %v2885_v32 = vmax.f32 %v2789_v18, %v2837_v31  ;;  %v2313_v20 = vpop.f32.mrf.mxu0  ;;  %v2697_v33 = vpop.f32.mrf.mxu1  ;;  %v4704_v18 = vld [vmem:[#allocation30_spill] sm:$0xff] }
 0x1b6   : > { %3035 = vst [vmem:[%s4430_s14 + $0xe0] sm:$0xff] %v2987_v10  ;;  %v2990_v50 = vmax.f32 %v2942_v48, 0.0  ;;  %v2890_v51 = vmax.f32 %v2794_v4, %v2842_v5  ;;  %v2792_v61 = vmax.f32 %v4693_v21, %v2313_v20  ;;  %v2840_v34 = vmax.f32 %v4694_v63, %v2697_v33  ;;  %v4705_v4 = vld [vmem:[#allocation31_spill] sm:$0xff]  ;;  %v4706_v5 = vld [vmem:[#allocation32_spill] sm:$0xff]  ;;  %v4707_v21 = vld [vmem:[#allocation33_spill] sm:$0xff] }
 0x1b7   : > { %v2940_v35 = vadd.f32 %v4420_v62, %v2885_v32  ;;  %v3507_v55 = vpop.f32.mrf.mxu0  ;;  %v3603_v12 = vpop.f32.mrf.mxu1  ;;  %v4708_v63 = vld [vmem:[#allocation34_spill] sm:$0xff] }
 0x1b8   : > { %3038 = vst [vmem:[%s4430_s14 + $0xf8] sm:$0xff] %v2990_v50  ;;  %v2945_v13 = vadd.f32 %v4420_v62, %v2890_v51  ;;  %v2888_v22 = vmax.f32 %v2792_v61, %v2840_v34  ;;  %v2795_v36 = vmax.f32 %v4695_v23, %v3507_v55  ;;  %v2843_v52 = vmax.f32 %v4696_v37, %v3603_v12  ;;  %v4709_v23 = vld [vmem:[#allocation35_spill] sm:$0xff]  ;;  %v4710_v37 = vld [vmem:[#allocation36_spill] sm:$0xff] }
 0x1b9   : > { %v2988_v6 = vmax.f32 %v2940_v35, 0.0  ;;  %v2316_v56 = vpop.f32.mrf.mxu0  ;;  %v2700_v7 = vpop.f32.mrf.mxu1 }
 0x1ba   : > { %v2993_v54 = vmax.f32 %v2945_v13, 0.0  ;;  %v2943_v38 = vadd.f32 %v4420_v62, %v2888_v22  ;;  %v2891_v39 = vmax.f32 %v2795_v36, %v2843_v52  ;;  %v2793_v24 = vmax.f32 %v4697_v14, %v2316_v56 }
 0x1bb   : > { %3036 = vst [vmem:[%s4430_s14 + $0xe8] sm:$0xff] %v2988_v6  ;;  %v2841_v25 = vmax.f32 %v4698_v15, %v2700_v7  ;;  %v3510_v58 = vpop.f32.mrf.mxu0  ;;  %v3606_v0 = vpop.f32.mrf.mxu1 }
 0x1bc   : > { %3041 = vst [vmem:[%s4430_s14 + $0x110] sm:$0xff] %v2993_v54  ;;  %v2991_v40 = vmax.f32 %v2943_v38, 0.0  ;;  %v2946_v1 = vadd.f32 %v4420_v62, %v2891_v39  ;;  %v2798_v26 = vmax.f32 %v4699_v41, %v3510_v58  ;;  %v2846_v53 = vmax.f32 %v4700_v27, %v3606_v0  ;;  %v4711_v39 = vld [vmem:[#allocation37_spill] sm:$0xff] }
 0x1bd   : > { %v2889_v42 = vmax.f32 %v2793_v24, %v2841_v25  ;;  %v2329_v43 = vpop.f32.mrf.mxu0  ;;  %v2713_v2 = vpop.f32.mrf.mxu1  ;;  %v4712_v24 = vld [vmem:[#allocation38_spill] sm:$0xff] }
 0x1be   : > { %3039 = vst [vmem:[%s4430_s14 + $0x100] sm:$0xff] %v2991_v40  ;;  %v2994_v3 = vmax.f32 %v2946_v1, 0.0  ;;  %v2894_v16 = vmax.f32 %v2798_v26, %v2846_v53  ;;  %v2796_v28 = vmax.f32 %v4701_v8, %v2329_v43  ;;  %v2844_v45 = vmax.f32 %v4702_v44, %v2713_v2  ;;  %v4713_v26 = vld [vmem:[#allocation39_spill] sm:$0xff]  ;;  %v4714_v53 = vld [vmem:[#allocation40_spill] sm:$0xff]  ;;  %v4715_v8 = vld [vmem:[#allocation41_spill] sm:$0xff] }
 0x1bf   : > { %v2944_v29 = vadd.f32 %v4420_v62, %v2889_v42  ;;  %v3511_v17 = vpop.f32.mrf.mxu0  ;;  %v3607_v9 = vpop.f32.mrf.mxu1  ;;  %v4716_v44 = vld [vmem:[#allocation42_spill] sm:$0xff] }
 0x1c0   : > { %3042 = vst [vmem:[%s4430_s14 + $0x118] sm:$0xff] %v2994_v3  ;;  %v2949_v57 = vadd.f32 %v4420_v62, %v2894_v16  ;;  %v2892_v59 = vmax.f32 %v2796_v28, %v2844_v45  ;;  %v2799_v47 = vmax.f32 %v4703_v46, %v3511_v17  ;;  %v2847_v30 = vmax.f32 %v4704_v18, %v3607_v9  ;;  %v4717_v46 = vld [vmem:[#allocation43_spill] sm:$0xff]  ;;  %v4718_v18 = vld [vmem:[#allocation44_spill] sm:$0xff] }
 0x1c1   : > { %v2992_v31 = vmax.f32 %v2944_v29, 0.0  ;;  %v2332_v19 = vpop.f32.mrf.mxu0  ;;  %v2716_v60 = vpop.f32.mrf.mxu1 }
 0x1c2   : > { %v2997_v10 = vmax.f32 %v2949_v57, 0.0  ;;  %v2947_v48 = vadd.f32 %v4420_v62, %v2892_v59  ;;  %v2895_v11 = vmax.f32 %v2799_v47, %v2847_v30  ;;  %v2797_v49 = vmax.f32 %v4705_v4, %v2332_v19 }
 0x1c3   : > { %3040 = vst [vmem:[%s4430_s14 + $0x108] sm:$0xff] %v2992_v31  ;;  %v2845_v32 = vmax.f32 %v4706_v5, %v2716_v60  ;;  %v3514_v20 = vpop.f32.mrf.mxu0  ;;  %v3610_v33 = vpop.f32.mrf.mxu1 }
 0x1c4   : > { %3045 = vst [vmem:[%s4430_s14 + $0x130] sm:$0xff] %v2997_v10  ;;  %v2995_v50 = vmax.f32 %v2947_v48, 0.0  ;;  %v2950_v51 = vadd.f32 %v4420_v62, %v2895_v11  ;;  %v2802_v61 = vmax.f32 %v4707_v21, %v3514_v20  ;;  %v2850_v34 = vmax.f32 %v4708_v63, %v3610_v33  ;;  %v4719_v11 = vld [vmem:[#allocation45_spill] sm:$0xff] }
 0x1c5   : > { %v2893_v35 = vmax.f32 %v2797_v49, %v2845_v32  ;;  %v2345_v55 = vpop.f32.mrf.mxu0  ;;  %v2729_v12 = vpop.f32.mrf.mxu1  ;;  %v4720_v49 = vld [vmem:[#allocation46_spill] sm:$0xff] }
 0x1c6   : > { %3043 = vst [vmem:[%s4430_s14 + $0x120] sm:$0xff] %v2995_v50  ;;  %v2998_v13 = vmax.f32 %v2950_v51, 0.0  ;;  %v2898_v22 = vmax.f32 %v2802_v61, %v2850_v34  ;;  %v2800_v36 = vmax.f32 %v4709_v23, %v2345_v55  ;;  %v2848_v52 = vmax.f32 %v4710_v37, %v2729_v12  ;;  %v4721_v61 = vld [vmem:[#allocation47_spill] sm:$0xff]  ;;  %v4722_v34 = vld [vmem:[#allocation48_spill] sm:$0xff] }
 0x1c7   : > { %v2948_v6 = vadd.f32 %v4420_v62, %v2893_v35  ;;  %v3515_v56 = vpop.f32.mrf.mxu0  ;;  %v3611_v7 = vpop.f32.mrf.mxu1 }
 0x1c8   : > { %3046 = vst [vmem:[%s4430_s14 + $0x138] sm:$0xff] %v2998_v13  ;;  %v2953_v54 = vadd.f32 %v4420_v62, %v2898_v22  ;;  %v2896_v38 = vmax.f32 %v2800_v36, %v2848_v52  ;;  %v2803_v14 = vmax.f32 %v4711_v39, %v3515_v56  ;;  %v2851_v15 = vmax.f32 %v4712_v24, %v3611_v7 }
 0x1c9   : > { %v2996_v25 = vmax.f32 %v2948_v6, 0.0  ;;  %v2348_v58 = vpop.f32.mrf.mxu0  ;;  %v2732_v0 = vpop.f32.mrf.mxu1 }
 0x1ca   : > { %v3001_v40 = vmax.f32 %v2953_v54, 0.0  ;;  %v2951_v1 = vadd.f32 %v4420_v62, %v2896_v38  ;;  %v2899_v41 = vmax.f32 %v2803_v14, %v2851_v15  ;;  %v2801_v27 = vmax.f32 %v4713_v26, %v2348_v58 }
 0x1cb   : > { %3044 = vst [vmem:[%s4430_s14 + $0x128] sm:$0xff] %v2996_v25  ;;  %v2849_v42 = vmax.f32 %v4714_v53, %v2732_v0  ;;  %v3518_v43 = vpop.f32.mrf.mxu0  ;;  %v3614_v2 = vpop.f32.mrf.mxu1 }
 0x1cc   : > { %3049 = vst [vmem:[%s4430_s14 + $0x150] sm:$0xff] %v3001_v40  ;;  %v2999_v3 = vmax.f32 %v2951_v1, 0.0  ;;  %v2954_v16 = vadd.f32 %v4420_v62, %v2899_v41  ;;  %v2806_v28 = vmax.f32 %v4715_v8, %v3518_v43  ;;  %v2854_v45 = vmax.f32 %v4716_v44, %v3614_v2 }
 0x1cd   : > { %v2897_v29 = vmax.f32 %v2801_v27, %v2849_v42  ;;  %v2361_v17 = vpop.f32.mrf.mxu0  ;;  %v2745_v9 = vpop.f32.mrf.mxu1 }
 0x1ce   : > { %3047 = vst [vmem:[%s4430_s14 + $0x140] sm:$0xff] %v2999_v3  ;;  %v3002_v57 = vmax.f32 %v2954_v16, 0.0  ;;  %v2902_v59 = vmax.f32 %v2806_v28, %v2854_v45  ;;  %v2804_v47 = vmax.f32 %v4717_v46, %v2361_v17  ;;  %v2852_v30 = vmax.f32 %v4718_v18, %v2745_v9 }
 0x1cf   : > { %v2952_v31 = vadd.f32 %v4420_v62, %v2897_v29  ;;  %v3519_v19 = vpop.f32.mrf.mxu0  ;;  %v3615_v60 = vpop.f32.mrf.mxu1 }
 0x1d0   : > { %3050 = vst [vmem:[%s4430_s14 + $0x158] sm:$0xff] %v3002_v57  ;;  %v2957_v10 = vadd.f32 %v4420_v62, %v2902_v59  ;;  %v2900_v48 = vmax.f32 %v2804_v47, %v2852_v30  ;;  %v2807_v4 = vmax.f32 %v4719_v11, %v3519_v19  ;;  %v2855_v5 = vmax.f32 %v4720_v49, %v3615_v60 }
 0x1d1   : > { %v3000_v32 = vmax.f32 %v2952_v31, 0.0  ;;  %v2364_v20 = vpop.f32.mrf.mxu0  ;;  %v2748_v33 = vpop.f32.mrf.mxu1 }
 0x1d2   : > { %v3005_v50 = vmax.f32 %v2957_v10, 0.0  ;;  %v2955_v51 = vadd.f32 %v4420_v62, %v2900_v48  ;;  %v2903_v21 = vmax.f32 %v2807_v4, %v2855_v5  ;;  %v2805_v63 = vmax.f32 %v4721_v61, %v2364_v20 }
 0x1d3   : > { %3048 = vst [vmem:[%s4430_s14 + $0x148] sm:$0xff] %v3000_v32  ;;  %v2853_v35 = vmax.f32 %v4722_v34, %v2748_v33 }
 0x1d4   : > { %3053 = vst [vmem:[%s4430_s14 + $0x170] sm:$0xff] %v3005_v50  ;;  %v3003_v55 = vmax.f32 %v2955_v51, 0.0  ;;  %v2958_v12 = vadd.f32 %v4420_v62, %v2903_v21 }
 0x1d5   : > { %v2901_v13 = vmax.f32 %v2805_v63, %v2853_v35 }
 0x1d6   : > { %3051 = vst [vmem:[%s4430_s14 + $0x160] sm:$0xff] %v3003_v55  ;;  %v3006_v22 = vmax.f32 %v2958_v12, 0.0 }
 0x1d7   : > { %v2956_v23 = vadd.f32 %v4420_v62, %v2901_v13 }
 0x1d8   : > { %3054 = vst [vmem:[%s4430_s14 + $0x178] sm:$0xff] %v3006_v22 }
 0x1d9   : > { %v3004_v36 = vmax.f32 %v2956_v23, 0.0 }
 0x1db   : > { %3052 = vst [vmem:[%s4430_s14 + $0x168] sm:$0xff] %v3004_v36 }
 0x1dc PF: > { %p10_p9 = scmp.ge.s32.totalorder %s3805_s16, 8   ;;  %s4723_s12 = smov %s3762_s13 }
 0x1dd   : > { %s4724_s13 = smov %s3814_s19  ;;  %s4725_s14 = smov %s3805_s16 }
 0x1de   :  { %12 = sbr.rel (!%p10_p9) target bundleno = 2 (0x2), region = 108 }

// kernel: crnn_forward.4
= control target key start
LH: loop header
LB: loop body
LE: loop exit
PB: predicated region body
PF: predicated region fallthrough
CT: control target
= control target key end

     0   :  { %v3929_v0 = vmov 0   ;;  %vm1687_vm0 = vcmask 130048   ;;  %s5399_s1 = inlined_call_operand.vmem [shape: bf16[400,128], index: 1, kind: input, shape index: {}]   ;;  %s5400_s0 = inlined_call_operand.vmem [shape: bf16[4,256,400], index: 0, kind: input, shape index: {}]   ;;  %s5401_s2 = inlined_call_operand.vmem [shape: f32[1,128], index: 2, kind: input, shape index: {}]   ;;  %s5402_s3 = inlined_call_operand.vmem [shape: f32[256,128], index: 3, kind: output, shape index: {}]  }
   0x1   :  { %1880 = vmatprep.subr.bf16.mxu0 %v3929_v0  ;;  %v3520_v1 = vld [vmem:[%s5399_s1 + $0x38] sm:$0xff]   ;;  %2425 = vmatprep.subr.bf16.mxu1 %v3929_v0  ;;  %v3521_v2 = vld [vmem:[%s5399_s1 + $0x30] sm:$0xff]   ;;  %v3522_v3 = vld [vmem:[%s5399_s1 + $0x28] sm:$0xff]  }
   0x2   :  { %1881 = vmatpush1.bf16.msra.mxu0 %v3520_v1  ;;  %v3526_v4 = vld [vmem:[%s5399_s1 + $0xb8] sm:$0xff]   ;;  %v3528_v5 = vld [vmem:[%s5399_s1 + $0xb0] sm:$0xff]   ;;  %v3523_v6 = vld [vmem:[%s5399_s1 + $0x20] sm:$0xff]  }
   0x3   :  { %1882 = vmatprep.subr.bf16.mxu0 %v3929_v0  ;;  %2426 = vmatpush1.bf16.msra.mxu1 %v3526_v4  ;;  %v3530_v7 = vld [vmem:[%s5399_s1 + $0xa8] sm:$0xff]   ;;  %v3524_v8 = vld [vmem:[%s5399_s1 + $0x18] sm:$0xff]   ;;  %v3532_v9 = vld [vmem:[%s5399_s1 + $0xa0] sm:$0xff]  }
   0x4   :  { %2427 = vmatprep.subr.bf16.mxu1 %v3929_v0  ;;  %v3525_v10 = vld [vmem:[%s5399_s1 + $0x10] sm:$0xff]   ;;  %v3534_v11 = vld [vmem:[%s5399_s1 + $0x98] sm:$0xff]   ;;  %v3527_v12 = vld [vmem:[%s5399_s1 + $0x8] sm:$0xff]  }
   0x5   :  { %v3536_v13 = vld [vmem:[%s5399_s1 + $0x90] sm:$0xff]   ;;  %v3546_v14 = vld [vmem:[%s5400_s0 + $0xc] ss:$16 sps:$4 sm:$0xff]   ;;  %v3529_v15 = vld [vmem:[%s5399_s1] sm:$0xff]  }
   0x6   :  { %1883 = vmatpush1.bf16.msra.mxu0 %v3521_v2  ;;  %3454 = vmatprep.mubr.msk.bf16.mxu1 %vm1687_vm0, %v3546_v14  ;;  %v3550_v16 = vld [vmem:[%s5400_s0 + $0x4] ss:$16 sps:$4 sm:$0xff]   ;;  %v3538_v17 = vld [vmem:[%s5399_s1 + $0x88] sm:$0xff]   ;;  %v3531_v18 = vld [vmem:[%s5399_s1 + $0x78] sm:$0xff]  }
   0x7   :  { %1884 = vmatprep.subr.bf16.mxu0 %v3929_v0  ;;  %2428 = vmatpush1.bf16.msra.mxu1 %v3528_v5  ;;  %v3540_v19 = vld [vmem:[%s5399_s1 + $0x80] sm:$0xff]   ;;  %v3533_v20 = vld [vmem:[%s5399_s1 + $0x70] sm:$0xff]   ;;  %v3535_v22 = vld [vmem:[%s5399_s1 + $0x68] sm:$0xff]  }
   0x8   :  { %2429 = vmatprep.subr.bf16.mxu1 %v3929_v0  ;;  %1912 = vmatprep.mubr.bf16.mxu0 %v3550_v16  ;;  %v3542_v21 = vld [vmem:[%s5399_s1 + $0xc0] sm:$0xff]   ;;  %v3544_v23 = vld [vmem:[%s5400_s0 + $0x8] ss:$16 sps:$4 sm:$0xff]   ;;  %v3551_v24 = vld [vmem:[%s5400_s0 + $0x2c] ss:$16 sps:$4 sm:$0xff]  }
   0x9   :  { %v3537_v25 = vld [vmem:[%s5399_s1 + $0x60] sm:$0xff]   ;;  %v3539_v26 = vld [vmem:[%s5399_s1 + $0x58] sm:$0xff]   ;;  %v3541_v29 = vld [vmem:[%s5399_s1 + $0x50] sm:$0xff]  }
   0xa   :  { %1885 = vmatpush1.bf16.msra.mxu0 %v3522_v3  ;;  %v3553_v27 = vld [vmem:[%s5400_s0 + $0x28] ss:$16 sps:$4 sm:$0xff]   ;;  %v3557_v28 = vld [vmem:[%s5400_s0 + $0x4c] ss:$16 sps:$4 sm:$0xff]   ;;  %v3547_v33 = vld [vmem:[%s5399_s1 + $0x40] sm:$0xff]  }
   0xb   :  { %1886 = vmatprep.subr.bf16.mxu0 %v3929_v0  ;;  %2430 = vmatpush1.bf16.msra.mxu1 %v3530_v7  ;;  %v3543_v30 = vld [vmem:[%s5399_s1 + $0x48] sm:$0xff]   ;;  %v3548_v34 = vld [vmem:[%s5400_s0] ss:$16 sps:$4 sm:$0xff]   ;;  %v3554_v35 = vld [vmem:[%s5400_s0 + $0x24] ss:$16 sps:$4 sm:$0xff]  }
   0xc   :  { %2431 = vmatprep.subr.bf16.mxu1 %v3929_v0  ;;  %v3559_v31 = vld [vmem:[%s5400_s0 + $0x48] ss:$16 sps:$4 sm:$0xff]   ;;  %v3563_v32 = vld [vmem:[%s5400_s0 + $0x6c] ss:$16 sps:$4 sm:$0xff]   ;;  %v3556_v38 = vld [vmem:[%s5400_s0 + $0x20] ss:$16 sps:$4 sm:$0xff]  }
   0xd   :  { %v3565_v36 = vld [vmem:[%s5400_s0 + $0x68] ss:$16 sps:$4 sm:$0xff]   ;;  %v3569_v37 = vld [vmem:[%s5400_s0 + $0x8c] ss:$16 sps:$4 sm:$0xff]   ;;  %v3560_v39 = vld [vmem:[%s5400_s0 + $0x44] ss:$16 sps:$4 sm:$0xff]  }
   0xe   :  { %1887 = vmatpush1.bf16.msra.mxu0 %v3523_v6  ;;  %v3571_v40 = vld [vmem:[%s5400_s0 + $0x88] ss:$16 sps:$4 sm:$0xff]   ;;  %v3575_v41 = vld [vmem:[%s5400_s0 + $0xac] ss:$16 sps:$4 sm:$0xff]   ;;  %v3562_v42 = vld [vmem:[%s5400_s0 + $0x40] ss:$16 sps:$4 sm:$0xff]  }
   0xf   :  { %1888 = vmatprep.subr.bf16.mxu0 %v3929_v0  ;;  %2432 = vmatpush1.bf16.msra.mxu1 %v3532_v9  ;;  %v3566_v43 = vld [vmem:[%s5400_s0 + $0x64] ss:$16 sps:$4 sm:$0xff]   ;;  %v3577_v44 = vld [vmem:[%s5400_s0 + $0xa8] ss:$16 sps:$4 sm:$0xff]   ;;  %v3581_v45 = vld [vmem:[%s5400_s0 + $0xcc] ss:$16 sps:$4 sm:$0xff]  }
  0x10   :  { %2433 = vmatprep.subr.bf16.mxu1 %v3929_v0  ;;  %v3568_v46 = vld [vmem:[%s5400_s0 + $0x60] ss:$16 sps:$4 sm:$0xff]   ;;  %v3572_v47 = vld [vmem:[%s5400_s0 + $0x84] ss:$16 sps:$4 sm:$0xff]   ;;  %v3583_v48 = vld [vmem:[%s5400_s0 + $0xc8] ss:$16 sps:$4 sm:$0xff]  }
  0x11   :  { %v3587_v49 = vld [vmem:[%s5400_s0 + $0xec] ss:$16 sps:$4 sm:$0xff]   ;;  %v3574_v50 = vld [vmem:[%s5400_s0 + $0x80] ss:$16 sps:$4 sm:$0xff]   ;;  %v3578_v51 = vld [vmem:[%s5400_s0 + $0xa4] ss:$16 sps:$4 sm:$0xff]  }
  0x12   :  { %1889 = vmatpush1.bf16.msra.mxu0 %v3524_v8  ;;  %v3589_v52 = vld [vmem:[%s5400_s0 + $0xe8] ss:$16 sps:$4 sm:$0xff]   ;;  %v3593_v53 = vld [vmem:[%s5400_s0 + $0x10c] ss:$16 sps:$4 sm:$0xff]   ;;  %v3580_v54 = vld [vmem:[%s5400_s0 + $0xa0] ss:$16 sps:$4 sm:$0xff]  }
  0x13   :  { %1890 = vmatprep.subr.bf16.mxu0 %v3929_v0  ;;  %2434 = vmatpush1.bf16.msra.mxu1 %v3534_v11  ;;  %v3584_v55 = vld [vmem:[%s5400_s0 + $0xc4] ss:$16 sps:$4 sm:$0xff]   ;;  %v3595_v56 = vld [vmem:[%s5400_s0 + $0x108] ss:$16 sps:$4 sm:$0xff]   ;;  %v3599_v57 = vld [vmem:[%s5400_s0 + $0x12c] ss:$16 sps:$4 sm:$0xff]  }
  0x14   :  { %2435 = vmatprep.subr.bf16.mxu1 %v3929_v0  ;;  %v3586_v58 = vld [vmem:[%s5400_s0 + $0xc0] ss:$16 sps:$4 sm:$0xff]   ;;  %v3590_v59 = vld [vmem:[%s5400_s0 + $0xe4] ss:$16 sps:$4 sm:$0xff]   ;;  %v3601_v60 = vld [vmem:[%s5400_s0 + $0x128] ss:$16 sps:$4 sm:$0xff]  }
  0x15   :  { %v3605_v61 = vld [vmem:[%s5400_s0 + $0x14c] ss:$16 sps:$4 sm:$0xff]   ;;  %v3592_v62 = vld [vmem:[%s5400_s0 + $0xe0] ss:$16 sps:$4 sm:$0xff]   ;;  %v3596_v63 = vld [vmem:[%s5400_s0 + $0x104] ss:$16 sps:$4 sm:$0xff]  }
  0x16   :  { %1891 = vmatpush1.bf16.msra.mxu0 %v3525_v10  ;;  %v3611_v1 = vld [vmem:[%s5400_s0 + $0x16c] ss:$16 sps:$4 sm:$0xff]   ;;  %v3598_v2 = vld [vmem:[%s5400_s0 + $0x100] ss:$16 sps:$4 sm:$0xff]   ;;  %v3602_v3 = vld [vmem:[%s5400_s0 + $0x124] ss:$16 sps:$4 sm:$0xff]  }
  0x17   :  { %1892 = vmatprep.subr.bf16.mxu0 %v3929_v0  ;;  %2436 = vmatpush1.bf16.msra.mxu1 %v3536_v13  ;;  %v3613_v4 = vld [vmem:[%s5400_s0 + $0x168] ss:$16 sps:$4 sm:$0xff]   ;;  %v3617_v5 = vld [vmem:[%s5400_s0 + $0x18c] ss:$16 sps:$4 sm:$0xff]   ;;  %v3604_v6 = vld [vmem:[%s5400_s0 + $0x120] ss:$16 sps:$4 sm:$0xff]  }
  0x18   :  { %2437 = vmatprep.subr.bf16.mxu1 %v3929_v0  ;;  %v3608_v7 = vld [vmem:[%s5400_s0 + $0x144] ss:$16 sps:$4 sm:$0xff]   ;;  %v3619_v8 = vld [vmem:[%s5400_s0 + $0x188] ss:$16 sps:$4 sm:$0xff]   ;;  %v3623_v9 = vld [vmem:[%s5400_s0 + $0x1ac] ss:$16 sps:$4 sm:$0xff]  }
  0x19   :  { %v3610_v10 = vld [vmem:[%s5400_s0 + $0x140] ss:$16 sps:$4 sm:$0xff]   ;;  %v3614_v11 = vld [vmem:[%s5400_s0 + $0x164] ss:$16 sps:$4 sm:$0xff]   ;;  %v3629_v13 = vld [vmem:[%s5400_s0 + $0x1cc] ss:$16 sps:$4 sm:$0xff]  }
  0x1a   :  { %1893 = vmatpush1.bf16.msra.mxu0 %v3527_v12  ;;  %v3625_v12 = vld [vmem:[%s5400_s0 + $0x1a8] ss:$16 sps:$4 sm:$0xff]   ;;  %v3616_v14 = vld [vmem:[%s5400_s0 + $0x160] ss:$16 sps:$4 sm:$0xff]  }
  0x1b   :  { %1894 = vmatprep.subr.bf16.mxu0 %v3929_v0  ;;  %2438 = vmatpush1.bf16.msra.mxu1 %v3538_v17  ;;  %v3631_v16 = vld [vmem:[%s5400_s0 + $0x1c8] ss:$16 sps:$4 sm:$0xff]   ;;  %v3635_v17 = vld [vmem:[%s5400_s0 + $0x1ec] ss:$16 sps:$4 sm:$0xff]  }
  0x1c   :  { %2439 = vmatprep.subr.bf16.mxu1 %v3929_v0 }
  0x1e   :  { %1895 = vmatpush1.bf16.msra.mxu0 %v3529_v15  ;;  %v3620_v15 = vld [vmem:[%s5400_s0 + $0x184] ss:$16 sps:$4 sm:$0xff]  }
  0x1f   :  { %1896 = vmatprep.subr.bf16.mxu0 %v3929_v0  ;;  %2440 = vmatpush1.bf16.msra.mxu1 %v3540_v19  ;;  %v3626_v19 = vld [vmem:[%s5400_s0 + $0x1a4] ss:$16 sps:$4 sm:$0xff]  }
  0x20   :  { %2455 = vmatprep.subr.bf16.mxu1 %v3929_v0 }
  0x22   :  { %1897 = vmatpush2.bf16.msra.mxu0 %v3531_v18  ;;  %v3622_v18 = vld [vmem:[%s5400_s0 + $0x180] ss:$16 sps:$4 sm:$0xff]  }
  0x23   :  { %1898 = vmatprep.subr.bf16.mxu0 %v3929_v0  ;;  %2456 = vmatpush2.bf16.msra.mxu1 %v3542_v21  ;;  %v3641_v21 = vld [vmem:[%s5400_s0 + $0x20c] ss:$16 sps:$4 sm:$0xff]  }
  0x26   :  { %1899 = vmatpush2.bf16.msra.mxu0 %v3533_v20  ;;  %2458 = vmatmul.mubr.bf16.vlgmr.msra.gmra.mxu1 %v3544_v23  ;;  %v3637_v20 = vld [vmem:[%s5400_s0 + $0x1e8] ss:$16 sps:$4 sm:$0xff]   ;;  %v3632_v23 = vld [vmem:[%s5400_s0 + $0x1c4] ss:$16 sps:$4 sm:$0xff]  }
  0x27   :  { %1900 = vmatprep.subr.bf16.mxu0 %v3929_v0  ;;  %3455 = vmatprep.mubr.msk.bf16.mxu1 %vm1687_vm0, %v3551_v24  ;;  %v3643_v24 = vld [vmem:[%s5400_s0 + $0x208] ss:$16 sps:$4 sm:$0xff]  }
  0x2a   :  { %1901 = vmatpush2.bf16.msra.mxu0 %v3535_v22  ;;  %v3628_v22 = vld [vmem:[%s5400_s0 + $0x1a0] ss:$16 sps:$4 sm:$0xff]  }
  0x2b   :  { %1902 = vmatprep.subr.bf16.mxu0 %v3929_v0 }
  0x2e   :  { %1903 = vmatpush2.bf16.msra.mxu0 %v3537_v25  ;;  %2466 = vmatmul.mubr.bf16.gmra.mxu1 %v3553_v27  ;;  %v3647_v25 = vld [vmem:[%s5400_s0 + $0x22c] ss:$16 sps:$4 sm:$0xff]   ;;  %v3638_v27 = vld [vmem:[%s5400_s0 + $0x1e4] ss:$16 sps:$4 sm:$0xff]  }
  0x2f   :  { %1904 = vmatprep.subr.bf16.mxu0 %v3929_v0  ;;  %3456 = vmatprep.mubr.msk.bf16.mxu1 %vm1687_vm0, %v3557_v28  ;;  %v3649_v28 = vld [vmem:[%s5400_s0 + $0x228] ss:$16 sps:$4 sm:$0xff]  }
  0x32   :  { %1905 = vmatpush2.bf16.msra.mxu0 %v3539_v26  ;;  %v3634_v26 = vld [vmem:[%s5400_s0 + $0x1c0] ss:$16 sps:$4 sm:$0xff]  }
  0x33   :  { %1906 = vmatprep.subr.bf16.mxu0 %v3929_v0 }
  0x36   :  { %1907 = vmatpush2.bf16.msra.mxu0 %v3541_v29  ;;  %2474 = vmatmul.mubr.bf16.gmra.mxu1 %v3559_v31  ;;  %v3653_v29 = vld [vmem:[%s5400_s0 + $0x24c] ss:$16 sps:$4 sm:$0xff]   ;;  %v3644_v31 = vld [vmem:[%s5400_s0 + $0x204] ss:$16 sps:$4 sm:$0xff]  }
  0x37   :  { %1908 = vmatprep.subr.bf16.mxu0 %v3929_v0  ;;  %3457 = vmatprep.mubr.msk.bf16.mxu1 %vm1687_vm0, %v3563_v32  ;;  %v3655_v32 = vld [vmem:[%s5400_s0 + $0x248] ss:$16 sps:$4 sm:$0xff]  }
  0x3a   :  { %1909 = vmatpush2.bf16.msra.mxu0 %v3543_v30  ;;  %v3640_v30 = vld [vmem:[%s5400_s0 + $0x1e0] ss:$16 sps:$4 sm:$0xff]  }
  0x3b   :  { %1910 = vmatprep.subr.bf16.mxu0 %v3929_v0  ;;  %v3607_v0 = vld [vmem:[%s5400_s0 + $0x148] ss:$16 sps:$4 sm:$0xff]  }
  0x3e   :  { %1911 = vmatpush2.bf16.msra.mxu0 %v3547_v33  ;;  %2482 = vmatmul.mubr.bf16.gmra.mxu1 %v3565_v36  ;;  %v3659_v33 = vld [vmem:[%s5400_s0 + $0x26c] ss:$16 sps:$4 sm:$0xff]   ;;  %v3661_v36 = vld [vmem:[%s5400_s0 + $0x268] ss:$16 sps:$4 sm:$0xff]  }
  0x3f   :  { %3458 = vmatprep.mubr.msk.bf16.mxu1 %vm1687_vm0, %v3569_v37  ;;  %v3665_v37 = vld [vmem:[%s5400_s0 + $0x28c] ss:$16 sps:$4 sm:$0xff]  }
  0x41   :  { %1913 = vmatmul.mubr.bf16.vlgmr.msra.gmra.mxu0 %v3548_v34  ;;  %v3646_v34 = vld [vmem:[%s5400_s0 + $0x200] ss:$16 sps:$4 sm:$0xff]  }
  0x42   :  { %1920 = vmatprep.mubr.bf16.mxu0 %v3554_v35  ;;  %v3650_v35 = vld [vmem:[%s5400_s0 + $0x224] ss:$16 sps:$4 sm:$0xff]  }
  0x46   :  { %2490 = vmatmul.mubr.bf16.gmra.mxu1 %v3571_v40  ;;  %v3667_v40 = vld [vmem:[%s5400_s0 + $0x288] ss:$16 sps:$4 sm:$0xff]  }
  0x47   :  { %3459 = vmatprep.mubr.msk.bf16.mxu1 %vm1687_vm0, %v3575_v41  ;;  %v3671_v41 = vld [vmem:[%s5400_s0 + $0x2ac] ss:$16 sps:$4 sm:$0xff]  }
  0x49   :  { %1921 = vmatmul.mubr.bf16.gmra.mxu0 %v3556_v38  ;;  %v3652_v38 = vld [vmem:[%s5400_s0 + $0x220] ss:$16 sps:$4 sm:$0xff]  }
  0x4a   :  { %1928 = vmatprep.mubr.bf16.mxu0 %v3560_v39  ;;  %v3656_v39 = vld [vmem:[%s5400_s0 + $0x244] ss:$16 sps:$4 sm:$0xff]  }
  0x4e   :  { %2498 = vmatmul.mubr.bf16.gmra.mxu1 %v3577_v44  ;;  %v3673_v44 = vld [vmem:[%s5400_s0 + $0x2a8] ss:$16 sps:$4 sm:$0xff]  }
  0x4f   :  { %3460 = vmatprep.mubr.msk.bf16.mxu1 %vm1687_vm0, %v3581_v45  ;;  %v3677_v45 = vld [vmem:[%s5400_s0 + $0x2cc] ss:$16 sps:$4 sm:$0xff]  }
  0x51   :  { %1929 = vmatmul.mubr.bf16.gmra.mxu0 %v3562_v42  ;;  %v3658_v42 = vld [vmem:[%s5400_s0 + $0x240] ss:$16 sps:$4 sm:$0xff]  }
  0x52   :  { %1936 = vmatprep.mubr.bf16.mxu0 %v3566_v43  ;;  %v3662_v43 = vld [vmem:[%s5400_s0 + $0x264] ss:$16 sps:$4 sm:$0xff]  }
  0x56   :  { %2506 = vmatmul.mubr.bf16.gmra.mxu1 %v3583_v48  ;;  %v3679_v48 = vld [vmem:[%s5400_s0 + $0x2c8] ss:$16 sps:$4 sm:$0xff]  }
  0x57   :  { %3461 = vmatprep.mubr.msk.bf16.mxu1 %vm1687_vm0, %v3587_v49  ;;  %v3683_v49 = vld [vmem:[%s5400_s0 + $0x2ec] ss:$16 sps:$4 sm:$0xff]  }
  0x59   :  { %1937 = vmatmul.mubr.bf16.gmra.mxu0 %v3568_v46  ;;  %v3664_v46 = vld [vmem:[%s5400_s0 + $0x260] ss:$16 sps:$4 sm:$0xff]  }
  0x5a   :  { %1944 = vmatprep.mubr.bf16.mxu0 %v3572_v47  ;;  %v3668_v47 = vld [vmem:[%s5400_s0 + $0x284] ss:$16 sps:$4 sm:$0xff]  }
  0x5e   :  { %2514 = vmatmul.mubr.bf16.gmra.mxu1 %v3589_v52  ;;  %v3685_v52 = vld [vmem:[%s5400_s0 + $0x2e8] ss:$16 sps:$4 sm:$0xff]  }
  0x5f   :  { %3462 = vmatprep.mubr.msk.bf16.mxu1 %vm1687_vm0, %v3593_v53  ;;  %v3689_v53 = vld [vmem:[%s5400_s0 + $0x30c] ss:$16 sps:$4 sm:$0xff]  }
  0x61   :  { %1945 = vmatmul.mubr.bf16.gmra.mxu0 %v3574_v50  ;;  %v3670_v50 = vld [vmem:[%s5400_s0 + $0x280] ss:$16 sps:$4 sm:$0xff]  }
  0x62   :  { %1952 = vmatprep.mubr.bf16.mxu0 %v3578_v51  ;;  %v3674_v51 = vld [vmem:[%s5400_s0 + $0x2a4] ss:$16 sps:$4 sm:$0xff]  }
  0x66   :  { %2522 = vmatmul.mubr.bf16.gmra.mxu1 %v3595_v56  ;;  %v3691_v56 = vld [vmem:[%s5400_s0 + $0x308] ss:$16 sps:$4 sm:$0xff]  }
  0x67   :  { %3463 = vmatprep.mubr.msk.bf16.mxu1 %vm1687_vm0, %v3599_v57  ;;  %v3695_v57 = vld [vmem:[%s5400_s0 + $0x32c] ss:$16 sps:$4 sm:$0xff]  }
  0x69   :  { %1953 = vmatmul.mubr.bf16.gmra.mxu0 %v3580_v54  ;;  %v3676_v54 = vld [vmem:[%s5400_s0 + $0x2a0] ss:$16 sps:$4 sm:$0xff]  }
  0x6a   :  { %1960 = vmatprep.mubr.bf16.mxu0 %v3584_v55  ;;  %v3680_v55 = vld [vmem:[%s5400_s0 + $0x2c4] ss:$16 sps:$4 sm:$0xff]  }
  0x6e   :  { %2530 = vmatmul.mubr.bf16.gmra.mxu1 %v3601_v60 }
  0x6f   :  { %3464 = vmatprep.mubr.msk.bf16.mxu1 %vm1687_vm0, %v3605_v61  ;;  %v3686_v61 = vld [vmem:[%s5400_s0 + $0x2e4] ss:$16 sps:$4 sm:$0xff]  }
  0x71   :  { %1961 = vmatmul.mubr.bf16.gmra.mxu0 %v3586_v58 }
  0x72   :  { %1968 = vmatprep.mubr.bf16.mxu0 %v3590_v59  ;;  %v3682_v59 = vld [vmem:[%s5400_s0 + $0x2c0] ss:$16 sps:$4 sm:$0xff]  }
  0x76   :  { %2538 = vmatmul.mubr.bf16.gmra.mxu1 %v3607_v0  ;;  %v3701_v0 = vld [vmem:[%s5400_s0 + $0x34c] ss:$16 sps:$4 sm:$0xff]  }
  0x77   :  { %3465 = vmatprep.mubr.msk.bf16.mxu1 %vm1687_vm0, %v3611_v1 }
  0x79   :  { %1969 = vmatmul.mubr.bf16.gmra.mxu0 %v3592_v62 }
  0x7a   :  { %1976 = vmatprep.mubr.bf16.mxu0 %v3596_v63  ;;  %v3697_v63 = vld [vmem:[%s5400_s0 + $0x328] ss:$16 sps:$4 sm:$0xff]  }
  0x7e   :  { %2546 = vmatmul.mubr.bf16.gmra.mxu1 %v3613_v4 }
  0x7f   :  { %3466 = vmatprep.mubr.msk.bf16.mxu1 %vm1687_vm0, %v3617_v5  ;;  %v3692_v5 = vld [vmem:[%s5400_s0 + $0x304] ss:$16 sps:$4 sm:$0xff]  }
  0x81   :  { %1977 = vmatmul.mubr.bf16.gmra.mxu0 %v3598_v2 }
  0x82   :  { %1984 = vmatprep.mubr.bf16.mxu0 %v3602_v3  ;;  %v3688_v3 = vld [vmem:[%s5400_s0 + $0x2e0] ss:$16 sps:$4 sm:$0xff]  }
  0x86   :  { %2554 = vmatmul.mubr.bf16.gmra.mxu1 %v3619_v8  ;;  %v3707_v8 = vld [vmem:[%s5400_s0 + $0x36c] ss:$16 sps:$4 sm:$0xff]  }
  0x87   :  { %3467 = vmatprep.mubr.msk.bf16.mxu1 %vm1687_vm0, %v3623_v9 }
  0x89   :  { %1985 = vmatmul.mubr.bf16.gmra.mxu0 %v3604_v6 }
  0x8a   :  { %1992 = vmatprep.mubr.bf16.mxu0 %v3608_v7  ;;  %v3703_v7 = vld [vmem:[%s5400_s0 + $0x348] ss:$16 sps:$4 sm:$0xff]  }
  0x8e   :  { %2562 = vmatmul.mubr.bf16.gmra.mxu1 %v3625_v12 }
  0x8f   :  { %3468 = vmatprep.mubr.msk.bf16.mxu1 %vm1687_vm0, %v3629_v13  ;;  %v3698_v13 = vld [vmem:[%s5400_s0 + $0x324] ss:$16 sps:$4 sm:$0xff]  }
  0x91   :  { %1993 = vmatmul.mubr.bf16.gmra.mxu0 %v3610_v10 }
  0x92   :  { %2000 = vmatprep.mubr.bf16.mxu0 %v3614_v11  ;;  %v3694_v11 = vld [vmem:[%s5400_s0 + $0x300] ss:$16 sps:$4 sm:$0xff]  }
  0x96   :  { %2570 = vmatmul.mubr.bf16.gmra.mxu1 %v3631_v16  ;;  %v3713_v16 = vld [vmem:[%s5400_s0 + $0x38c] ss:$16 sps:$4 sm:$0xff]  }
  0x97   :  { %3469 = vmatprep.mubr.msk.bf16.mxu1 %vm1687_vm0, %v3635_v17 }
  0x99   :  { %2001 = vmatmul.mubr.bf16.gmra.mxu0 %v3616_v14 }
  0x9a   :  { %2008 = vmatprep.mubr.bf16.mxu0 %v3620_v15  ;;  %v3709_v15 = vld [vmem:[%s5400_s0 + $0x368] ss:$16 sps:$4 sm:$0xff]  }
  0x9e   :  { %2578 = vmatmul.mubr.bf16.gmra.mxu1 %v3637_v20 }
  0x9f   :  { %3470 = vmatprep.mubr.msk.bf16.mxu1 %vm1687_vm0, %v3641_v21 }
  0xa1   :  { %2009 = vmatmul.mubr.bf16.gmra.mxu0 %v3622_v18 }
  0xa2   :  { %2016 = vmatprep.mubr.bf16.mxu0 %v3626_v19 }
  0xa6   :  { %2586 = vmatmul.mubr.bf16.gmra.mxu1 %v3643_v24 }
  0xa7   :  { %3471 = vmatprep.mubr.msk.bf16.mxu1 %vm1687_vm0, %v3647_v25 }
  0xa9   :  { %2017 = vmatmul.mubr.bf16.gmra.mxu0 %v3628_v22 }
  0xaa   :  { %2024 = vmatprep.mubr.bf16.mxu0 %v3632_v23  ;;  %v3700_v23 = vld [vmem:[%s5400_s0 + $0x320] ss:$16 sps:$4 sm:$0xff]  }
  0xae   :  { %2594 = vmatmul.mubr.bf16.gmra.mxu1 %v3649_v28 }
  0xaf   :  { %3472 = vmatprep.mubr.msk.bf16.mxu1 %vm1687_vm0, %v3653_v29  ;;  %v3715_v29 = vld [vmem:[%s5400_s0 + $0x388] ss:$16 sps:$4 sm:$0xff]  }
  0xb1   :  { %2025 = vmatmul.mubr.bf16.gmra.mxu0 %v3634_v26  ;;  %v3704_v26 = vld [vmem:[%s5400_s0 + $0x344] ss:$16 sps:$4 sm:$0xff]  }
  0xb2   :  { %2032 = vmatprep.mubr.bf16.mxu0 %v3638_v27 }
  0xb6   :  { %2602 = vmatmul.mubr.bf16.gmra.mxu1 %v3655_v32 }
  0xb7   :  { %3473 = vmatprep.mubr.msk.bf16.mxu1 %vm1687_vm0, %v3659_v33 }
  0xb9   :  { %2033 = vmatmul.mubr.bf16.gmra.mxu0 %v3640_v30  ;;  %v3719_v30 = vld [vmem:[%s5400_s0 + $0x3ac] ss:$16 sps:$4 sm:$0xff]  }
  0xba   :  { %2040 = vmatprep.mubr.bf16.mxu0 %v3644_v31 }
  0xbe   :  { %2610 = vmatmul.mubr.bf16.gmra.mxu1 %v3661_v36 }
  0xbf   :  { %3474 = vmatprep.mubr.msk.bf16.mxu1 %vm1687_vm0, %v3665_v37  ;;  %v3706_v37 = vld [vmem:[%s5400_s0 + $0x340] ss:$16 sps:$4 sm:$0xff]  }
  0xc1   :  { %2041 = vmatmul.mubr.bf16.gmra.mxu0 %v3646_v34 }
  0xc2   :  { %2048 = vmatprep.mubr.bf16.mxu0 %v3650_v35 }
  0xc6   :  { %2618 = vmatmul.mubr.bf16.gmra.mxu1 %v3667_v40  ;;  %v3710_v40 = vld [vmem:[%s5400_s0 + $0x364] ss:$16 sps:$4 sm:$0xff]  }
  0xc7   :  { %3475 = vmatprep.mubr.msk.bf16.mxu1 %vm1687_vm0, %v3671_v41 }
  0xc9   :  { %2049 = vmatmul.mubr.bf16.gmra.mxu0 %v3652_v38 }
  0xca   :  { %2056 = vmatprep.mubr.bf16.mxu0 %v3656_v39 }
  0xce   :  { %2626 = vmatmul.mubr.bf16.gmra.mxu1 %v3673_v44  ;;  %v3725_v44 = vld [vmem:[%s5400_s0 + $0x3cc] ss:$16 sps:$4 sm:$0xff]  }
  0xcf   :  { %3476 = vmatprep.mubr.msk.bf16.mxu1 %vm1687_vm0, %v3677_v45 }
  0xd1   :  { %2057 = vmatmul.mubr.bf16.gmra.mxu0 %v3658_v42 }
  0xd2   :  { %2064 = vmatprep.mubr.bf16.mxu0 %v3662_v43  ;;  %v3721_v43 = vld [vmem:[%s5400_s0 + $0x3a8] ss:$16 sps:$4 sm:$0xff]  }
  0xd6   :  { %2634 = vmatmul.mubr.bf16.gmra.mxu1 %v3679_v48 }
  0xd7   :  { %3477 = vmatprep.mubr.msk.bf16.mxu1 %vm1687_vm0, %v3683_v49 }
  0xd9   :  { %2065 = vmatmul.mubr.bf16.gmra.mxu0 %v3664_v46 }
  0xda   :  { %2072 = vmatprep.mubr.bf16.mxu0 %v3668_v47 }
  0xde   :  { %2642 = vmatmul.mubr.bf16.gmra.mxu1 %v3685_v52 }
  0xdf   :  { %3478 = vmatprep.mubr.msk.bf16.mxu1 %vm1687_vm0, %v3689_v53 }
  0xe1   :  { %2073 = vmatmul.mubr.bf16.gmra.mxu0 %v3670_v50 }
  0xe2   :  { %2080 = vmatprep.mubr.bf16.mxu0 %v3674_v51  ;;  %v3712_v51 = vld [vmem:[%s5400_s0 + $0x360] ss:$16 sps:$4 sm:$0xff]  }
  0xe6   :  { %v2459_v58 = vpop.f32.mrf.mxu1  ;;  %2650 = vmatmul.mubr.bf16.gmra.mxu1 %v3691_v56 }
  0xe7   :  { %3479 = vmatprep.mubr.msk.bf16.mxu1 %vm1687_vm0, %v3695_v57  ;;  %v3727_v57 = vld [vmem:[%s5400_s0 + $0x3c8] ss:$16 sps:$4 sm:$0xff]  }
  0xe8   :  { %v2461_v60 = vpop.f32.mrf.mxu1 }
  0xe9   :  { %2081 = vmatmul.mubr.bf16.gmra.mxu0 %v3676_v54  ;;  %v3718_v54 = vld [vmem:[%s5400_s0 + $0x384] ss:$16 sps:$4 sm:$0xff]  }
  0xea   :  { %2088 = vmatprep.mubr.bf16.mxu0 %v3680_v55  ;;  %v2462_v62 = vpop.f32.mrf.mxu1 }
  0xec   :  { %v2464_v1 = vpop.f32.mrf.mxu1 }
  0xed   :  { %v3716_v1 = vld [vmem:[%s5400_s0 + $0x380] ss:$16 sps:$4 sm:$0xff]  }
  0xee   :  { %v2467_v2 = vpop.f32.mrf.mxu1  ;;  %2658 = vmatmul.mubr.bf16.gmra.mxu1 %v3697_v63 }
  0xef   :  { %3480 = vmatprep.mubr.msk.bf16.mxu1 %vm1687_vm0, %v3701_v0 }
  0xf0   :  { %v2469_v4 = vpop.f32.mrf.mxu1 }
  0xf1   :  { %2089 = vmatmul.mubr.bf16.gmra.mxu0 %v3682_v59  ;;  %v3724_v4 = vld [vmem:[%s5400_s0 + $0x3a4] ss:$16 sps:$4 sm:$0xff]  }
  0xf2   :  { %2096 = vmatprep.mubr.bf16.mxu0 %v3686_v61  ;;  %v2470_v6 = vpop.f32.mrf.mxu1 }
  0xf4   :  { %v2472_v9 = vpop.f32.mrf.mxu1 }
  0xf6   :  { %v2475_v10 = vpop.f32.mrf.mxu1  ;;  %2666 = vmatmul.mubr.bf16.gmra.mxu1 %v3703_v7  ;;  %v3733_v7 = vld [vmem:[%s5400_s0 + $0x3e8] ss:$16 sps:$4 sm:$0xff]  }
  0xf7   :  { %3481 = vmatprep.mubr.msk.bf16.mxu1 %vm1687_vm0, %v3707_v8  ;;  %v3737_v8 = vld [vmem:[%s5400_s0 + $0x40c] ss:$16 sps:$4 sm:$0xff]  }
  0xf8   :  { %v2477_v12 = vpop.f32.mrf.mxu1 }
  0xf9   :  { %2097 = vmatmul.mubr.bf16.gmra.mxu0 %v3688_v3 }
  0xfa   :  { %2104 = vmatprep.mubr.bf16.mxu0 %v3692_v5  ;;  %v2478_v14 = vpop.f32.mrf.mxu1 }
  0xfc   :  { %v2480_v18 = vpop.f32.mrf.mxu1 }
  0xfd   :  { %v3730_v18 = vld [vmem:[%s5400_s0 + $0x3c4] ss:$16 sps:$4 sm:$0xff]  }
  0xfe   :  { %v2483_v21 = vpop.f32.mrf.mxu1  ;;  %2674 = vmatmul.mubr.bf16.gmra.mxu1 %v3709_v15  ;;  %v3722_v15 = vld [vmem:[%s5400_s0 + $0x3a0] ss:$16 sps:$4 sm:$0xff]  }
  0xff   :  { %3482 = vmatprep.mubr.msk.bf16.mxu1 %vm1687_vm0, %v3713_v16 }
 0x100   :  { %v2485_v24 = vpop.f32.mrf.mxu1 }
 0x101   :  { %v1914_v17 = vpop.f32.mrf.mxu0  ;;  %2105 = vmatmul.mubr.bf16.gmra.mxu0 %v3694_v11 }
 0x102   :  { %v4402_v19 = vadd.f32 %v2459_v58, %v1914_v17  ;;  %2112 = vmatprep.mubr.bf16.mxu0 %v3698_v13  ;;  %v2486_v28 = vpop.f32.mrf.mxu1  ;;  %v3731_v58 = vld [vmem:[%s5400_s0 + $0x3ec] ss:$16 sps:$4 sm:$0xff]  }
 0x103   :  { %v1916_v20 = vpop.f32.mrf.mxu0 }
 0x104   :  { %v2488_v32 = vpop.f32.mrf.mxu1 }
 0x105   :  { %v1917_v22 = vpop.f32.mrf.mxu0 }
 0x106   :  { %v4408_v25 = vadd.f32 %v2462_v62, %v1917_v22  ;;  %v2491_v35 = vpop.f32.mrf.mxu1  ;;  %2682 = vmatmul.mubr.bf16.gmra.mxu1 %v3715_v29  ;;  %v3739_v22 = vld [vmem:[%s5400_s0 + $0x408] ss:$16 sps:$4 sm:$0xff]  }
 0x107   :  { %v1919_v27 = vpop.f32.mrf.mxu0  ;;  %3483 = vmatprep.mubr.msk.bf16.mxu1 %vm1687_vm0, %v3719_v30 }
 0x108   :  { %v2493_v38 = vpop.f32.mrf.mxu1 }
 0x109   :  { %v1922_v31 = vpop.f32.mrf.mxu0  ;;  %2113 = vmatmul.mubr.bf16.gmra.mxu0 %v3700_v23  ;;  %v3743_v23 = vld [vmem:[%s5400_s0 + $0x42c] ss:$16 sps:$4 sm:$0xff]   ;;  %v3745_v38 = vld [vmem:[%s5400_s0 + $0x428] ss:$16 sps:$4 sm:$0xff]  }
 0x10a   :  { %v4419_v33 = vadd.f32 %v2467_v2, %v1922_v31  ;;  %2120 = vmatprep.mubr.bf16.mxu0 %v3704_v26  ;;  %v2494_v42 = vpop.f32.mrf.mxu1  ;;  %v3728_v31 = vld [vmem:[%s5400_s0 + $0x3c0] ss:$16 sps:$4 sm:$0xff]  }
 0x10b   :  { %v1924_v34 = vpop.f32.mrf.mxu0 }
 0x10c   :  { %v2496_v46 = vpop.f32.mrf.mxu1 }
 0x10d   :  { %v1925_v36 = vpop.f32.mrf.mxu0 }
 0x10e   :  { %v4425_v39 = vadd.f32 %v2470_v6, %v1925_v36  ;;  %v2499_v49 = vpop.f32.mrf.mxu1  ;;  %2690 = vmatmul.mubr.bf16.gmra.mxu1 %v3721_v43 }
 0x10f   :  { %v1927_v41 = vpop.f32.mrf.mxu0  ;;  %3484 = vmatprep.mubr.msk.bf16.mxu1 %vm1687_vm0, %v3725_v44 }
 0x110   :  { %v2501_v52 = vpop.f32.mrf.mxu1 }
 0x111   :  { %v1930_v45 = vpop.f32.mrf.mxu0  ;;  %2121 = vmatmul.mubr.bf16.gmra.mxu0 %v3706_v37 }
 0x112   :  { %v4436_v47 = vadd.f32 %v2475_v10, %v1930_v45  ;;  %2128 = vmatprep.mubr.bf16.mxu0 %v3710_v40  ;;  %v2502_v56 = vpop.f32.mrf.mxu1  ;;  %v3749_v40 = vld [vmem:[%s5400_s0 + $0x44c] ss:$16 sps:$4 sm:$0xff]  }
 0x113   :  { %v1932_v48 = vpop.f32.mrf.mxu0 }
 0x114   :  { %v2504_v60 = vpop.f32.mrf.mxu1  ;;  %v3734_v48 = vld [vmem:[%s5400_s0 + $0x3e0] ss:$16 sps:$4 sm:$0xff]  }
 0x115   :  { %v1933_v50 = vpop.f32.mrf.mxu0 }
 0x116   :  { %v4442_v53 = vadd.f32 %v2478_v14, %v1933_v50  ;;  %v2507_v63 = vpop.f32.mrf.mxu1  ;;  %2698 = vmatmul.mubr.bf16.gmra.mxu1 %v3727_v57 }
 0x117   :  { %v1935_v55 = vpop.f32.mrf.mxu0  ;;  %3485 = vmatprep.mubr.msk.bf16.mxu1 %vm1687_vm0, %v3731_v58 }
 0x118   :  { %v2509_v2 = vpop.f32.mrf.mxu1  ;;  %v3751_v55 = vld [vmem:[%s5400_s0 + $0x448] ss:$16 sps:$4 sm:$0xff]  }
 0x119   :  { %v1938_v59 = vpop.f32.mrf.mxu0  ;;  %2129 = vmatmul.mubr.bf16.gmra.mxu0 %v3712_v51  ;;  %v3742_v51 = vld [vmem:[%s5400_s0 + $0x404] ss:$16 sps:$4 sm:$0xff]  }
 0x11a   :  { %v4453_v61 = vadd.f32 %v2483_v21, %v1938_v59  ;;  %2136 = vmatprep.mubr.bf16.mxu0 %v3718_v54  ;;  %v2510_v6 = vpop.f32.mrf.mxu1 }
 0x11b   :  { %v1940_v62 = vpop.f32.mrf.mxu0 }
 0x11c   :  { %v2512_v10 = vpop.f32.mrf.mxu1 }
 0x11d   :  { %v1941_v0 = vpop.f32.mrf.mxu0 }
 0x11e   :  { %v4459_v3 = vadd.f32 %v2486_v28, %v1941_v0  ;;  %v2515_v13 = vpop.f32.mrf.mxu1  ;;  %2706 = vmatmul.mubr.bf16.gmra.mxu1 %v3733_v7  ;;  %v3740_v0 = vld [vmem:[%s5400_s0 + $0x400] ss:$16 sps:$4 sm:$0xff]   ;;  %v3757_v7 = vld [vmem:[%s5400_s0 + $0x468] ss:$16 sps:$4 sm:$0xff]  }
 0x11f   :  { %v1943_v5 = vpop.f32.mrf.mxu0  ;;  %3486 = vmatprep.mubr.msk.bf16.mxu1 %vm1687_vm0, %v3737_v8  ;;  %v3761_v8 = vld [vmem:[%s5400_s0 + $0x48c] ss:$16 sps:$4 sm:$0xff]  }
 0x120   :  { %v2517_v16 = vpop.f32.mrf.mxu1 }
 0x121   :  { %v1946_v9 = vpop.f32.mrf.mxu0  ;;  %2137 = vmatmul.mubr.bf16.gmra.mxu0 %v3716_v1  ;;  %v3746_v16 = vld [vmem:[%s5400_s0 + $0x420] ss:$16 sps:$4 sm:$0xff]  }
 0x122   :  { %v4470_v11 = vadd.f32 %v2491_v35, %v1946_v9  ;;  %2144 = vmatprep.mubr.bf16.mxu0 %v3724_v4  ;;  %v2518_v21 = vpop.f32.mrf.mxu1  ;;  %v3736_v35 = vld [vmem:[%s5400_s0 + $0x3e4] ss:$16 sps:$4 sm:$0xff]  }
 0x123   :  { %v1948_v12 = vpop.f32.mrf.mxu0  ;;  %v3748_v4 = vld [vmem:[%s5400_s0 + $0x424] ss:$16 sps:$4 sm:$0xff]  }
 0x124   :  { %v2520_v26 = vpop.f32.mrf.mxu1 }
 0x125   :  { %v1949_v14 = vpop.f32.mrf.mxu0  ;;  %v3767_v26 = vld [vmem:[%s5400_s0 + $0x4ac] ss:$16 sps:$4 sm:$0xff]  }
 0x126   :  { %v4476_v17 = vadd.f32 %v2494_v42, %v1949_v14  ;;  %v2523_v29 = vpop.f32.mrf.mxu1  ;;  %2714 = vmatmul.mubr.bf16.gmra.mxu1 %v3739_v22 }
 0x127   :  { %v1951_v20 = vpop.f32.mrf.mxu0  ;;  %3487 = vmatprep.mubr.msk.bf16.mxu1 %vm1687_vm0, %v3743_v23 }
 0x128   :  { %v2525_v32 = vpop.f32.mrf.mxu1 }
 0x129   :  { %v1954_v24 = vpop.f32.mrf.mxu0  ;;  %2145 = vmatmul.mubr.bf16.gmra.mxu0 %v3722_v15 }
 0x12a   :  { %v4487_v27 = vadd.f32 %v2499_v49, %v1954_v24  ;;  %2152 = vmatprep.mubr.bf16.mxu0 %v3730_v18  ;;  %v2526_v37 = vpop.f32.mrf.mxu1  ;;  %v3763_v24 = vld [vmem:[%s5400_s0 + $0x488] ss:$16 sps:$4 sm:$0xff]  }
 0x12b   :  { %v1956_v28 = vpop.f32.mrf.mxu0 }
 0x12c   :  { %v2528_v42 = vpop.f32.mrf.mxu1 }
 0x12d   :  { %v1957_v30 = vpop.f32.mrf.mxu0 }
 0x12e   :  { %v4493_v34 = vadd.f32 %v2502_v56, %v1957_v30  ;;  %v2531_v45 = vpop.f32.mrf.mxu1  ;;  %2722 = vmatmul.mubr.bf16.gmra.mxu1 %v3745_v38  ;;  %v3755_v56 = vld [vmem:[%s5400_s0 + $0x46c] ss:$16 sps:$4 sm:$0xff]  }
 0x12f   :  { %v1959_v36 = vpop.f32.mrf.mxu0  ;;  %3488 = vmatprep.mubr.msk.bf16.mxu1 %vm1687_vm0, %v3749_v40  ;;  %v3760_v40 = vld [vmem:[%s5400_s0 + $0x464] ss:$16 sps:$4 sm:$0xff]  }
 0x130   :  { %v2533_v49 = vpop.f32.mrf.mxu1  ;;  %v3752_v36 = vld [vmem:[%s5400_s0 + $0x440] ss:$16 sps:$4 sm:$0xff]  }
 0x131   :  { %v1962_v41 = vpop.f32.mrf.mxu0  ;;  %2153 = vmatmul.mubr.bf16.gmra.mxu0 %v3728_v31 }
 0x132   :  { %v4504_v43 = vadd.f32 %v2507_v63, %v1962_v41  ;;  %2160 = vmatprep.mubr.bf16.mxu0 %v3736_v35  ;;  %v2534_v54 = vpop.f32.mrf.mxu1 }
 0x133   :  { %v1964_v44 = vpop.f32.mrf.mxu0 }
 0x134   :  { %v2536_v58 = vpop.f32.mrf.mxu1  ;;  %v3769_v44 = vld [vmem:[%s5400_s0 + $0x4a8] ss:$16 sps:$4 sm:$0xff]  }
 0x135   :  { %v1965_v46 = vpop.f32.mrf.mxu0  ;;  %v3766_v58 = vld [vmem:[%s5400_s0 + $0x484] ss:$16 sps:$4 sm:$0xff]  }
 0x136   :  { %v4510_v50 = vadd.f32 %v2510_v6, %v1965_v46  ;;  %v2539_v62 = vpop.f32.mrf.mxu1  ;;  %2730 = vmatmul.mubr.bf16.gmra.mxu1 %v3751_v55  ;;  %v3758_v55 = vld [vmem:[%s5400_s0 + $0x460] ss:$16 sps:$4 sm:$0xff]  }
 0x137   :  { %v1967_v52 = vpop.f32.mrf.mxu0  ;;  %3489 = vmatprep.mubr.msk.bf16.mxu1 %vm1687_vm0, %v3755_v56 }
 0x138   :  { %5441 = vst [vmem:[#allocation2_spill] sm:$0xff] %v4510_v50  ;;  %v2541_v1 = vpop.f32.mrf.mxu1 }
 0x139   :  { %v1970_v57 = vpop.f32.mrf.mxu0  ;;  %2161 = vmatmul.mubr.bf16.gmra.mxu0 %v3734_v48 }
 0x13a   :  { %v4521_v59 = vadd.f32 %v2515_v13, %v1970_v57  ;;  %2168 = vmatprep.mubr.bf16.mxu0 %v3742_v51  ;;  %v2542_v6 = vpop.f32.mrf.mxu1 }
 0x13b   :  { %v1972_v60 = vpop.f32.mrf.mxu0 }
 0x13c   :  { %5442 = vst [vmem:[#allocation3_spill] sm:$0xff] %v4521_v59  ;;  %v2544_v10 = vpop.f32.mrf.mxu1 }
 0x13d   :  { %v1973_v63 = vpop.f32.mrf.mxu0 }
 0x13e   :  { %v4527_v2 = vadd.f32 %v2518_v21, %v1973_v63  ;;  %v2547_v14 = vpop.f32.mrf.mxu1  ;;  %2738 = vmatmul.mubr.bf16.gmra.mxu1 %v3757_v7  ;;  %v3754_v21 = vld [vmem:[%s5400_s0 + $0x444] ss:$16 sps:$4 sm:$0xff]   ;;  %v3775_v63 = vld [vmem:[%s5400_s0 + $0x4c8] ss:$16 sps:$4 sm:$0xff]  }
 0x13f   :  { %v1975_v5 = vpop.f32.mrf.mxu0  ;;  %3490 = vmatprep.mubr.msk.bf16.mxu1 %vm1687_vm0, %v3761_v8 }
 0x140   :  { %5443 = vst [vmem:[#allocation4_spill] sm:$0xff] %v4527_v2  ;;  %v2549_v18 = vpop.f32.mrf.mxu1 }
 0x141   :  { %v1978_v9 = vpop.f32.mrf.mxu0  ;;  %2169 = vmatmul.mubr.bf16.gmra.mxu0 %v3740_v0  ;;  %v3779_v0 = vld [vmem:[%s5400_s0 + $0x4ec] ss:$16 sps:$4 sm:$0xff]   ;;  %v3781_v18 = vld [vmem:[%s5400_s0 + $0x4e8] ss:$16 sps:$4 sm:$0xff]  }
 0x142   :  { %v4538_v12 = vadd.f32 %v2523_v29, %v1978_v9  ;;  %2176 = vmatprep.mubr.bf16.mxu0 %v3748_v4  ;;  %v2550_v23 = vpop.f32.mrf.mxu1  ;;  %v3764_v9 = vld [vmem:[%s5400_s0 + $0x480] ss:$16 sps:$4 sm:$0xff]  }
 0x143   :  { %v1980_v13 = vpop.f32.mrf.mxu0 }
 0x144   :  { %5444 = vst [vmem:[#allocation5_spill] sm:$0xff] %v4538_v12  ;;  %v2552_v29 = vpop.f32.mrf.mxu1 }
 0x145   :  { %v1981_v15 = vpop.f32.mrf.mxu0 }
 0x146   :  { %v4544_v20 = vadd.f32 %v2526_v37, %v1981_v15  ;;  %v2555_v32 = vpop.f32.mrf.mxu1  ;;  %2746 = vmatmul.mubr.bf16.gmra.mxu1 %v3763_v24  ;;  %v3772_v15 = vld [vmem:[%s5400_s0 + $0x4a4] ss:$16 sps:$4 sm:$0xff]  }
 0x147   :  { %v1983_v22 = vpop.f32.mrf.mxu0  ;;  %3491 = vmatprep.mubr.msk.bf16.mxu1 %vm1687_vm0, %v3767_v26 }
 0x148   :  { %5445 = vst [vmem:[#allocation6_spill] sm:$0xff] %v4544_v20  ;;  %v2557_v37 = vpop.f32.mrf.mxu1 }
 0x149   :  { %v1986_v28 = vpop.f32.mrf.mxu0  ;;  %2177 = vmatmul.mubr.bf16.gmra.mxu0 %v3746_v16  ;;  %v3778_v37 = vld [vmem:[%s5400_s0 + $0x4c4] ss:$16 sps:$4 sm:$0xff]  }
 0x14a   :  { %v4555_v30 = vadd.f32 %v2531_v45, %v1986_v28  ;;  %2184 = vmatprep.mubr.bf16.mxu0 %v3754_v21  ;;  %v2558_v42 = vpop.f32.mrf.mxu1  ;;  %v3773_v45 = vld [vmem:[%s5400_s0 + $0x4cc] ss:$16 sps:$4 sm:$0xff]  }
 0x14b   :  { %v1988_v31 = vpop.f32.mrf.mxu0  ;;  %v3785_v21 = vld [vmem:[%s5400_s0 + $0x50c] ss:$16 sps:$4 sm:$0xff]  }
 0x14c   :  { %5446 = vst [vmem:[#allocation7_spill] sm:$0xff] %v4555_v30  ;;  %v2560_v48 = vpop.f32.mrf.mxu1  ;;  %v3770_v31 = vld [vmem:[%s5400_s0 + $0x4a0] ss:$16 sps:$4 sm:$0xff]  }
 0x14d   :  { %v1989_v35 = vpop.f32.mrf.mxu0 }
 0x14e   :  { %v4561_v38 = vadd.f32 %v2534_v54, %v1989_v35  ;;  %v2563_v52 = vpop.f32.mrf.mxu1  ;;  %2754 = vmatmul.mubr.bf16.gmra.mxu1 %v3769_v44  ;;  %v3791_v44 = vld [vmem:[%s5400_s0 + $0x52c] ss:$16 sps:$4 sm:$0xff]  }
 0x14f   :  { %v1991_v41 = vpop.f32.mrf.mxu0  ;;  %3492 = vmatprep.mubr.msk.bf16.mxu1 %vm1687_vm0, %v3773_v45 }
 0x150   :  { %5447 = vst [vmem:[#allocation8_spill] sm:$0xff] %v4561_v38  ;;  %v2565_v56 = vpop.f32.mrf.mxu1  ;;  %v3787_v41 = vld [vmem:[%s5400_s0 + $0x508] ss:$16 sps:$4 sm:$0xff]  }
 0x151   :  { %v1994_v46 = vpop.f32.mrf.mxu0  ;;  %2185 = vmatmul.mubr.bf16.gmra.mxu0 %v3752_v36 }
 0x152   :  { %v4572_v49 = vadd.f32 %v2539_v62, %v1994_v46  ;;  %2192 = vmatprep.mubr.bf16.mxu0 %v3760_v40  ;;  %v2566_v62 = vpop.f32.mrf.mxu1 }
 0x153   :  { %v1996_v51 = vpop.f32.mrf.mxu0 }
 0x154   :  { %5448 = vst [vmem:[#allocation9_spill] sm:$0xff] %v4572_v49  ;;  %v2568_v4 = vpop.f32.mrf.mxu1 }
 0x155   :  { %v1997_v54 = vpop.f32.mrf.mxu0 }
 0x156   :  { %v4578_v57 = vadd.f32 %v2542_v6, %v1997_v54  ;;  %v2571_v7 = vpop.f32.mrf.mxu1  ;;  %2762 = vmatmul.mubr.bf16.gmra.mxu1 %v3775_v63 }
 0x157   :  { %v1999_v60 = vpop.f32.mrf.mxu0  ;;  %3493 = vmatprep.mubr.msk.bf16.mxu1 %vm1687_vm0, %v3779_v0  ;;  %v3793_v0 = vld [vmem:[%s5400_s0 + $0x528] ss:$16 sps:$4 sm:$0xff]  }
 0x158   :  { %5449 = vst [vmem:[#allocation10_spill] sm:$0xff] %v4578_v57  ;;  %v2573_v10 = vpop.f32.mrf.mxu1  ;;  %v3784_v60 = vld [vmem:[%s5400_s0 + $0x4e4] ss:$16 sps:$4 sm:$0xff]  }
 0x159   :  { %v2002_v1 = vpop.f32.mrf.mxu0  ;;  %2193 = vmatmul.mubr.bf16.gmra.mxu0 %v3758_v55  ;;  %v3776_v55 = vld [vmem:[%s5400_s0 + $0x4c0] ss:$16 sps:$4 sm:$0xff]  }
 0x15a   :  { %v4589_v5 = vadd.f32 %v2547_v14, %v2002_v1  ;;  %2200 = vmatprep.mubr.bf16.mxu0 %v3766_v58  ;;  %v2574_v16 = vpop.f32.mrf.mxu1  ;;  %v3797_v1 = vld [vmem:[%s5400_s0 + $0x54c] ss:$16 sps:$4 sm:$0xff]  }
 0x15b   :  { %v2004_v6 = vpop.f32.mrf.mxu0 }
 0x15c   :  { %5450 = vst [vmem:[#allocation11_spill] sm:$0xff] %v4589_v5  ;;  %v2576_v24 = vpop.f32.mrf.mxu1 }
 0x15d   :  { %v2005_v8 = vpop.f32.mrf.mxu0  ;;  %v3799_v24 = vld [vmem:[%s5400_s0 + $0x548] ss:$16 sps:$4 sm:$0xff]  }
 0x15e   :  { %v4595_v13 = vadd.f32 %v2550_v23, %v2005_v8  ;;  %v2579_v28 = vpop.f32.mrf.mxu1  ;;  %2770 = vmatmul.mubr.bf16.gmra.mxu1 %v3781_v18 }
 0x15f   :  { %v2007_v14 = vpop.f32.mrf.mxu0  ;;  %3494 = vmatprep.mubr.msk.bf16.mxu1 %vm1687_vm0, %v3785_v21  ;;  %v3790_v21 = vld [vmem:[%s5400_s0 + $0x504] ss:$16 sps:$4 sm:$0xff]  }
 0x160   :  { %5451 = vst [vmem:[#allocation12_spill] sm:$0xff] %v4595_v13  ;;  %v2581_v35 = vpop.f32.mrf.mxu1 }
 0x161   :  { %v2010_v22 = vpop.f32.mrf.mxu0  ;;  %2201 = vmatmul.mubr.bf16.gmra.mxu0 %v3764_v9 }
 0x162   :  { %v4606_v26 = vadd.f32 %v2555_v32, %v2010_v22  ;;  %2208 = vmatprep.mubr.bf16.mxu0 %v3772_v15  ;;  %v2582_v40 = vpop.f32.mrf.mxu1  ;;  %v3782_v15 = vld [vmem:[%s5400_s0 + $0x4e0] ss:$16 sps:$4 sm:$0xff]  }
 0x163   :  { %v2012_v23 = vpop.f32.mrf.mxu0 }
 0x164   :  { %5452 = vst [vmem:[#allocation13_spill] sm:$0xff] %v4606_v26  ;;  %v2584_v46 = vpop.f32.mrf.mxu1  ;;  %v3803_v23 = vld [vmem:[%s5400_s0 + $0x56c] ss:$16 sps:$4 sm:$0xff]  }
 0x165   :  { %v2013_v29 = vpop.f32.mrf.mxu0  ;;  %v3796_v46 = vld [vmem:[%s5400_s0 + $0x524] ss:$16 sps:$4 sm:$0xff]  }
 0x166   :  { %v4612_v36 = vadd.f32 %v2558_v42, %v2013_v29  ;;  %v2587_v51 = vpop.f32.mrf.mxu1  ;;  %2778 = vmatmul.mubr.bf16.gmra.mxu1 %v3787_v41  ;;  %v3788_v41 = vld [vmem:[%s5400_s0 + $0x500] ss:$16 sps:$4 sm:$0xff]  }
 0x167   :  { %v2015_v32 = vpop.f32.mrf.mxu0  ;;  %3495 = vmatprep.mubr.msk.bf16.mxu1 %vm1687_vm0, %v3791_v44 }
 0x168   :  { %5453 = vst [vmem:[#allocation14_spill] sm:$0xff] %v4612_v36  ;;  %v2589_v56 = vpop.f32.mrf.mxu1 }
 0x169   :  { %v2018_v45 = vpop.f32.mrf.mxu0  ;;  %2209 = vmatmul.mubr.bf16.gmra.mxu0 %v3770_v31 }
 0x16a   :  { %v4623_v48 = vadd.f32 %v2563_v52, %v2018_v45  ;;  %2216 = vmatprep.mubr.bf16.mxu0 %v3778_v37  ;;  %v2590_v63 = vpop.f32.mrf.mxu1 }
 0x16b   :  { %v2020_v42 = vpop.f32.mrf.mxu0 }
 0x16c   :  { %5454 = vst [vmem:[#allocation15_spill] sm:$0xff] %v4623_v48  ;;  %v2592_v6 = vpop.f32.mrf.mxu1 }
 0x16d   :  { %v2021_v54 = vpop.f32.mrf.mxu0  ;;  %v3794_v6 = vld [vmem:[%s5400_s0 + $0x520] ss:$16 sps:$4 sm:$0xff]  }
 0x16e   :  { %v4629_v58 = vadd.f32 %v2566_v62, %v2021_v54  ;;  %v2595_v9 = vpop.f32.mrf.mxu1  ;;  %2786 = vmatmul.mubr.bf16.gmra.mxu1 %v3793_v0  ;;  %v3805_v54 = vld [vmem:[%s5400_s0 + $0x568] ss:$16 sps:$4 sm:$0xff]  }
 0x16f   :  { %v2023_v52 = vpop.f32.mrf.mxu0  ;;  %3496 = vmatprep.mubr.msk.bf16.mxu1 %vm1687_vm0, %v3797_v1 }
 0x170   :  { %5455 = vst [vmem:[#allocation16_spill] sm:$0xff] %v4629_v58  ;;  %v2597_v14 = vpop.f32.mrf.mxu1 }
 0x171   :  { %v2026_v4 = vpop.f32.mrf.mxu0  ;;  %2217 = vmatmul.mubr.bf16.gmra.mxu0 %v3776_v55  ;;  %v3809_v55 = vld [vmem:[%s5400_s0 + $0x58c] ss:$16 sps:$4 sm:$0xff]  }
 0x172   :  { %v4640_v8 = vadd.f32 %v2571_v7, %v2026_v4  ;;  %2224 = vmatprep.mubr.bf16.mxu0 %v3784_v60  ;;  %v2598_v22 = vpop.f32.mrf.mxu1 }
 0x173   :  { %v2028_v62 = vpop.f32.mrf.mxu0 }
 0x174   :  { %5456 = vst [vmem:[#allocation17_spill] sm:$0xff] %v4640_v8  ;;  %v2600_v31 = vpop.f32.mrf.mxu1 }
 0x175   :  { %v2029_v10 = vpop.f32.mrf.mxu0 }
 0x176   :  { %v4646_v18 = vadd.f32 %v2574_v16, %v2029_v10  ;;  %v2603_v37 = vpop.f32.mrf.mxu1  ;;  %2794 = vmatmul.mubr.bf16.gmra.mxu1 %v3799_v24  ;;  %v3815_v24 = vld [vmem:[%s5400_s0 + $0x5ac] ss:$16 sps:$4 sm:$0xff]  }
 0x177   :  { %v2031_v7 = vpop.f32.mrf.mxu0  ;;  %3497 = vmatprep.mubr.msk.bf16.mxu1 %vm1687_vm0, %v3803_v23 }
 0x178   :  { %5457 = vst [vmem:[#allocation18_spill] sm:$0xff] %v4646_v18  ;;  %v2605_v44 = vpop.f32.mrf.mxu1 }
 0x179   :  { %v2034_v29 = vpop.f32.mrf.mxu0  ;;  %2225 = vmatmul.mubr.bf16.gmra.mxu0 %v3782_v15  ;;  %v3800_v44 = vld [vmem:[%s5400_s0 + $0x540] ss:$16 sps:$4 sm:$0xff]  }
 0x17a   :  { %v4657_v35 = vadd.f32 %v2579_v28, %v2034_v29  ;;  %2232 = vmatprep.mubr.bf16.mxu0 %v3790_v21  ;;  %v2606_v42 = vpop.f32.mrf.mxu1  ;;  %v3811_v21 = vld [vmem:[%s5400_s0 + $0x588] ss:$16 sps:$4 sm:$0xff]  }
 0x17b   :  { %v2036_v16 = vpop.f32.mrf.mxu0 }
 0x17c   :  { %5458 = vst [vmem:[#allocation19_spill] sm:$0xff] %v4657_v35  ;;  %v2608_v60 = vpop.f32.mrf.mxu1 }
 0x17d   :  { %v2037_v32 = vpop.f32.mrf.mxu0 }
 0x17e   :  { %v4663_v45 = vadd.f32 %v2582_v40, %v2037_v32  ;;  %v2611_v0 = vpop.f32.mrf.mxu1  ;;  %2802 = vmatmul.mubr.bf16.gmra.mxu1 %v3805_v54 }
 0x17f   :  { %v2039_v28 = vpop.f32.mrf.mxu0  ;;  %3498 = vmatprep.mubr.msk.bf16.mxu1 %vm1687_vm0, %v3809_v55 }
 0x180   :  { %5459 = vst [vmem:[#allocation20_spill] sm:$0xff] %v4663_v45  ;;  %v2613_v62 = vpop.f32.mrf.mxu1 }
 0x181   :  { %v2042_v56 = vpop.f32.mrf.mxu0  ;;  %2233 = vmatmul.mubr.bf16.gmra.mxu0 %v3788_v41 }
 0x182   :  { %v4674_v52 = vadd.f32 %v2587_v51, %v2042_v56  ;;  %2240 = vmatprep.mubr.bf16.mxu0 %v3796_v46  ;;  %v3802_v51 = vld [vmem:[%s5400_s0 + $0x544] ss:$16 sps:$4 sm:$0xff]   ;;  %v2614_v14 = vpop.f32.mrf.mxu1  ;;  %v3817_v56 = vld [vmem:[%s5400_s0 + $0x5a8] ss:$16 sps:$4 sm:$0xff]  }
 0x183   :  { %v2044_v40 = vpop.f32.mrf.mxu0 }
 0x184   :  { %v3821_v40 = vld [vmem:[%s5400_s0 + $0x5cc] ss:$16 sps:$4 sm:$0xff]  }
 0x185   :  { %v2045_v4 = vpop.f32.mrf.mxu0 }
 0x186   :  { %v4682_v10 = vadd.f32 %v2590_v63, %v2045_v4  ;;  %v2616_v63 = vpop.f32.mrf.mxu1  ;;  %2810 = vmatmul.mubr.bf16.gmra.mxu1 %v3811_v21 }
 0x187   :  { %v2047_v15 = vpop.f32.mrf.mxu0  ;;  %3499 = vmatprep.mubr.msk.bf16.mxu1 %vm1687_vm0, %v3815_v24  ;;  %v3806_v24 = vld [vmem:[%s5400_s0 + $0x560] ss:$16 sps:$4 sm:$0xff]  }
 0x188   :  { %v2619_v16 = vpop.f32.mrf.mxu1 }
 0x189   :  { %v2050_v23 = vpop.f32.mrf.mxu0  ;;  %2241 = vmatmul.mubr.bf16.gmra.mxu0 %v3794_v6 }
 0x18a   :  { %v4695_v29 = vadd.f32 %v2595_v9, %v2050_v23  ;;  %2248 = vmatprep.mubr.bf16.mxu0 %v3802_v51  ;;  %v2621_v46 = vpop.f32.mrf.mxu1  ;;  %v3808_v9 = vld [vmem:[%s5400_s0 + $0x564] ss:$16 sps:$4 sm:$0xff]  }
 0x18b   :  { %v2052_v31 = vpop.f32.mrf.mxu0 }
 0x18c   :  { %v2622_v55 = vpop.f32.mrf.mxu1 }
 0x18d   :  { %v2053_v41 = vpop.f32.mrf.mxu0 }
 0x18e   :  { %v4703_v28 = vadd.f32 %v2598_v22, %v2053_v41  ;;  %v2624_v22 = vpop.f32.mrf.mxu1  ;;  %2818 = vmatmul.mubr.bf16.gmra.mxu1 %v3817_v56 }
 0x18f   :  { %v2055_v54 = vpop.f32.mrf.mxu0  ;;  %3500 = vmatprep.mubr.msk.bf16.mxu1 %vm1687_vm0, %v3821_v40 }
 0x190   :  { %v2627_v51 = vpop.f32.mrf.mxu1 }
 0x191   :  { %v2058_v4 = vpop.f32.mrf.mxu0  ;;  %2249 = vmatmul.mubr.bf16.gmra.mxu0 %v3800_v44  ;;  %v3823_v44 = vld [vmem:[%s5400_s0 + $0x5c8] ss:$16 sps:$4 sm:$0xff]  }
 0x192   :  { %v4716_v6 = vadd.f32 %v2603_v37, %v2058_v4  ;;  %2256 = vmatprep.mubr.bf16.mxu0 %v3808_v9  ;;  %v2629_v23 = vpop.f32.mrf.mxu1  ;;  %v3814_v37 = vld [vmem:[%s5400_s0 + $0x584] ss:$16 sps:$4 sm:$0xff]   ;;  %v3827_v9 = vld [vmem:[%s5400_s0 + $0x5ec] ss:$16 sps:$4 sm:$0xff]  }
 0x193   :  { %v2060_v62 = vpop.f32.mrf.mxu0 }
 0x194   :  { %v2630_v41 = vpop.f32.mrf.mxu1 }
 0x195   :  { %v2061_v21 = vpop.f32.mrf.mxu0 }
 0x196   :  { %v4724_v63 = vadd.f32 %v2606_v42, %v2061_v21  ;;  %v2632_v42 = vpop.f32.mrf.mxu1  ;;  %2826 = vmatmul.mubr.bf16.gmra.mxu1 %v3823_v44  ;;  %v3812_v21 = vld [vmem:[%s5400_s0 + $0x580] ss:$16 sps:$4 sm:$0xff]   ;;  %v3829_v44 = vld [vmem:[%s5400_s0 + $0x5e8] ss:$16 sps:$4 sm:$0xff]  }
 0x197   :  { %v2063_v31 = vpop.f32.mrf.mxu0  ;;  %3501 = vmatprep.mubr.msk.bf16.mxu1 %vm1687_vm0, %v3827_v9  ;;  %v3818_v9 = vld [vmem:[%s5400_s0 + $0x5a0] ss:$16 sps:$4 sm:$0xff]  }
 0x198   :  { %v2635_v4 = vpop.f32.mrf.mxu1 }
 0x199   :  { %v2066_v54 = vpop.f32.mrf.mxu0  ;;  %2257 = vmatmul.mubr.bf16.gmra.mxu0 %v3806_v24 }
 0x19a   :  { %v4737_v56 = vadd.f32 %v2611_v0, %v2066_v54  ;;  %2264 = vmatprep.mubr.bf16.mxu0 %v3814_v37  ;;  %v2637_v23 = vpop.f32.mrf.mxu1  ;;  %v3820_v0 = vld [vmem:[%s5400_s0 + $0x5a4] ss:$16 sps:$4 sm:$0xff]   ;;  %v3833_v54 = vld [vmem:[%s5400_s0 + $0x60c] ss:$16 sps:$4 sm:$0xff]  }
 0x19b   :  { %v2068_v40 = vpop.f32.mrf.mxu0 }
 0x19c   :  { %v2638_v37 = vpop.f32.mrf.mxu1 }
 0x19d   :  { %v2069_v62 = vpop.f32.mrf.mxu0 }
 0x19e   :  { %v4745_v31 = vadd.f32 %v2614_v14, %v2069_v62  ;;  %v2640_v14 = vpop.f32.mrf.mxu1  ;;  %2834 = vmatmul.mubr.bf16.gmra.mxu1 %v3829_v44  ;;  %v3835_v44 = vld [vmem:[%s5400_s0 + $0x608] ss:$16 sps:$4 sm:$0xff]  }
 0x19f   :  { %v2071_v24 = vpop.f32.mrf.mxu0  ;;  %3502 = vmatprep.mubr.msk.bf16.mxu1 %vm1687_vm0, %v3833_v54  ;;  %v3824_v54 = vld [vmem:[%s5400_s0 + $0x5c0] ss:$16 sps:$4 sm:$0xff]  }
 0x1a0   :  { %v2643_v23 = vpop.f32.mrf.mxu1 }
 0x1a1   :  { %v2074_v42 = vpop.f32.mrf.mxu0  ;;  %2265 = vmatmul.mubr.bf16.gmra.mxu0 %v3812_v21 }
 0x1a2   :  { %v4758_v40 = vadd.f32 %v2619_v16, %v2074_v42  ;;  %2272 = vmatprep.mubr.bf16.mxu0 %v3820_v0  ;;  %v2645_v46 = vpop.f32.mrf.mxu1  ;;  %v3826_v16 = vld [vmem:[%s5400_s0 + $0x5c4] ss:$16 sps:$4 sm:$0xff]   ;;  %v3839_v42 = vld [vmem:[%s5400_s0 + $0x62c] ss:$16 sps:$4 sm:$0xff]  }
 0x1a3   :  { %v2076_v62 = vpop.f32.mrf.mxu0 }
 0x1a4   :  { %v2646_v0 = vpop.f32.mrf.mxu1 }
 0x1a5   :  { %v2077_v22 = vpop.f32.mrf.mxu0 }
 0x1a6   :  { %v4766_v15 = vadd.f32 %v2622_v55, %v2077_v22  ;;  %v2648_v55 = vpop.f32.mrf.mxu1  ;;  %2842 = vmatmul.mubr.bf16.gmra.mxu1 %v3835_v44  ;;  %v3841_v44 = vld [vmem:[%s5400_s0 + $0x628] ss:$16 sps:$4 sm:$0xff]  }
 0x1a7   :  { %v2079_v21 = vpop.f32.mrf.mxu0  ;;  %3503 = vmatprep.mubr.msk.bf16.mxu1 %vm1687_vm0, %v3839_v42  ;;  %v3830_v42 = vld [vmem:[%s5400_s0 + $0x5e0] ss:$16 sps:$4 sm:$0xff]  }
 0x1a8   :  { %v2651_v62 = vpop.f32.mrf.mxu1 }
 0x1a9   :  { %v2082_v46 = vpop.f32.mrf.mxu0  ;;  %2273 = vmatmul.mubr.bf16.gmra.mxu0 %v3818_v9 }
 0x1aa   :  { %v4779_v22 = vadd.f32 %v2627_v51, %v2082_v46  ;;  %2280 = vmatprep.mubr.bf16.mxu0 %v3826_v16  ;;  %v2653_v60 = vpop.f32.mrf.mxu1  ;;  %v3832_v51 = vld [vmem:[%s5400_s0 + $0x5e4] ss:$16 sps:$4 sm:$0xff]   ;;  %v3845_v46 = vld [vmem:[%s5400_s0 + $0x64c] ss:$16 sps:$4 sm:$0xff]  }
 0x1ab   :  { %v2084_v14 = vpop.f32.mrf.mxu0 }
 0x1ac   :  { %v2654_v16 = vpop.f32.mrf.mxu1 }
 0x1ad   :  { %v2085_v24 = vpop.f32.mrf.mxu0 }
 0x1ae   :  { %v4787_v32 = vadd.f32 %v2630_v41, %v2085_v24  ;;  %v2656_v41 = vpop.f32.mrf.mxu1  ;;  %2850 = vmatmul.mubr.bf16.gmra.mxu1 %v3841_v44  ;;  %v3847_v44 = vld [vmem:[%s5400_s0 + $0x648] ss:$16 sps:$4 sm:$0xff]  }
 0x1af   :  { %v2087_v9 = vpop.f32.mrf.mxu0  ;;  %3504 = vmatprep.mubr.msk.bf16.mxu1 %vm1687_vm0, %v3845_v46  ;;  %v3836_v46 = vld [vmem:[%s5400_s0 + $0x600] ss:$16 sps:$4 sm:$0xff]  }
 0x1b0   :  { %v2659_v14 = vpop.f32.mrf.mxu1 }
 0x1b1   :  { %v2090_v60 = vpop.f32.mrf.mxu0  ;;  %2281 = vmatmul.mubr.bf16.gmra.mxu0 %v3824_v54 }
 0x1b2   :  { %v4800_v24 = vadd.f32 %v2635_v4, %v2090_v60  ;;  %2288 = vmatprep.mubr.bf16.mxu0 %v3832_v51  ;;  %v2661_v7 = vpop.f32.mrf.mxu1  ;;  %v3838_v4 = vld [vmem:[%s5400_s0 + $0x604] ss:$16 sps:$4 sm:$0xff]   ;;  %v3851_v60 = vld [vmem:[%s5400_s0 + $0x66c] ss:$16 sps:$4 sm:$0xff]  }
 0x1b3   :  { %v2092_v55 = vpop.f32.mrf.mxu0 }
 0x1b4   :  { %v2662_v51 = vpop.f32.mrf.mxu1 }
 0x1b5   :  { %v2093_v21 = vpop.f32.mrf.mxu0 }
 0x1b6   :  { %v4808_v1 = vadd.f32 %v2638_v37, %v2093_v21  ;;  %v2664_v37 = vpop.f32.mrf.mxu1  ;;  %2858 = vmatmul.mubr.bf16.gmra.mxu1 %v3847_v44  ;;  %v3853_v44 = vld [vmem:[%s5400_s0 + $0x668] ss:$16 sps:$4 sm:$0xff]  }
 0x1b7   :  { %v2095_v54 = vpop.f32.mrf.mxu0  ;;  %3505 = vmatprep.mubr.msk.bf16.mxu1 %vm1687_vm0, %v3851_v60  ;;  %v3842_v60 = vld [vmem:[%s5400_s0 + $0x620] ss:$16 sps:$4 sm:$0xff]  }
 0x1b8   :  { %5460 = vst [vmem:[#allocation21_spill] sm:$0xff] %v4808_v1  ;;  %v2667_v55 = vpop.f32.mrf.mxu1 }
 0x1b9   :  { %v2098_v7 = vpop.f32.mrf.mxu0  ;;  %2289 = vmatmul.mubr.bf16.gmra.mxu0 %v3830_v42 }
 0x1ba   :  { %v4821_v21 = vadd.f32 %v2643_v23, %v2098_v7  ;;  %2296 = vmatprep.mubr.bf16.mxu0 %v3838_v4  ;;  %v2669_v1 = vpop.f32.mrf.mxu1  ;;  %v3844_v23 = vld [vmem:[%s5400_s0 + $0x624] ss:$16 sps:$4 sm:$0xff]   ;;  %v3857_v7 = vld [vmem:[%s5400_s0 + $0x68c] ss:$16 sps:$4 sm:$0xff]  }
 0x1bb   :  { %v2100_v41 = vpop.f32.mrf.mxu0 }
 0x1bc   :  { %5461 = vst [vmem:[#allocation22_spill] sm:$0xff] %v4821_v21  ;;  %v2670_v4 = vpop.f32.mrf.mxu1 }
 0x1bd   :  { %v2101_v9 = vpop.f32.mrf.mxu0 }
 0x1be   :  { %v4829_v50 = vadd.f32 %v2646_v0, %v2101_v9  ;;  %v2672_v0 = vpop.f32.mrf.mxu1  ;;  %2866 = vmatmul.mubr.bf16.gmra.mxu1 %v3853_v44  ;;  %v3859_v44 = vld [vmem:[%s5400_s0 + $0x688] ss:$16 sps:$4 sm:$0xff]  }
 0x1bf   :  { %v2103_v42 = vpop.f32.mrf.mxu0  ;;  %3506 = vmatprep.mubr.msk.bf16.mxu1 %vm1687_vm0, %v3857_v7  ;;  %v3848_v7 = vld [vmem:[%s5400_s0 + $0x640] ss:$16 sps:$4 sm:$0xff]  }
 0x1c0   :  { %5462 = vst [vmem:[#allocation23_spill] sm:$0xff] %v4829_v50  ;;  %v2675_v41 = vpop.f32.mrf.mxu1 }
 0x1c1   :  { %v2106_v1 = vpop.f32.mrf.mxu0  ;;  %2297 = vmatmul.mubr.bf16.gmra.mxu0 %v3836_v46 }
 0x1c2   :  { %v4842_v9 = vadd.f32 %v2651_v62, %v2106_v1  ;;  %2304 = vmatprep.mubr.bf16.mxu0 %v3844_v23  ;;  %v2677_v50 = vpop.f32.mrf.mxu1  ;;  %v3850_v62 = vld [vmem:[%s5400_s0 + $0x644] ss:$16 sps:$4 sm:$0xff]   ;;  %v3863_v1 = vld [vmem:[%s5400_s0 + $0x6ac] ss:$16 sps:$4 sm:$0xff]  }
 0x1c3   :  { %v2108_v37 = vpop.f32.mrf.mxu0 }
 0x1c4   :  { %5463 = vst [vmem:[#allocation24_spill] sm:$0xff] %v4842_v9  ;;  %v2678_v23 = vpop.f32.mrf.mxu1 }
 0x1c5   :  { %v2109_v54 = vpop.f32.mrf.mxu0 }
 0x1c6   :  { %v4850_v2 = vadd.f32 %v2654_v16, %v2109_v54  ;;  %v2680_v16 = vpop.f32.mrf.mxu1  ;;  %2874 = vmatmul.mubr.bf16.gmra.mxu1 %v3859_v44  ;;  %v3865_v44 = vld [vmem:[%s5400_s0 + $0x6a8] ss:$16 sps:$4 sm:$0xff]  }
 0x1c7   :  { %v2111_v46 = vpop.f32.mrf.mxu0  ;;  %3507 = vmatprep.mubr.msk.bf16.mxu1 %vm1687_vm0, %v3863_v1  ;;  %v3854_v1 = vld [vmem:[%s5400_s0 + $0x660] ss:$16 sps:$4 sm:$0xff]  }
 0x1c8   :  { %5464 = vst [vmem:[#allocation25_spill] sm:$0xff] %v4850_v2  ;;  %v2683_v37 = vpop.f32.mrf.mxu1 }
 0x1c9   :  { %v2114_v50 = vpop.f32.mrf.mxu0  ;;  %2305 = vmatmul.mubr.bf16.gmra.mxu0 %v3842_v60 }
 0x1ca   :  { %v4863_v54 = vadd.f32 %v2659_v14, %v2114_v50  ;;  %2312 = vmatprep.mubr.bf16.mxu0 %v3850_v62  ;;  %v2685_v2 = vpop.f32.mrf.mxu1  ;;  %v3856_v14 = vld [vmem:[%s5400_s0 + $0x664] ss:$16 sps:$4 sm:$0xff]   ;;  %v3869_v50 = vld [vmem:[%s5400_s0 + $0x6cc] ss:$16 sps:$4 sm:$0xff]  }
 0x1cb   :  { %v2116_v0 = vpop.f32.mrf.mxu0 }
 0x1cc   :  { %5465 = vst [vmem:[#allocation26_spill] sm:$0xff] %v4863_v54  ;;  %v2686_v62 = vpop.f32.mrf.mxu1 }
 0x1cd   :  { %v2117_v42 = vpop.f32.mrf.mxu0 }
 0x1ce   :  { %v4871_v20 = vadd.f32 %v2662_v51, %v2117_v42  ;;  %v2688_v51 = vpop.f32.mrf.mxu1  ;;  %2882 = vmatmul.mubr.bf16.gmra.mxu1 %v3865_v44  ;;  %v3871_v44 = vld [vmem:[%s5400_s0 + $0x6c8] ss:$16 sps:$4 sm:$0xff]  }
 0x1cf   :  { %v2119_v60 = vpop.f32.mrf.mxu0  ;;  %3508 = vmatprep.mubr.msk.bf16.mxu1 %vm1687_vm0, %v3869_v50  ;;  %v3860_v50 = vld [vmem:[%s5400_s0 + $0x680] ss:$16 sps:$4 sm:$0xff]  }
 0x1d0   :  { %5466 = vst [vmem:[#allocation27_spill] sm:$0xff] %v4871_v20  ;;  %v2691_v0 = vpop.f32.mrf.mxu1 }
 0x1d1   :  { %v2122_v2 = vpop.f32.mrf.mxu0  ;;  %2313 = vmatmul.mubr.bf16.gmra.mxu0 %v3848_v7 }
 0x1d2   :  { %v4884_v42 = vadd.f32 %v2667_v55, %v2122_v2  ;;  %2320 = vmatprep.mubr.bf16.mxu0 %v3856_v14  ;;  %v2693_v20 = vpop.f32.mrf.mxu1  ;;  %v3862_v55 = vld [vmem:[%s5400_s0 + $0x684] ss:$16 sps:$4 sm:$0xff]   ;;  %v3875_v2 = vld [vmem:[%s5400_s0 + $0x6ec] ss:$16 sps:$4 sm:$0xff]  }
 0x1d3   :  { %v2124_v16 = vpop.f32.mrf.mxu0 }
 0x1d4   :  { %5467 = vst [vmem:[#allocation28_spill] sm:$0xff] %v4884_v42  ;;  %v2694_v14 = vpop.f32.mrf.mxu1 }
 0x1d5   :  { %v2125_v46 = vpop.f32.mrf.mxu0 }
 0x1d6   :  { %v4892_v38 = vadd.f32 %v2670_v4, %v2125_v46  ;;  %v2696_v4 = vpop.f32.mrf.mxu1  ;;  %2890 = vmatmul.mubr.bf16.gmra.mxu1 %v3871_v44  ;;  %v3877_v44 = vld [vmem:[%s5400_s0 + $0x6e8] ss:$16 sps:$4 sm:$0xff]  }
 0x1d7   :  { %v2127_v7 = vpop.f32.mrf.mxu0  ;;  %3509 = vmatprep.mubr.msk.bf16.mxu1 %vm1687_vm0, %v3875_v2  ;;  %v3866_v2 = vld [vmem:[%s5400_s0 + $0x6a0] ss:$16 sps:$4 sm:$0xff]  }
 0x1d8   :  { %5468 = vst [vmem:[#allocation29_spill] sm:$0xff] %v4892_v38  ;;  %v2699_v16 = vpop.f32.mrf.mxu1 }
 0x1d9   :  { %v2130_v20 = vpop.f32.mrf.mxu0  ;;  %2321 = vmatmul.mubr.bf16.gmra.mxu0 %v3854_v1 }
 0x1da   :  { %v4905_v46 = vadd.f32 %v2675_v41, %v2130_v20  ;;  %2328 = vmatprep.mubr.bf16.mxu0 %v3862_v55  ;;  %v2701_v38 = vpop.f32.mrf.mxu1  ;;  %v3868_v41 = vld [vmem:[%s5400_s0 + $0x6a4] ss:$16 sps:$4 sm:$0xff]   ;;  %v3881_v20 = vld [vmem:[%s5400_s0 + $0x70c] ss:$16 sps:$4 sm:$0xff]  }
 0x1db   :  { %v2132_v51 = vpop.f32.mrf.mxu0 }
 0x1dc   :  { %5469 = vst [vmem:[#allocation30_spill] sm:$0xff] %v4905_v46  ;;  %v2702_v55 = vpop.f32.mrf.mxu1 }
 0x1dd   :  { %v2133_v60 = vpop.f32.mrf.mxu0 }
 0x1de   :  { %v4913_v57 = vadd.f32 %v2678_v23, %v2133_v60  ;;  %v2704_v23 = vpop.f32.mrf.mxu1  ;;  %2898 = vmatmul.mubr.bf16.gmra.mxu1 %v3877_v44  ;;  %v3883_v44 = vld [vmem:[%s5400_s0 + $0x708] ss:$16 sps:$4 sm:$0xff]  }
 0x1df   :  { %v2135_v1 = vpop.f32.mrf.mxu0  ;;  %3510 = vmatprep.mubr.msk.bf16.mxu1 %vm1687_vm0, %v3881_v20  ;;  %v3872_v20 = vld [vmem:[%s5400_s0 + $0x6c0] ss:$16 sps:$4 sm:$0xff]  }
 0x1e0   :  { %5470 = vst [vmem:[#allocation31_spill] sm:$0xff] %v4913_v57  ;;  %v2707_v51 = vpop.f32.mrf.mxu1 }
 0x1e1   :  { %v2138_v38 = vpop.f32.mrf.mxu0  ;;  %2329 = vmatmul.mubr.bf16.gmra.mxu0 %v3860_v50 }
 0x1e2   :  { %v4926_v60 = vadd.f32 %v2683_v37, %v2138_v38  ;;  %2336 = vmatprep.mubr.bf16.mxu0 %v3868_v41  ;;  %v2709_v57 = vpop.f32.mrf.mxu1  ;;  %v3874_v37 = vld [vmem:[%s5400_s0 + $0x6c4] ss:$16 sps:$4 sm:$0xff]   ;;  %v3887_v38 = vld [vmem:[%s5400_s0 + $0x72c] ss:$16 sps:$4 sm:$0xff]  }
 0x1e3   :  { %v2140_v4 = vpop.f32.mrf.mxu0 }
 0x1e4   :  { %5471 = vst [vmem:[#allocation32_spill] sm:$0xff] %v4926_v60  ;;  %v2710_v41 = vpop.f32.mrf.mxu1  ;;  %v3922_v60 = vld [vmem:[%s5400_s0 + $0x7c4] ss:$16 sps:$4 sm:$0xff]  }
 0x1e5   :  { %v2141_v7 = vpop.f32.mrf.mxu0 }
 0x1e6   :  { %v4934_v13 = vadd.f32 %v2686_v62, %v2141_v7  ;;  %v2712_v62 = vpop.f32.mrf.mxu1  ;;  %2906 = vmatmul.mubr.bf16.gmra.mxu1 %v3883_v44  ;;  %v3889_v44 = vld [vmem:[%s5400_s0 + $0x728] ss:$16 sps:$4 sm:$0xff]  }
 0x1e7   :  { %v2143_v50 = vpop.f32.mrf.mxu0  ;;  %3511 = vmatprep.mubr.msk.bf16.mxu1 %vm1687_vm0, %v3887_v38  ;;  %v3878_v38 = vld [vmem:[%s5400_s0 + $0x6e0] ss:$16 sps:$4 sm:$0xff]  }
 0x1e8   :  { %5472 = vst [vmem:[#allocation33_spill] sm:$0xff] %v4934_v13  ;;  %v2715_v4 = vpop.f32.mrf.mxu1 }
 0x1e9   :  { %v2146_v57 = vpop.f32.mrf.mxu0  ;;  %2337 = vmatmul.mubr.bf16.gmra.mxu0 %v3866_v2 }
 0x1ea   :  { %v4947_v7 = vadd.f32 %v2691_v0, %v2146_v57  ;;  %2344 = vmatprep.mubr.bf16.mxu0 %v3874_v37  ;;  %v2717_v13 = vpop.f32.mrf.mxu1  ;;  %v3880_v0 = vld [vmem:[%s5400_s0 + $0x6e4] ss:$16 sps:$4 sm:$0xff]   ;;  %v3893_v57 = vld [vmem:[%s5400_s0 + $0x74c] ss:$16 sps:$4 sm:$0xff]  }
 0x1eb   :  { %v2148_v23 = vpop.f32.mrf.mxu0 }
 0x1ec   :  { %5473 = vst [vmem:[#allocation34_spill] sm:$0xff] %v4947_v7  ;;  %v2718_v37 = vpop.f32.mrf.mxu1 }
 0x1ed   :  { %v2149_v1 = vpop.f32.mrf.mxu0 }
 0x1ee   :  { %v4955_v36 = vadd.f32 %v2694_v14, %v2149_v1  ;;  %v2720_v14 = vpop.f32.mrf.mxu1  ;;  %2914 = vmatmul.mubr.bf16.gmra.mxu1 %v3889_v44  ;;  %v3895_v44 = vld [vmem:[%s5400_s0 + $0x748] ss:$16 sps:$4 sm:$0xff]  }
 0x1ef   :  { %v2151_v2 = vpop.f32.mrf.mxu0  ;;  %3512 = vmatprep.mubr.msk.bf16.mxu1 %vm1687_vm0, %v3893_v57  ;;  %v3884_v57 = vld [vmem:[%s5400_s0 + $0x700] ss:$16 sps:$4 sm:$0xff]  }
 0x1f0   :  { %5474 = vst [vmem:[#allocation35_spill] sm:$0xff] %v4955_v36  ;;  %v2723_v23 = vpop.f32.mrf.mxu1 }
 0x1f1   :  { %v2154_v13 = vpop.f32.mrf.mxu0  ;;  %2345 = vmatmul.mubr.bf16.gmra.mxu0 %v3872_v20 }
 0x1f2   :  { %v4968_v1 = vadd.f32 %v2699_v16, %v2154_v13  ;;  %2352 = vmatprep.mubr.bf16.mxu0 %v3880_v0  ;;  %v2725_v36 = vpop.f32.mrf.mxu1  ;;  %v3886_v16 = vld [vmem:[%s5400_s0 + $0x704] ss:$16 sps:$4 sm:$0xff]   ;;  %v3899_v13 = vld [vmem:[%s5400_s0 + $0x76c] ss:$16 sps:$4 sm:$0xff]  }
 0x1f3   :  { %v2156_v62 = vpop.f32.mrf.mxu0 }
 0x1f4   :  { %5475 = vst [vmem:[#allocation36_spill] sm:$0xff] %v4968_v1  ;;  %v2726_v0 = vpop.f32.mrf.mxu1 }
 0x1f5   :  { %v2157_v50 = vpop.f32.mrf.mxu0 }
 0x1f6   :  { %v4976_v58 = vadd.f32 %v2702_v55, %v2157_v50  ;;  %v2728_v55 = vpop.f32.mrf.mxu1  ;;  %2922 = vmatmul.mubr.bf16.gmra.mxu1 %v3895_v44  ;;  %v3901_v44 = vld [vmem:[%s5400_s0 + $0x768] ss:$16 sps:$4 sm:$0xff]  }
 0x1f7   :  { %v2159_v20 = vpop.f32.mrf.mxu0  ;;  %3513 = vmatprep.mubr.msk.bf16.mxu1 %vm1687_vm0, %v3899_v13  ;;  %v3890_v13 = vld [vmem:[%s5400_s0 + $0x720] ss:$16 sps:$4 sm:$0xff]  }
 0x1f8   :  { %5476 = vst [vmem:[#allocation37_spill] sm:$0xff] %v4976_v58  ;;  %v2731_v62 = vpop.f32.mrf.mxu1 }
 0x1f9   :  { %v2162_v36 = vpop.f32.mrf.mxu0  ;;  %2353 = vmatmul.mubr.bf16.gmra.mxu0 %v3878_v38 }
 0x1fa   :  { %v4989_v50 = vadd.f32 %v2707_v51, %v2162_v36  ;;  %2360 = vmatprep.mubr.bf16.mxu0 %v3886_v16  ;;  %v2733_v58 = vpop.f32.mrf.mxu1  ;;  %v3892_v51 = vld [vmem:[%s5400_s0 + $0x724] ss:$16 sps:$4 sm:$0xff]   ;;  %v3905_v36 = vld [vmem:[%s5400_s0 + $0x78c] ss:$16 sps:$4 sm:$0xff]  }
 0x1fb   :  { %v2164_v14 = vpop.f32.mrf.mxu0 }
 0x1fc   :  { %5477 = vst [vmem:[#allocation38_spill] sm:$0xff] %v4989_v50  ;;  %v2734_v16 = vpop.f32.mrf.mxu1 }
 0x1fd   :  { %v2165_v2 = vpop.f32.mrf.mxu0 }
 0x1fe   :  { %v4997_v18 = vadd.f32 %v2710_v41, %v2165_v2  ;;  %v2736_v41 = vpop.f32.mrf.mxu1  ;;  %2930 = vmatmul.mubr.bf16.gmra.mxu1 %v3901_v44  ;;  %v3911_v44 = vld [vmem:[%s5400_s0 + $0x7ac] ss:$16 sps:$4 sm:$0xff]  }
 0x1ff   :  { %v2167_v38 = vpop.f32.mrf.mxu0  ;;  %3514 = vmatprep.mubr.msk.bf16.mxu1 %vm1687_vm0, %v3905_v36 }
 0x200   :  { %5478 = vst [vmem:[#allocation39_spill] sm:$0xff] %v4997_v18  ;;  %v2739_v14 = vpop.f32.mrf.mxu1 }
 0x201   :  { %v2170_v58 = vpop.f32.mrf.mxu0  ;;  %2361 = vmatmul.mubr.bf16.gmra.mxu0 %v3884_v57  ;;  %v3898_v57 = vld [vmem:[%s5400_s0 + $0x744] ss:$16 sps:$4 sm:$0xff]  }
 0x202   :  { %v5010_v2 = vadd.f32 %v2715_v4, %v2170_v58  ;;  %2368 = vmatprep.mubr.bf16.mxu0 %v3892_v51  ;;  %v2741_v20 = vpop.f32.mrf.mxu1  ;;  %v3907_v51 = vld [vmem:[%s5400_s0 + $0x788] ss:$16 sps:$4 sm:$0xff]  }
 0x203   :  { %v2172_v55 = vpop.f32.mrf.mxu0 }
 0x204   :  { %v2742_v58 = vpop.f32.mrf.mxu1 }
 0x205   :  { %v2173_v38 = vpop.f32.mrf.mxu0 }
 0x206   :  { %v5016_v18 = vadd.f32 %v2718_v37, %v2173_v38  ;;  %v2744_v41 = vpop.f32.mrf.mxu1  ;;  %2938 = vmatmul.mubr.bf16.gmra.mxu1 %v3907_v51  ;;  %v3917_v51 = vld [vmem:[%s5400_s0 + $0x7cc] ss:$16 sps:$4 sm:$0xff]  }
 0x207   :  { %v2175_v4 = vpop.f32.mrf.mxu0  ;;  %3515 = vmatprep.mubr.msk.bf16.mxu1 %vm1687_vm0, %v3911_v44 }
 0x208   :  { %v2747_v55 = vpop.f32.mrf.mxu1  ;;  %v3896_v4 = vld [vmem:[%s5400_s0 + $0x740] ss:$16 sps:$4 sm:$0xff]  }
 0x209   :  { %v2178_v36 = vpop.f32.mrf.mxu0  ;;  %2369 = vmatmul.mubr.bf16.gmra.mxu0 %v3890_v13  ;;  %v3904_v13 = vld [vmem:[%s5400_s0 + $0x764] ss:$16 sps:$4 sm:$0xff]  }
 0x20a   :  { %v5027_v20 = vadd.f32 %v2723_v23, %v2178_v36  ;;  %2376 = vmatprep.mubr.bf16.mxu0 %v3898_v57  ;;  %v2749_v45 = vpop.f32.mrf.mxu1  ;;  %v3913_v57 = vld [vmem:[%s5400_s0 + $0x7a8] ss:$16 sps:$4 sm:$0xff]  }
 0x20b   :  { %v2180_v37 = vpop.f32.mrf.mxu0 }
 0x20c   :  { %v2750_v36 = vpop.f32.mrf.mxu1 }
 0x20d   :  { %v2181_v38 = vpop.f32.mrf.mxu0 }
 0x20e   :  { %v5033_v50 = vadd.f32 %v2726_v0, %v2181_v38  ;;  %v2752_v41 = vpop.f32.mrf.mxu1  ;;  %2946 = vmatmul.mubr.bf16.gmra.mxu1 %v3913_v57  ;;  %v3923_v57 = vld [vmem:[%s5400_s0 + $0x7ec] ss:$16 sps:$4 sm:$0xff]  }
 0x20f   :  { %v2183_v23 = vpop.f32.mrf.mxu0  ;;  %3516 = vmatprep.mubr.msk.bf16.mxu1 %vm1687_vm0, %v3917_v51 }
 0x210   :  { %v2755_v37 = vpop.f32.mrf.mxu1  ;;  %v3902_v23 = vld [vmem:[%s5400_s0 + $0x760] ss:$16 sps:$4 sm:$0xff]  }
 0x211   :  { %v2186_v44 = vpop.f32.mrf.mxu0  ;;  %2377 = vmatmul.mubr.bf16.gmra.mxu0 %v3896_v4  ;;  %v3910_v4 = vld [vmem:[%s5400_s0 + $0x784] ss:$16 sps:$4 sm:$0xff]  }
 0x212   :  { %v5044_v45 = vadd.f32 %v2731_v62, %v2186_v44  ;;  %2384 = vmatprep.mubr.bf16.mxu0 %v3904_v13  ;;  %v2757_v35 = vpop.f32.mrf.mxu1  ;;  %v3919_v13 = vld [vmem:[%s5400_s0 + $0x7c8] ss:$16 sps:$4 sm:$0xff]  }
 0x213   :  { %v2188_v0 = vpop.f32.mrf.mxu0 }
 0x214   :  { %v2758_v44 = vpop.f32.mrf.mxu1 }
 0x215   :  { %v2189_v38 = vpop.f32.mrf.mxu0 }
 0x216   :  { %v5050_v1 = vadd.f32 %v2734_v16, %v2189_v38  ;;  %v2760_v41 = vpop.f32.mrf.mxu1  ;;  %2954 = vmatmul.mubr.bf16.gmra.mxu1 %v3919_v13 }
 0x217   :  { %v2191_v62 = vpop.f32.mrf.mxu0  ;;  %3517 = vmatprep.mubr.msk.bf16.mxu1 %vm1687_vm0, %v3923_v57 }
 0x218   :  { %v2763_v0 = vpop.f32.mrf.mxu1  ;;  %v3908_v62 = vld [vmem:[%s5400_s0 + $0x780] ss:$16 sps:$4 sm:$0xff]  }
 0x219   :  { %v2194_v51 = vpop.f32.mrf.mxu0  ;;  %2385 = vmatmul.mubr.bf16.gmra.mxu0 %v3902_v23  ;;  %v3916_v23 = vld [vmem:[%s5400_s0 + $0x7a4] ss:$16 sps:$4 sm:$0xff]  }
 0x21a   :  { %v5061_v35 = vadd.f32 %v2739_v14, %v2194_v51  ;;  %2392 = vmatprep.mubr.bf16.mxu0 %v3910_v4  ;;  %v2765_v8 = vpop.f32.mrf.mxu1  ;;  %v3925_v4 = vld [vmem:[%s5400_s0 + $0x7e8] ss:$16 sps:$4 sm:$0xff]  }
 0x21b   :  { %v2196_v16 = vpop.f32.mrf.mxu0 }
 0x21c   :  { %v2766_v51 = vpop.f32.mrf.mxu1 }
 0x21d   :  { %v2197_v38 = vpop.f32.mrf.mxu0 }
 0x21e   :  { %v5067_v7 = vadd.f32 %v2742_v58, %v2197_v38  ;;  %v2768_v57 = vpop.f32.mrf.mxu1  ;;  %2962 = vmatmul.mubr.bf16.gmra.mxu1 %v3925_v4  ;;  %v3914_v38 = vld [vmem:[%s5400_s0 + $0x7a0] ss:$16 sps:$4 sm:$0xff]  }
 0x21f   :  { %v2199_v14 = vpop.f32.mrf.mxu0 }
 0x220   :  { %v2771_v8 = vpop.f32.mrf.mxu1 }
 0x221   :  { %v2202_v13 = vpop.f32.mrf.mxu0  ;;  %2393 = vmatmul.mubr.bf16.gmra.mxu0 %v3908_v62 }
 0x222   :  { %v5075_v41 = vadd.f32 %v2747_v55, %v2202_v13  ;;  %2400 = vmatprep.mubr.bf16.mxu0 %v3916_v23  ;;  %v2773_v14 = vpop.f32.mrf.mxu1 }
 0x223   :  { %v2204_v16 = vpop.f32.mrf.mxu0 }
 0x224   :  { %v2774_v57 = vpop.f32.mrf.mxu1 }
 0x225   :  { %v2205_v58 = vpop.f32.mrf.mxu0 }
 0x226   :  { %v5080_v48 = vadd.f32 %v2750_v36, %v2205_v58  ;;  %v2776_v23 = vpop.f32.mrf.mxu1  ;;  %v3920_v36 = vld [vmem:[%s5400_s0 + $0x7c0] ss:$16 sps:$4 sm:$0xff]  }
 0x227   :  { %v2207_v62 = vpop.f32.mrf.mxu0 }
 0x228   :  { %v2779_v16 = vpop.f32.mrf.mxu1  ;;  %v3928_v62 = vld [vmem:[%s5400_s0 + $0x7e4] ss:$16 sps:$4 sm:$0xff]  }
 0x229   :  { %v2210_v55 = vpop.f32.mrf.mxu0  ;;  %2401 = vmatmul.mubr.bf16.gmra.mxu0 %v3914_v38 }
 0x22a   :  { %v5085_v13 = vadd.f32 %v2755_v37, %v2210_v55  ;;  %2408 = vmatprep.mubr.bf16.mxu0 %v3922_v60  ;;  %v2781_v58 = vpop.f32.mrf.mxu1 }
 0x22b   :  { %v2212_v4 = vpop.f32.mrf.mxu0 }
 0x22c   :  { %v2782_v38 = vpop.f32.mrf.mxu1 }
 0x22d   :  { %v2213_v26 = vpop.f32.mrf.mxu0 }
 0x22e   :  { %v5090_v14 = vadd.f32 %v2758_v44, %v2213_v26  ;;  %v2784_v37 = vpop.f32.mrf.mxu1  ;;  %v3926_v26 = vld [vmem:[%s5400_s0 + $0x7e0] ss:$16 sps:$4 sm:$0xff]  }
 0x22f   :  { %v2215_v46 = vpop.f32.mrf.mxu0 }
 0x230   :  { %v2787_v4 = vpop.f32.mrf.mxu1 }
 0x231   :  { %v2218_v23 = vpop.f32.mrf.mxu0  ;;  %2409 = vmatmul.mubr.bf16.gmra.mxu0 %v3920_v36 }
 0x232   :  { %v5095_v60 = vadd.f32 %v2763_v0, %v2218_v23  ;;  %2416 = vmatprep.mubr.bf16.mxu0 %v3928_v62  ;;  %v2789_v44 = vpop.f32.mrf.mxu1 }
 0x233   :  { %v2220_v55 = vpop.f32.mrf.mxu0 }
 0x234   :  { %v2790_v49 = vpop.f32.mrf.mxu1 }
 0x235   :  { %v2221_v5 = vpop.f32.mrf.mxu0 }
 0x236   :  { %v5100_v58 = vadd.f32 %v2766_v51, %v2221_v5  ;;  %v2792_v54 = vpop.f32.mrf.mxu1 }
 0x237   :  { %v2223_v42 = vpop.f32.mrf.mxu0 }
 0x238   :  { %v2795_v23 = vpop.f32.mrf.mxu1 }
 0x239   :  { %v2226_v46 = vpop.f32.mrf.mxu0  ;;  %2417 = vmatmul.mubr.bf16.gmra.mxu0 %v3926_v26 }
 0x23a   :  { %v5102_v36 = vadd.f32 %v2771_v8, %v2226_v46  ;;  %v2797_v37 = vpop.f32.mrf.mxu1 }
 0x23b   :  { %v2228_v0 = vpop.f32.mrf.mxu0 }
 0x23c   :  { %5479 = vst [vmem:[#allocation40_spill] sm:$0xff] %v5102_v36  ;;  %v2798_v9 = vpop.f32.mrf.mxu1 }
 0x23d   :  { %v2229_v62 = vpop.f32.mrf.mxu0 }
 0x23e   :  { %v5104_v55 = vadd.f32 %v2774_v57, %v2229_v62  ;;  %v2800_v21 = vpop.f32.mrf.mxu1 }
 0x23f   :  { %v2231_v30 = vpop.f32.mrf.mxu0 }
 0x240   :  { %5480 = vst [vmem:[#allocation41_spill] sm:$0xff] %v5104_v55  ;;  %v2803_v42 = vpop.f32.mrf.mxu1 }
 0x241   :  { %v2234_v12 = vpop.f32.mrf.mxu0 }
 0x242   :  { %v5106_v44 = vadd.f32 %v2779_v16, %v2234_v12  ;;  %v2805_v59 = vpop.f32.mrf.mxu1 }
 0x243   :  { %v2236_v5 = vpop.f32.mrf.mxu0 }
 0x244   :  { %5481 = vst [vmem:[#allocation42_spill] sm:$0xff] %v5106_v44  ;;  %v2806_v8 = vpop.f32.mrf.mxu1 }
 0x245   :  { %v2237_v51 = vpop.f32.mrf.mxu0 }
 0x246   :  { %v5108_v26 = vadd.f32 %v2782_v38, %v2237_v51  ;;  %v2808_v0 = vpop.f32.mrf.mxu1 }
 0x247   :  { %v2239_v54 = vpop.f32.mrf.mxu0 }
 0x248   :  { %5482 = vst [vmem:[#allocation43_spill] sm:$0xff] %v5108_v26  ;;  %v2811_v62 = vpop.f32.mrf.mxu1 }
 0x249   :  { %v2242_v46 = vpop.f32.mrf.mxu0 }
 0x24a   :  { %v5110_v36 = vadd.f32 %v2787_v4, %v2242_v46  ;;  %v2813_v37 = vpop.f32.mrf.mxu1 }
 0x24b   :  { %v2244_v57 = vpop.f32.mrf.mxu0 }
 0x24c   :  { %5483 = vst [vmem:[#allocation44_spill] sm:$0xff] %v5110_v36  ;;  %v2814_v21 = vpop.f32.mrf.mxu1 }
 0x24d   :  { %v2245_v30 = vpop.f32.mrf.mxu0 }
 0x24e   :  { %v5112_v55 = vadd.f32 %v2790_v49, %v2245_v30  ;;  %v2816_v5 = vpop.f32.mrf.mxu1 }
 0x24f   :  { %v2247_v12 = vpop.f32.mrf.mxu0 }
 0x250   :  { %5484 = vst [vmem:[#allocation45_spill] sm:$0xff] %v5112_v55  ;;  %v2819_v38 = vpop.f32.mrf.mxu1 }
 0x251   :  { %v2250_v16 = vpop.f32.mrf.mxu0 }
 0x252   :  { %v5114_v44 = vadd.f32 %v2795_v23, %v2250_v16  ;;  %v2821_v54 = vpop.f32.mrf.mxu1 }
 0x253   :  { %v2252_v59 = vpop.f32.mrf.mxu0 }
 0x254   :  { %5485 = vst [vmem:[#allocation46_spill] sm:$0xff] %v5114_v44  ;;  %v2822_v46 = vpop.f32.mrf.mxu1 }
 0x255   :  { %v2253_v51 = vpop.f32.mrf.mxu0 }
 0x256   :  { %v5116_v26 = vadd.f32 %v2798_v9, %v2253_v51  ;;  %v2824_v57 = vpop.f32.mrf.mxu1 }
 0x257   :  { %v2255_v4 = vpop.f32.mrf.mxu0 }
 0x258   :  { %5486 = vst [vmem:[#allocation47_spill] sm:$0xff] %v5116_v26  ;;  %v2827_v30 = vpop.f32.mrf.mxu1 }
 0x259   :  { %v2258_v0 = vpop.f32.mrf.mxu0 }
 0x25a   :  { %v5118_v36 = vadd.f32 %v2803_v42, %v2258_v0  ;;  %v2829_v12 = vpop.f32.mrf.mxu1 }
 0x25b   :  { %v2260_v49 = vpop.f32.mrf.mxu0 }
 0x25c   :  { %5487 = vst [vmem:[#allocation48_spill] sm:$0xff] %v5118_v36  ;;  %v2830_v16 = vpop.f32.mrf.mxu1 }
 0x25d   :  { %v2261_v37 = vpop.f32.mrf.mxu0 }
 0x25e   :  { %v5120_v55 = vadd.f32 %v2806_v8, %v2261_v37  ;;  %v2832_v59 = vpop.f32.mrf.mxu1 }
 0x25f   :  { %v2263_v23 = vpop.f32.mrf.mxu0 }
 0x260   :  { %5488 = vst [vmem:[#allocation49_spill] sm:$0xff] %v5120_v55  ;;  %v2835_v51 = vpop.f32.mrf.mxu1 }
 0x261   :  { %v2266_v5 = vpop.f32.mrf.mxu0 }
 0x262   :  { %v5122_v44 = vadd.f32 %v2811_v62, %v2266_v5  ;;  %v2837_v4 = vpop.f32.mrf.mxu1 }
 0x263   :  { %v2268_v9 = vpop.f32.mrf.mxu0 }
 0x264   :  { %5489 = vst [vmem:[#allocation50_spill] sm:$0xff] %v5122_v44  ;;  %v2838_v0 = vpop.f32.mrf.mxu1 }
 0x265   :  { %v2269_v54 = vpop.f32.mrf.mxu0 }
 0x266   :  { %v5124_v26 = vadd.f32 %v2814_v21, %v2269_v54  ;;  %v2840_v49 = vpop.f32.mrf.mxu1 }
 0x267   :  { %v2271_v42 = vpop.f32.mrf.mxu0 }
 0x268   :  { %5490 = vst [vmem:[#allocation51_spill] sm:$0xff] %v5124_v26  ;;  %v2843_v37 = vpop.f32.mrf.mxu1 }
 0x269   :  { %v2274_v57 = vpop.f32.mrf.mxu0 }
 0x26a   :  { %v5126_v36 = vadd.f32 %v2819_v38, %v2274_v57  ;;  %v2845_v23 = vpop.f32.mrf.mxu1 }
 0x26b   :  { %v2276_v8 = vpop.f32.mrf.mxu0 }
 0x26c   :  { %5491 = vst [vmem:[#allocation52_spill] sm:$0xff] %v5126_v36  ;;  %v2846_v5 = vpop.f32.mrf.mxu1 }
 0x26d   :  { %v2277_v12 = vpop.f32.mrf.mxu0 }
 0x26e   :  { %v5128_v55 = vadd.f32 %v2822_v46, %v2277_v12  ;;  %v2848_v9 = vpop.f32.mrf.mxu1 }
 0x26f   :  { %v2279_v62 = vpop.f32.mrf.mxu0 }
 0x270   :  { %5492 = vst [vmem:[#allocation53_spill] sm:$0xff] %v5128_v55  ;;  %v2851_v54 = vpop.f32.mrf.mxu1 }
 0x271   :  { %v2282_v59 = vpop.f32.mrf.mxu0 }
 0x272   :  { %v5130_v44 = vadd.f32 %v2827_v30, %v2282_v59  ;;  %v2853_v42 = vpop.f32.mrf.mxu1 }
 0x273   :  { %v2284_v21 = vpop.f32.mrf.mxu0 }
 0x274   :  { %5493 = vst [vmem:[#allocation54_spill] sm:$0xff] %v5130_v44  ;;  %v2854_v57 = vpop.f32.mrf.mxu1 }
 0x275   :  { %v2285_v4 = vpop.f32.mrf.mxu0 }
 0x276   :  { %v5132_v26 = vadd.f32 %v2830_v16, %v2285_v4  ;;  %v2856_v8 = vpop.f32.mrf.mxu1 }
 0x277   :  { %v2287_v38 = vpop.f32.mrf.mxu0 }
 0x278   :  { %v2859_v12 = vpop.f32.mrf.mxu1 }
 0x279   :  { %v2290_v49 = vpop.f32.mrf.mxu0 }
 0x27a   :  { %v5134_v36 = vadd.f32 %v2835_v51, %v2290_v49  ;;  %v2861_v62 = vpop.f32.mrf.mxu1  ;;  %v5142_v51 = vld [vmem:[%s5401_s2] ss:$0 sm:$0xff] }
 0x27b   :  { %v2292_v46 = vpop.f32.mrf.mxu0 }
 0x27c   :  { %5494 = vst [vmem:[#allocation55_spill] sm:$0xff] %v5134_v36  ;;  %v2862_v59 = vpop.f32.mrf.mxu1 }
 0x27d   :  { %v2293_v23 = vpop.f32.mrf.mxu0 }
 0x27e   :  { %v5136_v55 = vadd.f32 %v2838_v0, %v2293_v23  ;;  %v2864_v21 = vpop.f32.mrf.mxu1  ;;  %v5496_v0 = vmax.f32 %v4402_v19, %v4674_v52 }
 0x27f   :  { %v2295_v30 = vpop.f32.mrf.mxu0  ;;  %v5497_v21 = vmax.f32 %v4408_v25, %v4682_v10 }
 0x280   :  { %5495 = vst [vmem:[#allocation56_spill] sm:$0xff] %v5136_v55  ;;  %v2867_v16 = vpop.f32.mrf.mxu1 }
 0x281   :  { %v2298_v9 = vpop.f32.mrf.mxu0 }
 0x282   :  { %v2844_v44 = vadd.f32 %v2843_v37, %v2298_v9  ;;  %v2869_v49 = vpop.f32.mrf.mxu1 }
 0x283   :  { %v2300_v42 = vpop.f32.mrf.mxu0 }
 0x284   :  { %v3002_v4 = vmax.f32 %v5010_v2, %v2844_v44  ;;  %v2870_v62 = vpop.f32.mrf.mxu1 }
 0x285   :  { %v2301_v38 = vpop.f32.mrf.mxu0 }
 0x286   :  { %v3034_v8 = vmax.f32 %v5496_v0, %v3002_v4  ;;  %v2847_v46 = vadd.f32 %v2846_v5, %v2301_v38  ;;  %v2872_v2 = vpop.f32.mrf.mxu1  ;;  %v5498_v38 = vmax.f32 %v4419_v33, %v4695_v29 }
 0x287   :  { %v2303_v23 = vpop.f32.mrf.mxu0 }
 0x288   :  { %v3073_v37 = vadd.f32 %v5142_v51, %v3034_v8  ;;  %v3003_v30 = vmax.f32 %v5016_v18, %v2847_v46  ;;  %v2875_v36 = vpop.f32.mrf.mxu1 }
 0x289   :  { %v2306_v9 = vpop.f32.mrf.mxu0 }
 0x28a   :  { %v3105_v44 = vmax.f32 %v3073_v37, 0.0  ;;  %v3035_v42 = vmax.f32 %v5497_v21, %v3003_v30  ;;  %v2852_v55 = vadd.f32 %v2851_v54, %v2306_v9  ;;  %v2877_v18 = vpop.f32.mrf.mxu1  ;;  %v5499_v37 = vmax.f32 %v4425_v39, %v4703_v28 }
 0x28b   :  { %v2308_v49 = vpop.f32.mrf.mxu0 }
 0x28c   :  { %3137 = vst [vmem:[%s5402_s3] sm:$0xff] %v3105_v44  ;;  %v3074_v19 = vadd.f32 %v5142_v51, %v3035_v42  ;;  %v3004_v52 = vmax.f32 %v5027_v20, %v2852_v55  ;;  %v2878_v54 = vpop.f32.mrf.mxu1  ;;  %v5500_v42 = vmax.f32 %v4436_v47, %v4716_v6 }
 0x28d   :  { %v2309_v5 = vpop.f32.mrf.mxu0 }
 0x28e   :  { %v3106_v4 = vmax.f32 %v3074_v19, 0.0  ;;  %v3036_v0 = vmax.f32 %v5498_v38, %v3004_v52  ;;  %v2855_v25 = vadd.f32 %v2854_v57, %v2309_v5  ;;  %v2880_v20 = vpop.f32.mrf.mxu1 }
 0x28f   :  { %v2311_v10 = vpop.f32.mrf.mxu0 }
 0x290   :  { %3138 = vst [vmem:[%s5402_s3 + $0x8] sm:$0xff] %v3106_v4  ;;  %v3075_v8 = vadd.f32 %v5142_v51, %v3036_v0  ;;  %v3005_v46 = vmax.f32 %v5033_v50, %v2855_v25  ;;  %v2883_v57 = vpop.f32.mrf.mxu1  ;;  %v5501_v4 = vmax.f32 %v4442_v53, %v4724_v63 }
 0x291   :  { %v2314_v23 = vpop.f32.mrf.mxu0 }
 0x292   :  { %v3107_v55 = vmax.f32 %v3075_v8, 0.0  ;;  %v3037_v30 = vmax.f32 %v5499_v37, %v3005_v46  ;;  %v2860_v33 = vadd.f32 %v2859_v12, %v2314_v23  ;;  %v2885_v50 = vpop.f32.mrf.mxu1  ;;  %v5502_v46 = vmax.f32 %v4453_v61, %v4737_v56 }
 0x293   :  { %v2316_v29 = vpop.f32.mrf.mxu0 }
 0x294   :  { %3139 = vst [vmem:[%s5402_s3 + $0x10] sm:$0xff] %v3107_v55  ;;  %v3076_v9 = vadd.f32 %v5142_v51, %v3037_v30  ;;  %v3006_v2 = vmax.f32 %v5044_v45, %v2860_v33  ;;  %v2886_v12 = vpop.f32.mrf.mxu1  ;;  %v5503_v33 = vmax.f32 %v4459_v3, %v4745_v31 }
 0x295   :  { %v2317_v44 = vpop.f32.mrf.mxu0 }
 0x296   :  { %v3108_v21 = vmax.f32 %v3076_v9, 0.0  ;;  %v3038_v49 = vmax.f32 %v5500_v42, %v3006_v2  ;;  %v2863_v39 = vadd.f32 %v2862_v59, %v2317_v44  ;;  %v2888_v45 = vpop.f32.mrf.mxu1 }
 0x297   :  { %v2319_v28 = vpop.f32.mrf.mxu0 }
 0x298   :  { %3140 = vst [vmem:[%s5402_s3 + $0x18] sm:$0xff] %v3108_v21  ;;  %v3077_v19 = vadd.f32 %v5142_v51, %v3038_v49  ;;  %v3007_v52 = vmax.f32 %v5050_v1, %v2863_v39  ;;  %v2891_v59 = vpop.f32.mrf.mxu1  ;;  %v5504_v21 = vmax.f32 %v4470_v11, %v4758_v40 }
 0x299   :  { %v2322_v5 = vpop.f32.mrf.mxu0 }
 0x29a   :  { %v3109_v18 = vmax.f32 %v3077_v19, 0.0  ;;  %v3039_v38 = vmax.f32 %v5501_v4, %v3007_v52  ;;  %v2868_v47 = vadd.f32 %v2867_v16, %v2322_v5  ;;  %v2893_v1 = vpop.f32.mrf.mxu1  ;;  %v5505_v52 = vmax.f32 %v4476_v17, %v4766_v15 }
 0x29b   :  { %v2324_v6 = vpop.f32.mrf.mxu0 }
 0x29c   :  { %3141 = vst [vmem:[%s5402_s3 + $0x20] sm:$0xff] %v3109_v18  ;;  %v3078_v0 = vadd.f32 %v5142_v51, %v3039_v38  ;;  %v3008_v25 = vmax.f32 %v5061_v35, %v2868_v47  ;;  %v2894_v16 = vpop.f32.mrf.mxu1  ;;  %v5506_v47 = vmax.f32 %v4487_v27, %v4779_v22 }
 0x29d   :  { %v2325_v10 = vpop.f32.mrf.mxu0 }
 0x29e   :  { %v3110_v8 = vmax.f32 %v3078_v0, 0.0  ;;  %v3040_v23 = vmax.f32 %v5502_v46, %v3008_v25  ;;  %v2871_v53 = vadd.f32 %v2870_v62, %v2325_v10  ;;  %v2896_v35 = vpop.f32.mrf.mxu1 }
 0x29f   :  { %v2327_v63 = vpop.f32.mrf.mxu0 }
 0x2a0   :  { %3142 = vst [vmem:[%s5402_s3 + $0x28] sm:$0xff] %v3110_v8  ;;  %v3079_v20 = vadd.f32 %v5142_v51, %v3040_v23  ;;  %v3009_v55 = vmax.f32 %v5067_v7, %v2871_v53  ;;  %v2899_v62 = vpop.f32.mrf.mxu1  ;;  %v5507_v8 = vmax.f32 %v4493_v34, %v4787_v32 }
 0x2a1   :  { %v2330_v37 = vpop.f32.mrf.mxu0 }
 0x2a2   :  { %v3111_v30 = vmax.f32 %v3079_v20, 0.0  ;;  %v3041_v29 = vmax.f32 %v5503_v33, %v3009_v55  ;;  %v2876_v61 = vadd.f32 %v2875_v36, %v2330_v37  ;;  %v2901_v7 = vpop.f32.mrf.mxu1  ;;  %v5508_v55 = vmax.f32 %v4504_v43, %v4800_v24 }
 0x2a3   :  { %v2332_v56 = vpop.f32.mrf.mxu0  ;;  %v5512_v7 = vld [vmem:[#allocation40_spill] sm:$0xff] }
 0x2a4   :  { %3143 = vst [vmem:[%s5402_s3 + $0x30] sm:$0xff] %v3111_v30  ;;  %v3080_v9 = vadd.f32 %v5142_v51, %v3041_v29  ;;  %v3010_v2 = vmax.f32 %v5075_v41, %v2876_v61  ;;  %v2902_v36 = vpop.f32.mrf.mxu1  ;;  %v5509_v61 = vld [vmem:[#allocation2_spill] sm:$0xff]  ;;  %v5510_v56 = vld [vmem:[#allocation21_spill] sm:$0xff] }
 0x2a5   :  { %v2333_v44 = vpop.f32.mrf.mxu0 }
 0x2a6   :  { %v3112_v50 = vmax.f32 %v3080_v9, 0.0  ;;  %v3042_v42 = vmax.f32 %v5504_v21, %v3010_v2  ;;  %v2879_v3 = vadd.f32 %v2878_v54, %v2333_v44  ;;  %v2904_v41 = vpop.f32.mrf.mxu1  ;;  %v5511_v9 = vmax.f32 %v5509_v61, %v5510_v56  ;;  %v5528_v61 = vld [vmem:[#allocation44_spill] sm:$0xff] }
 0x2a7   :  { %v2335_v31 = vpop.f32.mrf.mxu0 }
 0x2a8   :  { %3144 = vst [vmem:[%s5402_s3 + $0x38] sm:$0xff] %v3112_v50  ;;  %v3081_v49 = vadd.f32 %v5142_v51, %v3042_v42  ;;  %v3011_v39 = vmax.f32 %v5080_v48, %v2879_v3  ;;  %v2907_v54 = vpop.f32.mrf.mxu1  ;;  %v5513_v3 = vld [vmem:[#allocation3_spill] sm:$0xff]  ;;  %v5514_v31 = vld [vmem:[#allocation22_spill] sm:$0xff] }
 0x2a9   :  { %v2338_v28 = vpop.f32.mrf.mxu0 }
 0x2aa   :  { %v3113_v19 = vmax.f32 %v3081_v49, 0.0  ;;  %v3043_v5 = vmax.f32 %v5505_v52, %v3011_v39  ;;  %v2884_v11 = vadd.f32 %v2883_v57, %v2338_v28  ;;  %v2909_v48 = vpop.f32.mrf.mxu1  ;;  %v5515_v49 = vmax.f32 %v5513_v3, %v5514_v31  ;;  %v5516_v52 = vld [vmem:[#allocation41_spill] sm:$0xff] }
 0x2ab   :  { %v2340_v40 = vpop.f32.mrf.mxu0  ;;  %v5532_v3 = vld [vmem:[#allocation45_spill] sm:$0xff] }
 0x2ac   :  { %3145 = vst [vmem:[%s5402_s3 + $0x40] sm:$0xff] %v3113_v19  ;;  %v3082_v45 = vadd.f32 %v5142_v51, %v3043_v5  ;;  %v3012_v18 = vmax.f32 %v5085_v13, %v2884_v11  ;;  %v2910_v57 = vpop.f32.mrf.mxu1 }
 0x2ad   :  { %v2341_v4 = vpop.f32.mrf.mxu0 }
 0x2ae   :  { %v3114_v38 = vmax.f32 %v3082_v45, 0.0  ;;  %v3044_v6 = vmax.f32 %v5506_v47, %v3012_v18  ;;  %v2887_v17 = vadd.f32 %v2886_v12, %v2341_v4  ;;  %v2912_v13 = vpop.f32.mrf.mxu1  ;;  %v5517_v18 = vld [vmem:[#allocation4_spill] sm:$0xff]  ;;  %v5518_v4 = vld [vmem:[#allocation23_spill] sm:$0xff] }
 0x2af   :  { %v2343_v15 = vpop.f32.mrf.mxu0  ;;  %v5519_v48 = vmax.f32 %v5517_v18, %v5518_v4  ;;  %v5536_v18 = vld [vmem:[#allocation46_spill] sm:$0xff] }
 0x2b0   :  { %3146 = vst [vmem:[%s5402_s3 + $0x48] sm:$0xff] %v3114_v38  ;;  %v3083_v0 = vadd.f32 %v5142_v51, %v3044_v6  ;;  %v3013_v25 = vmax.f32 %v5090_v14, %v2887_v17  ;;  %v2915_v12 = vpop.f32.mrf.mxu1  ;;  %v5520_v15 = vld [vmem:[#allocation42_spill] sm:$0xff] }
 0x2b1   :  { %v2346_v10 = vpop.f32.mrf.mxu0 }
 0x2b2   :  { %v3115_v1 = vmax.f32 %v3083_v0, 0.0  ;;  %v3045_v46 = vmax.f32 %v5507_v8, %v3013_v25  ;;  %v2892_v27 = vadd.f32 %v2891_v59, %v2346_v10  ;;  %v2917_v14 = vpop.f32.mrf.mxu1  ;;  %v5522_v8 = vld [vmem:[#allocation24_spill] sm:$0xff] }
 0x2b3   :  { %v2348_v22 = vpop.f32.mrf.mxu0 }
 0x2b4   :  { %3147 = vst [vmem:[%s5402_s3 + $0x50] sm:$0xff] %v3115_v1  ;;  %v3084_v23 = vadd.f32 %v5142_v51, %v3045_v46  ;;  %v3014_v53 = vmax.f32 %v5095_v60, %v2892_v27  ;;  %v2918_v59 = vpop.f32.mrf.mxu1  ;;  %v5521_v1 = vld [vmem:[#allocation5_spill] sm:$0xff] }
 0x2b5   :  { %v2349_v63 = vpop.f32.mrf.mxu0  ;;  %v5523_v46 = vmax.f32 %v5521_v1, %v5522_v8  ;;  %v5540_v1 = vld [vmem:[#allocation47_spill] sm:$0xff] }
 0x2b6   :  { %v3116_v20 = vmax.f32 %v3084_v23, 0.0  ;;  %v3046_v37 = vmax.f32 %v5508_v55, %v3014_v53  ;;  %v2895_v34 = vadd.f32 %v2894_v16, %v2349_v63  ;;  %v2920_v60 = vpop.f32.mrf.mxu1  ;;  %v5524_v63 = vld [vmem:[#allocation43_spill] sm:$0xff] }
 0x2b7   :  { %v2351_v32 = vpop.f32.mrf.mxu0 }
 0x2b8   :  { %3148 = vst [vmem:[%s5402_s3 + $0x58] sm:$0xff] %v3116_v20  ;;  %v3085_v35 = vadd.f32 %v5142_v51, %v3046_v37  ;;  %v3015_v30 = vmax.f32 %v5100_v58, %v2895_v34  ;;  %v2923_v16 = vpop.f32.mrf.mxu1  ;;  %v5525_v34 = vld [vmem:[#allocation6_spill] sm:$0xff]  ;;  %v5526_v32 = vld [vmem:[#allocation25_spill] sm:$0xff] }
 0x2b9   :  { %v2354_v33 = vpop.f32.mrf.mxu0 }
 0x2ba   :  { %v3117_v29 = vmax.f32 %v3085_v35, 0.0  ;;  %v3047_v2 = vmax.f32 %v5511_v9, %v3015_v30  ;;  %v2900_v43 = vadd.f32 %v2899_v62, %v2354_v33  ;;  %v2925_v58 = vpop.f32.mrf.mxu1  ;;  %v5527_v35 = vmax.f32 %v5525_v34, %v5526_v32  ;;  %v5544_v34 = vld [vmem:[#allocation48_spill] sm:$0xff] }
 0x2bb   :  { %v2356_v24 = vpop.f32.mrf.mxu0 }
 0x2bc   :  { %3149 = vst [vmem:[%s5402_s3 + $0x60] sm:$0xff] %v3117_v29  ;;  %v3086_v44 = vadd.f32 %v5142_v51, %v3047_v2  ;;  %v3016_v50 = vmax.f32 %v5512_v7, %v2900_v43  ;;  %v2926_v62 = vpop.f32.mrf.mxu1  ;;  %v5529_v24 = vld [vmem:[#allocation7_spill] sm:$0xff] }
 0x2bd   :  { %v2357_v21 = vpop.f32.mrf.mxu0 }
 0x2be   :  { %v3118_v42 = vmax.f32 %v3086_v44, 0.0  ;;  %v3048_v39 = vmax.f32 %v5515_v49, %v3016_v50  ;;  %v2903_v28 = vadd.f32 %v2902_v36, %v2357_v21  ;;  %v2928_v40 = vpop.f32.mrf.mxu1  ;;  %v5530_v44 = vld [vmem:[#allocation26_spill] sm:$0xff] }
 0x2bf   :  { %v2359_v41 = vpop.f32.mrf.mxu0  ;;  %v5531_v7 = vmax.f32 %v5529_v24, %v5530_v44  ;;  %v5548_v24 = vld [vmem:[#allocation49_spill] sm:$0xff] }
 0x2c0   :  { %3150 = vst [vmem:[%s5402_s3 + $0x68] sm:$0xff] %v3118_v42  ;;  %v3087_v19 = vadd.f32 %v5142_v51, %v3048_v39  ;;  %v3017_v5 = vmax.f32 %v5516_v52, %v2903_v28  ;;  %v2931_v36 = vpop.f32.mrf.mxu1  ;;  %v5533_v41 = vld [vmem:[#allocation8_spill] sm:$0xff] }
 0x2c1   :  { %v2362_v11 = vpop.f32.mrf.mxu0 }
 0x2c2   :  { %v3119_v45 = vmax.f32 %v3087_v19, 0.0  ;;  %v3049_v38 = vmax.f32 %v5519_v48, %v3017_v5  ;;  %v2908_v47 = vadd.f32 %v2907_v54, %v2362_v11  ;;  %v2933_v10 = vpop.f32.mrf.mxu1  ;;  %v5534_v19 = vld [vmem:[#allocation27_spill] sm:$0xff] }
 0x2c3   :  { %v2364_v6 = vpop.f32.mrf.mxu0  ;;  %v5535_v52 = vmax.f32 %v5533_v41, %v5534_v19  ;;  %v5552_v41 = vld [vmem:[#allocation50_spill] sm:$0xff] }
 0x2c4   :  { %3151 = vst [vmem:[%s5402_s3 + $0x70] sm:$0xff] %v3119_v45  ;;  %v3088_v17 = vadd.f32 %v5142_v51, %v3049_v38  ;;  %v3018_v0 = vmax.f32 %v5520_v15, %v2908_v47  ;;  %v2934_v54 = vpop.f32.mrf.mxu1  ;;  %v5537_v6 = vld [vmem:[#allocation9_spill] sm:$0xff] }
 0x2c5   :  { %v2365_v25 = vpop.f32.mrf.mxu0 }
 0x2c6   :  { %v3120_v13 = vmax.f32 %v3088_v17, 0.0  ;;  %v3050_v27 = vmax.f32 %v5523_v46, %v3018_v0  ;;  %v2911_v22 = vadd.f32 %v2910_v57, %v2365_v25  ;;  %v2936_v55 = vpop.f32.mrf.mxu1  ;;  %v5538_v17 = vld [vmem:[#allocation28_spill] sm:$0xff] }
 0x2c7   :  { %v2367_v23 = vpop.f32.mrf.mxu0  ;;  %v5539_v15 = vmax.f32 %v5537_v6, %v5538_v17  ;;  %v5556_v6 = vld [vmem:[#allocation51_spill] sm:$0xff] }
 0x2c8   :  { %3152 = vst [vmem:[%s5402_s3 + $0x78] sm:$0xff] %v3120_v13  ;;  %v3089_v53 = vadd.f32 %v5142_v51, %v3050_v27  ;;  %v3019_v14 = vmax.f32 %v5524_v63, %v2911_v22  ;;  %v2939_v57 = vpop.f32.mrf.mxu1  ;;  %v5541_v23 = vld [vmem:[#allocation10_spill] sm:$0xff] }
 0x2c9   :  { %v2370_v20 = vpop.f32.mrf.mxu0 }
 0x2ca   :  { %v3121_v37 = vmax.f32 %v3089_v53, 0.0  ;;  %v3051_v30 = vmax.f32 %v5527_v35, %v3019_v14  ;;  %v2916_v33 = vadd.f32 %v2915_v12, %v2370_v20  ;;  %v2941_v2 = vpop.f32.mrf.mxu1  ;;  %v5542_v53 = vld [vmem:[#allocation29_spill] sm:$0xff] }
 0x2cb   :  { %v2372_v60 = vpop.f32.mrf.mxu0  ;;  %v5543_v63 = vmax.f32 %v5541_v23, %v5542_v53 }
 0x2cc   :  { %3153 = vst [vmem:[%s5402_s3 + $0x80] sm:$0xff] %v3121_v37  ;;  %v3090_v29 = vadd.f32 %v5142_v51, %v3051_v30  ;;  %v3020_v56 = vmax.f32 %v5528_v61, %v2916_v33  ;;  %v2942_v12 = vpop.f32.mrf.mxu1  ;;  %v5545_v60 = vld [vmem:[#allocation11_spill] sm:$0xff] }
 0x2cd   :  { %v2373_v9 = vpop.f32.mrf.mxu0 }
 0x2ce   :  { %v3122_v43 = vmax.f32 %v3090_v29, 0.0  ;;  %v3052_v50 = vmax.f32 %v5531_v7, %v3020_v56  ;;  %v2919_v21 = vadd.f32 %v2918_v59, %v2373_v9  ;;  %v2944_v39 = vpop.f32.mrf.mxu1  ;;  %v5546_v29 = vld [vmem:[#allocation30_spill] sm:$0xff] }
 0x2cf   :  { %v2375_v58 = vpop.f32.mrf.mxu0  ;;  %v5547_v61 = vmax.f32 %v5545_v60, %v5546_v29  ;;  %v5565_v29 = vld [vmem:[#allocation16_spill] sm:$0xff] }
 0x2d0   :  { %3154 = vst [vmem:[%s5402_s3 + $0x88] sm:$0xff] %v3122_v43  ;;  %v3091_v42 = vadd.f32 %v5142_v51, %v3052_v50  ;;  %v3021_v31 = vmax.f32 %v5532_v3, %v2919_v21  ;;  %v2947_v59 = vpop.f32.mrf.mxu1  ;;  %v5549_v58 = vld [vmem:[#allocation12_spill] sm:$0xff] }
 0x2d1   :  { %v2378_v49 = vpop.f32.mrf.mxu0 }
 0x2d2   :  { %v3123_v28 = vmax.f32 %v3091_v42, 0.0  ;;  %v3053_v5 = vmax.f32 %v5535_v52, %v3021_v31  ;;  %v2924_v11 = vadd.f32 %v2923_v16, %v2378_v49  ;;  %v2949_v38 = vpop.f32.mrf.mxu1  ;;  %v5550_v42 = vld [vmem:[#allocation31_spill] sm:$0xff] }
 0x2d3   :  { %v2380_v40 = vpop.f32.mrf.mxu0  ;;  %v5551_v3 = vmax.f32 %v5549_v58, %v5550_v42  ;;  %v5570_v58 = vld [vmem:[#allocation36_spill] sm:$0xff] }
 0x2d4   :  { %3155 = vst [vmem:[%s5402_s3 + $0x90] sm:$0xff] %v3123_v28  ;;  %v3092_v45 = vadd.f32 %v5142_v51, %v3053_v5  ;;  %v3022_v4 = vmax.f32 %v5536_v18, %v2924_v11  ;;  %v2950_v16 = vpop.f32.mrf.mxu1  ;;  %v5553_v40 = vld [vmem:[#allocation13_spill] sm:$0xff] }
 0x2d5   :  { %v2381_v48 = vpop.f32.mrf.mxu0 }
 0x2d6   :  { %v3124_v47 = vmax.f32 %v3092_v45, 0.0  ;;  %v3054_v0 = vmax.f32 %v5539_v15, %v3022_v4  ;;  %v2927_v25 = vadd.f32 %v2926_v62, %v2381_v48  ;;  %v2952_v27 = vpop.f32.mrf.mxu1  ;;  %v5554_v45 = vld [vmem:[#allocation32_spill] sm:$0xff] }
 0x2d7   :  { %v2383_v10 = vpop.f32.mrf.mxu0  ;;  %v5555_v18 = vmax.f32 %v5553_v40, %v5554_v45 }
 0x2d8   :  { %3156 = vst [vmem:[%s5402_s3 + $0x98] sm:$0xff] %v3124_v47  ;;  %v3093_v13 = vadd.f32 %v5142_v51, %v3054_v0  ;;  %v3023_v8 = vmax.f32 %v5540_v1, %v2927_v25  ;;  %v2955_v62 = vpop.f32.mrf.mxu1  ;;  %v5557_v10 = vld [vmem:[#allocation14_spill] sm:$0xff] }
 0x2d9   :  { %v2386_v46 = vpop.f32.mrf.mxu0 }
 0x2da   :  { %v3125_v22 = vmax.f32 %v3093_v13, 0.0  ;;  %v3055_v14 = vmax.f32 %v5543_v63, %v3023_v8  ;;  %v2932_v20 = vadd.f32 %v2931_v36, %v2386_v46  ;;  %v2957_v30 = vpop.f32.mrf.mxu1  ;;  %v5558_v13 = vld [vmem:[#allocation33_spill] sm:$0xff] }
 0x2db   :  { %v2388_v55 = vpop.f32.mrf.mxu0  ;;  %v5559_v1 = vmax.f32 %v5557_v10, %v5558_v13 }
 0x2dc   :  { %3157 = vst [vmem:[%s5402_s3 + $0xa0] sm:$0xff] %v3125_v22  ;;  %v3094_v37 = vadd.f32 %v5142_v51, %v3055_v14  ;;  %v3024_v32 = vmax.f32 %v5544_v34, %v2932_v20  ;;  %v2958_v36 = vpop.f32.mrf.mxu1  ;;  %v5560_v22 = vld [vmem:[#allocation52_spill] sm:$0xff]  ;;  %v5561_v14 = vld [vmem:[#allocation15_spill] sm:$0xff]  ;;  %v5562_v20 = vld [vmem:[#allocation34_spill] sm:$0xff] }
 0x2dd   :  { %v2389_v35 = vpop.f32.mrf.mxu0  ;;  %v5563_v55 = vmax.f32 %v5561_v14, %v5562_v20 }
 0x2de   :  { %v3126_v33 = vmax.f32 %v3094_v37, 0.0  ;;  %v3056_v56 = vmax.f32 %v5547_v61, %v3024_v32  ;;  %v2935_v9 = vadd.f32 %v2934_v54, %v2389_v35  ;;  %v2960_v50 = vpop.f32.mrf.mxu1  ;;  %v5564_v35 = vld [vmem:[#allocation53_spill] sm:$0xff]  ;;  %v5566_v61 = vld [vmem:[#allocation35_spill] sm:$0xff] }
 0x2df   :  { %v2391_v2 = vpop.f32.mrf.mxu0 }
 0x2e0   :  { %3158 = vst [vmem:[%s5402_s3 + $0xa8] sm:$0xff] %v3126_v33  ;;  %v3095_v43 = vadd.f32 %v5142_v51, %v3056_v56  ;;  %v3025_v44 = vmax.f32 %v5548_v24, %v2935_v9  ;;  %v2963_v54 = vpop.f32.mrf.mxu1  ;;  %v5567_v56 = vmax.f32 %v5565_v29, %v5566_v61  ;;  %v5568_v24 = vld [vmem:[#allocation54_spill] sm:$0xff] }
 0x2e1   :  { %v2394_v7 = vpop.f32.mrf.mxu0 }
 0x2e2   :  { %v3127_v21 = vmax.f32 %v3095_v43, 0.0  ;;  %v3057_v31 = vmax.f32 %v5551_v3, %v3025_v44  ;;  %v2940_v49 = vadd.f32 %v2939_v57, %v2394_v7  ;;  %v2965_v5 = vpop.f32.mrf.mxu1 }
 0x2e3   :  { %v2396_v39 = vpop.f32.mrf.mxu0 }
 0x2e4   :  { %3159 = vst [vmem:[%s5402_s3 + $0xb0] sm:$0xff] %v3127_v21  ;;  %v3096_v28 = vadd.f32 %v5142_v51, %v3057_v31  ;;  %v3026_v19 = vmax.f32 %v5552_v41, %v2940_v49  ;;  %v2966_v57 = vpop.f32.mrf.mxu1  ;;  %v5569_v21 = vld [vmem:[#allocation17_spill] sm:$0xff] }
 0x2e5   :  { %v2397_v52 = vpop.f32.mrf.mxu0  ;;  %v5571_v42 = vmax.f32 %v5569_v21, %v5570_v58 }
 0x2e6   :  { %v3128_v11 = vmax.f32 %v3096_v28, 0.0  ;;  %v3058_v4 = vmax.f32 %v5555_v18, %v3026_v19  ;;  %v2943_v48 = vadd.f32 %v2942_v12, %v2397_v52  ;;  %v2968_v0 = vpop.f32.mrf.mxu1  ;;  %v5572_v19 = vld [vmem:[#allocation18_spill] sm:$0xff]  ;;  %v5573_v52 = vld [vmem:[#allocation37_spill] sm:$0xff]  ;;  %v5575_v18 = vld [vmem:[#allocation55_spill] sm:$0xff] }
 0x2e7   :  { %v2399_v38 = vpop.f32.mrf.mxu0  ;;  %v5574_v5 = vmax.f32 %v5572_v19, %v5573_v52 }
 0x2e8   :  { %3160 = vst [vmem:[%s5402_s3 + $0xb8] sm:$0xff] %v3128_v11  ;;  %v3097_v47 = vadd.f32 %v5142_v51, %v3058_v4  ;;  %v3027_v17 = vmax.f32 %v5556_v6, %v2943_v48 }
 0x2e9   :  { %v2402_v15 = vpop.f32.mrf.mxu0 }
 0x2ea   :  { %v3129_v25 = vmax.f32 %v3097_v47, 0.0  ;;  %v3059_v8 = vmax.f32 %v5559_v1, %v3027_v17  ;;  %v2948_v46 = vadd.f32 %v2947_v59, %v2402_v15  ;;  %v5576_v47 = vld [vmem:[#allocation19_spill] sm:$0xff]  ;;  %v5580_v1 = vld [vmem:[#allocation20_spill] sm:$0xff] }
 0x2eb   :  { %v2404_v27 = vpop.f32.mrf.mxu0 }
 0x2ec   :  { %3161 = vst [vmem:[%s5402_s3 + $0xc0] sm:$0xff] %v3129_v25  ;;  %v3098_v12 = vadd.f32 %v5142_v51, %v3059_v8  ;;  %v3028_v23 = vmax.f32 %v5560_v22, %v2948_v46  ;;  %v5579_v25 = vld [vmem:[#allocation56_spill] sm:$0xff]  ;;  %v5581_v8 = vld [vmem:[#allocation39_spill] sm:$0xff] }
 0x2ed   :  { %v2405_v53 = vpop.f32.mrf.mxu0  ;;  %v5582_v46 = vmax.f32 %v5580_v1, %v5581_v8 }
 0x2ee   :  { %v3130_v63 = vmax.f32 %v3098_v12, 0.0  ;;  %v3060_v37 = vmax.f32 %v5563_v55, %v3028_v23  ;;  %v2951_v34 = vadd.f32 %v2950_v16, %v2405_v53 }
 0x2ef   :  { %v2407_v32 = vpop.f32.mrf.mxu0 }
 0x2f0   :  { %3162 = vst [vmem:[%s5402_s3 + $0xc8] sm:$0xff] %v3130_v63  ;;  %v3099_v59 = vadd.f32 %v5142_v51, %v3060_v37  ;;  %v3029_v30 = vmax.f32 %v5564_v35, %v2951_v34 }
 0x2f1   :  { %v2410_v33 = vpop.f32.mrf.mxu0 }
 0x2f2   :  { %v3131_v60 = vmax.f32 %v3099_v59, 0.0  ;;  %v3061_v9 = vmax.f32 %v5567_v56, %v3029_v30  ;;  %v2956_v2 = vadd.f32 %v2955_v62, %v2410_v33 }
 0x2f3   :  { %v2412_v43 = vpop.f32.mrf.mxu0 }
 0x2f4   :  { %3163 = vst [vmem:[%s5402_s3 + $0xd0] sm:$0xff] %v3131_v60  ;;  %v3100_v16 = vadd.f32 %v5142_v51, %v3061_v9  ;;  %v3030_v44 = vmax.f32 %v5568_v24, %v2956_v2 }
 0x2f5   :  { %v2413_v7 = vpop.f32.mrf.mxu0 }
 0x2f6   :  { %v3132_v50 = vmax.f32 %v3100_v16, 0.0  ;;  %v3062_v3 = vmax.f32 %v5571_v42, %v3030_v44  ;;  %v2959_v31 = vadd.f32 %v2958_v36, %v2413_v7 }
 0x2f7   :  { %v2415_v49 = vpop.f32.mrf.mxu0 }
 0x2f8   :  { %3164 = vst [vmem:[%s5402_s3 + $0xd8] sm:$0xff] %v3132_v50  ;;  %v3101_v62 = vadd.f32 %v5142_v51, %v3062_v3  ;;  %v3031_v39 = vmax.f32 %v5132_v26, %v2959_v31  ;;  %v5577_v26 = vld [vmem:[#allocation38_spill] sm:$0xff] }
 0x2f9   :  { %v2418_v28 = vpop.f32.mrf.mxu0  ;;  %v5578_v6 = vmax.f32 %v5576_v47, %v5577_v26 }
 0x2fa   :  { %v3133_v41 = vmax.f32 %v3101_v62, 0.0  ;;  %v3063_v11 = vmax.f32 %v5574_v5, %v3031_v39  ;;  %v2964_v40 = vadd.f32 %v2963_v54, %v2418_v28 }
 0x2fb   :  { %v2420_v45 = vpop.f32.mrf.mxu0 }
 0x2fc   :  { %3165 = vst [vmem:[%s5402_s3 + $0xe0] sm:$0xff] %v3133_v41  ;;  %v3102_v36 = vadd.f32 %v5142_v51, %v3063_v11  ;;  %v3032_v4 = vmax.f32 %v5575_v18, %v2964_v40 }
 0x2fd   :  { %v2421_v48 = vpop.f32.mrf.mxu0 }
 0x2fe   :  { %v3134_v38 = vmax.f32 %v3102_v36, 0.0  ;;  %v3064_v17 = vmax.f32 %v5578_v6, %v3032_v4  ;;  %v2967_v15 = vadd.f32 %v2966_v57, %v2421_v48 }
 0x2ff   :  { %v2423_v0 = vpop.f32.mrf.mxu0 }
 0x300   :  { %3166 = vst [vmem:[%s5402_s3 + $0xe8] sm:$0xff] %v3134_v38  ;;  %v3103_v54 = vadd.f32 %v5142_v51, %v3064_v17  ;;  %v3033_v10 = vmax.f32 %v5579_v25, %v2967_v15 }
 0x302   :  { %v3135_v13 = vmax.f32 %v3103_v54, 0.0  ;;  %v3065_v27 = vmax.f32 %v5582_v46, %v3033_v10 }
 0x304   :  { %3167 = vst [vmem:[%s5402_s3 + $0xf0] sm:$0xff] %v3135_v13  ;;  %v3104_v57 = vadd.f32 %v5142_v51, %v3065_v27 }
 0x306   :  { %v3136_v12 = vmax.f32 %v3104_v57, 0.0 }
 0x308   :  { %3168 = vst [vmem:[%s5402_s3 + $0xf8] sm:$0xff] %v3136_v12 }

// kernel: crnn_forward.5
= control target key start
LH: loop header
LB: loop body
LE: loop exit
PB: predicated region body
PF: predicated region fallthrough
CT: control target
= control target key end

     0   :  { %vm8179_vm0 = vmmov 0   ;;  %s11025_s1 = inlined_call_operand.vmem [shape: bf16[512,512], index: 1, kind: input, shape index: {}]   ;;  %s11026_s0 = inlined_call_operand.vmem [shape: bf16[128,512], index: 0, kind: input, shape index: {}]   ;;  %s11027_s2 = inlined_call_operand.vmem [shape: bf16[128,512], index: 2, kind: input, shape index: {}]   ;;  %s11028_s3 = inlined_call_operand.vmem [shape: f32[1,512], index: 3, kind: input, shape index: {}]   ;;  %s11029_s4 = inlined_call_operand.vmem [shape: bf16[128,512], index: 4, kind: input, shape index: {}]   ;;  %s11030_s5 = inlined_call_operand.vmem [shape: bf16[128,512], index: 5, kind: input, shape index: {}]   ;;  %s11031_s6 = inlined_call_operand.vmem [shape: f32[1,512], index: 6, kind: input, shape index: {}]   ;;  %s11032_s7 = inlined_call_operand.vmem [shape: bf16[128,128], index: 7, kind: input, shape index: {}]   ;;  %s11033_s8 = inlined_call_operand.vmem [shape: f32[1,128], index: 8, kind: input, shape index: {}]   ;;  %s11034_s9 = inlined_call_operand.vmem [shape: f32[16,128], index: 9, kind: output, shape index: {}]  }
   0x1   :  { %v7137_v0 = vld [vmem:[%s11025_s1 + $0xe4] ss:$16 sps:$4 sm:$0xff]   ;;  %v7141_v2 = vld [vmem:[%s11025_s1 + $0xe0] ss:$16 sps:$4 sm:$0xff]   ;;  %v8388_v51 = vld [vmem:[%s11026_s0 + $0xc] ss:$16 sps:$4 sm:$0xff]  }
   0x2   :  { %v7139_v1 = vld [vmem:[%s11025_s1 + $0x2e4] ss:$16 sps:$4 sm:$0xff]   ;;  %1015 = vmatprep.subr.bf16.mxu0 %v7137_v0  ;;  %v7142_v3 = vld [vmem:[%s11025_s1 + $0x2e0] ss:$16 sps:$4 sm:$0xff]   ;;  %1160 = vmatprep.mubr.bf16.mxu1 %v8388_v51 }
   0x3   :  { %1128 = vmatprep.subr.bf16.mxu1 %v7139_v1  ;;  %v7143_v4 = vld [vmem:[%s11025_s1 + $0xc4] ss:$16 sps:$4 sm:$0xff]   ;;  %1016 = vmatpush1.bf16.msra.mxu0 %v7141_v2  ;;  %v7147_v6 = vld [vmem:[%s11025_s1 + $0xc0] ss:$16 sps:$4 sm:$0xff]   ;;  %v7241_v2 = vld [vmem:[%s11025_s1 + $0xec] ss:$16 sps:$4 sm:$0xff]  }
   0x4   :  { %1129 = vmatpush1.bf16.msra.mxu1 %v7142_v3  ;;  %v7145_v5 = vld [vmem:[%s11025_s1 + $0x2c4] ss:$16 sps:$4 sm:$0xff]   ;;  %1017 = vmatprep.subr.bf16.mxu0 %v7143_v4  ;;  %v7148_v7 = vld [vmem:[%s11025_s1 + $0x2c0] ss:$16 sps:$4 sm:$0xff]   ;;  %v7244_v3 = vld [vmem:[%s11025_s1 + $0x2ec] ss:$16 sps:$4 sm:$0xff]  }
   0x5   :  { %1130 = vmatprep.subr.bf16.mxu1 %v7145_v5  ;;  %v7149_v8 = vld [vmem:[%s11025_s1 + $0xa4] ss:$16 sps:$4 sm:$0xff]   ;;  %v7153_v10 = vld [vmem:[%s11025_s1 + $0xa0] ss:$16 sps:$4 sm:$0xff]   ;;  %v8448_v5 = vld [vmem:[%s11026_s0 + $0x8] ss:$16 sps:$4 sm:$0xff]  }
   0x6   :  { %v7151_v9 = vld [vmem:[%s11025_s1 + $0x2a4] ss:$16 sps:$4 sm:$0xff]   ;;  %v7154_v11 = vld [vmem:[%s11025_s1 + $0x2a0] ss:$16 sps:$4 sm:$0xff]  }
   0x7   :  { %1018 = vmatpush1.bf16.msra.mxu0 %v7147_v6  ;;  %v7155_v12 = vld [vmem:[%s11025_s1 + $0x84] ss:$16 sps:$4 sm:$0xff]   ;;  %v7159_v14 = vld [vmem:[%s11025_s1 + $0x80] ss:$16 sps:$4 sm:$0xff]   ;;  %v7239_v6 = vld [vmem:[%s11025_s1 + $0xe8] ss:$16 sps:$4 sm:$0xff]  }
   0x8   :  { %1131 = vmatpush1.bf16.msra.mxu1 %v7148_v7  ;;  %1019 = vmatprep.subr.bf16.mxu0 %v7149_v8  ;;  %v7157_v13 = vld [vmem:[%s11025_s1 + $0x284] ss:$16 sps:$4 sm:$0xff]   ;;  %v7160_v15 = vld [vmem:[%s11025_s1 + $0x280] ss:$16 sps:$4 sm:$0xff]   ;;  %v7242_v7 = vld [vmem:[%s11025_s1 + $0x2e8] ss:$16 sps:$4 sm:$0xff]  }
   0x9   :  { %1132 = vmatprep.subr.bf16.mxu1 %v7151_v9  ;;  %v7161_v16 = vld [vmem:[%s11025_s1 + $0x64] ss:$16 sps:$4 sm:$0xff]   ;;  %v7165_v18 = vld [vmem:[%s11025_s1 + $0x60] ss:$16 sps:$4 sm:$0xff]   ;;  %v7247_v8 = vld [vmem:[%s11025_s1 + $0xcc] ss:$16 sps:$4 sm:$0xff]  }
   0xa   :  { %v7163_v17 = vld [vmem:[%s11025_s1 + $0x264] ss:$16 sps:$4 sm:$0xff]   ;;  %v7166_v19 = vld [vmem:[%s11025_s1 + $0x260] ss:$16 sps:$4 sm:$0xff]   ;;  %v7250_v9 = vld [vmem:[%s11025_s1 + $0x2cc] ss:$16 sps:$4 sm:$0xff]  }
   0xb   :  { %1020 = vmatpush1.bf16.msra.mxu0 %v7153_v10  ;;  %v7167_v20 = vld [vmem:[%s11025_s1 + $0x44] ss:$16 sps:$4 sm:$0xff]   ;;  %v7171_v22 = vld [vmem:[%s11025_s1 + $0x40] ss:$16 sps:$4 sm:$0xff]  }
   0xc   :  { %1133 = vmatpush1.bf16.msra.mxu1 %v7154_v11  ;;  %1021 = vmatprep.subr.bf16.mxu0 %v7155_v12  ;;  %v7169_v21 = vld [vmem:[%s11025_s1 + $0x244] ss:$16 sps:$4 sm:$0xff]   ;;  %v7172_v23 = vld [vmem:[%s11025_s1 + $0x240] ss:$16 sps:$4 sm:$0xff]   ;;  %v8470_v11 = vld [vmem:[%s11026_s0 + $0x2c] ss:$16 sps:$4 sm:$0xff]  }
   0xd   :  { %1134 = vmatprep.subr.bf16.mxu1 %v7157_v13  ;;  %v7173_v24 = vld [vmem:[%s11025_s1 + $0x24] ss:$16 sps:$4 sm:$0xff]   ;;  %v7177_v26 = vld [vmem:[%s11025_s1 + $0x20] ss:$16 sps:$4 sm:$0xff]   ;;  %v7245_v12 = vld [vmem:[%s11025_s1 + $0xc8] ss:$16 sps:$4 sm:$0xff]  }
   0xe   :  { %v7175_v25 = vld [vmem:[%s11025_s1 + $0x224] ss:$16 sps:$4 sm:$0xff]   ;;  %v7178_v27 = vld [vmem:[%s11025_s1 + $0x220] ss:$16 sps:$4 sm:$0xff]   ;;  %v7248_v13 = vld [vmem:[%s11025_s1 + $0x2c8] ss:$16 sps:$4 sm:$0xff]  }
   0xf   :  { %1022 = vmatpush1.bf16.msra.mxu0 %v7159_v14  ;;  %v7179_v28 = vld [vmem:[%s11025_s1 + $0x4] ss:$16 sps:$4 sm:$0xff]   ;;  %v7183_v30 = vld [vmem:[%s11025_s1] ss:$16 sps:$4 sm:$0xff]   ;;  %v7259_v14 = vld [vmem:[%s11025_s1 + $0xac] ss:$16 sps:$4 sm:$0xff]  }
  0x10   :  { %1135 = vmatpush1.bf16.msra.mxu1 %v7160_v15  ;;  %1023 = vmatprep.subr.bf16.mxu0 %v7161_v16  ;;  %v7181_v29 = vld [vmem:[%s11025_s1 + $0x204] ss:$16 sps:$4 sm:$0xff]   ;;  %v7184_v31 = vld [vmem:[%s11025_s1 + $0x200] ss:$16 sps:$4 sm:$0xff]   ;;  %v7262_v15 = vld [vmem:[%s11025_s1 + $0x2ac] ss:$16 sps:$4 sm:$0xff]  }
  0x11   :  { %1136 = vmatprep.subr.bf16.mxu1 %v7163_v17  ;;  %v7185_v32 = vld [vmem:[%s11025_s1 + $0x1e4] ss:$16 sps:$4 sm:$0xff]   ;;  %v7189_v34 = vld [vmem:[%s11025_s1 + $0x1e0] ss:$16 sps:$4 sm:$0xff]   ;;  %v8496_v17 = vld [vmem:[%s11026_s0 + $0x28] ss:$16 sps:$4 sm:$0xff]  }
  0x12   :  { %v7187_v33 = vld [vmem:[%s11025_s1 + $0x3e4] ss:$16 sps:$4 sm:$0xff]   ;;  %v7190_v35 = vld [vmem:[%s11025_s1 + $0x3e0] ss:$16 sps:$4 sm:$0xff]  }
  0x13   :  { %1024 = vmatpush1.bf16.msra.mxu0 %v7165_v18  ;;  %v7191_v36 = vld [vmem:[%s11025_s1 + $0x1c4] ss:$16 sps:$4 sm:$0xff]   ;;  %v7195_v38 = vld [vmem:[%s11025_s1 + $0x1c0] ss:$16 sps:$4 sm:$0xff]   ;;  %v7257_v18 = vld [vmem:[%s11025_s1 + $0xa8] ss:$16 sps:$4 sm:$0xff]  }
  0x14   :  { %1137 = vmatpush1.bf16.msra.mxu1 %v7166_v19  ;;  %1025 = vmatprep.subr.bf16.mxu0 %v7167_v20  ;;  %v7193_v37 = vld [vmem:[%s11025_s1 + $0x3c4] ss:$16 sps:$4 sm:$0xff]   ;;  %v7196_v39 = vld [vmem:[%s11025_s1 + $0x3c0] ss:$16 sps:$4 sm:$0xff]   ;;  %v7260_v19 = vld [vmem:[%s11025_s1 + $0x2a8] ss:$16 sps:$4 sm:$0xff]  }
  0x15   :  { %1138 = vmatprep.subr.bf16.mxu1 %v7169_v21  ;;  %v7197_v40 = vld [vmem:[%s11025_s1 + $0x1a4] ss:$16 sps:$4 sm:$0xff]   ;;  %v7201_v42 = vld [vmem:[%s11025_s1 + $0x1a0] ss:$16 sps:$4 sm:$0xff]   ;;  %v7265_v20 = vld [vmem:[%s11025_s1 + $0x8c] ss:$16 sps:$4 sm:$0xff]  }
  0x16   :  { %v7199_v41 = vld [vmem:[%s11025_s1 + $0x3a4] ss:$16 sps:$4 sm:$0xff]   ;;  %v7202_v43 = vld [vmem:[%s11025_s1 + $0x3a0] ss:$16 sps:$4 sm:$0xff]   ;;  %v7268_v21 = vld [vmem:[%s11025_s1 + $0x28c] ss:$16 sps:$4 sm:$0xff]  }
  0x17   :  { %1026 = vmatpush1.bf16.msra.mxu0 %v7171_v22  ;;  %v7203_v44 = vld [vmem:[%s11025_s1 + $0x184] ss:$16 sps:$4 sm:$0xff]   ;;  %v7207_v46 = vld [vmem:[%s11025_s1 + $0x180] ss:$16 sps:$4 sm:$0xff]  }
  0x18   :  { %1139 = vmatpush1.bf16.msra.mxu1 %v7172_v23  ;;  %1027 = vmatprep.subr.bf16.mxu0 %v7173_v24  ;;  %v7205_v45 = vld [vmem:[%s11025_s1 + $0x384] ss:$16 sps:$4 sm:$0xff]   ;;  %v7208_v47 = vld [vmem:[%s11025_s1 + $0x380] ss:$16 sps:$4 sm:$0xff]   ;;  %v8518_v23 = vld [vmem:[%s11026_s0 + $0x4c] ss:$16 sps:$4 sm:$0xff]  }
  0x19   :  { %1140 = vmatprep.subr.bf16.mxu1 %v7175_v25  ;;  %v7209_v48 = vld [vmem:[%s11025_s1 + $0x164] ss:$16 sps:$4 sm:$0xff]   ;;  %v7213_v52 = vld [vmem:[%s11025_s1 + $0x160] ss:$16 sps:$4 sm:$0xff]   ;;  %v7263_v24 = vld [vmem:[%s11025_s1 + $0x88] ss:$16 sps:$4 sm:$0xff]  }
  0x1a   :  { %v8380_v49 = vld [vmem:[%s11026_s0 + $0x4] ss:$16 sps:$4 sm:$0xff]   ;;  %v7214_v53 = vld [vmem:[%s11025_s1 + $0x360] ss:$16 sps:$4 sm:$0xff]   ;;  %v7266_v25 = vld [vmem:[%s11025_s1 + $0x288] ss:$16 sps:$4 sm:$0xff]  }
  0x1b   :  { %1028 = vmatpush1.bf16.msra.mxu0 %v7177_v26  ;;  %v7211_v50 = vld [vmem:[%s11025_s1 + $0x364] ss:$16 sps:$4 sm:$0xff]   ;;  %1047 = vmatprep.mubr.bf16.mxu0 %v8380_v49  ;;  %v7219_v56 = vld [vmem:[%s11025_s1 + $0x140] ss:$16 sps:$4 sm:$0xff]   ;;  %v7277_v26 = vld [vmem:[%s11025_s1 + $0x6c] ss:$16 sps:$4 sm:$0xff]  }
  0x1c   :  { %1141 = vmatpush1.bf16.msra.mxu1 %v7178_v27  ;;  %1029 = vmatprep.subr.bf16.mxu0 %v7179_v28  ;;  %v7215_v54 = vld [vmem:[%s11025_s1 + $0x144] ss:$16 sps:$4 sm:$0xff]   ;;  %v7220_v57 = vld [vmem:[%s11025_s1 + $0x340] ss:$16 sps:$4 sm:$0xff]   ;;  %v7280_v27 = vld [vmem:[%s11025_s1 + $0x26c] ss:$16 sps:$4 sm:$0xff]  }
  0x1d   :  { %1142 = vmatprep.subr.bf16.mxu1 %v7181_v29  ;;  %v7217_v55 = vld [vmem:[%s11025_s1 + $0x344] ss:$16 sps:$4 sm:$0xff]   ;;  %v7225_v60 = vld [vmem:[%s11025_s1 + $0x120] ss:$16 sps:$4 sm:$0xff]   ;;  %v8544_v29 = vld [vmem:[%s11026_s0 + $0x48] ss:$16 sps:$4 sm:$0xff]  }
  0x1e   :  { %v7221_v58 = vld [vmem:[%s11025_s1 + $0x124] ss:$16 sps:$4 sm:$0xff]   ;;  %v7226_v61 = vld [vmem:[%s11025_s1 + $0x320] ss:$16 sps:$4 sm:$0xff]  }
  0x1f   :  { %1030 = vmatpush1.bf16.msra.mxu0 %v7183_v30  ;;  %v7223_v59 = vld [vmem:[%s11025_s1 + $0x324] ss:$16 sps:$4 sm:$0xff]   ;;  %v7231_v0 = vld [vmem:[%s11025_s1 + $0x100] ss:$16 sps:$4 sm:$0xff]   ;;  %v7275_v30 = vld [vmem:[%s11025_s1 + $0x68] ss:$16 sps:$4 sm:$0xff]  }
  0x20   :  { %1143 = vmatpush1.bf16.msra.mxu1 %v7184_v31  ;;  %1031 = vmatprep.subr.bf16.mxu0 %v7185_v32  ;;  %v7227_v62 = vld [vmem:[%s11025_s1 + $0x104] ss:$16 sps:$4 sm:$0xff]   ;;  %v7232_v1 = vld [vmem:[%s11025_s1 + $0x300] ss:$16 sps:$4 sm:$0xff]   ;;  %v7278_v31 = vld [vmem:[%s11025_s1 + $0x268] ss:$16 sps:$4 sm:$0xff]  }
  0x21   :  { %1144 = vmatprep.subr.bf16.mxu1 %v7187_v33  ;;  %v7229_v63 = vld [vmem:[%s11025_s1 + $0x304] ss:$16 sps:$4 sm:$0xff]   ;;  %v8443_v4 = vld [vmem:[%s11026_s0] ss:$16 sps:$4 sm:$0xff]   ;;  %v7283_v32 = vld [vmem:[%s11025_s1 + $0x4c] ss:$16 sps:$4 sm:$0xff]  }
  0x22   :  { %v8465_v10 = vld [vmem:[%s11026_s0 + $0x24] ss:$16 sps:$4 sm:$0xff]   ;;  %v8491_v16 = vld [vmem:[%s11026_s0 + $0x20] ss:$16 sps:$4 sm:$0xff]   ;;  %v7286_v33 = vld [vmem:[%s11025_s1 + $0x24c] ss:$16 sps:$4 sm:$0xff]  }
  0x23   :  { %1032 = vmatpush2.bf16.msra.mxu0 %v7189_v34  ;;  %v8513_v22 = vld [vmem:[%s11026_s0 + $0x44] ss:$16 sps:$4 sm:$0xff]   ;;  %v8539_v28 = vld [vmem:[%s11026_s0 + $0x40] ss:$16 sps:$4 sm:$0xff]  }
  0x24   :  { %1145 = vmatpush2.bf16.msra.mxu1 %v7190_v35  ;;  %1033 = vmatprep.subr.bf16.mxu0 %v7191_v36  ;;  %v8561_v34 = vld [vmem:[%s11026_s0 + $0x64] ss:$16 sps:$4 sm:$0xff]   ;;  %v8566_v35 = vld [vmem:[%s11026_s0 + $0x6c] ss:$16 sps:$4 sm:$0xff]   ;;  %v7281_v36 = vld [vmem:[%s11025_s1 + $0x48] ss:$16 sps:$4 sm:$0xff]  }
  0x25   :  { %1146 = vmatprep.subr.bf16.mxu1 %v7193_v37  ;;  %v7284_v37 = vld [vmem:[%s11025_s1 + $0x248] ss:$16 sps:$4 sm:$0xff]  }
  0x27   :  { %1034 = vmatpush2.bf16.msra.mxu0 %v7195_v38  ;;  %v7295_v38 = vld [vmem:[%s11025_s1 + $0x2c] ss:$16 sps:$4 sm:$0xff]  }
  0x28   :  { %1147 = vmatpush2.bf16.msra.mxu1 %v7196_v39  ;;  %1035 = vmatprep.subr.bf16.mxu0 %v7197_v40  ;;  %v7298_v39 = vld [vmem:[%s11025_s1 + $0x22c] ss:$16 sps:$4 sm:$0xff]   ;;  %v8587_v40 = vld [vmem:[%s11026_s0 + $0x60] ss:$16 sps:$4 sm:$0xff]  }
  0x29   :  { %1148 = vmatprep.subr.bf16.mxu1 %v7199_v41  ;;  %v8592_v41 = vld [vmem:[%s11026_s0 + $0x68] ss:$16 sps:$4 sm:$0xff]  }
  0x2b   :  { %1036 = vmatpush2.bf16.msra.mxu0 %v7201_v42  ;;  %v7293_v42 = vld [vmem:[%s11025_s1 + $0x28] ss:$16 sps:$4 sm:$0xff]  }
  0x2c   :  { %1149 = vmatpush2.bf16.msra.mxu1 %v7202_v43  ;;  %1037 = vmatprep.subr.bf16.mxu0 %v7203_v44  ;;  %v7296_v43 = vld [vmem:[%s11025_s1 + $0x228] ss:$16 sps:$4 sm:$0xff]   ;;  %v7301_v44 = vld [vmem:[%s11025_s1 + $0xc] ss:$16 sps:$4 sm:$0xff]  }
  0x2d   :  { %1150 = vmatprep.subr.bf16.mxu1 %v7205_v45  ;;  %v7304_v45 = vld [vmem:[%s11025_s1 + $0x20c] ss:$16 sps:$4 sm:$0xff]  }
  0x2f   :  { %1038 = vmatpush2.bf16.msra.mxu0 %v7207_v46  ;;  %v8609_v46 = vld [vmem:[%s11026_s0 + $0x84] ss:$16 sps:$4 sm:$0xff]  }
  0x30   :  { %1151 = vmatpush2.bf16.msra.mxu1 %v7208_v47  ;;  %1039 = vmatprep.subr.bf16.mxu0 %v7209_v48  ;;  %v8614_v47 = vld [vmem:[%s11026_s0 + $0x8c] ss:$16 sps:$4 sm:$0xff]   ;;  %v7299_v48 = vld [vmem:[%s11025_s1 + $0x8] ss:$16 sps:$4 sm:$0xff]  }
  0x31   :  { %1152 = vmatprep.subr.bf16.mxu1 %v7211_v50  ;;  %v7302_v50 = vld [vmem:[%s11025_s1 + $0x208] ss:$16 sps:$4 sm:$0xff]  }
  0x33   :  { %1040 = vmatpush2.bf16.msra.mxu0 %v7213_v52  ;;  %v7313_v52 = vld [vmem:[%s11025_s1 + $0x1ec] ss:$16 sps:$4 sm:$0xff]  }
  0x34   :  { %1153 = vmatpush2.bf16.msra.mxu1 %v7214_v53  ;;  %1041 = vmatprep.subr.bf16.mxu0 %v7215_v54  ;;  %v7316_v53 = vld [vmem:[%s11025_s1 + $0x3ec] ss:$16 sps:$4 sm:$0xff]   ;;  %v8635_v54 = vld [vmem:[%s11026_s0 + $0x80] ss:$16 sps:$4 sm:$0xff]  }
  0x35   :  { %1154 = vmatprep.subr.bf16.mxu1 %v7217_v55  ;;  %v8640_v55 = vld [vmem:[%s11026_s0 + $0x88] ss:$16 sps:$4 sm:$0xff]  }
  0x37   :  { %1042 = vmatpush2.bf16.msra.mxu0 %v7219_v56  ;;  %v7311_v56 = vld [vmem:[%s11025_s1 + $0x1e8] ss:$16 sps:$4 sm:$0xff]  }
  0x38   :  { %1155 = vmatpush2.bf16.msra.mxu1 %v7220_v57  ;;  %1043 = vmatprep.subr.bf16.mxu0 %v7221_v58  ;;  %v7314_v57 = vld [vmem:[%s11025_s1 + $0x3e8] ss:$16 sps:$4 sm:$0xff]   ;;  %v7319_v58 = vld [vmem:[%s11025_s1 + $0x1cc] ss:$16 sps:$4 sm:$0xff]  }
  0x39   :  { %1156 = vmatprep.subr.bf16.mxu1 %v7223_v59  ;;  %v7322_v59 = vld [vmem:[%s11025_s1 + $0x3cc] ss:$16 sps:$4 sm:$0xff]  }
  0x3b   :  { %1044 = vmatpush2.bf16.msra.mxu0 %v7225_v60  ;;  %v8657_v60 = vld [vmem:[%s11026_s0 + $0xa4] ss:$16 sps:$4 sm:$0xff]  }
  0x3c   :  { %1157 = vmatpush2.bf16.msra.mxu1 %v7226_v61  ;;  %1045 = vmatprep.subr.bf16.mxu0 %v7227_v62  ;;  %v8662_v61 = vld [vmem:[%s11026_s0 + $0xac] ss:$16 sps:$4 sm:$0xff]   ;;  %v7317_v62 = vld [vmem:[%s11025_s1 + $0x1c8] ss:$16 sps:$4 sm:$0xff]  }
  0x3d   :  { %1158 = vmatprep.subr.bf16.mxu1 %v7229_v63  ;;  %v7320_v63 = vld [vmem:[%s11025_s1 + $0x3c8] ss:$16 sps:$4 sm:$0xff]  }
  0x3f   :  { %1046 = vmatpush2.bf16.msra.mxu0 %v7231_v0  ;;  %v7331_v0 = vld [vmem:[%s11025_s1 + $0x1ac] ss:$16 sps:$4 sm:$0xff]  }
  0x40   :  { %1159 = vmatpush2.bf16.msra.mxu1 %v7232_v1  ;;  %1241 = vmatprep.subr.bf16.mxu0 %v7241_v2  ;;  %v7334_v1 = vld [vmem:[%s11025_s1 + $0x3ac] ss:$16 sps:$4 sm:$0xff]   ;;  %v8683_v2 = vld [vmem:[%s11026_s0 + $0xa0] ss:$16 sps:$4 sm:$0xff]  }
  0x41   :  { %1354 = vmatprep.subr.bf16.mxu1 %v7244_v3  ;;  %v8688_v3 = vld [vmem:[%s11026_s0 + $0xa8] ss:$16 sps:$4 sm:$0xff]  }
  0x42   :  { %1048 = vmatmul.mubr.bf16.vlgmr.msra.gmra.mxu0 %v8443_v4 }
  0x43   :  { %1161 = vmatmul.mubr.bf16.vlgmr.msra.gmra.mxu1 %v8448_v5  ;;  %1242 = vmatpush1.bf16.msra.mxu0 %v7239_v6  ;;  %v7329_v6 = vld [vmem:[%s11025_s1 + $0x1a8] ss:$16 sps:$4 sm:$0xff]  }
  0x44   :  { %1355 = vmatpush1.bf16.msra.mxu1 %v7242_v7  ;;  %1243 = vmatprep.subr.bf16.mxu0 %v7247_v8  ;;  %v7332_v7 = vld [vmem:[%s11025_s1 + $0x3a8] ss:$16 sps:$4 sm:$0xff]   ;;  %v7337_v8 = vld [vmem:[%s11025_s1 + $0x18c] ss:$16 sps:$4 sm:$0xff]  }
  0x45   :  { %1356 = vmatprep.subr.bf16.mxu1 %v7250_v9  ;;  %1057 = vmatprep.mubr.bf16.mxu0 %v8465_v10  ;;  %v7340_v9 = vld [vmem:[%s11025_s1 + $0x38c] ss:$16 sps:$4 sm:$0xff]  }
  0x46   :  { %1170 = vmatprep.mubr.bf16.mxu1 %v8470_v11 }
  0x47   :  { %1244 = vmatpush1.bf16.msra.mxu0 %v7245_v12  ;;  %v8705_v12 = vld [vmem:[%s11026_s0 + $0xc4] ss:$16 sps:$4 sm:$0xff]  }
  0x48   :  { %1357 = vmatpush1.bf16.msra.mxu1 %v7248_v13  ;;  %1245 = vmatprep.subr.bf16.mxu0 %v7259_v14  ;;  %v8710_v13 = vld [vmem:[%s11026_s0 + $0xcc] ss:$16 sps:$4 sm:$0xff]   ;;  %v7335_v14 = vld [vmem:[%s11025_s1 + $0x188] ss:$16 sps:$4 sm:$0xff]  }
  0x49   :  { %1358 = vmatprep.subr.bf16.mxu1 %v7262_v15  ;;  %v7338_v15 = vld [vmem:[%s11025_s1 + $0x388] ss:$16 sps:$4 sm:$0xff]  }
  0x4a   :  { %1058 = vmatmul.mubr.bf16.gmra.mxu0 %v8491_v16 }
  0x4b   :  { %1171 = vmatmul.mubr.bf16.gmra.mxu1 %v8496_v17  ;;  %1246 = vmatpush1.bf16.msra.mxu0 %v7257_v18  ;;  %v7349_v18 = vld [vmem:[%s11025_s1 + $0x16c] ss:$16 sps:$4 sm:$0xff]  }
  0x4c   :  { %1359 = vmatpush1.bf16.msra.mxu1 %v7260_v19  ;;  %1247 = vmatprep.subr.bf16.mxu0 %v7265_v20  ;;  %v7352_v19 = vld [vmem:[%s11025_s1 + $0x36c] ss:$16 sps:$4 sm:$0xff]   ;;  %v8731_v20 = vld [vmem:[%s11026_s0 + $0xc0] ss:$16 sps:$4 sm:$0xff]  }
  0x4d   :  { %1360 = vmatprep.subr.bf16.mxu1 %v7268_v21  ;;  %1067 = vmatprep.mubr.bf16.mxu0 %v8513_v22  ;;  %v8736_v21 = vld [vmem:[%s11026_s0 + $0xc8] ss:$16 sps:$4 sm:$0xff]  }
  0x4e   :  { %1180 = vmatprep.mubr.bf16.mxu1 %v8518_v23 }
  0x4f   :  { %1248 = vmatpush1.bf16.msra.mxu0 %v7263_v24  ;;  %v7347_v24 = vld [vmem:[%s11025_s1 + $0x168] ss:$16 sps:$4 sm:$0xff]  }
  0x50   :  { %1361 = vmatpush1.bf16.msra.mxu1 %v7266_v25  ;;  %1249 = vmatprep.subr.bf16.mxu0 %v7277_v26  ;;  %v7350_v25 = vld [vmem:[%s11025_s1 + $0x368] ss:$16 sps:$4 sm:$0xff]   ;;  %v7355_v26 = vld [vmem:[%s11025_s1 + $0x14c] ss:$16 sps:$4 sm:$0xff]  }
  0x51   :  { %1362 = vmatprep.subr.bf16.mxu1 %v7280_v27  ;;  %v7358_v27 = vld [vmem:[%s11025_s1 + $0x34c] ss:$16 sps:$4 sm:$0xff]  }
  0x52   :  { %1068 = vmatmul.mubr.bf16.gmra.mxu0 %v8539_v28 }
  0x53   :  { %1181 = vmatmul.mubr.bf16.gmra.mxu1 %v8544_v29  ;;  %1250 = vmatpush1.bf16.msra.mxu0 %v7275_v30  ;;  %v8753_v30 = vld [vmem:[%s11026_s0 + $0xe4] ss:$16 sps:$4 sm:$0xff]  }
  0x54   :  { %1363 = vmatpush1.bf16.msra.mxu1 %v7278_v31  ;;  %1251 = vmatprep.subr.bf16.mxu0 %v7283_v32  ;;  %v8758_v31 = vld [vmem:[%s11026_s0 + $0xec] ss:$16 sps:$4 sm:$0xff]   ;;  %v7353_v32 = vld [vmem:[%s11025_s1 + $0x148] ss:$16 sps:$4 sm:$0xff]  }
  0x55   :  { %1364 = vmatprep.subr.bf16.mxu1 %v7286_v33  ;;  %1077 = vmatprep.mubr.bf16.mxu0 %v8561_v34  ;;  %v7356_v33 = vld [vmem:[%s11025_s1 + $0x348] ss:$16 sps:$4 sm:$0xff]  }
  0x56   :  { %1190 = vmatprep.mubr.bf16.mxu1 %v8566_v35 }
  0x57   :  { %1252 = vmatpush1.bf16.msra.mxu0 %v7281_v36  ;;  %v7367_v36 = vld [vmem:[%s11025_s1 + $0x12c] ss:$16 sps:$4 sm:$0xff]  }
  0x58   :  { %1365 = vmatpush1.bf16.msra.mxu1 %v7284_v37  ;;  %1253 = vmatprep.subr.bf16.mxu0 %v7295_v38  ;;  %v7370_v37 = vld [vmem:[%s11025_s1 + $0x32c] ss:$16 sps:$4 sm:$0xff]   ;;  %v8779_v38 = vld [vmem:[%s11026_s0 + $0xe0] ss:$16 sps:$4 sm:$0xff]  }
  0x59   :  { %1366 = vmatprep.subr.bf16.mxu1 %v7298_v39  ;;  %v8784_v39 = vld [vmem:[%s11026_s0 + $0xe8] ss:$16 sps:$4 sm:$0xff]  }
  0x5a   :  { %1078 = vmatmul.mubr.bf16.gmra.mxu0 %v8587_v40 }
  0x5b   :  { %1191 = vmatmul.mubr.bf16.gmra.mxu1 %v8592_v41  ;;  %1254 = vmatpush1.bf16.msra.mxu0 %v7293_v42  ;;  %v7365_v42 = vld [vmem:[%s11025_s1 + $0x128] ss:$16 sps:$4 sm:$0xff]  }
  0x5c   :  { %1367 = vmatpush1.bf16.msra.mxu1 %v7296_v43  ;;  %1255 = vmatprep.subr.bf16.mxu0 %v7301_v44  ;;  %v7368_v43 = vld [vmem:[%s11025_s1 + $0x328] ss:$16 sps:$4 sm:$0xff]   ;;  %v7373_v44 = vld [vmem:[%s11025_s1 + $0x10c] ss:$16 sps:$4 sm:$0xff]  }
  0x5d   :  { %1368 = vmatprep.subr.bf16.mxu1 %v7304_v45  ;;  %1087 = vmatprep.mubr.bf16.mxu0 %v8609_v46  ;;  %v7376_v45 = vld [vmem:[%s11025_s1 + $0x30c] ss:$16 sps:$4 sm:$0xff]  }
  0x5e   :  { %1200 = vmatprep.mubr.bf16.mxu1 %v8614_v47 }
  0x5f   :  { %1256 = vmatpush1.bf16.msra.mxu0 %v7299_v48  ;;  %v7371_v48 = vld [vmem:[%s11025_s1 + $0x108] ss:$16 sps:$4 sm:$0xff]  }
  0x60   :  { %1369 = vmatpush1.bf16.msra.mxu1 %v7302_v50  ;;  %1257 = vmatprep.subr.bf16.mxu0 %v7313_v52  ;;  %v7374_v50 = vld [vmem:[%s11025_s1 + $0x308] ss:$16 sps:$4 sm:$0xff]   ;;  %v8809_v52 = vld [vmem:[%s11027_s2 + $0xe4] ss:$16 sps:$4 sm:$0xff]  }
  0x61   :  { %1370 = vmatprep.subr.bf16.mxu1 %v7316_v53  ;;  %v8814_v53 = vld [vmem:[%s11027_s2 + $0xec] ss:$16 sps:$4 sm:$0xff]  }
  0x62   :  { %1088 = vmatmul.mubr.bf16.gmra.mxu0 %v8635_v54 }
  0x63   :  { %1201 = vmatmul.mubr.bf16.gmra.mxu1 %v8640_v55  ;;  %1258 = vmatpush2.bf16.msra.mxu0 %v7311_v56  ;;  %v8821_v56 = vld [vmem:[%s11027_s2 + $0xe0] ss:$16 sps:$4 sm:$0xff]  }
  0x64   :  { %1371 = vmatpush2.bf16.msra.mxu1 %v7314_v57  ;;  %1259 = vmatprep.subr.bf16.mxu0 %v7319_v58  ;;  %v8826_v57 = vld [vmem:[%s11027_s2 + $0xc4] ss:$16 sps:$4 sm:$0xff]   ;;  %v8831_v58 = vld [vmem:[%s11027_s2 + $0xe8] ss:$16 sps:$4 sm:$0xff]  }
  0x65   :  { %1372 = vmatprep.subr.bf16.mxu1 %v7322_v59  ;;  %1097 = vmatprep.mubr.bf16.mxu0 %v8657_v60  ;;  %v8850_v59 = vld [vmem:[%s11027_s2 + $0xa4] ss:$16 sps:$4 sm:$0xff]  }
  0x66   :  { %1210 = vmatprep.mubr.bf16.mxu1 %v8662_v61 }
  0x67   :  { %1260 = vmatpush2.bf16.msra.mxu0 %v7317_v62  ;;  %v8857_v62 = vld [vmem:[%s11027_s2 + $0xc8] ss:$16 sps:$4 sm:$0xff]  }
  0x68   :  { %1373 = vmatpush2.bf16.msra.mxu1 %v7320_v63  ;;  %1261 = vmatprep.subr.bf16.mxu0 %v7331_v0  ;;  %v8888_v63 = vld [vmem:[%s11027_s2 + $0x8c] ss:$16 sps:$4 sm:$0xff]   ;;  %v8896_v0 = vld [vmem:[%s11027_s2 + $0x80] ss:$16 sps:$4 sm:$0xff]  }
  0x69   :  { %1374 = vmatprep.subr.bf16.mxu1 %v7334_v1  ;;  %v8903_v1 = vld [vmem:[%s11027_s2 + $0x64] ss:$16 sps:$4 sm:$0xff]  }
  0x6a   :  { %1098 = vmatmul.mubr.bf16.gmra.mxu0 %v8683_v2 }
  0x6b   :  { %1211 = vmatmul.mubr.bf16.gmra.mxu1 %v8688_v3  ;;  %1262 = vmatpush2.bf16.msra.mxu0 %v7329_v6  ;;  %v8933_v6 = vld [vmem:[%s11027_s2 + $0x68] ss:$16 sps:$4 sm:$0xff]  }
  0x6c   :  { %1375 = vmatpush2.bf16.msra.mxu1 %v7332_v7  ;;  %1263 = vmatprep.subr.bf16.mxu0 %v7337_v8  ;;  %v8939_v7 = vld [vmem:[%s11027_s2 + $0x4c] ss:$16 sps:$4 sm:$0xff]   ;;  %v8951_v8 = vld [vmem:[%s11027_s2 + $0x40] ss:$16 sps:$4 sm:$0xff]  }
  0x6d   :  { %1376 = vmatprep.subr.bf16.mxu1 %v7340_v9  ;;  %1107 = vmatprep.mubr.bf16.mxu0 %v8705_v12  ;;  %v8983_v9 = vld [vmem:[%s11027_s2 + $0x4] ss:$16 sps:$4 sm:$0xff]  }
  0x6e   :  { %1220 = vmatprep.mubr.bf16.mxu1 %v8710_v13 }
  0x6f   :  { %1264 = vmatpush2.bf16.msra.mxu0 %v7335_v14  ;;  %v7419_v14 = vld [vmem:[%s11027_s2 + $0x28] ss:$16 sps:$4 sm:$0xff]  }
  0x70   :  { %1377 = vmatpush2.bf16.msra.mxu1 %v7338_v15  ;;  %1265 = vmatprep.subr.bf16.mxu0 %v7349_v18  ;;  %v7424_v15 = vld [vmem:[%s11027_s2 + $0xc] ss:$16 sps:$4 sm:$0xff]   ;;  %v7416_v18 = vld [vmem:[%s11027_s2] ss:$16 sps:$4 sm:$0xff]  }
  0x71   :  { %1378 = vmatprep.subr.bf16.mxu1 %v7352_v19 }
  0x72   :  { %1108 = vmatmul.mubr.bf16.gmra.mxu0 %v8731_v20 }
  0x73   :  { %1221 = vmatmul.mubr.bf16.gmra.mxu1 %v8736_v21  ;;  %1266 = vmatpush2.bf16.msra.mxu0 %v7347_v24 }
  0x74   :  { %1379 = vmatpush2.bf16.msra.mxu1 %v7350_v25  ;;  %1267 = vmatprep.subr.bf16.mxu0 %v7355_v26 }
  0x75   :  { %1380 = vmatprep.subr.bf16.mxu1 %v7358_v27  ;;  %1117 = vmatprep.mubr.bf16.mxu0 %v8753_v30 }
  0x76   :  { %1230 = vmatprep.mubr.bf16.mxu1 %v8758_v31 }
  0x77   :  { %1268 = vmatpush2.bf16.msra.mxu0 %v7353_v32 }
  0x78   :  { %1381 = vmatpush2.bf16.msra.mxu1 %v7356_v33  ;;  %1269 = vmatprep.subr.bf16.mxu0 %v7367_v36 }
  0x79   :  { %1382 = vmatprep.subr.bf16.mxu1 %v7370_v37 }
  0x7a   :  { %1118 = vmatmul.mubr.bf16.gmra.mxu0 %v8779_v38 }
  0x7b   :  { %1231 = vmatmul.mubr.bf16.gmra.mxu1 %v8784_v39  ;;  %1270 = vmatpush2.bf16.msra.mxu0 %v7365_v42 }
  0x7c   :  { %1383 = vmatpush2.bf16.msra.mxu1 %v7368_v43  ;;  %1271 = vmatprep.subr.bf16.mxu0 %v7373_v44 }
  0x7d   :  { %1384 = vmatprep.subr.bf16.mxu1 %v7376_v45  ;;  %1273 = vmatprep.mubr.bf16.mxu0 %v8380_v49  ;;  %v8838_v49 = vld [vmem:[%s11027_s2 + $0xcc] ss:$16 sps:$4 sm:$0xff]  }
  0x7e   :  { %1386 = vmatprep.mubr.bf16.mxu1 %v8388_v51  ;;  %v8843_v51 = vld [vmem:[%s11027_s2 + $0xc0] ss:$16 sps:$4 sm:$0xff]  }
  0x7f   :  { %1272 = vmatpush2.bf16.msra.mxu0 %v7371_v48 }
  0x80   :  { %1385 = vmatpush2.bf16.msra.mxu1 %v7374_v50  ;;  %1731 = vmatprep.subr.bf16.mxu0 %v8809_v52 }
  0x81   :  { %1774 = vmatprep.subr.bf16.mxu1 %v8814_v53 }
  0x82   :  { %1274 = vmatmul.mubr.bf16.vlgmr.msra.gmra.mxu0 %v8443_v4  ;;  %v8865_v4 = vld [vmem:[%s11027_s2 + $0xa0] ss:$16 sps:$4 sm:$0xff]  }
  0x83   :  { %1387 = vmatmul.mubr.bf16.vlgmr.msra.gmra.mxu1 %v8448_v5  ;;  %1732 = vmatpush1.bf16.msra.mxu0 %v8821_v56  ;;  %v8871_v5 = vld [vmem:[%s11027_s2 + $0xac] ss:$16 sps:$4 sm:$0xff]  }
  0x84   :  { %1283 = vmatprep.mubr.bf16.mxu0 %v8465_v10  ;;  %1396 = vmatprep.mubr.bf16.mxu1 %v8470_v11  ;;  %v8877_v10 = vld [vmem:[%s11027_s2 + $0x84] ss:$16 sps:$4 sm:$0xff]   ;;  %v8882_v11 = vld [vmem:[%s11027_s2 + $0xa8] ss:$16 sps:$4 sm:$0xff]  }
  0x85   :  { %1733 = vmatprep.subr.bf16.mxu0 %v8826_v57  ;;  %1775 = vmatpush1.bf16.msra.mxu1 %v8831_v58 }
  0x86   :  { %1776 = vmatprep.subr.bf16.mxu1 %v8838_v49 }
  0x87   :  { %1734 = vmatpush1.bf16.msra.mxu0 %v8843_v51 }
  0x88   :  { %1735 = vmatprep.subr.bf16.mxu0 %v8850_v59 }
  0x89   :  { %1777 = vmatpush1.bf16.msra.mxu1 %v8857_v62 }
  0x8a   :  { %1284 = vmatmul.mubr.bf16.gmra.mxu0 %v8491_v16  ;;  %v8908_v16 = vld [vmem:[%s11027_s2 + $0x88] ss:$16 sps:$4 sm:$0xff]   ;;  %1778 = vmatprep.subr.bf16.mxu1 %v8871_v5 }
  0x8b   :  { %1397 = vmatmul.mubr.bf16.gmra.mxu1 %v8496_v17  ;;  %1293 = vmatprep.mubr.bf16.mxu0 %v8513_v22  ;;  %v8917_v17 = vld [vmem:[%s11027_s2 + $0x60] ss:$16 sps:$4 sm:$0xff]   ;;  %v8923_v22 = vld [vmem:[%s11027_s2 + $0x6c] ss:$16 sps:$4 sm:$0xff]  }
  0x8c   :  { %1406 = vmatprep.mubr.bf16.mxu1 %v8518_v23  ;;  %1736 = vmatpush1.bf16.msra.mxu0 %v8865_v4  ;;  %v8928_v23 = vld [vmem:[%s11027_s2 + $0x44] ss:$16 sps:$4 sm:$0xff]  }
  0x8d   :  { %1737 = vmatprep.subr.bf16.mxu0 %v8877_v10  ;;  %1779 = vmatpush1.bf16.msra.mxu1 %v8882_v11 }
  0x8e   :  { %1780 = vmatprep.subr.bf16.mxu1 %v8888_v63 }
  0x90   :  { %1738 = vmatpush1.bf16.msra.mxu0 %v8896_v0 }
  0x91   :  { %1739 = vmatprep.subr.bf16.mxu0 %v8903_v1  ;;  %1781 = vmatpush1.bf16.msra.mxu1 %v8908_v16 }
  0x92   :  { %1294 = vmatmul.mubr.bf16.gmra.mxu0 %v8539_v28  ;;  %1782 = vmatprep.subr.bf16.mxu1 %v8923_v22  ;;  %v8958_v28 = vld [vmem:[%s11027_s2 + $0x24] ss:$16 sps:$4 sm:$0xff]  }
  0x93   :  { %1407 = vmatmul.mubr.bf16.gmra.mxu1 %v8544_v29  ;;  %1303 = vmatprep.mubr.bf16.mxu0 %v8561_v34  ;;  %v8964_v29 = vld [vmem:[%s11027_s2 + $0x48] ss:$16 sps:$4 sm:$0xff]   ;;  %v8971_v34 = vld [vmem:[%s11027_s2 + $0x20] ss:$16 sps:$4 sm:$0xff]  }
  0x94   :  { %1416 = vmatprep.mubr.bf16.mxu1 %v8566_v35  ;;  %1740 = vmatpush1.bf16.msra.mxu0 %v8917_v17  ;;  %v8976_v35 = vld [vmem:[%s11027_s2 + $0x2c] ss:$16 sps:$4 sm:$0xff]  }
  0x95   :  { %1741 = vmatprep.subr.bf16.mxu0 %v8928_v23  ;;  %1783 = vmatpush1.bf16.msra.mxu1 %v8933_v6 }
  0x96   :  { %1784 = vmatprep.subr.bf16.mxu1 %v8939_v7 }
  0x98   :  { %1742 = vmatpush1.bf16.msra.mxu0 %v8951_v8 }
  0x99   :  { %1743 = vmatprep.subr.bf16.mxu0 %v8958_v28  ;;  %1785 = vmatpush1.bf16.msra.mxu1 %v8964_v29 }
  0x9a   :  { %1304 = vmatmul.mubr.bf16.gmra.mxu0 %v8587_v40  ;;  %1786 = vmatprep.subr.bf16.mxu1 %v8976_v35  ;;  %v7422_v40 = vld [vmem:[%s11027_s2 + $0x8] ss:$16 sps:$4 sm:$0xff]  }
  0x9b   :  { %1417 = vmatmul.mubr.bf16.gmra.mxu1 %v8592_v41  ;;  %1313 = vmatprep.mubr.bf16.mxu0 %v8609_v46  ;;  %v11039_v41 = vmov 0   ;;  %v195_v46 = vlaneseq }
  0x9c   :  { %1426 = vmatprep.mubr.bf16.mxu1 %v8614_v47  ;;  %1744 = vmatpush1.bf16.msra.mxu0 %v8971_v34 }
  0x9d   :  { %1745 = vmatprep.subr.bf16.mxu0 %v8983_v9  ;;  %1787 = vmatpush1.bf16.msra.mxu1 %v7419_v14  ;;  %v9052_v47 = vshrl.u32 %v195_v46, 7 }
  0x9e   :  { %1788 = vmatprep.subr.bf16.mxu1 %v7424_v15 }
  0x9f   :  { %11043 = vst [vmem:[#allocation4_spill] sm:$0xff] %v9052_v47 }
  0xa0   :  { %1746 = vmatpush1.bf16.msra.mxu0 %v7416_v18 }
  0xa1   :  { %1789 = vmatpush1.bf16.msra.mxu1 %v7422_v40  ;;  %2083 = vmatprep.subr.bf16.mxu0 %v8809_v52 }
  0xa2   :  { %1314 = vmatmul.mubr.bf16.gmra.mxu0 %v8635_v54  ;;  %2126 = vmatprep.subr.bf16.mxu1 %v8814_v53  ;;  %v11038_v54 = vsub.s32 0, %v9052_v47 }
  0xa3   :  { %1427 = vmatmul.mubr.bf16.gmra.mxu1 %v8640_v55  ;;  %1323 = vmatprep.mubr.bf16.mxu0 %v8657_v60  ;;  %v9058_v55 = vld [vmem:[%s11028_s3] sm:$0xf]  ;;  %v11037_v60 = vsub.s32 1, %v9052_v47 }
  0xa4   :  { %1436 = vmatprep.mubr.bf16.mxu1 %v8662_v61  ;;  %v9064_v61 = vrot.slane %v9058_v55, %v11038_v54 }
  0xaa   :  { %1324 = vmatmul.mubr.bf16.gmra.mxu0 %v8683_v2  ;;  %v9069_v2 = vrot.slane %v9058_v55, %v11037_v60 }
  0xab   :  { %1437 = vmatmul.mubr.bf16.gmra.mxu1 %v8688_v3  ;;  %1333 = vmatprep.mubr.bf16.mxu0 %v8705_v12 }
  0xac   :  { %1446 = vmatprep.mubr.bf16.mxu1 %v8710_v13 }
  0xb2   :  { %1334 = vmatmul.mubr.bf16.gmra.mxu0 %v8731_v20 }
  0xb3   :  { %1447 = vmatmul.mubr.bf16.gmra.mxu1 %v8736_v21  ;;  %1343 = vmatprep.mubr.bf16.mxu0 %v8753_v30 }
  0xb4   :  { %1456 = vmatprep.mubr.bf16.mxu1 %v8758_v31 }
  0xba   :  { %1344 = vmatmul.mubr.bf16.gmra.mxu0 %v8779_v38 }
  0xbb   :  { %1457 = vmatmul.mubr.bf16.gmra.mxu1 %v8784_v39  ;;  %1763 = vmatprep.mubr.bf16.mxu0 %v11039_v41 }
  0xbc   :  { %1806 = vmatprep.mubr.bf16.mxu1 %v11039_v41 }
  0xc2   :  { %1764 = vmatmul.mubr.bf16.vlgmr.msra.gmra.mxu0 %v11039_v41 }
  0xc3   :  { %1807 = vmatmul.mubr.bf16.vlgmr.msra.gmra.mxu1 %v11039_v41  ;;  %2084 = vmatpush1.bf16.msra.mxu0 %v8821_v56 }
  0xc4   :  { %2127 = vmatpush1.bf16.msra.mxu1 %v8831_v58  ;;  %2085 = vmatprep.subr.bf16.mxu0 %v8826_v57 }
  0xc5   :  { %2128 = vmatprep.subr.bf16.mxu1 %v8838_v49  ;;  %2115 = vmatprep.mubr.bf16.mxu0 %v11039_v41 }
  0xc6   :  { %2158 = vmatprep.mubr.bf16.mxu1 %v11039_v41 }
  0xc7   :  { %2086 = vmatpush1.bf16.msra.mxu0 %v8843_v51 }
  0xc8   :  { %2129 = vmatpush1.bf16.msra.mxu1 %v8857_v62  ;;  %2087 = vmatprep.subr.bf16.mxu0 %v8850_v59 }
  0xc9   :  { %2130 = vmatprep.subr.bf16.mxu1 %v8871_v5 }
  0xcb   :  { %2088 = vmatpush1.bf16.msra.mxu0 %v8865_v4 }
  0xcc   :  { %2131 = vmatpush1.bf16.msra.mxu1 %v8882_v11  ;;  %2089 = vmatprep.subr.bf16.mxu0 %v8877_v10 }
  0xcd   :  { %2132 = vmatprep.subr.bf16.mxu1 %v8888_v63 }
  0xcf   :  { %2090 = vmatpush1.bf16.msra.mxu0 %v8896_v0 }
  0xd0   :  { %2133 = vmatpush1.bf16.msra.mxu1 %v8908_v16  ;;  %2091 = vmatprep.subr.bf16.mxu0 %v8903_v1 }
  0xd1   :  { %2134 = vmatprep.subr.bf16.mxu1 %v8923_v22 }
  0xd3   :  { %2092 = vmatpush1.bf16.msra.mxu0 %v8917_v17 }
  0xd4   :  { %2135 = vmatpush1.bf16.msra.mxu1 %v8933_v6  ;;  %2093 = vmatprep.subr.bf16.mxu0 %v8928_v23 }
  0xd5   :  { %2136 = vmatprep.subr.bf16.mxu1 %v8939_v7 }
  0xd7   :  { %2094 = vmatpush1.bf16.msra.mxu0 %v8951_v8 }
  0xd8   :  { %2137 = vmatpush1.bf16.msra.mxu1 %v8964_v29  ;;  %2095 = vmatprep.subr.bf16.mxu0 %v8958_v28 }
  0xd9   :  { %2138 = vmatprep.subr.bf16.mxu1 %v8976_v35 }
  0xdb   :  { %2096 = vmatpush1.bf16.msra.mxu0 %v8971_v34 }
  0xdc   :  { %2139 = vmatpush1.bf16.msra.mxu1 %v7419_v14  ;;  %2097 = vmatprep.subr.bf16.mxu0 %v8983_v9 }
  0xdd   :  { %2140 = vmatprep.subr.bf16.mxu1 %v7424_v15 }
  0xdf   :  { %2098 = vmatpush1.bf16.msra.mxu0 %v7416_v18 }
  0xe0   :  { %2141 = vmatpush1.bf16.msra.mxu1 %v7422_v40 }
 0x102   :  { %v1049_v3 = vpop.f32.mrf.mxu0 }
 0x103   :  { %v1162_v12 = vpop.f32.mrf.mxu1  ;;  %v1050_v13 = vadd.f32 %v1049_v3, %v9064_v61 }
 0x104   :  { %v1051_v19 = vpop.f32.mrf.mxu0 }
 0x105   :  { %v1164_v20 = vpop.f32.mrf.mxu1  ;;  %v9072_v21 = vadd.f32 %v1162_v12, %v1050_v13  ;;  %v1052_v24 = vadd.f32 %v1051_v19, %v9069_v2 }
 0x106   :  { %v1053_v25 = vpop.f32.mrf.mxu0 }
 0x107   :  { %v1166_v26 = vpop.f32.mrf.mxu1  ;;  %v9075_v27 = vadd.f32 %v1164_v20, %v1052_v24  ;;  %v1054_v30 = vadd.f32 %v1053_v25, %v9064_v61 }
 0x108   :  { %v9078_v31 = vpop.f32.mrf.mxu0 }
 0x109   :  { %v9080_v32 = vpop.f32.mrf.mxu1  ;;  %v9082_v33 = vadd.f32 %v1166_v26, %v1054_v30 }
 0x10a   :  { %v1059_v36 = vpop.f32.mrf.mxu0 }
 0x10b   :  { %v1172_v37 = vpop.f32.mrf.mxu1  ;;  %v1060_v38 = vadd.f32 %v1059_v36, %v9064_v61 }
 0x10c   :  { %v1061_v39 = vpop.f32.mrf.mxu0 }
 0x10d   :  { %v1174_v42 = vpop.f32.mrf.mxu1  ;;  %v9085_v43 = vadd.f32 %v1172_v37, %v1060_v38  ;;  %v1062_v44 = vadd.f32 %v1061_v39, %v9069_v2 }
 0x10e   :  { %v1063_v45 = vpop.f32.mrf.mxu0 }
 0x10f   :  { %v1176_v48 = vpop.f32.mrf.mxu1  ;;  %v9088_v50 = vadd.f32 %v1174_v42, %v1062_v44  ;;  %v1064_v52 = vadd.f32 %v1063_v45, %v9064_v61 }
 0x110   :  { %v9091_v53 = vpop.f32.mrf.mxu0 }
 0x111   :  { %v9093_v56 = vpop.f32.mrf.mxu1  ;;  %v9095_v57 = vadd.f32 %v1176_v48, %v1064_v52 }
 0x112   :  { %v1069_v58 = vpop.f32.mrf.mxu0 }
 0x113   :  { %v1182_v49 = vpop.f32.mrf.mxu1  ;;  %v1070_v51 = vadd.f32 %v1069_v58, %v9064_v61 }
 0x114   :  { %v1071_v59 = vpop.f32.mrf.mxu0 }
 0x115   :  { %v1184_v62 = vpop.f32.mrf.mxu1  ;;  %v9098_v4 = vadd.f32 %v1182_v49, %v1070_v51  ;;  %v1072_v5 = vadd.f32 %v1071_v59, %v9069_v2 }
 0x116   :  { %v1073_v10 = vpop.f32.mrf.mxu0 }
 0x117   :  { %v1186_v11 = vpop.f32.mrf.mxu1  ;;  %v9101_v63 = vadd.f32 %v1184_v62, %v1072_v5  ;;  %v1074_v0 = vadd.f32 %v1073_v10, %v9064_v61 }
 0x118   :  { %v9104_v1 = vpop.f32.mrf.mxu0 }
 0x119   :  { %11044 = vst [vmem:[#allocation5_spill] sm:$0xff] %v9101_v63  ;;  %v9106_v16 = vpop.f32.mrf.mxu1  ;;  %v9108_v17 = vadd.f32 %v1186_v11, %v1074_v0 }
 0x11a   :  { %11045 = vst [vmem:[#allocation6_spill] sm:$0xff] %v9106_v16  ;;  %v1079_v22 = vpop.f32.mrf.mxu0 }
 0x11b   :  { %11046 = vst [vmem:[#allocation7_spill] sm:$0xff] %v9108_v17  ;;  %v1192_v23 = vpop.f32.mrf.mxu1  ;;  %v1080_v6 = vadd.f32 %v1079_v22, %v9064_v61 }
 0x11c   :  { %v1081_v7 = vpop.f32.mrf.mxu0 }
 0x11d   :  { %v1194_v8 = vpop.f32.mrf.mxu1  ;;  %v9111_v28 = vadd.f32 %v1192_v23, %v1080_v6  ;;  %v1082_v29 = vadd.f32 %v1081_v7, %v9069_v2 }
 0x11e   :  { %v1083_v34 = vpop.f32.mrf.mxu0 }
 0x11f   :  { %11047 = vst [vmem:[#allocation8_spill] sm:$0xff] %v9111_v28  ;;  %v1196_v35 = vpop.f32.mrf.mxu1  ;;  %v9114_v9 = vadd.f32 %v1194_v8, %v1082_v29  ;;  %v1084_v14 = vadd.f32 %v1083_v34, %v9064_v61 }
 0x120   :  { %v9117_v15 = vpop.f32.mrf.mxu0 }
 0x121   :  { %11048 = vst [vmem:[#allocation9_spill] sm:$0xff] %v9114_v9  ;;  %11049 = vst [vmem:[#allocation10_spill] sm:$0xff] %v9117_v15  ;;  %v9119_v18 = vpop.f32.mrf.mxu1  ;;  %v9121_v40 = vadd.f32 %v1196_v35, %v1084_v14 }
 0x122   :  { %11050 = vst [vmem:[#allocation11_spill] sm:$0xff] %v9119_v18  ;;  %v1089_v46 = vpop.f32.mrf.mxu0 }
 0x123   :  { %11051 = vst [vmem:[#allocation12_spill] sm:$0xff] %v9121_v40  ;;  %v1202_v3 = vpop.f32.mrf.mxu1  ;;  %v1090_v12 = vadd.f32 %v1089_v46, %v9064_v61 }
 0x124   :  { %v1091_v13 = vpop.f32.mrf.mxu0 }
 0x125   :  { %v1204_v19 = vpop.f32.mrf.mxu1  ;;  %v9124_v20 = vadd.f32 %v1202_v3, %v1090_v12  ;;  %v1092_v24 = vadd.f32 %v1091_v13, %v9069_v2 }
 0x126   :  { %v1093_v25 = vpop.f32.mrf.mxu0 }
 0x127   :  { %11052 = vst [vmem:[#allocation13_spill] sm:$0xff] %v9124_v20  ;;  %v1206_v26 = vpop.f32.mrf.mxu1  ;;  %v9127_v30 = vadd.f32 %v1204_v19, %v1092_v24  ;;  %v1094_v36 = vadd.f32 %v1093_v25, %v9064_v61  ;;  %v9469_v20 = vld [vmem:[%s11027_s2 + $0x28] ss:$16 sps:$4 sm:$0xff]  }
 0x128   :  { %v9130_v37 = vpop.f32.mrf.mxu0 }
 0x129   :  { %11053 = vst [vmem:[#allocation14_spill] sm:$0xff] %v9127_v30  ;;  %11054 = vst [vmem:[#allocation15_spill] sm:$0xff] %v9130_v37  ;;  %v9132_v38 = vpop.f32.mrf.mxu1  ;;  %v9134_v39 = vadd.f32 %v1206_v26, %v1094_v36  ;;  %v11035_v36 = vsub.s32 2, %v9052_v47  ;;  %v9464_v30 = vld [vmem:[%s11027_s2 + $0x20] ss:$16 sps:$4 sm:$0xff]  }
 0x12a   :  { %11055 = vst [vmem:[#allocation16_spill] sm:$0xff] %v9132_v38  ;;  %v1099_v42 = vpop.f32.mrf.mxu0  ;;  %v9457_v38 = vld [vmem:[%s11027_s2 + $0x2c] ss:$16 sps:$4 sm:$0xff]   ;;  %v9476_v37 = vld [vmem:[%s11027_s2 + $0x4] ss:$16 sps:$4 sm:$0xff]  }
 0x12b   :  { %11056 = vst [vmem:[#allocation17_spill] sm:$0xff] %v9134_v39  ;;  %v1212_v44 = vpop.f32.mrf.mxu1  ;;  %v1100_v45 = vadd.f32 %v1099_v42, %v9064_v61 }
 0x12c   :  { %v1101_v48 = vpop.f32.mrf.mxu0 }
 0x12d   :  { %v1214_v52 = vpop.f32.mrf.mxu1  ;;  %v9137_v58 = vadd.f32 %v1212_v44, %v1100_v45  ;;  %v1102_v49 = vadd.f32 %v1101_v48, %v9069_v2 }
 0x12e   :  { %v1103_v51 = vpop.f32.mrf.mxu0 }
 0x12f   :  { %11057 = vst [vmem:[#allocation18_spill] sm:$0xff] %v9137_v58  ;;  %v1216_v59 = vpop.f32.mrf.mxu1  ;;  %v9140_v62 = vadd.f32 %v1214_v52, %v1102_v49  ;;  %v1104_v5 = vadd.f32 %v1103_v51, %v9064_v61  ;;  %v11036_v52 = vsub.s32 3, %v9052_v47 }
 0x130   :  { %v9143_v10 = vpop.f32.mrf.mxu0 }
 0x131   :  { %11058 = vst [vmem:[#allocation19_spill] sm:$0xff] %v9140_v62  ;;  %11059 = vst [vmem:[#allocation20_spill] sm:$0xff] %v9143_v10  ;;  %v9145_v11 = vpop.f32.mrf.mxu1  ;;  %v9147_v0 = vadd.f32 %v1216_v59, %v1104_v5 }
 0x132   :  { %11060 = vst [vmem:[#allocation21_spill] sm:$0xff] %v9145_v11  ;;  %v1109_v22 = vpop.f32.mrf.mxu0 }
 0x133   :  { %11061 = vst [vmem:[#allocation22_spill] sm:$0xff] %v9147_v0  ;;  %v1222_v23 = vpop.f32.mrf.mxu1  ;;  %v1110_v6 = vadd.f32 %v1109_v22, %v9064_v61  ;;  %v9174_v22 = vrot.slane %v9058_v55, %v11035_v36 }
 0x134   :  { %v1111_v7 = vpop.f32.mrf.mxu0 }
 0x135   :  { %v1224_v8 = vpop.f32.mrf.mxu1  ;;  %v9150_v29 = vadd.f32 %v1222_v23, %v1110_v6  ;;  %v1112_v34 = vadd.f32 %v1111_v7, %v9069_v2 }
 0x136   :  { %v1113_v35 = vpop.f32.mrf.mxu0 }
 0x137   :  { %11062 = vst [vmem:[#allocation23_spill] sm:$0xff] %v9150_v29  ;;  %v1226_v14 = vpop.f32.mrf.mxu1  ;;  %v9153_v46 = vadd.f32 %v1224_v8, %v1112_v34  ;;  %v1114_v3 = vadd.f32 %v1113_v35, %v9064_v61  ;;  %v9185_v8 = vrot.slane %v9058_v55, %v11036_v52 }
 0x138   :  { %v9156_v12 = vpop.f32.mrf.mxu0 }
 0x139   :  { %11063 = vst [vmem:[#allocation24_spill] sm:$0xff] %v9153_v46  ;;  %11064 = vst [vmem:[#allocation25_spill] sm:$0xff] %v9156_v12  ;;  %v9158_v13 = vpop.f32.mrf.mxu1  ;;  %v9160_v19 = vadd.f32 %v1226_v14, %v1114_v3 }
 0x13a   :  { %11065 = vst [vmem:[#allocation26_spill] sm:$0xff] %v9158_v13  ;;  %v1119_v24 = vpop.f32.mrf.mxu0 }
 0x13b   :  { %11066 = vst [vmem:[#allocation27_spill] sm:$0xff] %v9160_v19  ;;  %v1232_v25 = vpop.f32.mrf.mxu1  ;;  %v1120_v26 = vadd.f32 %v1119_v24, %v9064_v61 }
 0x13c   :  { %v1121_v42 = vpop.f32.mrf.mxu0 }
 0x13d   :  { %v1234_v44 = vpop.f32.mrf.mxu1  ;;  %v9164_v45 = vadd.f32 %v1232_v25, %v1120_v26  ;;  %v1122_v48 = vadd.f32 %v1121_v42, %v9069_v2 }
 0x13e   :  { %v1123_v49 = vpop.f32.mrf.mxu0 }
 0x13f   :  { %11067 = vst [vmem:[#allocation28_spill] sm:$0xff] %v9164_v45  ;;  %v1236_v51 = vpop.f32.mrf.mxu1  ;;  %v9168_v59 = vadd.f32 %v1234_v44, %v1122_v48  ;;  %v1124_v5 = vadd.f32 %v1123_v49, %v9064_v61 }
 0x140   :  { %v9176_v23 = vpop.f32.mrf.mxu0 }
 0x141   :  { %11068 = vst [vmem:[#allocation29_spill] sm:$0xff] %v9168_v59  ;;  %11069 = vst [vmem:[#allocation30_spill] sm:$0xff] %v9176_v23  ;;  %v9178_v6 = vpop.f32.mrf.mxu1  ;;  %v9180_v7 = vadd.f32 %v1236_v51, %v1124_v5 }
 0x142   :  { %11070 = vst [vmem:[#allocation31_spill] sm:$0xff] %v9178_v6  ;;  %v1275_v34 = vpop.f32.mrf.mxu0 }
 0x143   :  { %11071 = vst [vmem:[#allocation32_spill] sm:$0xff] %v9180_v7  ;;  %v1388_v35 = vpop.f32.mrf.mxu1  ;;  %v1276_v61 = vadd.f32 %v1275_v34, %v9174_v22 }
 0x144   :  { %v1277_v14 = vpop.f32.mrf.mxu0 }
 0x145   :  { %v1390_v3 = vpop.f32.mrf.mxu1  ;;  %v9188_v24 = vadd.f32 %v1388_v35, %v1276_v61  ;;  %v1278_v25 = vadd.f32 %v1277_v14, %v9185_v8 }
 0x146   :  { %v1279_v26 = vpop.f32.mrf.mxu0 }
 0x147   :  { %v1392_v42 = vpop.f32.mrf.mxu1  ;;  %v9191_v44 = vadd.f32 %v1390_v3, %v1278_v25  ;;  %v1280_v48 = vadd.f32 %v1279_v26, %v9174_v22 }
 0x148   :  { %v9194_v49 = vpop.f32.mrf.mxu0 }
 0x149   :  { %v9196_v55 = vpop.f32.mrf.mxu1  ;;  %v9198_v51 = vadd.f32 %v1392_v42, %v1280_v48 }
 0x14a   :  { %v1285_v5 = vpop.f32.mrf.mxu0 }
 0x14b   :  { %v1398_v34 = vpop.f32.mrf.mxu1  ;;  %v1286_v36 = vadd.f32 %v1285_v5, %v9174_v22 }
 0x14c   :  { %v1287_v35 = vpop.f32.mrf.mxu0 }
 0x14d   :  { %v1400_v61 = vpop.f32.mrf.mxu1  ;;  %v9201_v52 = vadd.f32 %v1398_v34, %v1286_v36  ;;  %v1288_v14 = vadd.f32 %v1287_v35, %v9185_v8 }
 0x14e   :  { %v1289_v3 = vpop.f32.mrf.mxu0 }
 0x14f   :  { %v1402_v25 = vpop.f32.mrf.mxu1  ;;  %v9204_v60 = vadd.f32 %v1400_v61, %v1288_v14  ;;  %v1290_v26 = vadd.f32 %v1289_v3, %v9174_v22 }
 0x150   :  { %v9207_v54 = vpop.f32.mrf.mxu0 }
 0x151   :  { %v9209_v42 = vpop.f32.mrf.mxu1  ;;  %v9211_v48 = vadd.f32 %v1402_v25, %v1290_v26 }
 0x152   :  { %v1295_v41 = vpop.f32.mrf.mxu0 }
 0x153   :  { %v1408_v5 = vpop.f32.mrf.mxu1  ;;  %v1296_v47 = vadd.f32 %v1295_v41, %v9174_v22 }
 0x154   :  { %v1297_v36 = vpop.f32.mrf.mxu0 }
 0x155   :  { %v1410_v34 = vpop.f32.mrf.mxu1  ;;  %v9214_v7 = vadd.f32 %v1408_v5, %v1296_v47  ;;  %v1298_v35 = vadd.f32 %v1297_v36, %v9185_v8 }
 0x156   :  { %v1299_v61 = vpop.f32.mrf.mxu0 }
 0x157   :  { %11072 = vst [vmem:[#allocation33_spill] sm:$0xff] %v9214_v7  ;;  %v1412_v14 = vpop.f32.mrf.mxu1  ;;  %v9217_v6 = vadd.f32 %v1410_v34, %v1298_v35  ;;  %v1300_v3 = vadd.f32 %v1299_v61, %v9174_v22 }
 0x158   :  { %v9220_v59 = vpop.f32.mrf.mxu0 }
 0x159   :  { %11073 = vst [vmem:[#allocation34_spill] sm:$0xff] %v9217_v6  ;;  %11074 = vst [vmem:[#allocation35_spill] sm:$0xff] %v9220_v59  ;;  %v9222_v25 = vpop.f32.mrf.mxu1  ;;  %v9224_v26 = vadd.f32 %v1412_v14, %v1300_v3 }
 0x15a   :  { %11075 = vst [vmem:[#allocation36_spill] sm:$0xff] %v9222_v25  ;;  %v1305_v45 = vpop.f32.mrf.mxu0 }
 0x15b   :  { %11076 = vst [vmem:[#allocation37_spill] sm:$0xff] %v9224_v26  ;;  %v1418_v41 = vpop.f32.mrf.mxu1  ;;  %v1306_v23 = vadd.f32 %v1305_v45, %v9174_v22 }
 0x15c   :  { %v1307_v47 = vpop.f32.mrf.mxu0 }
 0x15d   :  { %v1420_v5 = vpop.f32.mrf.mxu1  ;;  %v9227_v19 = vadd.f32 %v1418_v41, %v1306_v23  ;;  %v1308_v36 = vadd.f32 %v1307_v47, %v9185_v8 }
 0x15e   :  { %v1309_v34 = vpop.f32.mrf.mxu0 }
 0x15f   :  { %11077 = vst [vmem:[#allocation38_spill] sm:$0xff] %v9227_v19  ;;  %v1422_v35 = vpop.f32.mrf.mxu1  ;;  %v9230_v13 = vadd.f32 %v1420_v5, %v1308_v36  ;;  %v1310_v61 = vadd.f32 %v1309_v34, %v9174_v22  ;;  %v9488_v19 = vld [vmem:[%s11027_s2] ss:$16 sps:$4 sm:$0xff]  }
 0x160   :  { %v9233_v46 = vpop.f32.mrf.mxu0 }
 0x161   :  { %11078 = vst [vmem:[#allocation39_spill] sm:$0xff] %v9230_v13  ;;  %11079 = vst [vmem:[#allocation40_spill] sm:$0xff] %v9233_v46  ;;  %v9235_v14 = vpop.f32.mrf.mxu1  ;;  %v9237_v3 = vadd.f32 %v1422_v35, %v1310_v61  ;;  %v1066_v46 = vadd.f32 %v9091_v53, %v9069_v2 }
 0x162   :  { %11080 = vst [vmem:[#allocation41_spill] sm:$0xff] %v9235_v14  ;;  %v1315_v29 = vpop.f32.mrf.mxu0  ;;  %v9493_v14 = vld [vmem:[%s11027_s2 + $0x8] ss:$16 sps:$4 sm:$0xff]  }
 0x163   :  { %11081 = vst [vmem:[#allocation42_spill] sm:$0xff] %v9237_v3  ;;  %v1428_v45 = vpop.f32.mrf.mxu1  ;;  %v1316_v12 = vadd.f32 %v1315_v29, %v9174_v22  ;;  %v9481_v3 = vld [vmem:[%s11027_s2 + $0xc] ss:$16 sps:$4 sm:$0xff]   ;;  %v1179_v7 = vadd.f32 %v9093_v56, %v1066_v46 }
 0x164   :  { %v1317_v23 = vpop.f32.mrf.mxu0 }
 0x165   :  { %v1430_v41 = vpop.f32.mrf.mxu1  ;;  %v9240_v0 = vadd.f32 %v1428_v45, %v1316_v12  ;;  %v1318_v47 = vadd.f32 %v1317_v23, %v9185_v8 }
 0x166   :  { %v1319_v5 = vpop.f32.mrf.mxu0 }
 0x167   :  { %11082 = vst [vmem:[#allocation43_spill] sm:$0xff] %v9240_v0  ;;  %v1432_v36 = vpop.f32.mrf.mxu1  ;;  %v9243_v11 = vadd.f32 %v1430_v41, %v1318_v47  ;;  %v1320_v34 = vadd.f32 %v1319_v5, %v9174_v22 }
 0x168   :  { %v1321_v62 = vpop.f32.mrf.mxu0 }
 0x169   :  { %11083 = vst [vmem:[#allocation44_spill] sm:$0xff] %v9243_v11  ;;  %v1434_v58 = vpop.f32.mrf.mxu1  ;;  %v9246_v35 = vadd.f32 %v1432_v36, %v1320_v34  ;;  %v1322_v61 = vadd.f32 %v1321_v62, %v9185_v8 }
 0x16a   :  { %v1325_v10 = vpop.f32.mrf.mxu0 }
 0x16b   :  { %11084 = vst [vmem:[#allocation45_spill] sm:$0xff] %v9246_v35  ;;  %v1438_v29 = vpop.f32.mrf.mxu1  ;;  %v9249_v39 = vadd.f32 %v1434_v58, %v1322_v61  ;;  %v1326_v12 = vadd.f32 %v1325_v10, %v9174_v22 }
 0x16c   :  { %v1327_v45 = vpop.f32.mrf.mxu0 }
 0x16d   :  { %11085 = vst [vmem:[#allocation46_spill] sm:$0xff] %v9249_v39  ;;  %v1440_v23 = vpop.f32.mrf.mxu1  ;;  %v9252_v0 = vadd.f32 %v1438_v29, %v1326_v12  ;;  %v1328_v41 = vadd.f32 %v1327_v45, %v9185_v8 }
 0x16e   :  { %v1329_v47 = vpop.f32.mrf.mxu0 }
 0x16f   :  { %11086 = vst [vmem:[#allocation47_spill] sm:$0xff] %v9252_v0  ;;  %v1442_v5 = vpop.f32.mrf.mxu1  ;;  %v9255_v11 = vadd.f32 %v1440_v23, %v1328_v41  ;;  %v1330_v36 = vadd.f32 %v1329_v47, %v9174_v22 }
 0x170   :  { %v1331_v34 = vpop.f32.mrf.mxu0 }
 0x171   :  { %11087 = vst [vmem:[#allocation48_spill] sm:$0xff] %v9255_v11  ;;  %v1444_v62 = vpop.f32.mrf.mxu1  ;;  %v9258_v35 = vadd.f32 %v1442_v5, %v1330_v36  ;;  %v1332_v58 = vadd.f32 %v1331_v34, %v9185_v8 }
 0x172   :  { %v1335_v61 = vpop.f32.mrf.mxu0 }
 0x173   :  { %11088 = vst [vmem:[#allocation49_spill] sm:$0xff] %v9258_v35  ;;  %v1448_v10 = vpop.f32.mrf.mxu1  ;;  %v9261_v39 = vadd.f32 %v1444_v62, %v1332_v58  ;;  %v1336_v29 = vadd.f32 %v1335_v61, %v9174_v22 }
 0x174   :  { %v1337_v12 = vpop.f32.mrf.mxu0 }
 0x175   :  { %11089 = vst [vmem:[#allocation50_spill] sm:$0xff] %v9261_v39  ;;  %v1450_v45 = vpop.f32.mrf.mxu1  ;;  %v9264_v0 = vadd.f32 %v1448_v10, %v1336_v29  ;;  %v1338_v23 = vadd.f32 %v1337_v12, %v9185_v8 }
 0x176   :  { %v1339_v41 = vpop.f32.mrf.mxu0 }
 0x177   :  { %11090 = vst [vmem:[#allocation51_spill] sm:$0xff] %v9264_v0  ;;  %v1452_v47 = vpop.f32.mrf.mxu1  ;;  %v9267_v11 = vadd.f32 %v1450_v45, %v1338_v23  ;;  %v1340_v5 = vadd.f32 %v1339_v41, %v9174_v22 }
 0x178   :  { %v1341_v36 = vpop.f32.mrf.mxu0 }
 0x179   :  { %11091 = vst [vmem:[#allocation52_spill] sm:$0xff] %v9267_v11  ;;  %v1454_v34 = vpop.f32.mrf.mxu1  ;;  %v9270_v35 = vadd.f32 %v1452_v47, %v1340_v5  ;;  %v1342_v62 = vadd.f32 %v1341_v36, %v9185_v8 }
 0x17a   :  { %v1345_v58 = vpop.f32.mrf.mxu0 }
 0x17b   :  { %11092 = vst [vmem:[#allocation53_spill] sm:$0xff] %v9270_v35  ;;  %v1458_v61 = vpop.f32.mrf.mxu1  ;;  %v9273_v39 = vadd.f32 %v1454_v34, %v1342_v62  ;;  %v1346_v10 = vadd.f32 %v1345_v58, %v9174_v22  ;;  %v1056_v58 = vadd.f32 %v9078_v31, %v9069_v2 }
 0x17c   :  { %v1347_v29 = vpop.f32.mrf.mxu0 }
 0x17d   :  { %11093 = vst [vmem:[#allocation54_spill] sm:$0xff] %v9273_v39  ;;  %v1460_v12 = vpop.f32.mrf.mxu1  ;;  %v9276_v0 = vadd.f32 %v1458_v61, %v1346_v10  ;;  %v1348_v45 = vadd.f32 %v1347_v29, %v9185_v8  ;;  %v9452_v39 = vld [vmem:[%s11027_s2 + $0x24] ss:$16 sps:$4 sm:$0xff]  }
 0x17e   :  { %v1349_v23 = vpop.f32.mrf.mxu0 }
 0x17f   :  { %11094 = vst [vmem:[#allocation55_spill] sm:$0xff] %v9276_v0  ;;  %v1462_v41 = vpop.f32.mrf.mxu1  ;;  %v9279_v11 = vadd.f32 %v1460_v12, %v1348_v45  ;;  %v1350_v47 = vadd.f32 %v1349_v23, %v9174_v22  ;;  %v1169_v23 = vadd.f32 %v9080_v32, %v1056_v58 }
 0x180   :  { %v1351_v5 = vpop.f32.mrf.mxu0 }
 0x181   :  { %11095 = vst [vmem:[#allocation56_spill] sm:$0xff] %v9279_v11  ;;  %v1464_v36 = vpop.f32.mrf.mxu1  ;;  %v9282_v35 = vadd.f32 %v1462_v41, %v1350_v47  ;;  %v1352_v34 = vadd.f32 %v1351_v5, %v9185_v8  ;;  %v9445_v11 = vld [vmem:[%s11027_s2 + $0x48] ss:$16 sps:$4 sm:$0xff]  }
 0x182   :  { %v1765_v62 = vpop.f32.mrf.mxu0 }
 0x183   :  { %11096 = vst [vmem:[#allocation57_spill] sm:$0xff] %v9282_v35  ;;  %v9287_v61 = vadd.f32 %v1464_v36, %v1352_v34  ;;  %v1817_v10 = vadd.f32 %v1765_v62, %v9072_v21  ;;  %v1808_v29 = vpop.f32.mrf.mxu1  ;;  %v1282_v62 = vadd.f32 %v9194_v49, %v9185_v8 }
 0x184   :  { %v1767_v0 = vpop.f32.mrf.mxu0  ;;  %v1819_v58 = vadd.f32 %v1808_v29, %v9188_v24 }
 0x185   :  { %11097 = vst [vmem:[#allocation58_spill] sm:$0xff] %v9287_v61  ;;  %v6625_v12 = vmul.f32 -1.442695, %v1817_v10  ;;  %v1818_v45 = vadd.f32 %v1767_v0, %v9075_v27  ;;  %v1810_v47 = vpop.f32.mrf.mxu1  ;;  %v1395_v32 = vadd.f32 %v9196_v55, %v1282_v62  ;;  %v9440_v61 = vld [vmem:[%s11027_s2 + $0x40] ss:$16 sps:$4 sm:$0xff]  }
 0x186   :  { %v1769_v22 = vpop.f32.mrf.mxu0  ;;  %v1820_v27 = vadd.f32 %v1810_v47, %v9191_v44 }
 0x187   :  { %7633 = vpow2.f32 %v6625_v12  ;;  %v6627_v41 = vmul.f32 -1.442695, %v1818_v45  ;;  %v1821_v5 = vadd.f32 %v1769_v22, %v9082_v33  ;;  %v1812_v34 = vpop.f32.mrf.mxu1 }
 0x188   :  { %v1771_v35 = vpop.f32.mrf.mxu0  ;;  %v6629_v10 = vmul.f32 -1.442695, %v1820_v27  ;;  %v1823_v45 = vadd.f32 %v1812_v34, %v9198_v51 }
 0x189   :  { %7635 = vpow2.f32 %v6627_v41  ;;  %v6626_v31 = vmul.f32 -1.442695, %v1821_v5  ;;  %v1822_v36 = vadd.f32 %v1771_v35, %v1169_v23  ;;  %v1814_v0 = vpop.f32.mrf.mxu1 }
 0x18a   :  { %v1824_v33 = vadd.f32 %v1814_v0, %v1395_v32 }
 0x18b   :  { %7637 = vpow2.f32 %v6626_v31  ;;  %v6628_v21 = vmul.f32 -1.442695, %v1822_v36 }
 0x18c   :  { %v6630_v23 = vmul.f32 -1.442695, %v1824_v33 }
 0x18d   :  { %7639 = vpow2.f32 %v6628_v21 }
 0x18e   :  { %7641 = vtanh.f32 %v1819_v58 }
 0x18f   :  { %7643 = vpow2.f32 %v6629_v10 }
 0x194   :  { %v7634_v12 = vpop.eup %7633 }
 0x195   :  { %v1831_v35 = vadd.f32 1.0, %v7634_v12 }
 0x196   :  { %v7636_v22 = vpop.eup %7635 }
 0x197   :  { %7645 = vrcp.f32 %v1831_v35  ;;  %v1843_v49 = vadd.f32 1.0, %v7636_v22 }
 0x198   :  { %v7638_v41 = vpop.eup %7637  ;;  %7647 = vtanh.f32 %v1823_v45 }
 0x199   :  { %7649 = vrcp.f32 %v1843_v49  ;;  %v1832_v44 = vadd.f32 1.0, %v7638_v41 }
 0x19a   :  { %v7640_v47 = vpop.eup %7639  ;;  %7651 = vpow2.f32 %v6630_v23 }
 0x19b   :  { %7653 = vrcp.f32 %v1832_v44  ;;  %v1844_v24 = vadd.f32 1.0, %v7640_v47  ;;  %v7642_v55 = vpop.eup %7641  ;;  %v11098_v47 = vmov 0  }
 0x19c   :  { %v7644_v29 = vpop.eup %7643 }
 0x19d   :  { %7655 = vrcp.f32 %v1844_v24  ;;  %v1857_v27 = vadd.f32 1.0, %v7644_v29  ;;  %v9310_v24 = vld [vmem:[%s11027_s2 + $0xe4] ss:$16 sps:$4 sm:$0xff]   ;;  %v9320_v29 = vld [vmem:[%s11027_s2 + $0xe0] ss:$16 sps:$4 sm:$0xff]  }
 0x19e   :  { %2435 = vmatprep.subr.bf16.mxu0 %v9310_v24 }
 0x19f   :  { %7657 = vrcp.f32 %v1857_v27  ;;  %v9368_v27 = vld [vmem:[%s11027_s2 + $0xa0] ss:$16 sps:$4 sm:$0xff]  }
 0x1a4   :  { %v7646_v5 = vpop.eup %7645 }
 0x1a5   :  { %v7648_v51 = vpop.eup %7647  ;;  %v1865_v31 = vmul.f32 %v7646_v5, %v7642_v55  ;;  %v9315_v55 = vld [vmem:[%s11027_s2 + $0xec] ss:$16 sps:$4 sm:$0xff]   ;;  %v9325_v5 = vld [vmem:[%s11027_s2 + $0xe8] ss:$16 sps:$4 sm:$0xff]  }
 0x1a6   :  { %v7650_v36 = vpop.eup %7649  ;;  %2478 = vmatprep.subr.bf16.mxu1 %v9315_v55 }
 0x1a7   :  { %v7652_v34 = vpop.eup %7651  ;;  %v1863_v21 = vmul.f32 0.0, %v7650_v36  ;;  %v9344_v36 = vld [vmem:[%s11027_s2 + $0xc0] ss:$16 sps:$4 sm:$0xff]  }
 0x1a8   :  { %v7654_v62 = vpop.eup %7653  ;;  %v1858_v10 = vadd.f32 1.0, %v7652_v34  ;;  %v9349_v34 = vld [vmem:[%s11027_s2 + $0xc8] ss:$16 sps:$4 sm:$0xff]  }
 0x1a9   :  { %v9299_v0 = vadd.f32 %v1865_v31, %v1863_v21  ;;  %v1866_v32 = vmul.f32 %v7654_v62, %v7648_v51  ;;  %v9334_v51 = vld [vmem:[%s11027_s2 + $0xc4] ss:$16 sps:$4 sm:$0xff]   ;;  %v9339_v31 = vld [vmem:[%s11027_s2 + $0xcc] ss:$16 sps:$4 sm:$0xff]  }
 0x1aa   :  { %v7656_v58 = vpop.eup %7655  ;;  %v9358_v21 = vld [vmem:[%s11027_s2 + $0xa4] ss:$16 sps:$4 sm:$0xff]   ;;  %v9363_v62 = vld [vmem:[%s11027_s2 + $0xac] ss:$16 sps:$4 sm:$0xff]  }
 0x1ab   :  { %v1864_v33 = vmul.f32 0.0, %v7656_v58  ;;  %7659 = vtanh.f32 %v9299_v0  ;;  %v9382_v58 = vld [vmem:[%s11027_s2 + $0x80] ss:$16 sps:$4 sm:$0xff]  }
 0x1ac   :  { %7661 = vrcp.f32 %v1858_v10  ;;  %v7658_v45 = vpop.eup %7657  ;;  %v9387_v10 = vld [vmem:[%s11027_s2 + $0x84] ss:$16 sps:$4 sm:$0xff]  }
 0x1ad   :  { %v9302_v12 = vadd.f32 %v1866_v32, %v1864_v33  ;;  %v9373_v32 = vld [vmem:[%s11027_s2 + $0xa8] ss:$16 sps:$4 sm:$0xff]  }
 0x1ae   :  { %v9392_v33 = vld [vmem:[%s11027_s2 + $0x88] ss:$16 sps:$4 sm:$0xff]  }
 0x1af   :  { %7663 = vtanh.f32 %v9302_v12 }
 0x1b8   :  { %v7660_v35 = vpop.eup %7659 }
 0x1b9   :  { %v7662_v22 = vpop.eup %7661  ;;  %v1871_v49 = vmul.f32 %v7660_v35, %v7658_v45  ;;  %v9397_v45 = vld [vmem:[%s11027_s2 + $0x8c] ss:$16 sps:$4 sm:$0xff]   ;;  %v9402_v35 = vld [vmem:[%s11027_s2 + $0x64] ss:$16 sps:$4 sm:$0xff]  }
 0x1bc   :  { %v7664_v23 = vpop.eup %7663 }
 0x1bd   :  { %v1872_v41 = vmul.f32 %v7664_v23, %v7662_v22  ;;  %v9408_v22 = vld [vmem:[%s11027_s2 + $0x6c] ss:$16 sps:$4 sm:$0xff]   ;;  %v9416_v23 = vld [vmem:[%s11027_s2 + $0x60] ss:$16 sps:$4 sm:$0xff]  }
 0x1bf   :  { %v1873_v44 = vpack.c.bf16 %v1872_v41, %v1871_v49  ;;  %v9421_v49 = vld [vmem:[%s11027_s2 + $0x68] ss:$16 sps:$4 sm:$0xff]   ;;  %v9428_v41 = vld [vmem:[%s11027_s2 + $0x44] ss:$16 sps:$4 sm:$0xff]  }
 0x1c1   :  { %7062 = vst [vmem:[#allocation3] sm:$0xff] %v1873_v44   ;;  %2116 = vmatmul.mubr.bf16.vlgmr.msra.gmra.mxu0 %v1873_v44  ;;  %2159 = vmatmul.mubr.bf16.vlgmr.msra.gmra.mxu1 %v1873_v44  ;;  %v9433_v44 = vld [vmem:[%s11027_s2 + $0x4c] ss:$16 sps:$4 sm:$0xff]  }
 0x1c2   :  { %2467 = vmatprep.mubr.bf16.mxu0 %v11098_v47  ;;  %2510 = vmatprep.mubr.bf16.mxu1 %v11098_v47 }
 0x1c3   :  { %2436 = vmatpush1.bf16.msra.mxu0 %v9320_v29  ;;  %2479 = vmatpush1.bf16.msra.mxu1 %v9325_v5 }
 0x1c4   :  { %2437 = vmatprep.subr.bf16.mxu0 %v9334_v51  ;;  %2480 = vmatprep.subr.bf16.mxu1 %v9339_v31 }
 0x1c7   :  { %2438 = vmatpush1.bf16.msra.mxu0 %v9344_v36  ;;  %2481 = vmatpush1.bf16.msra.mxu1 %v9349_v34 }
 0x1c8   :  { %2439 = vmatprep.subr.bf16.mxu0 %v9358_v21  ;;  %2482 = vmatprep.subr.bf16.mxu1 %v9363_v62 }
 0x1cb   :  { %2440 = vmatpush1.bf16.msra.mxu0 %v9368_v27  ;;  %2483 = vmatpush1.bf16.msra.mxu1 %v9373_v32 }
 0x1cc   :  { %2441 = vmatprep.subr.bf16.mxu0 %v9387_v10  ;;  %2484 = vmatprep.subr.bf16.mxu1 %v9397_v45 }
 0x1cf   :  { %2442 = vmatpush1.bf16.msra.mxu0 %v9382_v58  ;;  %2485 = vmatpush1.bf16.msra.mxu1 %v9392_v33 }
 0x1d0   :  { %2443 = vmatprep.subr.bf16.mxu0 %v9402_v35  ;;  %2486 = vmatprep.subr.bf16.mxu1 %v9408_v22 }
 0x1d3   :  { %2444 = vmatpush1.bf16.msra.mxu0 %v9416_v23  ;;  %2487 = vmatpush1.bf16.msra.mxu1 %v9421_v49 }
 0x1d4   :  { %2445 = vmatprep.subr.bf16.mxu0 %v9428_v41  ;;  %2488 = vmatprep.subr.bf16.mxu1 %v9433_v44 }
 0x1d7   :  { %2446 = vmatpush1.bf16.msra.mxu0 %v9440_v61  ;;  %2489 = vmatpush1.bf16.msra.mxu1 %v9445_v11 }
 0x1d8   :  { %2447 = vmatprep.subr.bf16.mxu0 %v9452_v39  ;;  %2490 = vmatprep.subr.bf16.mxu1 %v9457_v38 }
 0x1db   :  { %2448 = vmatpush1.bf16.msra.mxu0 %v9464_v30  ;;  %2491 = vmatpush1.bf16.msra.mxu1 %v9469_v20 }
 0x1dc   :  { %2449 = vmatprep.subr.bf16.mxu0 %v9476_v37  ;;  %2492 = vmatprep.subr.bf16.mxu1 %v9481_v3 }
 0x1df   :  { %2450 = vmatpush1.bf16.msra.mxu0 %v9488_v19  ;;  %2493 = vmatpush1.bf16.msra.mxu1 %v9493_v14 }
 0x1e0   :  { %2787 = vmatprep.subr.bf16.mxu0 %v9310_v24  ;;  %2830 = vmatprep.subr.bf16.mxu1 %v9315_v55 }
 0x281   :  { %v2117_v13 = vpop.f32.mrf.mxu0  ;;  %v2160_v18 = vpop.f32.mrf.mxu1 }
 0x282   :  { %v2169_v40 = vadd.f32 %v2117_v13, %v9085_v43 }
 0x283   :  { %v2119_v9 = vpop.f32.mrf.mxu0  ;;  %v2162_v6 = vpop.f32.mrf.mxu1 }
 0x284   :  { %v6665_v28 = vmul.f32 -1.442695, %v2169_v40  ;;  %v2170_v15 = vadd.f32 %v2119_v9, %v9088_v50  ;;  %v1292_v40 = vadd.f32 %v9207_v54, %v9185_v8  ;;  %v2172_v50 = vadd.f32 %v2162_v6, %v9204_v60 }
 0x285   :  { %v2121_v26 = vpop.f32.mrf.mxu0  ;;  %v2164_v53 = vpop.f32.mrf.mxu1 }
 0x286   :  { %7665 = vpow2.f32 %v6665_v28  ;;  %v6667_v25 = vmul.f32 -1.442695, %v2170_v15  ;;  %v2173_v59 = vadd.f32 %v2121_v26, %v9095_v57  ;;  %v1405_v56 = vadd.f32 %v9209_v42, %v1292_v40 }
 0x287   :  { %v2123_v17 = vpop.f32.mrf.mxu0  ;;  %v2166_v9 = vpop.f32.mrf.mxu1  ;;  %v2171_v28 = vadd.f32 %v2160_v18, %v9201_v52  ;;  %v6669_v15 = vmul.f32 -1.442695, %v2172_v50  ;;  %v2175_v13 = vadd.f32 %v2164_v53, %v9211_v48 }
 0x288   :  { %7667 = vpow2.f32 %v6667_v25  ;;  %v6666_v16 = vmul.f32 -1.442695, %v2173_v59  ;;  %v2174_v63 = vadd.f32 %v2123_v17, %v1179_v7  ;;  %v2176_v57 = vadd.f32 %v2166_v9, %v1405_v56 }
 0x28a   :  { %7669 = vpow2.f32 %v6666_v16  ;;  %v6668_v43 = vmul.f32 -1.442695, %v2174_v63  ;;  %v6670_v63 = vmul.f32 -1.442695, %v2176_v57 }
 0x28c   :  { %7671 = vpow2.f32 %v6668_v43 }
 0x28d   :  { %7673 = vtanh.f32 %v2171_v28 }
 0x28e   :  { %7675 = vpow2.f32 %v6669_v15 }
 0x293   :  { %v7666_v46 = vpop.eup %7665 }
 0x294   :  { %v2183_v17 = vadd.f32 1.0, %v7666_v46 }
 0x295   :  { %v7668_v16 = vpop.eup %7667 }
 0x296   :  { %7677 = vrcp.f32 %v2183_v17  ;;  %v2195_v54 = vadd.f32 1.0, %v7668_v16 }
 0x297   :  { %v7670_v59 = vpop.eup %7669  ;;  %7679 = vtanh.f32 %v2175_v13 }
 0x298   :  { %7681 = vrcp.f32 %v2195_v54  ;;  %v2184_v60 = vadd.f32 1.0, %v7670_v59 }
 0x299   :  { %v7672_v6 = vpop.eup %7671  ;;  %7683 = vpow2.f32 %v6670_v63 }
 0x29a   :  { %7685 = vrcp.f32 %v2184_v60  ;;  %v2196_v18 = vadd.f32 1.0, %v7672_v6  ;;  %v7674_v52 = vpop.eup %7673  ;;  %v1076_v60 = vadd.f32 %v9104_v1, %v9069_v2 }
 0x29b   :  { %v7676_v7 = vpop.eup %7675 }
 0x29c   :  { %7687 = vrcp.f32 %v2196_v18  ;;  %v2209_v50 = vadd.f32 1.0, %v7676_v7 }
 0x29e   :  { %7689 = vrcp.f32 %v2209_v50  ;;  %v11101_v50 = vld [vmem:[#allocation7_spill] sm:$0xff] }
 0x2a3   :  { %v7678_v42 = vpop.eup %7677 }
 0x2a4   :  { %v7680_v48 = vpop.eup %7679  ;;  %v2217_v25 = vmul.f32 %v7678_v42, %v7674_v52  ;;  %v11099_v42 = vld [vmem:[#allocation5_spill] sm:$0xff] }
 0x2a5   :  { %v7682_v26 = vpop.eup %7681 }
 0x2a6   :  { %v7684_v53 = vpop.eup %7683  ;;  %v2215_v43 = vmul.f32 %v7682_v26, %v9299_v0  ;;  %v11100_v26 = vld [vmem:[#allocation6_spill] sm:$0xff] }
 0x2a7   :  { %v7686_v40 = vpop.eup %7685  ;;  %v2210_v15 = vadd.f32 1.0, %v7684_v53  ;;  %v1189_v53 = vadd.f32 %v11100_v26, %v1076_v60 }
 0x2a8   :  { %v9514_v9 = vadd.f32 %v2217_v25, %v2215_v43  ;;  %v2218_v56 = vmul.f32 %v7686_v40, %v7680_v48 }
 0x2a9   :  { %v7688_v28 = vpop.eup %7687 }
 0x2aa   :  { %v2216_v57 = vmul.f32 %v7688_v28, %v9302_v12  ;;  %7691 = vtanh.f32 %v9514_v9 }
 0x2ab   :  { %7693 = vrcp.f32 %v2210_v15  ;;  %v7690_v13 = vpop.eup %7689 }
 0x2ac   :  { %v9517_v46 = vadd.f32 %v2218_v56, %v2216_v57 }
 0x2ae   :  { %7695 = vtanh.f32 %v9517_v46 }
 0x2b7   :  { %v7692_v17 = vpop.eup %7691 }
 0x2b8   :  { %v7694_v0 = vpop.eup %7693  ;;  %v2223_v63 = vmul.f32 %v7692_v17, %v7690_v13  ;;  %v11102_v13 = vld [vmem:[#allocation35_spill] sm:$0xff] }
 0x2b9   :  { %v1302_v17 = vadd.f32 %v11102_v13, %v9185_v8 }
 0x2bb   :  { %v7696_v16 = vpop.eup %7695 }
 0x2bc   :  { %v2224_v54 = vmul.f32 %v7696_v16, %v7694_v0  ;;  %v11103_v0 = vld [vmem:[#allocation34_spill] sm:$0xff] }
 0x2be   :  { %v2225_v59 = vpack.c.bf16 %v2224_v54, %v2223_v63  ;;  %v11104_v54 = vld [vmem:[#allocation36_spill] sm:$0xff] }
 0x2c0   :  { %7098 = vst [vmem:[#allocation3 + $0x8] sm:$0xff] %v2225_v59   ;;  %2468 = vmatmul.mubr.bf16.vlgmr.msra.gmra.mxu0 %v2225_v59  ;;  %2511 = vmatmul.mubr.bf16.vlgmr.msra.gmra.mxu1 %v2225_v59  ;;  %v1415_v59 = vadd.f32 %v11104_v54, %v1302_v17 }
 0x2c1   :  { %2788 = vmatpush1.bf16.msra.mxu0 %v9320_v29  ;;  %2831 = vmatpush1.bf16.msra.mxu1 %v9325_v5 }
 0x2c2   :  { %2789 = vmatprep.subr.bf16.mxu0 %v9334_v51  ;;  %2832 = vmatprep.subr.bf16.mxu1 %v9339_v31 }
 0x2c3   :  { %2819 = vmatprep.mubr.bf16.mxu0 %v11098_v47  ;;  %2862 = vmatprep.mubr.bf16.mxu1 %v11098_v47 }
 0x2c5   :  { %2790 = vmatpush1.bf16.msra.mxu0 %v9344_v36  ;;  %2833 = vmatpush1.bf16.msra.mxu1 %v9349_v34 }
 0x2c6   :  { %2791 = vmatprep.subr.bf16.mxu0 %v9358_v21  ;;  %2834 = vmatprep.subr.bf16.mxu1 %v9363_v62 }
 0x2c9   :  { %2792 = vmatpush1.bf16.msra.mxu0 %v9368_v27  ;;  %2835 = vmatpush1.bf16.msra.mxu1 %v9373_v32 }
 0x2ca   :  { %2793 = vmatprep.subr.bf16.mxu0 %v9387_v10  ;;  %2836 = vmatprep.subr.bf16.mxu1 %v9397_v45 }
 0x2cd   :  { %2794 = vmatpush1.bf16.msra.mxu0 %v9382_v58  ;;  %2837 = vmatpush1.bf16.msra.mxu1 %v9392_v33 }
 0x2ce   :  { %2795 = vmatprep.subr.bf16.mxu0 %v9402_v35  ;;  %2838 = vmatprep.subr.bf16.mxu1 %v9408_v22 }
 0x2d1   :  { %2796 = vmatpush1.bf16.msra.mxu0 %v9416_v23  ;;  %2839 = vmatpush1.bf16.msra.mxu1 %v9421_v49 }
 0x2d2   :  { %2797 = vmatprep.subr.bf16.mxu0 %v9428_v41  ;;  %2840 = vmatprep.subr.bf16.mxu1 %v9433_v44 }
 0x2d5   :  { %2798 = vmatpush1.bf16.msra.mxu0 %v9440_v61  ;;  %2841 = vmatpush1.bf16.msra.mxu1 %v9445_v11 }
 0x2d6   :  { %2799 = vmatprep.subr.bf16.mxu0 %v9452_v39  ;;  %2842 = vmatprep.subr.bf16.mxu1 %v9457_v38 }
 0x2d9   :  { %2800 = vmatpush1.bf16.msra.mxu0 %v9464_v30  ;;  %2843 = vmatpush1.bf16.msra.mxu1 %v9469_v20 }
 0x2da   :  { %2801 = vmatprep.subr.bf16.mxu0 %v9476_v37  ;;  %2844 = vmatprep.subr.bf16.mxu1 %v9481_v3 }
 0x2dd   :  { %2802 = vmatpush1.bf16.msra.mxu0 %v9488_v19  ;;  %2845 = vmatpush1.bf16.msra.mxu1 %v9493_v14 }
 0x2de   :  { %3139 = vmatprep.subr.bf16.mxu0 %v9310_v24  ;;  %3182 = vmatprep.subr.bf16.mxu1 %v9315_v55 }
 0x380   :  { %v2469_v12 = vpop.f32.mrf.mxu0  ;;  %v2512_v18 = vpop.f32.mrf.mxu1 }
 0x381   :  { %v2521_v6 = vadd.f32 %v2469_v12, %v9098_v4  ;;  %v11105_v12 = vld [vmem:[#allocation33_spill] sm:$0xff] }
 0x382   :  { %v2471_v52 = vpop.f32.mrf.mxu0  ;;  %v2514_v40 = vpop.f32.mrf.mxu1  ;;  %v2523_v60 = vadd.f32 %v2512_v18, %v11105_v12 }
 0x383   :  { %v6705_v7 = vmul.f32 -1.442695, %v2521_v6  ;;  %v2522_v48 = vadd.f32 %v2471_v52, %v11099_v42  ;;  %v2524_v16 = vadd.f32 %v2514_v40, %v11103_v0  ;;  %v11106_v42 = vld [vmem:[#allocation37_spill] sm:$0xff] }
 0x384   :  { %v2473_v25 = vpop.f32.mrf.mxu0  ;;  %v2516_v1 = vpop.f32.mrf.mxu1 }
 0x385   :  { %7697 = vpow2.f32 %v6705_v7  ;;  %v6707_v43 = vmul.f32 -1.442695, %v2522_v48  ;;  %v2525_v56 = vadd.f32 %v2473_v25, %v11101_v50  ;;  %v6709_v6 = vmul.f32 -1.442695, %v2524_v16 }
 0x386   :  { %v2475_v28 = vpop.f32.mrf.mxu0  ;;  %v2518_v63 = vpop.f32.mrf.mxu1  ;;  %v2527_v48 = vadd.f32 %v2516_v1, %v11106_v42 }
 0x387   :  { %7699 = vpow2.f32 %v6707_v43  ;;  %v6706_v15 = vmul.f32 -1.442695, %v2525_v56  ;;  %v2526_v57 = vadd.f32 %v2475_v28, %v1189_v53  ;;  %v2528_v52 = vadd.f32 %v2518_v63, %v1415_v59 }
 0x389   :  { %7701 = vpow2.f32 %v6706_v15  ;;  %v6708_v4 = vmul.f32 -1.442695, %v2526_v57  ;;  %v6710_v53 = vmul.f32 -1.442695, %v2528_v52 }
 0x38b   :  { %7703 = vpow2.f32 %v6708_v4 }
 0x38c   :  { %7705 = vtanh.f32 %v2523_v60 }
 0x38d   :  { %7707 = vpow2.f32 %v6709_v6 }
 0x392   :  { %v7698_v7 = vpop.eup %7697 }
 0x393   :  { %v2535_v25 = vadd.f32 1.0, %v7698_v7 }
 0x394   :  { %v7700_v26 = vpop.eup %7699 }
 0x395   :  { %7709 = vrcp.f32 %v2535_v25  ;;  %v2547_v43 = vadd.f32 1.0, %v7700_v26 }
 0x396   :  { %v7702_v50 = vpop.eup %7701  ;;  %7711 = vtanh.f32 %v2527_v48 }
 0x397   :  { %7713 = vrcp.f32 %v2547_v43  ;;  %v2536_v40 = vadd.f32 1.0, %v7702_v50  ;;  %v11107_v43 = vld [vmem:[#allocation10_spill] sm:$0xff] }
 0x398   :  { %v7704_v56 = vpop.eup %7703  ;;  %7715 = vpow2.f32 %v6710_v53  ;;  %v1086_v50 = vadd.f32 %v11107_v43, %v9069_v2 }
 0x399   :  { %7717 = vrcp.f32 %v2536_v40  ;;  %v2548_v18 = vadd.f32 1.0, %v7704_v56  ;;  %v7706_v28 = vpop.eup %7705  ;;  %v11108_v40 = vld [vmem:[#allocation8_spill] sm:$0xff] }
 0x39a   :  { %v7708_v15 = vpop.eup %7707 }
 0x39b   :  { %7719 = vrcp.f32 %v2548_v18  ;;  %v2561_v63 = vadd.f32 1.0, %v7708_v15 }
 0x39d   :  { %7721 = vrcp.f32 %v2561_v63 }
 0x3a2   :  { %v7710_v57 = vpop.eup %7709 }
 0x3a3   :  { %v7712_v1 = vpop.eup %7711  ;;  %v2569_v4 = vmul.f32 %v7710_v57, %v7706_v28  ;;  %v11109_v57 = vld [vmem:[#allocation9_spill] sm:$0xff] }
 0x3a4   :  { %v7714_v13 = vpop.eup %7713 }
 0x3a5   :  { %v7716_v17 = vpop.eup %7715  ;;  %v2567_v0 = vmul.f32 %v7714_v13, %v9514_v9  ;;  %v11110_v13 = vld [vmem:[#allocation11_spill] sm:$0xff] }
 0x3a6   :  { %v7718_v16 = vpop.eup %7717  ;;  %v2562_v60 = vadd.f32 1.0, %v7716_v17  ;;  %v1199_v17 = vadd.f32 %v11110_v13, %v1086_v50 }
 0x3a7   :  { %v9568_v54 = vadd.f32 %v2569_v4, %v2567_v0  ;;  %v2570_v59 = vmul.f32 %v7718_v16, %v7712_v1 }
 0x3a8   :  { %v7720_v12 = vpop.eup %7719 }
 0x3a9   :  { %v2568_v6 = vmul.f32 %v7720_v12, %v9517_v46  ;;  %7723 = vtanh.f32 %v9568_v54 }
 0x3aa   :  { %7725 = vrcp.f32 %v2562_v60  ;;  %v7722_v7 = vpop.eup %7721 }
 0x3ab   :  { %v9571_v52 = vadd.f32 %v2570_v59, %v2568_v6 }
 0x3ad   :  { %7727 = vtanh.f32 %v9571_v52 }
 0x3b6   :  { %v7724_v42 = vpop.eup %7723 }
 0x3b7   :  { %v7726_v9 = vpop.eup %7725  ;;  %v2575_v25 = vmul.f32 %v7724_v42, %v7722_v7  ;;  %v11112_v7 = vld [vmem:[#allocation40_spill] sm:$0xff] }
 0x3b8   :  { %v1312_v42 = vadd.f32 %v11112_v7, %v9185_v8 }
 0x3ba   :  { %v7728_v48 = vpop.eup %7727 }
 0x3bb   :  { %v2576_v26 = vmul.f32 %v7728_v48, %v7726_v9  ;;  %v11113_v9 = vld [vmem:[#allocation39_spill] sm:$0xff] }
 0x3bd   :  { %v2577_v53 = vpack.c.bf16 %v2576_v26, %v2575_v25  ;;  %v11114_v26 = vld [vmem:[#allocation41_spill] sm:$0xff] }
 0x3bf   :  { %7099 = vst [vmem:[#allocation3 + $0x10] sm:$0xff] %v2577_v53   ;;  %2820 = vmatmul.mubr.bf16.vlgmr.msra.gmra.mxu0 %v2577_v53  ;;  %2863 = vmatmul.mubr.bf16.vlgmr.msra.gmra.mxu1 %v2577_v53  ;;  %v1425_v53 = vadd.f32 %v11114_v26, %v1312_v42 }
 0x3c0   :  { %3140 = vmatpush1.bf16.msra.mxu0 %v9320_v29  ;;  %3183 = vmatpush1.bf16.msra.mxu1 %v9325_v5 }
 0x3c1   :  { %3141 = vmatprep.subr.bf16.mxu0 %v9334_v51  ;;  %3184 = vmatprep.subr.bf16.mxu1 %v9339_v31 }
 0x3c2   :  { %3171 = vmatprep.mubr.bf16.mxu0 %v11098_v47  ;;  %3214 = vmatprep.mubr.bf16.mxu1 %v11098_v47 }
 0x3c4   :  { %3142 = vmatpush1.bf16.msra.mxu0 %v9344_v36  ;;  %3185 = vmatpush1.bf16.msra.mxu1 %v9349_v34 }
 0x3c5   :  { %3143 = vmatprep.subr.bf16.mxu0 %v9358_v21  ;;  %3186 = vmatprep.subr.bf16.mxu1 %v9363_v62 }
 0x3c8   :  { %3144 = vmatpush1.bf16.msra.mxu0 %v9368_v27  ;;  %3187 = vmatpush1.bf16.msra.mxu1 %v9373_v32 }
 0x3c9   :  { %3145 = vmatprep.subr.bf16.mxu0 %v9387_v10  ;;  %3188 = vmatprep.subr.bf16.mxu1 %v9397_v45 }
 0x3cc   :  { %3146 = vmatpush1.bf16.msra.mxu0 %v9382_v58  ;;  %3189 = vmatpush1.bf16.msra.mxu1 %v9392_v33 }
 0x3cd   :  { %3147 = vmatprep.subr.bf16.mxu0 %v9402_v35  ;;  %3190 = vmatprep.subr.bf16.mxu1 %v9408_v22 }
 0x3d0   :  { %3148 = vmatpush1.bf16.msra.mxu0 %v9416_v23  ;;  %3191 = vmatpush1.bf16.msra.mxu1 %v9421_v49 }
 0x3d1   :  { %3149 = vmatprep.subr.bf16.mxu0 %v9428_v41  ;;  %3192 = vmatprep.subr.bf16.mxu1 %v9433_v44 }
 0x3d4   :  { %3150 = vmatpush1.bf16.msra.mxu0 %v9440_v61  ;;  %3193 = vmatpush1.bf16.msra.mxu1 %v9445_v11 }
 0x3d5   :  { %3151 = vmatprep.subr.bf16.mxu0 %v9452_v39  ;;  %3194 = vmatprep.subr.bf16.mxu1 %v9457_v38 }
 0x3d8   :  { %3152 = vmatpush1.bf16.msra.mxu0 %v9464_v30  ;;  %3195 = vmatpush1.bf16.msra.mxu1 %v9469_v20 }
 0x3d9   :  { %3153 = vmatprep.subr.bf16.mxu0 %v9476_v37  ;;  %3196 = vmatprep.subr.bf16.mxu1 %v9481_v3 }
 0x3dc   :  { %3154 = vmatpush1.bf16.msra.mxu0 %v9488_v19  ;;  %3197 = vmatpush1.bf16.msra.mxu1 %v9493_v14 }
 0x3dd   :  { %3491 = vmatprep.subr.bf16.mxu0 %v9310_v24  ;;  %3534 = vmatprep.subr.bf16.mxu1 %v9315_v55  ;;  %v11111_v24 = vld [vmem:[#allocation12_spill] sm:$0xff] }
 0x47f   :  { %v2821_v46 = vpop.f32.mrf.mxu0  ;;  %v2864_v18 = vpop.f32.mrf.mxu1 }
 0x480   :  { %v2873_v56 = vadd.f32 %v2821_v46, %v11108_v40  ;;  %v11115_v46 = vld [vmem:[#allocation38_spill] sm:$0xff] }
 0x481   :  { %v2823_v28 = vpop.f32.mrf.mxu0  ;;  %v2866_v16 = vpop.f32.mrf.mxu1  ;;  %v2875_v43 = vadd.f32 %v2864_v18, %v11115_v46 }
 0x482   :  { %v6745_v15 = vmul.f32 -1.442695, %v2873_v56  ;;  %v2874_v1 = vadd.f32 %v2823_v28, %v11109_v57  ;;  %v2876_v48 = vadd.f32 %v2866_v16, %v11113_v9  ;;  %v11116_v28 = vld [vmem:[#allocation42_spill] sm:$0xff] }
 0x483   :  { %v2825_v4 = vpop.f32.mrf.mxu0  ;;  %v2868_v60 = vpop.f32.mrf.mxu1 }
 0x484   :  { %7729 = vpow2.f32 %v6745_v15  ;;  %v6747_v0 = vmul.f32 -1.442695, %v2874_v1  ;;  %v2877_v63 = vadd.f32 %v2825_v4, %v11111_v24  ;;  %v6749_v50 = vmul.f32 -1.442695, %v2876_v48 }
 0x485   :  { %v2827_v55 = vpop.f32.mrf.mxu0  ;;  %v2870_v25 = vpop.f32.mrf.mxu1  ;;  %v2879_v15 = vadd.f32 %v2868_v60, %v11116_v28 }
 0x486   :  { %7731 = vpow2.f32 %v6747_v0  ;;  %v6746_v59 = vmul.f32 -1.442695, %v2877_v63  ;;  %v2878_v12 = vadd.f32 %v2827_v55, %v1199_v17  ;;  %v2880_v40 = vadd.f32 %v2870_v25, %v1425_v53 }
 0x488   :  { %7733 = vpow2.f32 %v6746_v59  ;;  %v6748_v6 = vmul.f32 -1.442695, %v2878_v12  ;;  %v6750_v4 = vmul.f32 -1.442695, %v2880_v40 }
 0x48a   :  { %7735 = vpow2.f32 %v6748_v6 }
 0x48b   :  { %7737 = vtanh.f32 %v2875_v43 }
 0x48c   :  { %7739 = vpow2.f32 %v6749_v50 }
 0x491   :  { %v7730_v56 = vpop.eup %7729 }
 0x492   :  { %v2887_v57 = vadd.f32 1.0, %v7730_v56 }
 0x493   :  { %v7732_v1 = vpop.eup %7731 }
 0x494   :  { %7741 = vrcp.f32 %v2887_v57  ;;  %v2899_v8 = vadd.f32 1.0, %v7732_v1  ;;  %v11125_v57 = vld [vmem:[#allocation45_spill] sm:$0xff] }
 0x495   :  { %v7734_v13 = vpop.eup %7733  ;;  %7743 = vtanh.f32 %v2879_v15 }
 0x496   :  { %7745 = vrcp.f32 %v2899_v8  ;;  %v2888_v17 = vadd.f32 1.0, %v7734_v13 }
 0x497   :  { %v7736_v0 = vpop.eup %7735  ;;  %7747 = vpow2.f32 %v6750_v4 }
 0x498   :  { %7749 = vrcp.f32 %v2888_v17  ;;  %v2900_v18 = vadd.f32 1.0, %v7736_v0  ;;  %v7738_v16 = vpop.eup %7737 }
 0x499   :  { %v7740_v24 = vpop.eup %7739 }
 0x49a   :  { %7751 = vrcp.f32 %v2900_v18  ;;  %v2913_v42 = vadd.f32 1.0, %v7740_v24 }
 0x49c   :  { %7753 = vrcp.f32 %v2913_v42 }
 0x4a1   :  { %v7742_v63 = vpop.eup %7741 }
 0x4a2   :  { %v7744_v55 = vpop.eup %7743  ;;  %v2921_v59 = vmul.f32 %v7742_v63, %v7738_v16 }
 0x4a3   :  { %v7746_v12 = vpop.eup %7745 }
 0x4a4   :  { %v7748_v60 = vpop.eup %7747  ;;  %v2919_v6 = vmul.f32 %v7746_v12, %v9568_v54 }
 0x4a5   :  { %v7750_v7 = vpop.eup %7749  ;;  %v2914_v26 = vadd.f32 1.0, %v7748_v60 }
 0x4a6   :  { %v9622_v9 = vadd.f32 %v2921_v59, %v2919_v6  ;;  %v2922_v48 = vmul.f32 %v7750_v7, %v7744_v55 }
 0x4a7   :  { %v7752_v25 = vpop.eup %7751 }
 0x4a8   :  { %v2920_v53 = vmul.f32 %v7752_v25, %v9571_v52  ;;  %7755 = vtanh.f32 %v9622_v9 }
 0x4a9   :  { %7757 = vrcp.f32 %v2914_v26  ;;  %v7754_v43 = vpop.eup %7753 }
 0x4aa   :  { %v9625_v46 = vadd.f32 %v2922_v48, %v2920_v53 }
 0x4ac   :  { %7759 = vtanh.f32 %v9625_v46 }
 0x4b5   :  { %v7756_v50 = vpop.eup %7755 }
 0x4b6   :  { %v7758_v54 = vpop.eup %7757  ;;  %v2927_v56 = vmul.f32 %v7756_v50, %v7754_v43 }
 0x4b9   :  { %v7760_v40 = vpop.eup %7759 }
 0x4ba   :  { %v2928_v28 = vmul.f32 %v7760_v40, %v7758_v54 }
 0x4bc   :  { %v2929_v15 = vpack.c.bf16 %v2928_v28, %v2927_v56 }
 0x4be   :  { %7100 = vst [vmem:[#allocation3 + $0x18] sm:$0xff] %v2929_v15   ;;  %3172 = vmatmul.mubr.bf16.vlgmr.msra.gmra.mxu0 %v2929_v15  ;;  %3215 = vmatmul.mubr.bf16.vlgmr.msra.gmra.mxu1 %v2929_v15 }
 0x4bf   :  { %3492 = vmatpush1.bf16.msra.mxu0 %v9320_v29  ;;  %3535 = vmatpush1.bf16.msra.mxu1 %v9325_v5  ;;  %v11118_v5 = vld [vmem:[#allocation13_spill] sm:$0xff] }
 0x4c0   :  { %3493 = vmatprep.subr.bf16.mxu0 %v9334_v51  ;;  %3536 = vmatprep.subr.bf16.mxu1 %v9339_v31 }
 0x4c1   :  { %3523 = vmatprep.mubr.bf16.mxu0 %v11098_v47  ;;  %3566 = vmatprep.mubr.bf16.mxu1 %v11098_v47 }
 0x4c3   :  { %3494 = vmatpush1.bf16.msra.mxu0 %v9344_v36  ;;  %3537 = vmatpush1.bf16.msra.mxu1 %v9349_v34  ;;  %v11120_v34 = vld [vmem:[#allocation16_spill] sm:$0xff] }
 0x4c4   :  { %3495 = vmatprep.subr.bf16.mxu0 %v9358_v21  ;;  %3538 = vmatprep.subr.bf16.mxu1 %v9363_v62 }
 0x4c7   :  { %3496 = vmatpush1.bf16.msra.mxu0 %v9368_v27  ;;  %3539 = vmatpush1.bf16.msra.mxu1 %v9373_v32 }
 0x4c8   :  { %3497 = vmatprep.subr.bf16.mxu0 %v9387_v10  ;;  %3540 = vmatprep.subr.bf16.mxu1 %v9397_v45 }
 0x4cb   :  { %3498 = vmatpush1.bf16.msra.mxu0 %v9382_v58  ;;  %3541 = vmatpush1.bf16.msra.mxu1 %v9392_v33  ;;  %v11122_v33 = vld [vmem:[#allocation44_spill] sm:$0xff] }
 0x4cc   :  { %3499 = vmatprep.subr.bf16.mxu0 %v9402_v35  ;;  %3542 = vmatprep.subr.bf16.mxu1 %v9408_v22  ;;  %v11123_v22 = vld [vmem:[#allocation43_spill] sm:$0xff] }
 0x4cf   :  { %3500 = vmatpush1.bf16.msra.mxu0 %v9416_v23  ;;  %3543 = vmatpush1.bf16.msra.mxu1 %v9421_v49 }
 0x4d0   :  { %3501 = vmatprep.subr.bf16.mxu0 %v9428_v41  ;;  %3544 = vmatprep.subr.bf16.mxu1 %v9433_v44  ;;  %v11124_v41 = vld [vmem:[#allocation46_spill] sm:$0xff] }
 0x4d3   :  { %3502 = vmatpush1.bf16.msra.mxu0 %v9440_v61  ;;  %3545 = vmatpush1.bf16.msra.mxu1 %v9445_v11  ;;  %v11117_v61 = vld [vmem:[#allocation15_spill] sm:$0xff] }
 0x4d4   :  { %3503 = vmatprep.subr.bf16.mxu0 %v9452_v39  ;;  %3546 = vmatprep.subr.bf16.mxu1 %v9457_v38  ;;  %v1096_v11 = vadd.f32 %v11117_v61, %v9069_v2 }
 0x4d7   :  { %3504 = vmatpush1.bf16.msra.mxu0 %v9464_v30  ;;  %3547 = vmatpush1.bf16.msra.mxu1 %v9469_v20  ;;  %v11119_v30 = vld [vmem:[#allocation14_spill] sm:$0xff] }
 0x4d8   :  { %3505 = vmatprep.subr.bf16.mxu0 %v9476_v37  ;;  %3548 = vmatprep.subr.bf16.mxu1 %v9481_v3  ;;  %v1209_v37 = vadd.f32 %v11120_v34, %v1096_v11  ;;  %v9737_v34 = vld [vmem:[%s11027_s2 + $0xac] ss:$16 sps:$4 sm:$0xff]  }
 0x4db   :  { %3506 = vmatpush1.bf16.msra.mxu0 %v9488_v19  ;;  %3549 = vmatpush1.bf16.msra.mxu1 %v9493_v14  ;;  %v11121_v19 = vld [vmem:[#allocation17_spill] sm:$0xff] }
 0x57e   :  { %v3173_v29 = vpop.f32.mrf.mxu0  ;;  %v3216_v51 = vpop.f32.mrf.mxu1 }
 0x57f   :  { %v3225_v39 = vadd.f32 %v3173_v29, %v11118_v5  ;;  %v3227_v23 = vadd.f32 %v3216_v51, %v11123_v22  ;;  %v9689_v5 = vld [vmem:[%s11027_s2 + $0xec] ss:$16 sps:$4 sm:$0xff]   ;;  %v9699_v51 = vld [vmem:[%s11027_s2 + $0xe8] ss:$16 sps:$4 sm:$0xff]  }
 0x580   :  { %v3175_v38 = vpop.f32.mrf.mxu0  ;;  %v3218_v21 = vpop.f32.mrf.mxu1  ;;  %3886 = vmatprep.subr.bf16.mxu1 %v9689_v5  ;;  %v9819_v22 = vld [vmem:[%s11027_s2 + $0x48] ss:$16 sps:$4 sm:$0xff]  }
 0x581   :  { %v6785_v31 = vmul.f32 -1.442695, %v3225_v39  ;;  %v3226_v36 = vadd.f32 %v3175_v38, %v11119_v30  ;;  %v3228_v45 = vadd.f32 %v3218_v21, %v11122_v33  ;;  %v9694_v39 = vld [vmem:[%s11027_s2 + $0xe0] ss:$16 sps:$4 sm:$0xff]   ;;  %v9708_v38 = vld [vmem:[%s11027_s2 + $0xc4] ss:$16 sps:$4 sm:$0xff]  }
 0x582   :  { %v3177_v20 = vpop.f32.mrf.mxu0  ;;  %v3220_v58 = vpop.f32.mrf.mxu1  ;;  %v9718_v30 = vld [vmem:[%s11027_s2 + $0xc0] ss:$16 sps:$4 sm:$0xff]   ;;  %v9802_v33 = vld [vmem:[%s11027_s2 + $0x44] ss:$16 sps:$4 sm:$0xff]  }
 0x583   :  { %7761 = vpow2.f32 %v6785_v31  ;;  %v6787_v3 = vmul.f32 -1.442695, %v3226_v36  ;;  %v3229_v62 = vadd.f32 %v3177_v20, %v11121_v19  ;;  %v6789_v49 = vmul.f32 -1.442695, %v3228_v45  ;;  %v9713_v31 = vld [vmem:[%s11027_s2 + $0xcc] ss:$16 sps:$4 sm:$0xff]  }
 0x584   :  { %v3179_v14 = vpop.f32.mrf.mxu0  ;;  %v3222_v35 = vpop.f32.mrf.mxu1  ;;  %v3231_v1 = vadd.f32 %v3220_v58, %v11125_v57  ;;  %v9723_v36 = vld [vmem:[%s11027_s2 + $0xc8] ss:$16 sps:$4 sm:$0xff]   ;;  %v9732_v20 = vld [vmem:[%s11027_s2 + $0xa4] ss:$16 sps:$4 sm:$0xff]   ;;  %v9756_v21 = vld [vmem:[%s11027_s2 + $0x80] ss:$16 sps:$4 sm:$0xff]  }
 0x585   :  { %7763 = vpow2.f32 %v6787_v3  ;;  %v6786_v27 = vmul.f32 -1.442695, %v3229_v62  ;;  %v3230_v32 = vadd.f32 %v3179_v14, %v1209_v37  ;;  %v3232_v44 = vadd.f32 %v3222_v35, %v11124_v41  ;;  %v9742_v37 = vld [vmem:[%s11027_s2 + $0xa0] ss:$16 sps:$4 sm:$0xff]   ;;  %v9747_v3 = vld [vmem:[%s11027_s2 + $0xa8] ss:$16 sps:$4 sm:$0xff]  }
 0x586   :  { %v9761_v19 = vld [vmem:[%s11027_s2 + $0x84] ss:$16 sps:$4 sm:$0xff]   ;;  %v9766_v62 = vld [vmem:[%s11027_s2 + $0x88] ss:$16 sps:$4 sm:$0xff]   ;;  %v9771_v14 = vld [vmem:[%s11027_s2 + $0x8c] ss:$16 sps:$4 sm:$0xff]  }
 0x587   :  { %7765 = vpow2.f32 %v6786_v27  ;;  %v6788_v10 = vmul.f32 -1.442695, %v3230_v32  ;;  %v6790_v13 = vmul.f32 -1.442695, %v3232_v44  ;;  %v9776_v27 = vld [vmem:[%s11027_s2 + $0x64] ss:$16 sps:$4 sm:$0xff]  }
 0x588   :  { %v9782_v32 = vld [vmem:[%s11027_s2 + $0x6c] ss:$16 sps:$4 sm:$0xff]   ;;  %v9790_v58 = vld [vmem:[%s11027_s2 + $0x60] ss:$16 sps:$4 sm:$0xff]   ;;  %v9843_v44 = vld [vmem:[%s11027_s2 + $0x28] ss:$16 sps:$4 sm:$0xff]  }
 0x589   :  { %7767 = vpow2.f32 %v6788_v10  ;;  %v9795_v10 = vld [vmem:[%s11027_s2 + $0x68] ss:$16 sps:$4 sm:$0xff]   ;;  %v9807_v45 = vld [vmem:[%s11027_s2 + $0x4c] ss:$16 sps:$4 sm:$0xff]   ;;  %v9814_v35 = vld [vmem:[%s11027_s2 + $0x40] ss:$16 sps:$4 sm:$0xff]  }
 0x58a   :  { %7769 = vtanh.f32 %v3227_v23  ;;  %v9826_v23 = vld [vmem:[%s11027_s2 + $0x24] ss:$16 sps:$4 sm:$0xff]   ;;  %v9838_v41 = vld [vmem:[%s11027_s2 + $0x20] ss:$16 sps:$4 sm:$0xff]   ;;  %v9855_v57 = vld [vmem:[%s11027_s2 + $0xc] ss:$16 sps:$4 sm:$0xff]  }
 0x58b   :  { %7771 = vpow2.f32 %v6789_v49  ;;  %v9831_v49 = vld [vmem:[%s11027_s2 + $0x2c] ss:$16 sps:$4 sm:$0xff]  }
 0x590   :  { %v7762_v52 = vpop.eup %7761 }
 0x591   :  { %v3239_v4 = vadd.f32 1.0, %v7762_v52  ;;  %v9850_v52 = vld [vmem:[%s11027_s2 + $0x4] ss:$16 sps:$4 sm:$0xff]  }
 0x592   :  { %v7764_v8 = vpop.eup %7763 }
 0x593   :  { %7773 = vrcp.f32 %v3239_v4  ;;  %v3251_v17 = vadd.f32 1.0, %v7764_v8  ;;  %v9867_v4 = vld [vmem:[%s11027_s2 + $0x8] ss:$16 sps:$4 sm:$0xff]  }
 0x594   :  { %v7766_v0 = vpop.eup %7765  ;;  %7775 = vtanh.f32 %v3231_v1  ;;  %v9862_v1 = vld [vmem:[%s11027_s2] ss:$16 sps:$4 sm:$0xff]  }
 0x595   :  { %7777 = vrcp.f32 %v3251_v17  ;;  %v3240_v18 = vadd.f32 1.0, %v7766_v0  ;;  %v11127_v0 = vld [vmem:[#allocation18_spill] sm:$0xff] }
 0x596   :  { %v7768_v16 = vpop.eup %7767  ;;  %7779 = vpow2.f32 %v6790_v13  ;;  %v11126_v13 = vld [vmem:[#allocation20_spill] sm:$0xff] }
 0x597   :  { %7781 = vrcp.f32 %v3240_v18  ;;  %v3252_v24 = vadd.f32 1.0, %v7768_v16  ;;  %v7770_v63 = vpop.eup %7769  ;;  %v1106_v17 = vadd.f32 %v11126_v13, %v9069_v2  ;;  %v11134_v13 = vld [vmem:[#allocation49_spill] sm:$0xff] }
 0x598   :  { %v7772_v55 = vpop.eup %7771 }
 0x599   :  { %7783 = vrcp.f32 %v3252_v24  ;;  %v3265_v25 = vadd.f32 1.0, %v7772_v55  ;;  %v11128_v55 = vld [vmem:[#allocation19_spill] sm:$0xff] }
 0x59b   :  { %7785 = vrcp.f32 %v3265_v25 }
 0x5a0   :  { %v7774_v59 = vpop.eup %7773 }
 0x5a1   :  { %v7776_v12 = vpop.eup %7775  ;;  %v3273_v60 = vmul.f32 %v7774_v59, %v7770_v63 }
 0x5a2   :  { %v7778_v6 = vpop.eup %7777 }
 0x5a3   :  { %v7780_v7 = vpop.eup %7779  ;;  %v3271_v42 = vmul.f32 %v7778_v6, %v9622_v9 }
 0x5a4   :  { %v7782_v48 = vpop.eup %7781  ;;  %v3266_v50 = vadd.f32 1.0, %v7780_v7 }
 0x5a5   :  { %v9672_v26 = vadd.f32 %v3273_v60, %v3271_v42  ;;  %v3274_v53 = vmul.f32 %v7782_v48, %v7776_v12  ;;  %v11129_v60 = vld [vmem:[#allocation21_spill] sm:$0xff]  ;;  %v11130_v48 = vld [vmem:[#allocation22_spill] sm:$0xff] }
 0x5a6   :  { %v7784_v43 = vpop.eup %7783  ;;  %v1219_v6 = vadd.f32 %v11129_v60, %v1106_v17 }
 0x5a7   :  { %v3272_v54 = vmul.f32 %v7784_v43, %v9625_v46  ;;  %7787 = vtanh.f32 %v9672_v26  ;;  %v9684_v46 = vld [vmem:[%s11027_s2 + $0xe4] ss:$16 sps:$4 sm:$0xff]  }
 0x5a8   :  { %7789 = vrcp.f32 %v3266_v50  ;;  %v7786_v56 = vpop.eup %7785  ;;  %3843 = vmatprep.subr.bf16.mxu0 %v9684_v46 }
 0x5a9   :  { %v9675_v40 = vadd.f32 %v3274_v53, %v3272_v54 }
 0x5ab   :  { %7791 = vtanh.f32 %v9675_v40 }
 0x5b4   :  { %v7788_v28 = vpop.eup %7787 }
 0x5b5   :  { %v7790_v9 = vpop.eup %7789  ;;  %v3279_v29 = vmul.f32 %v7788_v28, %v7786_v56  ;;  %v11131_v28 = vld [vmem:[#allocation48_spill] sm:$0xff] }
 0x5b8   :  { %v7792_v15 = vpop.eup %7791 }
 0x5b9   :  { %v3280_v61 = vmul.f32 %v7792_v15, %v7790_v9 }
 0x5bb   :  { %v3281_v11 = vpack.c.bf16 %v3280_v61, %v3279_v29  ;;  %v11132_v29 = vld [vmem:[#allocation47_spill] sm:$0xff] }
 0x5bd   :  { %7101 = vst [vmem:[#allocation3 + $0x20] sm:$0xff] %v3281_v11   ;;  %3524 = vmatmul.mubr.bf16.vlgmr.msra.gmra.mxu0 %v3281_v11  ;;  %3567 = vmatmul.mubr.bf16.vlgmr.msra.gmra.mxu1 %v3281_v11 }
 0x5be   :  { %3875 = vmatprep.mubr.bf16.mxu0 %v11098_v47  ;;  %3918 = vmatprep.mubr.bf16.mxu1 %v11098_v47 }
 0x5bf   :  { %3844 = vmatpush1.bf16.msra.mxu0 %v9694_v39  ;;  %3887 = vmatpush1.bf16.msra.mxu1 %v9699_v51 }
 0x5c0   :  { %3845 = vmatprep.subr.bf16.mxu0 %v9708_v38  ;;  %3888 = vmatprep.subr.bf16.mxu1 %v9713_v31 }
 0x5c3   :  { %3846 = vmatpush1.bf16.msra.mxu0 %v9718_v30  ;;  %3889 = vmatpush1.bf16.msra.mxu1 %v9723_v36 }
 0x5c4   :  { %3847 = vmatprep.subr.bf16.mxu0 %v9732_v20  ;;  %3890 = vmatprep.subr.bf16.mxu1 %v9737_v34 }
 0x5c7   :  { %3848 = vmatpush1.bf16.msra.mxu0 %v9742_v37  ;;  %3891 = vmatpush1.bf16.msra.mxu1 %v9747_v3 }
 0x5c8   :  { %3849 = vmatprep.subr.bf16.mxu0 %v9761_v19  ;;  %3892 = vmatprep.subr.bf16.mxu1 %v9771_v14 }
 0x5cb   :  { %3850 = vmatpush1.bf16.msra.mxu0 %v9756_v21  ;;  %3893 = vmatpush1.bf16.msra.mxu1 %v9766_v62 }
 0x5cc   :  { %3851 = vmatprep.subr.bf16.mxu0 %v9776_v27  ;;  %3894 = vmatprep.subr.bf16.mxu1 %v9782_v32 }
 0x5cf   :  { %3852 = vmatpush1.bf16.msra.mxu0 %v9790_v58  ;;  %3895 = vmatpush1.bf16.msra.mxu1 %v9795_v10 }
 0x5d0   :  { %3853 = vmatprep.subr.bf16.mxu0 %v9802_v33  ;;  %3896 = vmatprep.subr.bf16.mxu1 %v9807_v45 }
 0x5d3   :  { %3854 = vmatpush1.bf16.msra.mxu0 %v9814_v35  ;;  %3897 = vmatpush1.bf16.msra.mxu1 %v9819_v22 }
 0x5d4   :  { %3855 = vmatprep.subr.bf16.mxu0 %v9826_v23  ;;  %3898 = vmatprep.subr.bf16.mxu1 %v9831_v49 }
 0x5d7   :  { %3856 = vmatpush1.bf16.msra.mxu0 %v9838_v41  ;;  %3899 = vmatpush1.bf16.msra.mxu1 %v9843_v44 }
 0x5d8   :  { %3857 = vmatprep.subr.bf16.mxu0 %v9850_v52  ;;  %3900 = vmatprep.subr.bf16.mxu1 %v9855_v57 }
 0x5db   :  { %3858 = vmatpush1.bf16.msra.mxu0 %v9862_v1  ;;  %3901 = vmatpush1.bf16.msra.mxu1 %v9867_v4 }
 0x5dc   :  { %4195 = vmatprep.subr.bf16.mxu0 %v9684_v46  ;;  %4238 = vmatprep.subr.bf16.mxu1 %v9689_v5  ;;  %v11133_v46 = vld [vmem:[#allocation50_spill] sm:$0xff] }
 0x67d   :  { %v3525_v8 = vpop.f32.mrf.mxu0  ;;  %v3568_v16 = vpop.f32.mrf.mxu1 }
 0x67e   :  { %v3577_v18 = vadd.f32 %v3525_v8, %v11127_v0  ;;  %v3579_v61 = vadd.f32 %v3568_v16, %v11132_v29 }
 0x67f   :  { %v3527_v24 = vpop.f32.mrf.mxu0  ;;  %v3570_v42 = vpop.f32.mrf.mxu1 }
 0x680   :  { %v6825_v63 = vmul.f32 -1.442695, %v3577_v18  ;;  %v3578_v59 = vadd.f32 %v3527_v24, %v11128_v55  ;;  %v3580_v9 = vadd.f32 %v3570_v42, %v11131_v28 }
 0x681   :  { %v3529_v12 = vpop.f32.mrf.mxu0  ;;  %v3572_v54 = vpop.f32.mrf.mxu1 }
 0x682   :  { %7793 = vpow2.f32 %v6825_v63  ;;  %v6827_v7 = vmul.f32 -1.442695, %v3578_v59  ;;  %v3581_v25 = vadd.f32 %v3529_v12, %v11130_v48  ;;  %v6829_v11 = vmul.f32 -1.442695, %v3580_v9 }
 0x683   :  { %v3531_v53 = vpop.f32.mrf.mxu0  ;;  %v3574_v15 = vpop.f32.mrf.mxu1  ;;  %v3583_v17 = vadd.f32 %v3572_v54, %v11134_v13 }
 0x684   :  { %7795 = vpow2.f32 %v6827_v7  ;;  %v6826_v43 = vmul.f32 -1.442695, %v3581_v25  ;;  %v3582_v50 = vadd.f32 %v3531_v53, %v1219_v6  ;;  %v3584_v5 = vadd.f32 %v3574_v15, %v11133_v46 }
 0x686   :  { %7797 = vpow2.f32 %v6826_v43  ;;  %v6828_v56 = vmul.f32 -1.442695, %v3582_v50  ;;  %v6830_v24 = vmul.f32 -1.442695, %v3584_v5 }
 0x688   :  { %7799 = vpow2.f32 %v6828_v56 }
 0x689   :  { %7801 = vtanh.f32 %v3579_v61 }
 0x68a   :  { %7803 = vpow2.f32 %v6829_v11 }
 0x68f   :  { %v7794_v8 = vpop.eup %7793 }
 0x690   :  { %v3591_v0 = vadd.f32 1.0, %v7794_v8 }
 0x691   :  { %v7796_v18 = vpop.eup %7795 }
 0x692   :  { %7805 = vrcp.f32 %v3591_v0  ;;  %v3603_v63 = vadd.f32 1.0, %v7796_v18 }
 0x693   :  { %v7798_v55 = vpop.eup %7797  ;;  %7807 = vtanh.f32 %v3583_v17 }
 0x694   :  { %7809 = vrcp.f32 %v3603_v63  ;;  %v3592_v59 = vadd.f32 1.0, %v7798_v55 }
 0x695   :  { %v7800_v12 = vpop.eup %7799  ;;  %7811 = vpow2.f32 %v6830_v24  ;;  %v11143_v24 = vld [vmem:[#allocation53_spill] sm:$0xff] }
 0x696   :  { %7813 = vrcp.f32 %v3592_v59  ;;  %v3604_v16 = vadd.f32 1.0, %v7800_v12  ;;  %v7802_v60 = vpop.eup %7801 }
 0x697   :  { %v7804_v6 = vpop.eup %7803 }
 0x698   :  { %7815 = vrcp.f32 %v3604_v16  ;;  %v3617_v54 = vadd.f32 1.0, %v7804_v6 }
 0x69a   :  { %7817 = vrcp.f32 %v3617_v54 }
 0x69f   :  { %v7806_v7 = vpop.eup %7805 }
 0x6a0   :  { %v7808_v42 = vpop.eup %7807  ;;  %v3625_v48 = vmul.f32 %v7806_v7, %v7802_v60 }
 0x6a1   :  { %v7810_v25 = vpop.eup %7809 }
 0x6a2   :  { %v7812_v53 = vpop.eup %7811  ;;  %v3623_v43 = vmul.f32 %v7810_v25, %v9672_v26 }
 0x6a3   :  { %v7814_v50 = vpop.eup %7813  ;;  %v3618_v15 = vadd.f32 1.0, %v7812_v53 }
 0x6a4   :  { %v9886_v56 = vadd.f32 %v3625_v48, %v3623_v43  ;;  %v3626_v28 = vmul.f32 %v7814_v50, %v7808_v42 }
 0x6a5   :  { %v7816_v9 = vpop.eup %7815 }
 0x6a6   :  { %v3624_v29 = vmul.f32 %v7816_v9, %v9675_v40  ;;  %7819 = vtanh.f32 %v9886_v56  ;;  %v7523_v40 = vld [vmem:[%s11029_s4 + $0xe4] ss:$16 sps:$4 sm:$0xff]  }
 0x6a7   :  { %7821 = vrcp.f32 %v3618_v15  ;;  %v7818_v11 = vpop.eup %7817 }
 0x6a8   :  { %v9889_v61 = vadd.f32 %v3626_v28, %v3624_v29 }
 0x6aa   :  { %7823 = vtanh.f32 %v9889_v61 }
 0x6b3   :  { %v7820_v46 = vpop.eup %7819 }
 0x6b4   :  { %v7822_v26 = vpop.eup %7821  ;;  %v3631_v8 = vmul.f32 %v7820_v46, %v7818_v11 }
 0x6b7   :  { %v7824_v5 = vpop.eup %7823 }
 0x6b8   :  { %v3632_v13 = vmul.f32 %v7824_v5, %v7822_v26 }
 0x6ba   :  { %v3633_v17 = vpack.c.bf16 %v3632_v13, %v3631_v8 }
 0x6bc   :  { %7102 = vst [vmem:[#allocation3 + $0x28] sm:$0xff] %v3633_v17   ;;  %3876 = vmatmul.mubr.bf16.vlgmr.msra.gmra.mxu0 %v3633_v17  ;;  %3919 = vmatmul.mubr.bf16.vlgmr.msra.gmra.mxu1 %v3633_v17 }
 0x6bd   :  { %4196 = vmatpush1.bf16.msra.mxu0 %v9694_v39  ;;  %4239 = vmatpush1.bf16.msra.mxu1 %v9699_v51  ;;  %v7526_v39 = vld [vmem:[%s11029_s4 + $0xec] ss:$16 sps:$4 sm:$0xff]  }
 0x6be   :  { %4197 = vmatprep.subr.bf16.mxu0 %v9708_v38  ;;  %4240 = vmatprep.subr.bf16.mxu1 %v9713_v31  ;;  %v11135_v38 = vld [vmem:[#allocation25_spill] sm:$0xff] }
 0x6bf   :  { %4227 = vmatprep.mubr.bf16.mxu0 %v11098_v47  ;;  %4270 = vmatprep.mubr.bf16.mxu1 %v11098_v47  ;;  %v1116_v31 = vadd.f32 %v11135_v38, %v9069_v2 }
 0x6c1   :  { %4198 = vmatpush1.bf16.msra.mxu0 %v9718_v30  ;;  %4241 = vmatpush1.bf16.msra.mxu1 %v9723_v36  ;;  %v11136_v30 = vld [vmem:[#allocation23_spill] sm:$0xff] }
 0x6c2   :  { %4199 = vmatprep.subr.bf16.mxu0 %v9732_v20  ;;  %4242 = vmatprep.subr.bf16.mxu1 %v9737_v34 }
 0x6c5   :  { %4200 = vmatpush1.bf16.msra.mxu0 %v9742_v37  ;;  %4243 = vmatpush1.bf16.msra.mxu1 %v9747_v3  ;;  %v11137_v3 = vld [vmem:[#allocation24_spill] sm:$0xff] }
 0x6c6   :  { %4201 = vmatprep.subr.bf16.mxu0 %v9761_v19  ;;  %4244 = vmatprep.subr.bf16.mxu1 %v9771_v14 }
 0x6c9   :  { %4202 = vmatpush1.bf16.msra.mxu0 %v9756_v21  ;;  %4245 = vmatpush1.bf16.msra.mxu1 %v9766_v62  ;;  %v11138_v62 = vld [vmem:[#allocation26_spill] sm:$0xff] }
 0x6ca   :  { %4203 = vmatprep.subr.bf16.mxu0 %v9776_v27  ;;  %4246 = vmatprep.subr.bf16.mxu1 %v9782_v32  ;;  %v1229_v14 = vadd.f32 %v11138_v62, %v1116_v31  ;;  %v7521_v31 = vld [vmem:[%s11029_s4 + $0xe0] ss:$16 sps:$4 sm:$0xff]   ;;  %v7536_v62 = vld [vmem:[%s11029_s4 + $0xa8] ss:$16 sps:$4 sm:$0xff]  }
 0x6cd   :  { %4204 = vmatpush1.bf16.msra.mxu0 %v9790_v58  ;;  %4247 = vmatpush1.bf16.msra.mxu1 %v9795_v10  ;;  %v11139_v58 = vld [vmem:[#allocation27_spill] sm:$0xff] }
 0x6ce   :  { %4205 = vmatprep.subr.bf16.mxu0 %v9802_v33  ;;  %4248 = vmatprep.subr.bf16.mxu1 %v9807_v45 }
 0x6d1   :  { %4206 = vmatpush1.bf16.msra.mxu0 %v9814_v35  ;;  %4249 = vmatpush1.bf16.msra.mxu1 %v9819_v22 }
 0x6d2   :  { %4207 = vmatprep.subr.bf16.mxu0 %v9826_v23  ;;  %4250 = vmatprep.subr.bf16.mxu1 %v9831_v49  ;;  %v11140_v49 = vld [vmem:[#allocation52_spill] sm:$0xff] }
 0x6d5   :  { %4208 = vmatpush1.bf16.msra.mxu0 %v9838_v41  ;;  %4251 = vmatpush1.bf16.msra.mxu1 %v9843_v44 }
 0x6d6   :  { %4209 = vmatprep.subr.bf16.mxu0 %v9850_v52  ;;  %4252 = vmatprep.subr.bf16.mxu1 %v9855_v57  ;;  %v11141_v52 = vld [vmem:[#allocation51_spill] sm:$0xff] }
 0x6d9   :  { %4210 = vmatpush1.bf16.msra.mxu0 %v9862_v1  ;;  %4253 = vmatpush1.bf16.msra.mxu1 %v9867_v4  ;;  %v11142_v4 = vld [vmem:[#allocation54_spill] sm:$0xff] }
 0x6da   :  { %4625 = vmatprep.subr.bf16.mxu0 %v7523_v40  ;;  %4738 = vmatprep.subr.bf16.mxu1 %v7526_v39 }
 0x77c   :  { %v3877_v51 = vpop.f32.mrf.mxu0  ;;  %v3920_v20 = vpop.f32.mrf.mxu1 }
 0x77d   :  { %v3929_v36 = vadd.f32 %v3877_v51, %v11136_v30  ;;  %v3931_v57 = vadd.f32 %v3920_v20, %v11141_v52  ;;  %v7532_v20 = vld [vmem:[%s11029_s4 + $0xcc] ss:$16 sps:$4 sm:$0xff]  }
 0x77e   :  { %v3879_v34 = vpop.f32.mrf.mxu0  ;;  %v3922_v32 = vpop.f32.mrf.mxu1  ;;  %v7562_v52 = vld [vmem:[%s11029_s4 + $0x2c] ss:$16 sps:$4 sm:$0xff]  }
 0x77f   :  { %v6865_v37 = vmul.f32 -1.442695, %v3929_v36  ;;  %v3930_v21 = vadd.f32 %v3879_v34, %v11137_v3  ;;  %v3932_v41 = vadd.f32 %v3922_v32, %v11140_v49  ;;  %v7529_v36 = vld [vmem:[%s11029_s4 + $0xc4] ss:$16 sps:$4 sm:$0xff]   ;;  %v7527_v34 = vld [vmem:[%s11029_s4 + $0xc0] ss:$16 sps:$4 sm:$0xff]  }
 0x780   :  { %v3881_v19 = vpop.f32.mrf.mxu0  ;;  %v3924_v22 = vpop.f32.mrf.mxu1  ;;  %v7535_v3 = vld [vmem:[%s11029_s4 + $0xa4] ss:$16 sps:$4 sm:$0xff]   ;;  %v7539_v32 = vld [vmem:[%s11029_s4 + $0x80] ss:$16 sps:$4 sm:$0xff]  }
 0x781   :  { %7825 = vpow2.f32 %v6865_v37  ;;  %v6867_v27 = vmul.f32 -1.442695, %v3930_v21  ;;  %v3933_v10 = vadd.f32 %v3881_v19, %v11139_v58  ;;  %v6869_v1 = vmul.f32 -1.442695, %v3932_v41  ;;  %v7530_v37 = vld [vmem:[%s11029_s4 + $0xc8] ss:$16 sps:$4 sm:$0xff]  }
 0x782   :  { %v3883_v33 = vpop.f32.mrf.mxu0  ;;  %v3926_v44 = vpop.f32.mrf.mxu1  ;;  %v3935_v63 = vadd.f32 %v3924_v22, %v11143_v24  ;;  %v7538_v21 = vld [vmem:[%s11029_s4 + $0xac] ss:$16 sps:$4 sm:$0xff]   ;;  %v7533_v19 = vld [vmem:[%s11029_s4 + $0xa0] ss:$16 sps:$4 sm:$0xff]   ;;  %v7542_v58 = vld [vmem:[%s11029_s4 + $0x88] ss:$16 sps:$4 sm:$0xff]  }
 0x783   :  { %7827 = vpow2.f32 %v6867_v27  ;;  %v6866_v45 = vmul.f32 -1.442695, %v3933_v10  ;;  %v3934_v35 = vadd.f32 %v3883_v33, %v1229_v14  ;;  %v3936_v0 = vadd.f32 %v3926_v44, %v11142_v4  ;;  %v7541_v14 = vld [vmem:[%s11029_s4 + $0x84] ss:$16 sps:$4 sm:$0xff]   ;;  %v7544_v27 = vld [vmem:[%s11029_s4 + $0x8c] ss:$16 sps:$4 sm:$0xff]  }
 0x784   :  { %v7547_v10 = vld [vmem:[%s11029_s4 + $0x64] ss:$16 sps:$4 sm:$0xff]   ;;  %v7550_v33 = vld [vmem:[%s11029_s4 + $0x6c] ss:$16 sps:$4 sm:$0xff]   ;;  %v7551_v49 = vld [vmem:[%s11029_s4 + $0x40] ss:$16 sps:$4 sm:$0xff]  }
 0x785   :  { %7829 = vpow2.f32 %v6866_v45  ;;  %v6868_v23 = vmul.f32 -1.442695, %v3934_v35  ;;  %v6870_v12 = vmul.f32 -1.442695, %v3936_v0  ;;  %v7545_v45 = vld [vmem:[%s11029_s4 + $0x60] ss:$16 sps:$4 sm:$0xff]  }
 0x786   :  { %v7548_v35 = vld [vmem:[%s11029_s4 + $0x68] ss:$16 sps:$4 sm:$0xff]   ;;  %v7553_v22 = vld [vmem:[%s11029_s4 + $0x44] ss:$16 sps:$4 sm:$0xff]   ;;  %v7568_v0 = vld [vmem:[%s11029_s4 + $0xc] ss:$16 sps:$4 sm:$0xff]  }
 0x787   :  { %7831 = vpow2.f32 %v6868_v23  ;;  %v7556_v23 = vld [vmem:[%s11029_s4 + $0x4c] ss:$16 sps:$4 sm:$0xff]   ;;  %v7554_v41 = vld [vmem:[%s11029_s4 + $0x48] ss:$16 sps:$4 sm:$0xff]   ;;  %v7559_v44 = vld [vmem:[%s11029_s4 + $0x24] ss:$16 sps:$4 sm:$0xff]  }
 0x788   :  { %7833 = vtanh.f32 %v3931_v57  ;;  %v7557_v57 = vld [vmem:[%s11029_s4 + $0x20] ss:$16 sps:$4 sm:$0xff]   ;;  %v7565_v4 = vld [vmem:[%s11029_s4 + $0x4] ss:$16 sps:$4 sm:$0xff]   ;;  %v7566_v24 = vld [vmem:[%s11029_s4 + $0x8] ss:$16 sps:$4 sm:$0xff]  }
 0x789   :  { %7835 = vpow2.f32 %v6869_v1  ;;  %v7560_v1 = vld [vmem:[%s11029_s4 + $0x28] ss:$16 sps:$4 sm:$0xff]  }
 0x78e   :  { %v7826_v18 = vpop.eup %7825 }
 0x78f   :  { %v3943_v55 = vadd.f32 1.0, %v7826_v18  ;;  %v7563_v18 = vld [vmem:[%s11029_s4] ss:$16 sps:$4 sm:$0xff]  }
 0x790   :  { %v7828_v59 = vpop.eup %7827 }
 0x791   :  { %7837 = vrcp.f32 %v3943_v55  ;;  %v3955_v16 = vadd.f32 1.0, %v7828_v59  ;;  %v7570_v55 = vld [vmem:[#allocation3 + $0x8] sm:$0xff]   ;;  %v7571_v59 = vld [vmem:[#allocation3 + $0x10] sm:$0xff]  }
 0x792   :  { %v7830_v60 = vpop.eup %7829  ;;  %7839 = vtanh.f32 %v3935_v63  ;;  %v7569_v63 = vld [vmem:[#allocation3] sm:$0xff]  }
 0x793   :  { %7841 = vrcp.f32 %v3955_v16  ;;  %v3944_v6 = vadd.f32 1.0, %v7830_v60  ;;  %v7573_v16 = vld [vmem:[#allocation3 + $0x20] sm:$0xff]   ;;  %v7574_v60 = vld [vmem:[#allocation3 + $0x28] sm:$0xff]  }
 0x794   :  { %v7832_v7 = vpop.eup %7831  ;;  %7843 = vpow2.f32 %v6870_v12  ;;  %v7572_v12 = vld [vmem:[#allocation3 + $0x18] sm:$0xff]  }
 0x795   :  { %7845 = vrcp.f32 %v3944_v6  ;;  %v3956_v42 = vadd.f32 1.0, %v7832_v7  ;;  %v7834_v48 = vpop.eup %7833  ;;  %v10058_v7 = vld [vmem:[%s11030_s5 + $0xe4] ss:$16 sps:$4 sm:$0xff]  }
 0x796   :  { %v7836_v25 = vpop.eup %7835 }
 0x797   :  { %7847 = vrcp.f32 %v3956_v42  ;;  %v3969_v29 = vadd.f32 1.0, %v7836_v25  ;;  %v10063_v42 = vld [vmem:[%s11030_s5 + $0xe0] ss:$16 sps:$4 sm:$0xff]   ;;  %v10075_v25 = vld [vmem:[%s11030_s5 + $0xe8] ss:$16 sps:$4 sm:$0xff]  }
 0x799   :  { %7849 = vrcp.f32 %v3969_v29  ;;  %v10120_v29 = vld [vmem:[%s11030_s5 + $0xa8] ss:$16 sps:$4 sm:$0xff]  }
 0x79e   :  { %v7838_v53 = vpop.eup %7837 }
 0x79f   :  { %v7840_v43 = vpop.eup %7839  ;;  %v3977_v50 = vmul.f32 %v7838_v53, %v7834_v48  ;;  %v10070_v48 = vld [vmem:[%s11030_s5 + $0xec] ss:$16 sps:$4 sm:$0xff]   ;;  %v10080_v53 = vld [vmem:[%s11030_s5 + $0xc4] ss:$16 sps:$4 sm:$0xff]  }
 0x7a0   :  { %v7842_v54 = vpop.eup %7841 }
 0x7a1   :  { %v7844_v28 = vpop.eup %7843  ;;  %v3975_v9 = vmul.f32 %v7842_v54, %v9886_v56  ;;  %v10098_v54 = vld [vmem:[%s11030_s5 + $0xc8] ss:$16 sps:$4 sm:$0xff]  }
 0x7a2   :  { %v7846_v15 = vpop.eup %7845  ;;  %v3970_v5 = vadd.f32 1.0, %v7844_v28  ;;  %v10104_v28 = vld [vmem:[%s11030_s5 + $0xa4] ss:$16 sps:$4 sm:$0xff]  }
 0x7a3   :  { %v9942_v11 = vadd.f32 %v3977_v50, %v3975_v9  ;;  %v3978_v46 = vmul.f32 %v7846_v15, %v7840_v43  ;;  %v10085_v43 = vld [vmem:[%s11030_s5 + $0xc0] ss:$16 sps:$4 sm:$0xff]   ;;  %v10093_v50 = vld [vmem:[%s11030_s5 + $0xcc] ss:$16 sps:$4 sm:$0xff]  }
 0x7a4   :  { %v7848_v26 = vpop.eup %7847  ;;  %v10110_v9 = vld [vmem:[%s11030_s5 + $0xac] ss:$16 sps:$4 sm:$0xff]   ;;  %v10115_v15 = vld [vmem:[%s11030_s5 + $0xa0] ss:$16 sps:$4 sm:$0xff]  }
 0x7a5   :  { %v3976_v8 = vmul.f32 %v7848_v26, %v9889_v61  ;;  %7851 = vtanh.f32 %v9942_v11  ;;  %v7524_v61 = vld [vmem:[%s11029_s4 + $0xe8] ss:$16 sps:$4 sm:$0xff]   ;;  %v10134_v26 = vld [vmem:[%s11030_s5 + $0x8c] ss:$16 sps:$4 sm:$0xff]  }
 0x7a6   :  { %7853 = vrcp.f32 %v3970_v5  ;;  %v7850_v17 = vpop.eup %7849  ;;  %v10139_v5 = vld [vmem:[%s11030_s5 + $0x80] ss:$16 sps:$4 sm:$0xff]  }
 0x7a7   :  { %v9945_v13 = vadd.f32 %v3978_v46, %v3976_v8  ;;  %v10129_v46 = vld [vmem:[%s11030_s5 + $0x84] ss:$16 sps:$4 sm:$0xff]  }
 0x7a8   :  { %v10145_v8 = vld [vmem:[%s11030_s5 + $0x64] ss:$16 sps:$4 sm:$0xff]  }
 0x7a9   :  { %7855 = vtanh.f32 %v9945_v13 }
 0x7b2   :  { %v7852_v40 = vpop.eup %7851 }
 0x7b3   :  { %v7854_v56 = vpop.eup %7853  ;;  %v3983_v51 = vmul.f32 %v7852_v40, %v7850_v17  ;;  %v10150_v17 = vld [vmem:[%s11030_s5 + $0x60] ss:$16 sps:$4 sm:$0xff]   ;;  %v10156_v40 = vld [vmem:[%s11030_s5 + $0x88] ss:$16 sps:$4 sm:$0xff]  }
 0x7b6   :  { %v7856_v39 = vpop.eup %7855 }
 0x7b7   :  { %v3984_v38 = vmul.f32 %v7856_v39, %v7854_v56  ;;  %v10162_v56 = vld [vmem:[%s11030_s5 + $0x44] ss:$16 sps:$4 sm:$0xff]   ;;  %v10169_v39 = vld [vmem:[%s11030_s5 + $0x6c] ss:$16 sps:$4 sm:$0xff]  }
 0x7b9   :  { %v3985_v30 = vpack.c.bf16 %v3984_v38, %v3983_v51  ;;  %v10175_v51 = vld [vmem:[%s11030_s5 + $0x68] ss:$16 sps:$4 sm:$0xff]   ;;  %v10181_v38 = vld [vmem:[%s11030_s5 + $0x40] ss:$16 sps:$4 sm:$0xff]  }
 0x7bb   :  { %7103 = vst [vmem:[#allocation3 + $0x30] sm:$0xff] %v3985_v30   ;;  %4228 = vmatmul.mubr.bf16.vlgmr.msra.gmra.mxu0 %v3985_v30  ;;  %4271 = vmatmul.mubr.bf16.vlgmr.msra.gmra.mxu1 %v3985_v30  ;;  %v10199_v30 = vld [vmem:[%s11030_s5 + $0x48] ss:$16 sps:$4 sm:$0xff]  }
 0x7bc   :  { %4626 = vmatpush1.bf16.msra.mxu0 %v7521_v31  ;;  %4739 = vmatpush1.bf16.msra.mxu1 %v7524_v61  ;;  %v10188_v31 = vld [vmem:[%s11030_s5 + $0x24] ss:$16 sps:$4 sm:$0xff]   ;;  %v10193_v61 = vld [vmem:[%s11030_s5 + $0x4c] ss:$16 sps:$4 sm:$0xff]  }
 0x7bd   :  { %4627 = vmatprep.subr.bf16.mxu0 %v7529_v36  ;;  %4740 = vmatprep.subr.bf16.mxu1 %v7532_v20  ;;  %v10205_v36 = vld [vmem:[%s11030_s5 + $0x20] ss:$16 sps:$4 sm:$0xff]   ;;  %v10212_v20 = vld [vmem:[%s11030_s5 + $0x2c] ss:$16 sps:$4 sm:$0xff]  }
 0x7be   :  { %4657 = vmatprep.mubr.bf16.mxu0 %v11098_v47  ;;  %4770 = vmatprep.mubr.bf16.mxu1 %v11098_v47 }
 0x7c0   :  { %4628 = vmatpush1.bf16.msra.mxu0 %v7527_v34  ;;  %4741 = vmatpush1.bf16.msra.mxu1 %v7530_v37  ;;  %v10218_v34 = vld [vmem:[%s11030_s5 + $0x4] ss:$16 sps:$4 sm:$0xff]   ;;  %v10223_v37 = vld [vmem:[%s11030_s5 + $0x28] ss:$16 sps:$4 sm:$0xff]  }
 0x7c1   :  { %4629 = vmatprep.subr.bf16.mxu0 %v7535_v3  ;;  %4742 = vmatprep.subr.bf16.mxu1 %v7538_v21  ;;  %v10230_v3 = vld [vmem:[%s11030_s5] ss:$16 sps:$4 sm:$0xff]   ;;  %v10236_v21 = vld [vmem:[%s11030_s5 + $0xc] ss:$16 sps:$4 sm:$0xff]  }
 0x7c2   :  { %v7575_v6 = vld [vmem:[#allocation3 + $0x30] sm:$0xff]  }
 0x7c4   :  { %4630 = vmatpush1.bf16.msra.mxu0 %v7533_v19  ;;  %4743 = vmatpush1.bf16.msra.mxu1 %v7536_v62  ;;  %v10242_v19 = vld [vmem:[%s11030_s5 + $0x8] ss:$16 sps:$4 sm:$0xff]  }
 0x7c5   :  { %4631 = vmatprep.subr.bf16.mxu0 %v7541_v14  ;;  %4744 = vmatprep.subr.bf16.mxu1 %v7544_v27  ;;  %v11144_v14 = vld [vmem:[#allocation30_spill] sm:$0xff] }
 0x7c6   :  { %v1126_v27 = vadd.f32 %v11144_v14, %v9069_v2 }
 0x7c8   :  { %4632 = vmatpush1.bf16.msra.mxu0 %v7539_v32  ;;  %4745 = vmatpush1.bf16.msra.mxu1 %v7542_v58  ;;  %v11145_v32 = vld [vmem:[#allocation28_spill] sm:$0xff] }
 0x7c9   :  { %4633 = vmatprep.subr.bf16.mxu0 %v7547_v10  ;;  %4746 = vmatprep.subr.bf16.mxu1 %v7550_v33 }
 0x7cc   :  { %4634 = vmatpush1.bf16.msra.mxu0 %v7545_v45  ;;  %4747 = vmatpush1.bf16.msra.mxu1 %v7548_v35  ;;  %v11146_v35 = vld [vmem:[#allocation29_spill] sm:$0xff] }
 0x7cd   :  { %4635 = vmatprep.subr.bf16.mxu0 %v7553_v22  ;;  %4748 = vmatprep.subr.bf16.mxu1 %v7556_v23 }
 0x7d0   :  { %4636 = vmatpush1.bf16.msra.mxu0 %v7551_v49  ;;  %4749 = vmatpush1.bf16.msra.mxu1 %v7554_v41  ;;  %v11147_v49 = vld [vmem:[#allocation31_spill] sm:$0xff] }
 0x7d1   :  { %4637 = vmatprep.subr.bf16.mxu0 %v7559_v44  ;;  %4750 = vmatprep.subr.bf16.mxu1 %v7562_v52  ;;  %v1239_v41 = vadd.f32 %v11147_v49, %v1126_v27  ;;  %v11152_v27 = vld [vmem:[#allocation57_spill] sm:$0xff] }
 0x7d4   :  { %4638 = vmatpush1.bf16.msra.mxu0 %v7557_v57  ;;  %4751 = vmatpush1.bf16.msra.mxu1 %v7560_v1  ;;  %v11148_v57 = vld [vmem:[#allocation32_spill] sm:$0xff] }
 0x7d5   :  { %4639 = vmatprep.subr.bf16.mxu0 %v7565_v4  ;;  %4752 = vmatprep.subr.bf16.mxu1 %v7568_v0 }
 0x7d8   :  { %4640 = vmatpush1.bf16.msra.mxu0 %v7563_v18  ;;  %4753 = vmatpush1.bf16.msra.mxu1 %v7566_v24 }
 0x7d9   :  { %5115 = vmatprep.subr.bf16.mxu0 %v10058_v7  ;;  %5158 = vmatprep.subr.bf16.mxu1 %v10070_v48 }
 0x7db   :  { %4658 = vmatmul.mubr.bf16.vlgmr.msra.gmra.mxu0 %v7569_v63  ;;  %4771 = vmatmul.mubr.bf16.vlgmr.msra.gmra.mxu1 %v7569_v63  ;;  %v11149_v63 = vld [vmem:[#allocation56_spill] sm:$0xff] }
 0x7dc   :  { %4667 = vmatprep.mubr.bf16.mxu0 %v11098_v47  ;;  %4780 = vmatprep.mubr.bf16.mxu1 %v11098_v47 }
 0x7dd   :  { %5116 = vmatpush1.bf16.msra.mxu0 %v10063_v42  ;;  %5159 = vmatpush1.bf16.msra.mxu1 %v10075_v25 }
 0x7de   :  { %5117 = vmatprep.subr.bf16.mxu0 %v10080_v53  ;;  %5160 = vmatprep.subr.bf16.mxu1 %v10093_v50 }
 0x7e1   :  { %5118 = vmatpush1.bf16.msra.mxu0 %v10085_v43  ;;  %5161 = vmatpush1.bf16.msra.mxu1 %v10098_v54 }
 0x7e2   :  { %5119 = vmatprep.subr.bf16.mxu0 %v10104_v28  ;;  %5162 = vmatprep.subr.bf16.mxu1 %v10110_v9 }
 0x7e3   :  { %4668 = vmatmul.mubr.bf16.gmra.mxu0 %v7570_v55  ;;  %4781 = vmatmul.mubr.bf16.gmra.mxu1 %v7570_v55 }
 0x7e4   :  { %4677 = vmatprep.mubr.bf16.mxu0 %v11098_v47  ;;  %4790 = vmatprep.mubr.bf16.mxu1 %v11098_v47 }
 0x7e5   :  { %5120 = vmatpush1.bf16.msra.mxu0 %v10115_v15  ;;  %5163 = vmatpush1.bf16.msra.mxu1 %v10120_v29 }
 0x7e6   :  { %5121 = vmatprep.subr.bf16.mxu0 %v10129_v46  ;;  %5164 = vmatprep.subr.bf16.mxu1 %v10134_v26 }
 0x7e9   :  { %5122 = vmatpush1.bf16.msra.mxu0 %v10139_v5  ;;  %5165 = vmatpush1.bf16.msra.mxu1 %v10156_v40 }
 0x7ea   :  { %5123 = vmatprep.subr.bf16.mxu0 %v10145_v8  ;;  %5166 = vmatprep.subr.bf16.mxu1 %v10169_v39 }
 0x7eb   :  { %4678 = vmatmul.mubr.bf16.gmra.mxu0 %v7571_v59  ;;  %4791 = vmatmul.mubr.bf16.gmra.mxu1 %v7571_v59 }
 0x7ec   :  { %4687 = vmatprep.mubr.bf16.mxu0 %v11098_v47  ;;  %4800 = vmatprep.mubr.bf16.mxu1 %v11098_v47 }
 0x7ed   :  { %5124 = vmatpush1.bf16.msra.mxu0 %v10150_v17  ;;  %5167 = vmatpush1.bf16.msra.mxu1 %v10175_v51 }
 0x7ee   :  { %5125 = vmatprep.subr.bf16.mxu0 %v10162_v56  ;;  %5168 = vmatprep.subr.bf16.mxu1 %v10193_v61 }
 0x7f1   :  { %5126 = vmatpush1.bf16.msra.mxu0 %v10181_v38  ;;  %5169 = vmatpush1.bf16.msra.mxu1 %v10199_v30 }
 0x7f2   :  { %5127 = vmatprep.subr.bf16.mxu0 %v10188_v31  ;;  %5170 = vmatprep.subr.bf16.mxu1 %v10212_v20 }
 0x7f3   :  { %4688 = vmatmul.mubr.bf16.gmra.mxu0 %v7572_v12  ;;  %4801 = vmatmul.mubr.bf16.gmra.mxu1 %v7572_v12  ;;  %v11150_v12 = vld [vmem:[#allocation55_spill] sm:$0xff] }
 0x7f4   :  { %4697 = vmatprep.mubr.bf16.mxu0 %v11098_v47  ;;  %4810 = vmatprep.mubr.bf16.mxu1 %v11098_v47 }
 0x7f5   :  { %5128 = vmatpush1.bf16.msra.mxu0 %v10205_v36  ;;  %5171 = vmatpush1.bf16.msra.mxu1 %v10223_v37 }
 0x7f6   :  { %5129 = vmatprep.subr.bf16.mxu0 %v10218_v34  ;;  %5172 = vmatprep.subr.bf16.mxu1 %v10236_v21 }
 0x7f9   :  { %5130 = vmatpush1.bf16.msra.mxu0 %v10230_v3  ;;  %5173 = vmatpush1.bf16.msra.mxu1 %v10242_v19 }
 0x7fa   :  { %5266 = vmatprep.subr.bf16.mxu0 %v10058_v7  ;;  %5309 = vmatprep.subr.bf16.mxu1 %v10070_v48 }
 0x7fb   :  { %4698 = vmatmul.mubr.bf16.gmra.mxu0 %v7573_v16  ;;  %4811 = vmatmul.mubr.bf16.gmra.mxu1 %v7573_v16 }
 0x7fc   :  { %4707 = vmatprep.mubr.bf16.mxu0 %v11098_v47  ;;  %4820 = vmatprep.mubr.bf16.mxu1 %v11098_v47 }
 0x803   :  { %4708 = vmatmul.mubr.bf16.gmra.mxu0 %v7574_v60  ;;  %4821 = vmatmul.mubr.bf16.gmra.mxu1 %v7574_v60 }
 0x804   :  { %4717 = vmatprep.mubr.bf16.mxu0 %v11098_v47  ;;  %4830 = vmatprep.mubr.bf16.mxu1 %v11098_v47 }
 0x80b   :  { %4718 = vmatmul.mubr.bf16.gmra.mxu0 %v7575_v6  ;;  %4831 = vmatmul.mubr.bf16.gmra.mxu1 %v7575_v6  ;;  %v11151_v6 = vld [vmem:[#allocation58_spill] sm:$0xff] }
 0x80c   :  { %4727 = vmatprep.mubr.bf16.mxu0 %v11098_v47  ;;  %4840 = vmatprep.mubr.bf16.mxu1 %v11098_v47 }
 0x87b   :  { %v4229_v62 = vpop.f32.mrf.mxu0  ;;  %v4272_v10 = vpop.f32.mrf.mxu1 }
 0x87c   :  { %v4281_v58 = vadd.f32 %v4229_v62, %v11145_v32  ;;  %v4283_v16 = vadd.f32 %v4272_v10, %v11150_v12 }
 0x87d   :  { %v4231_v33 = vpop.f32.mrf.mxu0  ;;  %v4274_v52 = vpop.f32.mrf.mxu1 }
 0x87e   :  { %v6905_v45 = vmul.f32 -1.442695, %v4281_v58  ;;  %v4282_v22 = vadd.f32 %v4231_v33, %v11146_v35  ;;  %v4284_v55 = vadd.f32 %v4274_v52, %v11149_v63 }
 0x87f   :  { %v4233_v23 = vpop.f32.mrf.mxu0  ;;  %v4276_v2 = vpop.f32.mrf.mxu1 }
 0x880   :  { %7857 = vpow2.f32 %v6905_v45  ;;  %v6907_v44 = vmul.f32 -1.442695, %v4282_v22  ;;  %v4285_v1 = vadd.f32 %v4233_v23, %v11148_v57  ;;  %v6909_v60 = vmul.f32 -1.442695, %v4284_v55 }
 0x881   :  { %v4235_v4 = vpop.f32.mrf.mxu0  ;;  %v4278_v59 = vpop.f32.mrf.mxu1  ;;  %v4287_v32 = vadd.f32 %v4276_v2, %v11152_v27 }
 0x882   :  { %7859 = vpow2.f32 %v6907_v44  ;;  %v6906_v0 = vmul.f32 -1.442695, %v4285_v1  ;;  %v4286_v18 = vadd.f32 %v4235_v4, %v1239_v41  ;;  %v4288_v62 = vadd.f32 %v4278_v59, %v11151_v6 }
 0x884   :  { %7861 = vpow2.f32 %v6906_v0  ;;  %v6908_v24 = vmul.f32 -1.442695, %v4286_v18  ;;  %v6910_v45 = vmul.f32 -1.442695, %v4288_v62 }
 0x886   :  { %7863 = vpow2.f32 %v6908_v24 }
 0x887   :  { %7865 = vtanh.f32 %v4283_v16 }
 0x888   :  { %7867 = vpow2.f32 %v6909_v60 }
 0x88d   :  { %v7858_v14 = vpop.eup %7857 }
 0x88e   :  { %v4295_v58 = vadd.f32 1.0, %v7858_v14 }
 0x88f   :  { %v7860_v33 = vpop.eup %7859 }
 0x890   :  { %7869 = vrcp.f32 %v4295_v58  ;;  %v4307_v35 = vadd.f32 1.0, %v7860_v33 }
 0x891   :  { %v7862_v22 = vpop.eup %7861  ;;  %7871 = vtanh.f32 %v4287_v32 }
 0x892   :  { %7873 = vrcp.f32 %v4307_v35  ;;  %v4296_v23 = vadd.f32 1.0, %v7862_v22 }
 0x893   :  { %v7864_v49 = vpop.eup %7863  ;;  %7875 = vpow2.f32 %v6910_v45 }
 0x894   :  { %7877 = vrcp.f32 %v4296_v23  ;;  %v4308_v10 = vadd.f32 1.0, %v7864_v49  ;;  %v7866_v41 = vpop.eup %7865 }
 0x895   :  { %v7868_v44 = vpop.eup %7867 }
 0x896   :  { %7879 = vrcp.f32 %v4308_v10  ;;  %v4321_v0 = vadd.f32 1.0, %v7868_v44 }
 0x898   :  { %7881 = vrcp.f32 %v4321_v0 }
 0x89b   :  { %v10301_v45 = vpop.f32.mrf.mxu1 }
 0x89d   :  { %v7870_v52 = vpop.eup %7869  ;;  %v10305_v22 = vpop.f32.mrf.mxu1 }
 0x89e   :  { %v7872_v57 = vpop.eup %7871  ;;  %v4329_v1 = vmul.f32 %v7870_v52, %v7866_v41 }
 0x89f   :  { %v7874_v4 = vpop.eup %7873  ;;  %v10309_v49 = vpop.f32.mrf.mxu1 }
 0x8a0   :  { %v7876_v18 = vpop.eup %7875  ;;  %v4327_v2 = vmul.f32 %v7874_v4, %v9942_v11 }
 0x8a1   :  { %v7878_v24 = vpop.eup %7877  ;;  %v4322_v12 = vadd.f32 1.0, %v7876_v18  ;;  %v10313_v41 = vpop.f32.mrf.mxu1 }
 0x8a2   :  { %v4331_v63 = vadd.f32 %v4329_v1, %v4327_v2  ;;  %v4330_v55 = vmul.f32 %v7878_v24, %v7872_v57 }
 0x8a3   :  { %v7880_v59 = vpop.eup %7879  ;;  %v10317_v52 = vpop.f32.mrf.mxu1 }
 0x8a4   :  { %7883 = vtanh.f32 %v4331_v63  ;;  %v4328_v16 = vmul.f32 %v7880_v59, %v9945_v13  ;;  %v10299_v13 = vpop.f32.mrf.mxu0  ;;  %11153 = vst [vmem:[#allocation5_spill] sm:$0xff] %v10317_v52 }
 0x8a5   :  { %7885 = vrcp.f32 %v4322_v12  ;;  %v7882_v6 = vpop.eup %7881  ;;  %v10321_v1 = vpop.f32.mrf.mxu1 }
 0x8a6   :  { %v4332_v60 = vadd.f32 %v4330_v55, %v4328_v16  ;;  %v10303_v35 = vpop.f32.mrf.mxu0  ;;  %11154 = vst [vmem:[#allocation6_spill] sm:$0xff] %v10321_v1 }
 0x8a7   :  { %v10325_v0 = vpop.f32.mrf.mxu1 }
 0x8a8   :  { %7887 = vtanh.f32 %v4332_v60  ;;  %v10307_v23 = vpop.f32.mrf.mxu0  ;;  %11155 = vst [vmem:[#allocation7_spill] sm:$0xff] %v10325_v0 }
 0x8a9   :  { %v10329_v2 = vpop.f32.mrf.mxu1 }
 0x8aa   :  { %v10311_v10 = vpop.f32.mrf.mxu0  ;;  %11156 = vst [vmem:[#allocation35_spill] sm:$0xff] %v10329_v2 }
 0x8ab   :  { %v10333_v63 = vpop.f32.mrf.mxu1 }
 0x8ac   :  { %v10315_v44 = vpop.f32.mrf.mxu0  ;;  %11158 = vst [vmem:[#allocation36_spill] sm:$0xff] %v10333_v63 }
 0x8ad   :  { %v10337_v59 = vpop.f32.mrf.mxu1 }
 0x8ae   :  { %v10319_v57 = vpop.f32.mrf.mxu0  ;;  %11160 = vst [vmem:[#allocation37_spill] sm:$0xff] %v10337_v59 }
 0x8af   :  { %v10341_v16 = vpop.f32.mrf.mxu1 }
 0x8b0   :  { %v10323_v4 = vpop.f32.mrf.mxu0  ;;  %11162 = vst [vmem:[#allocation8_spill] sm:$0xff] %v10341_v16 }
 0x8b1   :  { %v7884_v62 = vpop.eup %7883 }
 0x8b2   :  { %v4335_v14 = vmul.f32 %v7884_v62, %v7882_v6  ;;  %v7886_v27 = vpop.eup %7885  ;;  %v10327_v18 = vpop.f32.mrf.mxu0 }
 0x8b3   :  { %v10345_v6 = vpop.f32.mrf.mxu1 }
 0x8b4   :  { %v10331_v24 = vpop.f32.mrf.mxu0  ;;  %11164 = vst [vmem:[#allocation11_spill] sm:$0xff] %v10345_v6 }
 0x8b5   :  { %v7888_v32 = vpop.eup %7887  ;;  %11157 = vst [vmem:[#allocation34_spill] sm:$0xff] %v10331_v24 }
 0x8b6   :  { %v4336_v58 = vmul.f32 %v7888_v32, %v7886_v27  ;;  %v10335_v55 = vpop.f32.mrf.mxu0 }
 0x8b7   :  { %11159 = vst [vmem:[#allocation33_spill] sm:$0xff] %v10335_v55 }
 0x8b8   :  { %v7096_v33 = vpack.c.bf16 %v4336_v58, %v4335_v14  ;;  %v10339_v12 = vpop.f32.mrf.mxu0  ;;  %v10349_v14 = vpop.f32.mrf.mxu1 }
 0x8b9   :  { %11161 = vst [vmem:[#allocation10_spill] sm:$0xff] %v10339_v12  ;;  %11166 = vst [vmem:[#allocation40_spill] sm:$0xff] %v10349_v14 }
 0x8ba   :  { %7104 = vst [vmem:[#allocation3 + $0x38] sm:$0xff] %v7096_v33   ;;  %v10343_v60 = vpop.f32.mrf.mxu0  ;;  %v10353_v32 = vpop.f32.mrf.mxu1 }
 0x8bb   :  { %11163 = vst [vmem:[#allocation9_spill] sm:$0xff] %v10343_v60  ;;  %11168 = vst [vmem:[#allocation41_spill] sm:$0xff] %v10353_v32 }
 0x8bc   :  { %v10347_v62 = vpop.f32.mrf.mxu0  ;;  %v10357_v33 = vpop.f32.mrf.mxu1 }
 0x8bd   :  { %11165 = vst [vmem:[#allocation12_spill] sm:$0xff] %v10347_v62  ;;  %11170 = vst [vmem:[#allocation42_spill] sm:$0xff] %v10357_v33 }
 0x8be   :  { %v10351_v27 = vpop.f32.mrf.mxu0  ;;  %v10361_v63 = vpop.f32.mrf.mxu1 }
 0x8bf   :  { %11167 = vst [vmem:[#allocation39_spill] sm:$0xff] %v10351_v27  ;;  %11172 = vst [vmem:[#allocation13_spill] sm:$0xff] %v10361_v63 }
 0x8c0   :  { %v10355_v58 = vpop.f32.mrf.mxu0  ;;  %v10365_v59 = vpop.f32.mrf.mxu1 }
 0x8c1   :  { %v7615_v11 = vld [vmem:[#allocation3 + $0x38] sm:$0xff]   ;;  %11169 = vst [vmem:[#allocation38_spill] sm:$0xff] %v10355_v58  ;;  %11174 = vst [vmem:[#allocation16_spill] sm:$0xff] %v10365_v59 }
 0x8c2   :  { %4728 = vmatmul.mubr.bf16.gmra.mxu0 %v7615_v11  ;;  %4841 = vmatmul.mubr.bf16.gmra.mxu1 %v7615_v11  ;;  %v10359_v11 = vpop.f32.mrf.mxu0  ;;  %v10369_v62 = vpop.f32.mrf.mxu1 }
 0x8c3   :  { %5147 = vmatprep.mubr.bf16.mxu0 %v11098_v47  ;;  %5190 = vmatprep.mubr.bf16.mxu1 %v11098_v47  ;;  %11171 = vst [vmem:[#allocation15_spill] sm:$0xff] %v10359_v11  ;;  %11176 = vst [vmem:[#allocation44_spill] sm:$0xff] %v10369_v62 }
 0x8c4   :  { %v10363_v16 = vpop.f32.mrf.mxu0  ;;  %v10373_v27 = vpop.f32.mrf.mxu1 }
 0x8c5   :  { %11173 = vst [vmem:[#allocation14_spill] sm:$0xff] %v10363_v16  ;;  %11178 = vst [vmem:[#allocation46_spill] sm:$0xff] %v10373_v27 }
 0x8c6   :  { %v10367_v6 = vpop.f32.mrf.mxu0  ;;  %v10377_v58 = vpop.f32.mrf.mxu1 }
 0x8c7   :  { %11175 = vst [vmem:[#allocation17_spill] sm:$0xff] %v10367_v6  ;;  %11180 = vst [vmem:[#allocation20_spill] sm:$0xff] %v10377_v58 }
 0x8c8   :  { %v10371_v14 = vpop.f32.mrf.mxu0  ;;  %v10381_v11 = vpop.f32.mrf.mxu1 }
 0x8c9   :  { %11177 = vst [vmem:[#allocation43_spill] sm:$0xff] %v10371_v14  ;;  %11182 = vst [vmem:[#allocation19_spill] sm:$0xff] %v10381_v11 }
 0x8ca   :  { %5148 = vmatmul.mubr.bf16.vlgmr.msra.gmra.mxu0 %v11098_v47  ;;  %5191 = vmatmul.mubr.bf16.vlgmr.msra.gmra.mxu1 %v11098_v47  ;;  %v10375_v32 = vpop.f32.mrf.mxu0  ;;  %v10385_v16 = vpop.f32.mrf.mxu1 }
 0x8cb   :  { %5267 = vmatpush1.bf16.msra.mxu0 %v10063_v42  ;;  %5310 = vmatpush1.bf16.msra.mxu1 %v10075_v25  ;;  %11179 = vst [vmem:[#allocation45_spill] sm:$0xff] %v10375_v32  ;;  %11184 = vst [vmem:[#allocation22_spill] sm:$0xff] %v10385_v16 }
 0x8cc   :  { %5268 = vmatprep.subr.bf16.mxu0 %v10080_v53  ;;  %5311 = vmatprep.subr.bf16.mxu1 %v10093_v50  ;;  %v10379_v33 = vpop.f32.mrf.mxu0  ;;  %v10389_v6 = vpop.f32.mrf.mxu1 }
 0x8cd   :  { %5298 = vmatprep.mubr.bf16.mxu0 %v11098_v47  ;;  %5341 = vmatprep.mubr.bf16.mxu1 %v11098_v47  ;;  %11181 = vst [vmem:[#allocation18_spill] sm:$0xff] %v10379_v33  ;;  %11186 = vst [vmem:[#allocation47_spill] sm:$0xff] %v10389_v6  ;;  %v4395_v6 = vld [vmem:[%s11031_s6] sm:$0xf] }
 0x8ce   :  { %v10383_v63 = vpop.f32.mrf.mxu0  ;;  %v10393_v14 = vpop.f32.mrf.mxu1 }
 0x8cf   :  { %5269 = vmatpush1.bf16.msra.mxu0 %v10085_v43  ;;  %5312 = vmatpush1.bf16.msra.mxu1 %v10098_v54  ;;  %11183 = vst [vmem:[#allocation21_spill] sm:$0xff] %v10383_v63  ;;  %11188 = vst [vmem:[#allocation49_spill] sm:$0xff] %v10393_v14 }
 0x8d0   :  { %5270 = vmatprep.subr.bf16.mxu0 %v10104_v28  ;;  %5313 = vmatprep.subr.bf16.mxu1 %v10110_v9  ;;  %v10387_v59 = vpop.f32.mrf.mxu0  ;;  %v10397_v32 = vpop.f32.mrf.mxu1 }
 0x8d1   :  { %11185 = vst [vmem:[#allocation48_spill] sm:$0xff] %v10387_v59  ;;  %11190 = vst [vmem:[#allocation23_spill] sm:$0xff] %v10397_v32 }
 0x8d2   :  { %v10391_v62 = vpop.f32.mrf.mxu0  ;;  %v10401_v33 = vpop.f32.mrf.mxu1 }
 0x8d3   :  { %5271 = vmatpush1.bf16.msra.mxu0 %v10115_v15  ;;  %5314 = vmatpush1.bf16.msra.mxu1 %v10120_v29  ;;  %11187 = vst [vmem:[#allocation50_spill] sm:$0xff] %v10391_v62  ;;  %11192 = vst [vmem:[#allocation26_spill] sm:$0xff] %v10401_v33  ;;  %v11201_v33 = vld [vmem:[#allocation4_spill] sm:$0xff] }
 0x8d4   :  { %5272 = vmatprep.subr.bf16.mxu0 %v10129_v46  ;;  %5315 = vmatprep.subr.bf16.mxu1 %v10134_v26  ;;  %v10395_v27 = vpop.f32.mrf.mxu0  ;;  %v10405_v63 = vpop.f32.mrf.mxu1  ;;  %v11208_v52 = vsub.s32 3, %v11201_v33 }
 0x8d5   :  { %11189 = vst [vmem:[#allocation25_spill] sm:$0xff] %v10395_v27  ;;  %11194 = vst [vmem:[#allocation52_spill] sm:$0xff] %v10405_v63 }
 0x8d6   :  { %v10399_v58 = vpop.f32.mrf.mxu0  ;;  %v10409_v59 = vpop.f32.mrf.mxu1  ;;  %v10448_v1 = vrot.slane %v4395_v6, %v11208_v52 }
 0x8d7   :  { %5273 = vmatpush1.bf16.msra.mxu0 %v10139_v5  ;;  %5316 = vmatpush1.bf16.msra.mxu1 %v10156_v40  ;;  %11191 = vst [vmem:[#allocation24_spill] sm:$0xff] %v10399_v58  ;;  %11196 = vst [vmem:[#allocation54_spill] sm:$0xff] %v10409_v59  ;;  %v11205_v59 = vsub.s32 1, %v11201_v33 }
 0x8d8   :  { %5274 = vmatprep.subr.bf16.mxu0 %v10145_v8  ;;  %5317 = vmatprep.subr.bf16.mxu1 %v10169_v39  ;;  %v10403_v11 = vpop.f32.mrf.mxu0 }
 0x8d9   :  { %11193 = vst [vmem:[#allocation27_spill] sm:$0xff] %v10403_v11  ;;  %v11202_v11 = vsub.s32 0, %v11201_v33  ;;  %v10432_v60 = vrot.slane %v4395_v6, %v11205_v59 }
 0x8da   :  { %v10407_v16 = vpop.f32.mrf.mxu0 }
 0x8db   :  { %5275 = vmatpush1.bf16.msra.mxu0 %v10150_v17  ;;  %5318 = vmatpush1.bf16.msra.mxu1 %v10175_v51  ;;  %11195 = vst [vmem:[#allocation51_spill] sm:$0xff] %v10407_v16  ;;  %v10424_v62 = vrot.slane %v4395_v6, %v11202_v11  ;;  %v4662_v11 = vadd.f32 %v10303_v35, %v10432_v60 }
 0x8dc   :  { %5276 = vmatprep.subr.bf16.mxu0 %v10162_v56  ;;  %5319 = vmatprep.subr.bf16.mxu1 %v10193_v61 }
 0x8df   :  { %5277 = vmatpush1.bf16.msra.mxu0 %v10181_v38  ;;  %5320 = vmatpush1.bf16.msra.mxu1 %v10199_v30 }
 0x8e0   :  { %5278 = vmatprep.subr.bf16.mxu0 %v10188_v31  ;;  %5321 = vmatprep.subr.bf16.mxu1 %v10212_v20 }
 0x8e3   :  { %5279 = vmatpush1.bf16.msra.mxu0 %v10205_v36  ;;  %5322 = vmatpush1.bf16.msra.mxu1 %v10223_v37 }
 0x8e4   :  { %5280 = vmatprep.subr.bf16.mxu0 %v10218_v34  ;;  %5323 = vmatprep.subr.bf16.mxu1 %v10236_v21 }
 0x8e7   :  { %5281 = vmatpush1.bf16.msra.mxu0 %v10230_v3  ;;  %5324 = vmatpush1.bf16.msra.mxu1 %v10242_v19 }
 0x8e8   :  { %5417 = vmatprep.subr.bf16.mxu0 %v10058_v7  ;;  %5460 = vmatprep.subr.bf16.mxu1 %v10070_v48 }
 0x982   :  { %v10414_v14 = vpop.f32.mrf.mxu0  ;;  %v10416_v27 = vpop.f32.mrf.mxu1 }
 0x983   :  { %11197 = vst [vmem:[#allocation53_spill] sm:$0xff] %v10414_v14  ;;  %11198 = vst [vmem:[#allocation30_spill] sm:$0xff] %v10416_v27  ;;  %v4660_v27 = vadd.f32 %v10299_v13, %v10424_v62 }
 0x984   :  { %v10418_v32 = vpop.f32.mrf.mxu0  ;;  %v10420_v58 = vpop.f32.mrf.mxu1 }
 0x985   :  { %11199 = vst [vmem:[#allocation28_spill] sm:$0xff] %v10418_v32  ;;  %11200 = vst [vmem:[#allocation29_spill] sm:$0xff] %v10420_v58 }
 0x986   :  { %v10426_v63 = vpop.f32.mrf.mxu0  ;;  %v10428_v16 = vpop.f32.mrf.mxu1 }
 0x987   :  { %11203 = vst [vmem:[#allocation31_spill] sm:$0xff] %v10426_v63  ;;  %11204 = vst [vmem:[#allocation32_spill] sm:$0xff] %v10428_v16  ;;  %v4664_v16 = vadd.f32 %v10307_v23, %v10424_v62  ;;  %v11209_v23 = vsub.s32 2, %v11201_v33 }
 0x988   :  { %v10434_v12 = vpop.f32.mrf.mxu0  ;;  %v10436_v14 = vpop.f32.mrf.mxu1 }
 0x989   :  { %11206 = vst [vmem:[#allocation56_spill] sm:$0xff] %v10434_v12  ;;  %11207 = vst [vmem:[#allocation55_spill] sm:$0xff] %v10436_v14  ;;  %v4666_v12 = vadd.f32 %v10311_v10, %v10432_v60  ;;  %v4775_v10 = vadd.f32 %v10305_v22, %v10448_v1 }
 0x98a   :  { %v5149_v58 = vpop.f32.mrf.mxu0  ;;  %v5192_v55 = vpop.f32.mrf.mxu1 }
 0x98b   :  { %v5201_v32 = vadd.f32 %v5149_v58, %v4660_v27 }
 0x98c   :  { %v5151_v63 = vpop.f32.mrf.mxu0  ;;  %v5194_v2 = vpop.f32.mrf.mxu1 }
 0x98d   :  { %v6985_v24 = vmul.f32 -1.442695, %v5201_v32  ;;  %v5202_v59 = vadd.f32 %v5151_v63, %v4662_v11  ;;  %v10452_v32 = vrot.slane %v4395_v6, %v11209_v23 }
 0x98e   :  { %v5153_v0 = vpop.f32.mrf.mxu0  ;;  %v5196_v63 = vpop.f32.mrf.mxu1 }
 0x98f   :  { %7889 = vpow2.f32 %v6985_v24  ;;  %v6987_v14 = vmul.f32 -1.442695, %v5202_v59  ;;  %v5205_v13 = vadd.f32 %v5153_v0, %v4664_v16  ;;  %v5204_v0 = vadd.f32 %v5194_v2, %v4775_v10 }
 0x990   :  { %v5155_v35 = vpop.f32.mrf.mxu0  ;;  %v4773_v52 = vadd.f32 %v10301_v45, %v10452_v32  ;;  %v5198_v24 = vpop.f32.mrf.mxu1  ;;  %v4779_v16 = vadd.f32 %v10313_v41, %v10448_v1  ;;  %v4777_v6 = vadd.f32 %v10309_v49, %v10452_v32 }
 0x991   :  { %7891 = vpow2.f32 %v6987_v14  ;;  %v6986_v27 = vmul.f32 -1.442695, %v5205_v13  ;;  %v5206_v58 = vadd.f32 %v5155_v35, %v4666_v12  ;;  %v6989_v14 = vmul.f32 -1.442695, %v5204_v0 }
 0x992   :  { %v5203_v12 = vadd.f32 %v5192_v55, %v4773_v52  ;;  %v5208_v33 = vadd.f32 %v5198_v24, %v4779_v16  ;;  %v5207_v13 = vadd.f32 %v5196_v63, %v4777_v6 }
 0x993   :  { %7893 = vpow2.f32 %v6986_v27  ;;  %v6988_v11 = vmul.f32 -1.442695, %v5206_v58 }
 0x994   :  { %v6990_v2 = vmul.f32 -1.442695, %v5208_v33 }
 0x995   :  { %7895 = vpow2.f32 %v6988_v11 }
 0x996   :  { %7897 = vtanh.f32 %v5203_v12 }
 0x997   :  { %7899 = vpow2.f32 %v6989_v14 }
 0x99c   :  { %v7890_v59 = vpop.eup %7889 }
 0x99d   :  { %v5215_v35 = vadd.f32 1.0, %v7890_v59 }
 0x99e   :  { %v7892_v22 = vpop.eup %7891 }
 0x99f   :  { %7901 = vrcp.f32 %v5215_v35  ;;  %v5227_v27 = vadd.f32 1.0, %v7892_v22 }
 0x9a0   :  { %v7894_v45 = vpop.eup %7893  ;;  %7903 = vtanh.f32 %v5207_v13 }
 0x9a1   :  { %7905 = vrcp.f32 %v5227_v27  ;;  %v5216_v58 = vadd.f32 1.0, %v7894_v45 }
 0x9a2   :  { %v7896_v41 = vpop.eup %7895  ;;  %7907 = vpow2.f32 %v6990_v2 }
 0x9a3   :  { %7909 = vrcp.f32 %v5216_v58  ;;  %v5228_v55 = vadd.f32 1.0, %v7896_v41  ;;  %v7898_v49 = vpop.eup %7897 }
 0x9a4   :  { %v7900_v23 = vpop.eup %7899 }
 0x9a5   :  { %7911 = vrcp.f32 %v5228_v55  ;;  %v5241_v12 = vadd.f32 1.0, %v7900_v23 }
 0x9a7   :  { %7913 = vrcp.f32 %v5241_v12 }
 0x9ac   :  { %v7902_v11 = vpop.eup %7901 }
 0x9ad   :  { %v7904_v63 = vpop.eup %7903  ;;  %v5249_v10 = vmul.f32 %v7902_v11, %v7898_v49  ;;  %v4670_v49 = vadd.f32 %v10315_v44, %v10424_v62  ;;  %v4672_v11 = vadd.f32 %v10319_v57, %v10432_v60 }
 0x9ae   :  { %v7906_v0 = vpop.eup %7905 }
 0x9af   :  { %v7908_v52 = vpop.eup %7907  ;;  %v5247_v24 = vmul.f32 0.0, %v7906_v0 }
 0x9b0   :  { %v7910_v16 = vpop.eup %7909  ;;  %v5242_v59 = vadd.f32 1.0, %v7908_v52  ;;  %v4674_v52 = vadd.f32 %v10323_v4, %v10424_v62 }
 0x9b1   :  { %v10462_v6 = vadd.f32 %v5249_v10, %v5247_v24  ;;  %v5250_v14 = vmul.f32 %v7910_v16, %v7904_v63 }
 0x9b2   :  { %v7912_v33 = vpop.eup %7911 }
 0x9b3   :  { %v5248_v13 = vmul.f32 0.0, %v7912_v33  ;;  %7915 = vtanh.f32 %v10462_v6 }
 0x9b4   :  { %7917 = vrcp.f32 %v5242_v59  ;;  %v7914_v22 = vpop.eup %7913 }
 0x9b5   :  { %v10465_v35 = vadd.f32 %v5250_v14, %v5248_v13  ;;  %v4676_v14 = vadd.f32 %v10327_v18, %v10432_v60 }
 0x9b7   :  { %7919 = vtanh.f32 %v10465_v35 }
 0x9c0   :  { %v7916_v2 = vpop.eup %7915 }
 0x9c1   :  { %v7918_v27 = vpop.eup %7917  ;;  %v5255_v58 = vmul.f32 %v7916_v2, %v7914_v22 }
 0x9c4   :  { %v7920_v45 = vpop.eup %7919 }
 0x9c5   :  { %v5256_v41 = vmul.f32 %v7920_v45, %v7918_v27  ;;  %v11210_v45 = vld [vmem:[#allocation6_spill] sm:$0xff] }
 0x9c6   :  { %v4785_v4 = vadd.f32 %v11210_v45, %v10448_v1 }
 0x9c7   :  { %v5265_v55 = vpack.c.bf16 %v5256_v41, %v5255_v58  ;;  %v11211_v41 = vld [vmem:[#allocation5_spill] sm:$0xff] }
 0x9c9   :  { %5299 = vmatmul.mubr.bf16.vlgmr.msra.gmra.mxu0 %v5265_v55  ;;  %5342 = vmatmul.mubr.bf16.vlgmr.msra.gmra.mxu1 %v5265_v55  ;;  %v4783_v55 = vadd.f32 %v11211_v41, %v10452_v32 }
 0x9ca   :  { %5418 = vmatpush1.bf16.msra.mxu0 %v10063_v42  ;;  %5461 = vmatpush1.bf16.msra.mxu1 %v10075_v25 }
 0x9cb   :  { %5419 = vmatprep.subr.bf16.mxu0 %v10080_v53  ;;  %5462 = vmatprep.subr.bf16.mxu1 %v10093_v50 }
 0x9cc   :  { %5449 = vmatprep.mubr.bf16.mxu0 %v11098_v47  ;;  %5492 = vmatprep.mubr.bf16.mxu1 %v11098_v47 }
 0x9ce   :  { %5420 = vmatpush1.bf16.msra.mxu0 %v10085_v43  ;;  %5463 = vmatpush1.bf16.msra.mxu1 %v10098_v54 }
 0x9cf   :  { %5421 = vmatprep.subr.bf16.mxu0 %v10104_v28  ;;  %5464 = vmatprep.subr.bf16.mxu1 %v10110_v9 }
 0x9d2   :  { %5422 = vmatpush1.bf16.msra.mxu0 %v10115_v15  ;;  %5465 = vmatpush1.bf16.msra.mxu1 %v10120_v29 }
 0x9d3   :  { %5423 = vmatprep.subr.bf16.mxu0 %v10129_v46  ;;  %5466 = vmatprep.subr.bf16.mxu1 %v10134_v26 }
 0x9d6   :  { %5424 = vmatpush1.bf16.msra.mxu0 %v10139_v5  ;;  %5467 = vmatpush1.bf16.msra.mxu1 %v10156_v40 }
 0x9d7   :  { %5425 = vmatprep.subr.bf16.mxu0 %v10145_v8  ;;  %5468 = vmatprep.subr.bf16.mxu1 %v10169_v39 }
 0x9da   :  { %5426 = vmatpush1.bf16.msra.mxu0 %v10150_v17  ;;  %5469 = vmatpush1.bf16.msra.mxu1 %v10175_v51 }
 0x9db   :  { %5427 = vmatprep.subr.bf16.mxu0 %v10162_v56  ;;  %5470 = vmatprep.subr.bf16.mxu1 %v10193_v61 }
 0x9de   :  { %5428 = vmatpush1.bf16.msra.mxu0 %v10181_v38  ;;  %5471 = vmatpush1.bf16.msra.mxu1 %v10199_v30 }
 0x9df   :  { %5429 = vmatprep.subr.bf16.mxu0 %v10188_v31  ;;  %5472 = vmatprep.subr.bf16.mxu1 %v10212_v20 }
 0x9e2   :  { %5430 = vmatpush1.bf16.msra.mxu0 %v10205_v36  ;;  %5473 = vmatpush1.bf16.msra.mxu1 %v10223_v37 }
 0x9e3   :  { %5431 = vmatprep.subr.bf16.mxu0 %v10218_v34  ;;  %5474 = vmatprep.subr.bf16.mxu1 %v10236_v21 }
 0x9e6   :  { %5432 = vmatpush1.bf16.msra.mxu0 %v10230_v3  ;;  %5475 = vmatpush1.bf16.msra.mxu1 %v10242_v19 }
 0x9e7   :  { %5568 = vmatprep.subr.bf16.mxu0 %v10058_v7  ;;  %5611 = vmatprep.subr.bf16.mxu1 %v10070_v48 }
 0xa89   :  { %v5300_v23 = vpop.f32.mrf.mxu0  ;;  %v5343_v10 = vpop.f32.mrf.mxu1 }
 0xa8a   :  { %v5352_v63 = vadd.f32 %v5300_v23, %v4670_v49  ;;  %v11212_v49 = vld [vmem:[#allocation35_spill] sm:$0xff] }
 0xa8b   :  { %v5302_v0 = vpop.f32.mrf.mxu0  ;;  %v5345_v59 = vpop.f32.mrf.mxu1  ;;  %v4789_v23 = vadd.f32 %v11212_v49, %v10448_v1 }
 0xa8c   :  { %v6991_v24 = vmul.f32 -1.442695, %v5352_v63  ;;  %v5353_v16 = vadd.f32 %v5302_v0, %v4672_v11  ;;  %v5355_v58 = vadd.f32 %v5345_v59, %v4785_v4  ;;  %v5354_v11 = vadd.f32 %v5343_v10, %v4783_v55  ;;  %v11213_v63 = vld [vmem:[#allocation7_spill] sm:$0xff] }
 0xa8d   :  { %v5304_v12 = vpop.f32.mrf.mxu0  ;;  %v5347_v2 = vpop.f32.mrf.mxu1  ;;  %v4787_v0 = vadd.f32 %v11213_v63, %v10452_v32 }
 0xa8e   :  { %7921 = vpow2.f32 %v6991_v24  ;;  %v6993_v33 = vmul.f32 -1.442695, %v5353_v16  ;;  %v5356_v44 = vadd.f32 %v5304_v12, %v4674_v52  ;;  %v6995_v52 = vmul.f32 -1.442695, %v5355_v58 }
 0xa8f   :  { %v5306_v13 = vpop.f32.mrf.mxu0  ;;  %v5349_v18 = vpop.f32.mrf.mxu1  ;;  %v5358_v12 = vadd.f32 %v5347_v2, %v4787_v0 }
 0xa90   :  { %7923 = vpow2.f32 %v6993_v33  ;;  %v6992_v22 = vmul.f32 -1.442695, %v5356_v44  ;;  %v5357_v57 = vadd.f32 %v5306_v13, %v4676_v14  ;;  %v5359_v24 = vadd.f32 %v5349_v18, %v4789_v23 }
 0xa92   :  { %7925 = vpow2.f32 %v6992_v22  ;;  %v6994_v27 = vmul.f32 -1.442695, %v5357_v57  ;;  %v6996_v59 = vmul.f32 -1.442695, %v5359_v24 }
 0xa94   :  { %7927 = vpow2.f32 %v6994_v27 }
 0xa95   :  { %7929 = vtanh.f32 %v5354_v11 }
 0xa96   :  { %7931 = vpow2.f32 %v6995_v52 }
 0xa9b   :  { %v7922_v16 = vpop.eup %7921 }
 0xa9c   :  { %v5366_v14 = vadd.f32 1.0, %v7922_v16 }
 0xa9d   :  { %v7924_v33 = vpop.eup %7923 }
 0xa9e   :  { %7933 = vrcp.f32 %v5366_v14  ;;  %v5378_v44 = vadd.f32 1.0, %v7924_v33 }
 0xa9f   :  { %v7926_v13 = vpop.eup %7925  ;;  %7935 = vtanh.f32 %v5358_v12 }
 0xaa0   :  { %7937 = vrcp.f32 %v5378_v44  ;;  %v5367_v22 = vadd.f32 1.0, %v7926_v13 }
 0xaa1   :  { %v7928_v57 = vpop.eup %7927  ;;  %7939 = vpow2.f32 %v6996_v59 }
 0xaa2   :  { %7941 = vrcp.f32 %v5367_v22  ;;  %v5379_v10 = vadd.f32 1.0, %v7928_v57  ;;  %v7930_v27 = vpop.eup %7929 }
 0xaa3   :  { %v7932_v45 = vpop.eup %7931 }
 0xaa4   :  { %7943 = vrcp.f32 %v5379_v10  ;;  %v5392_v23 = vadd.f32 1.0, %v7932_v45 }
 0xaa6   :  { %7945 = vrcp.f32 %v5392_v23 }
 0xaab   :  { %v7934_v4 = vpop.eup %7933 }
 0xaac   :  { %v7936_v2 = vpop.eup %7935  ;;  %v5400_v58 = vmul.f32 %v7934_v4, %v7930_v27 }
 0xaad   :  { %v7938_v41 = vpop.eup %7937 }
 0xaae   :  { %v7940_v55 = vpop.eup %7939  ;;  %v5398_v18 = vmul.f32 %v7938_v41, %v10462_v6 }
 0xaaf   :  { %v7942_v49 = vpop.eup %7941  ;;  %v5393_v52 = vadd.f32 1.0, %v7940_v55 }
 0xab0   :  { %v10519_v11 = vadd.f32 %v5400_v58, %v5398_v18  ;;  %v5401_v63 = vmul.f32 %v7942_v49, %v7936_v2 }
 0xab1   :  { %v7944_v0 = vpop.eup %7943 }
 0xab2   :  { %v5399_v24 = vmul.f32 %v7944_v0, %v10465_v35  ;;  %7947 = vtanh.f32 %v10519_v11  ;;  %v11221_v35 = vld [vmem:[#allocation8_spill] sm:$0xff] }
 0xab3   :  { %7949 = vrcp.f32 %v5393_v52  ;;  %v7946_v12 = vpop.eup %7945  ;;  %v4797_v22 = vadd.f32 %v11221_v35, %v10452_v32  ;;  %v10721_v35 = vld [vmem:[%s11030_s5 + $0x24] ss:$16 sps:$4 sm:$0xff]  }
 0xab4   :  { %v10523_v16 = vadd.f32 %v5401_v63, %v5399_v24 }
 0xab6   :  { %7951 = vtanh.f32 %v10523_v16 }
 0xabf   :  { %v7948_v14 = vpop.eup %7947 }
 0xac0   :  { %v7950_v6 = vpop.eup %7949  ;;  %v5406_v59 = vmul.f32 %v7948_v14, %v7946_v12 }
 0xac3   :  { %v7952_v33 = vpop.eup %7951 }
 0xac4   :  { %v5407_v44 = vmul.f32 %v7952_v33, %v7950_v6 }
 0xac6   :  { %v5416_v13 = vpack.c.bf16 %v5407_v44, %v5406_v59 }
 0xac8   :  { %5450 = vmatmul.mubr.bf16.vlgmr.msra.gmra.mxu0 %v5416_v13  ;;  %5493 = vmatmul.mubr.bf16.vlgmr.msra.gmra.mxu1 %v5416_v13 }
 0xac9   :  { %5569 = vmatpush1.bf16.msra.mxu0 %v10063_v42  ;;  %5612 = vmatpush1.bf16.msra.mxu1 %v10075_v25  ;;  %v11214_v42 = vld [vmem:[#allocation34_spill] sm:$0xff] }
 0xaca   :  { %5570 = vmatprep.subr.bf16.mxu0 %v10080_v53  ;;  %5613 = vmatprep.subr.bf16.mxu1 %v10093_v50  ;;  %v4680_v25 = vadd.f32 %v11214_v42, %v10424_v62 }
 0xacb   :  { %5600 = vmatprep.mubr.bf16.mxu0 %v11098_v47  ;;  %5643 = vmatprep.mubr.bf16.mxu1 %v11098_v47 }
 0xacd   :  { %5571 = vmatpush1.bf16.msra.mxu0 %v10085_v43  ;;  %5614 = vmatpush1.bf16.msra.mxu1 %v10098_v54  ;;  %v11215_v43 = vld [vmem:[#allocation33_spill] sm:$0xff] }
 0xace   :  { %5572 = vmatprep.subr.bf16.mxu0 %v10104_v28  ;;  %5615 = vmatprep.subr.bf16.mxu1 %v10110_v9  ;;  %v4682_v50 = vadd.f32 %v11215_v43, %v10432_v60 }
 0xad1   :  { %5573 = vmatpush1.bf16.msra.mxu0 %v10115_v15  ;;  %5616 = vmatpush1.bf16.msra.mxu1 %v10120_v29  ;;  %v11216_v15 = vld [vmem:[#allocation10_spill] sm:$0xff] }
 0xad2   :  { %5574 = vmatprep.subr.bf16.mxu0 %v10129_v46  ;;  %5617 = vmatprep.subr.bf16.mxu1 %v10134_v26  ;;  %v4684_v29 = vadd.f32 %v11216_v15, %v10424_v62 }
 0xad5   :  { %5575 = vmatpush1.bf16.msra.mxu0 %v10139_v5  ;;  %5618 = vmatpush1.bf16.msra.mxu1 %v10156_v40 }
 0xad6   :  { %5576 = vmatprep.subr.bf16.mxu0 %v10145_v8  ;;  %5619 = vmatprep.subr.bf16.mxu1 %v10169_v39 }
 0xad9   :  { %5577 = vmatpush1.bf16.msra.mxu0 %v10150_v17  ;;  %5620 = vmatpush1.bf16.msra.mxu1 %v10175_v51 }
 0xada   :  { %5578 = vmatprep.subr.bf16.mxu0 %v10162_v56  ;;  %5621 = vmatprep.subr.bf16.mxu1 %v10193_v61  ;;  %v11218_v61 = vld [vmem:[#allocation37_spill] sm:$0xff] }
 0xadd   :  { %5579 = vmatpush1.bf16.msra.mxu0 %v10181_v38  ;;  %5622 = vmatpush1.bf16.msra.mxu1 %v10199_v30  ;;  %v4795_v30 = vadd.f32 %v11218_v61, %v10448_v1  ;;  %v10667_v61 = vld [vmem:[%s11030_s5 + $0x88] ss:$16 sps:$4 sm:$0xff]  }
 0xade   :  { %5580 = vmatprep.subr.bf16.mxu0 %v10188_v31  ;;  %5623 = vmatprep.subr.bf16.mxu1 %v10212_v20  ;;  %v11219_v20 = vld [vmem:[#allocation36_spill] sm:$0xff] }
 0xae1   :  { %5581 = vmatpush1.bf16.msra.mxu0 %v10205_v36  ;;  %5624 = vmatpush1.bf16.msra.mxu1 %v10223_v37 }
 0xae2   :  { %5582 = vmatprep.subr.bf16.mxu0 %v10218_v34  ;;  %5625 = vmatprep.subr.bf16.mxu1 %v10236_v21  ;;  %v4793_v34 = vadd.f32 %v11219_v20, %v10452_v32  ;;  %v10685_v20 = vld [vmem:[%s11030_s5 + $0x60] ss:$16 sps:$4 sm:$0xff]  }
 0xae5   :  { %5583 = vmatpush1.bf16.msra.mxu0 %v10230_v3  ;;  %5626 = vmatpush1.bf16.msra.mxu1 %v10242_v19  ;;  %v11220_v3 = vld [vmem:[#allocation11_spill] sm:$0xff] }
 0xae6   :  { %5719 = vmatprep.subr.bf16.mxu0 %v10058_v7  ;;  %5762 = vmatprep.subr.bf16.mxu1 %v10070_v48  ;;  %v11217_v7 = vld [vmem:[#allocation9_spill] sm:$0xff]  ;;  %v4799_v21 = vadd.f32 %v11220_v3, %v10448_v1 }
 0xae7   :  { %v4686_v8 = vadd.f32 %v11217_v7, %v10432_v60  ;;  %v10605_v7 = vld [vmem:[%s11030_s5 + $0xcc] ss:$16 sps:$4 sm:$0xff]  }
 0xae8   :  { %v10703_v3 = vld [vmem:[%s11030_s5 + $0x4c] ss:$16 sps:$4 sm:$0xff]  }
 0xb88   :  { %v5451_v53 = vpop.f32.mrf.mxu0  ;;  %v5494_v28 = vpop.f32.mrf.mxu1 }
 0xb89   :  { %v5503_v54 = vadd.f32 %v5451_v53, %v4680_v25  ;;  %v5505_v19 = vadd.f32 %v5494_v28, %v4793_v34  ;;  %v10691_v34 = vld [vmem:[%s11030_s5 + $0x68] ss:$16 sps:$4 sm:$0xff]  }
 0xb8a   :  { %v5453_v9 = vpop.f32.mrf.mxu0  ;;  %v5496_v17 = vpop.f32.mrf.mxu1 }
 0xb8b   :  { %v6997_v46 = vmul.f32 -1.442695, %v5503_v54  ;;  %v5504_v26 = vadd.f32 %v5453_v9, %v4682_v50  ;;  %v5506_v36 = vadd.f32 %v5496_v17, %v4795_v30  ;;  %v10625_v17 = vld [vmem:[%s11030_s5 + $0xa4] ss:$16 sps:$4 sm:$0xff]  }
 0xb8c   :  { %v5455_v5 = vpop.f32.mrf.mxu0  ;;  %v5498_v38 = vpop.f32.mrf.mxu1  ;;  %v10673_v30 = vld [vmem:[%s11030_s5 + $0x64] ss:$16 sps:$4 sm:$0xff]  }
 0xb8d   :  { %7953 = vpow2.f32 %v6997_v46  ;;  %v6999_v48 = vmul.f32 -1.442695, %v5504_v26  ;;  %v5507_v40 = vadd.f32 %v5455_v5, %v4684_v29  ;;  %v7001_v57 = vmul.f32 -1.442695, %v5506_v36  ;;  %v10593_v26 = vld [vmem:[%s11030_s5 + $0xe8] ss:$16 sps:$4 sm:$0xff]  }
 0xb8e   :  { %v5457_v56 = vpop.f32.mrf.mxu0  ;;  %v5500_v37 = vpop.f32.mrf.mxu1  ;;  %v5509_v45 = vadd.f32 %v5498_v38, %v4797_v22  ;;  %v10599_v5 = vld [vmem:[%s11030_s5 + $0xc4] ss:$16 sps:$4 sm:$0xff]   ;;  %v10655_v38 = vld [vmem:[%s11030_s5 + $0x8c] ss:$16 sps:$4 sm:$0xff]  }
 0xb8f   :  { %7955 = vpow2.f32 %v6999_v48  ;;  %v6998_v39 = vmul.f32 -1.442695, %v5507_v40  ;;  %v5508_v51 = vadd.f32 %v5457_v56, %v4686_v8  ;;  %v5510_v10 = vadd.f32 %v5500_v37, %v4799_v21  ;;  %v10613_v8 = vld [vmem:[%s11030_s5 + $0xc0] ss:$16 sps:$4 sm:$0xff]   ;;  %v10619_v48 = vld [vmem:[%s11030_s5 + $0xc8] ss:$16 sps:$4 sm:$0xff]  }
 0xb90   :  { %v10631_v40 = vld [vmem:[%s11030_s5 + $0xac] ss:$16 sps:$4 sm:$0xff]   ;;  %v10637_v56 = vld [vmem:[%s11030_s5 + $0xa0] ss:$16 sps:$4 sm:$0xff]   ;;  %v10697_v37 = vld [vmem:[%s11030_s5 + $0x44] ss:$16 sps:$4 sm:$0xff]  }
 0xb91   :  { %7957 = vpow2.f32 %v6998_v39  ;;  %v7000_v31 = vmul.f32 -1.442695, %v5508_v51  ;;  %v7002_v58 = vmul.f32 -1.442695, %v5510_v10  ;;  %v10643_v39 = vld [vmem:[%s11030_s5 + $0xa8] ss:$16 sps:$4 sm:$0xff]  }
 0xb92   :  { %v10649_v51 = vld [vmem:[%s11030_s5 + $0x84] ss:$16 sps:$4 sm:$0xff]   ;;  %v10679_v36 = vld [vmem:[%s11030_s5 + $0x6c] ss:$16 sps:$4 sm:$0xff]   ;;  %v10709_v21 = vld [vmem:[%s11030_s5 + $0x40] ss:$16 sps:$4 sm:$0xff]  }
 0xb93   :  { %7959 = vpow2.f32 %v7000_v31  ;;  %v10661_v31 = vld [vmem:[%s11030_s5 + $0x80] ss:$16 sps:$4 sm:$0xff]   ;;  %v10727_v22 = vld [vmem:[%s11030_s5 + $0x2c] ss:$16 sps:$4 sm:$0xff]   ;;  %v10739_v10 = vld [vmem:[%s11030_s5 + $0x28] ss:$16 sps:$4 sm:$0xff]  }
 0xb94   :  { %7961 = vtanh.f32 %v5505_v19  ;;  %v10715_v19 = vld [vmem:[%s11030_s5 + $0x48] ss:$16 sps:$4 sm:$0xff]  }
 0xb95   :  { %7963 = vpow2.f32 %v7001_v57  ;;  %v10733_v57 = vld [vmem:[%s11030_s5 + $0x20] ss:$16 sps:$4 sm:$0xff]  }
 0xb9a   :  { %v7954_v27 = vpop.eup %7953 }
 0xb9b   :  { %v5517_v4 = vadd.f32 1.0, %v7954_v27  ;;  %v10745_v27 = vld [vmem:[%s11030_s5 + $0x4] ss:$16 sps:$4 sm:$0xff]  }
 0xb9c   :  { %v7956_v2 = vpop.eup %7955 }
 0xb9d   :  { %7965 = vrcp.f32 %v5517_v4  ;;  %v5529_v41 = vadd.f32 1.0, %v7956_v2  ;;  %v10757_v4 = vld [vmem:[%s11030_s5] ss:$16 sps:$4 sm:$0xff]   ;;  %v10763_v2 = vld [vmem:[%s11030_s5 + $0x8] ss:$16 sps:$4 sm:$0xff]  }
 0xb9e   :  { %v7958_v55 = vpop.eup %7957  ;;  %7967 = vtanh.f32 %v5509_v45  ;;  %v10751_v45 = vld [vmem:[%s11030_s5 + $0xc] ss:$16 sps:$4 sm:$0xff]  }
 0xb9f   :  { %7969 = vrcp.f32 %v5529_v41  ;;  %v5518_v18 = vadd.f32 1.0, %v7958_v55  ;;  %v10775_v41 = vld [vmem:[%s11030_s5 + $0xec] ss:$16 sps:$4 sm:$0xff]   ;;  %v11222_v55 = vld [vmem:[#allocation12_spill] sm:$0xff] }
 0xba0   :  { %v7960_v49 = vpop.eup %7959  ;;  %7971 = vpow2.f32 %v7002_v58  ;;  %v10769_v58 = vld [vmem:[%s11030_s5 + $0xe4] ss:$16 sps:$4 sm:$0xff]  }
 0xba1   :  { %7973 = vrcp.f32 %v5518_v18  ;;  %v5530_v23 = vadd.f32 1.0, %v7960_v49  ;;  %v7962_v63 = vpop.eup %7961  ;;  %v4690_v18 = vadd.f32 %v11222_v55, %v10424_v62 }
 0xba2   :  { %v7964_v0 = vpop.eup %7963 }
 0xba3   :  { %7975 = vrcp.f32 %v5530_v23  ;;  %v5543_v44 = vadd.f32 1.0, %v7964_v0  ;;  %v11223_v23 = vld [vmem:[#allocation39_spill] sm:$0xff] }
 0xba5   :  { %7977 = vrcp.f32 %v5543_v44  ;;  %v11225_v44 = vld [vmem:[#allocation15_spill] sm:$0xff] }
 0xbaa   :  { %v7966_v52 = vpop.eup %7965 }
 0xbab   :  { %v7968_v24 = vpop.eup %7967  ;;  %v5551_v12 = vmul.f32 %v7966_v52, %v7962_v63  ;;  %v4692_v63 = vadd.f32 %v11223_v23, %v10432_v60 }
 0xbac   :  { %v7970_v14 = vpop.eup %7969 }
 0xbad   :  { %v7972_v6 = vpop.eup %7971  ;;  %v5549_v33 = vmul.f32 %v7970_v14, %v10519_v11 }
 0xbae   :  { %v7974_v59 = vpop.eup %7973  ;;  %v5544_v53 = vadd.f32 1.0, %v7972_v6 }
 0xbaf   :  { %v10577_v13 = vadd.f32 %v5551_v12, %v5549_v33  ;;  %v5552_v42 = vmul.f32 %v7974_v59, %v7968_v24  ;;  %v11224_v12 = vld [vmem:[#allocation38_spill] sm:$0xff] }
 0xbb0   :  { %v7976_v25 = vpop.eup %7975  ;;  %v4694_v14 = vadd.f32 %v11224_v12, %v10424_v62  ;;  %v11229_v12 = vld [vmem:[#allocation42_spill] sm:$0xff] }
 0xbb1   :  { %v5550_v43 = vmul.f32 %v7976_v25, %v10523_v16  ;;  %7979 = vtanh.f32 %v10577_v13  ;;  %v10587_v16 = vld [vmem:[%s11030_s5 + $0xe0] ss:$16 sps:$4 sm:$0xff]  }
 0xbb2   :  { %7981 = vrcp.f32 %v5544_v53  ;;  %v7978_v54 = vpop.eup %7977 }
 0xbb3   :  { %v10581_v50 = vadd.f32 %v5552_v42, %v5550_v43  ;;  %v4696_v42 = vadd.f32 %v11225_v44, %v10432_v60 }
 0xbb5   :  { %7983 = vtanh.f32 %v10581_v50 }
 0xbbe   :  { %v7980_v28 = vpop.eup %7979 }
 0xbbf   :  { %v7982_v11 = vpop.eup %7981  ;;  %v5557_v15 = vmul.f32 %v7980_v28, %v7978_v54 }
 0xbc2   :  { %v7984_v9 = vpop.eup %7983 }
 0xbc3   :  { %v5558_v29 = vmul.f32 %v7984_v9, %v7982_v11 }
 0xbc5   :  { %v5567_v46 = vpack.c.bf16 %v5558_v29, %v5557_v15  ;;  %v11226_v29 = vld [vmem:[#allocation41_spill] sm:$0xff] }
 0xbc7   :  { %5601 = vmatmul.mubr.bf16.vlgmr.msra.gmra.mxu0 %v5567_v46  ;;  %5644 = vmatmul.mubr.bf16.vlgmr.msra.gmra.mxu1 %v5567_v46  ;;  %v4805_v46 = vadd.f32 %v11226_v29, %v10448_v1 }
 0xbc8   :  { %5720 = vmatpush1.bf16.msra.mxu0 %v10587_v16  ;;  %5763 = vmatpush1.bf16.msra.mxu1 %v10593_v26 }
 0xbc9   :  { %5721 = vmatprep.subr.bf16.mxu0 %v10599_v5  ;;  %5764 = vmatprep.subr.bf16.mxu1 %v10605_v7 }
 0xbca   :  { %5751 = vmatprep.mubr.bf16.mxu0 %v11098_v47  ;;  %5794 = vmatprep.mubr.bf16.mxu1 %v11098_v47 }
 0xbcc   :  { %5722 = vmatpush1.bf16.msra.mxu0 %v10613_v8  ;;  %5765 = vmatpush1.bf16.msra.mxu1 %v10619_v48 }
 0xbcd   :  { %5723 = vmatprep.subr.bf16.mxu0 %v10625_v17  ;;  %5766 = vmatprep.subr.bf16.mxu1 %v10631_v40 }
 0xbd0   :  { %5724 = vmatpush1.bf16.msra.mxu0 %v10637_v56  ;;  %5767 = vmatpush1.bf16.msra.mxu1 %v10643_v39 }
 0xbd1   :  { %5725 = vmatprep.subr.bf16.mxu0 %v10649_v51  ;;  %5768 = vmatprep.subr.bf16.mxu1 %v10655_v38 }
 0xbd4   :  { %5726 = vmatpush1.bf16.msra.mxu0 %v10661_v31  ;;  %5769 = vmatpush1.bf16.msra.mxu1 %v10667_v61 }
 0xbd5   :  { %5727 = vmatprep.subr.bf16.mxu0 %v10673_v30  ;;  %5770 = vmatprep.subr.bf16.mxu1 %v10679_v36 }
 0xbd8   :  { %5728 = vmatpush1.bf16.msra.mxu0 %v10685_v20  ;;  %5771 = vmatpush1.bf16.msra.mxu1 %v10691_v34 }
 0xbd9   :  { %5729 = vmatprep.subr.bf16.mxu0 %v10697_v37  ;;  %5772 = vmatprep.subr.bf16.mxu1 %v10703_v3 }
 0xbdc   :  { %5730 = vmatpush1.bf16.msra.mxu0 %v10709_v21  ;;  %5773 = vmatpush1.bf16.msra.mxu1 %v10715_v19 }
 0xbdd   :  { %5731 = vmatprep.subr.bf16.mxu0 %v10721_v35  ;;  %5774 = vmatprep.subr.bf16.mxu1 %v10727_v22 }
 0xbe0   :  { %5732 = vmatpush1.bf16.msra.mxu0 %v10733_v57  ;;  %5775 = vmatpush1.bf16.msra.mxu1 %v10739_v10 }
 0xbe1   :  { %5733 = vmatprep.subr.bf16.mxu0 %v10745_v27  ;;  %5776 = vmatprep.subr.bf16.mxu1 %v10751_v45 }
 0xbe4   :  { %5734 = vmatpush1.bf16.msra.mxu0 %v10757_v4  ;;  %5777 = vmatpush1.bf16.msra.mxu1 %v10763_v2 }
 0xbe5   :  { %5870 = vmatprep.subr.bf16.mxu0 %v10769_v58  ;;  %5913 = vmatprep.subr.bf16.mxu1 %v10775_v41 }
 0xc87   :  { %v5602_v49 = vpop.f32.mrf.mxu0  ;;  %v5645_v52 = vpop.f32.mrf.mxu1 }
 0xc88   :  { %v5654_v0 = vadd.f32 %v5602_v49, %v4690_v18  ;;  %v11227_v18 = vld [vmem:[#allocation40_spill] sm:$0xff] }
 0xc89   :  { %v5604_v24 = vpop.f32.mrf.mxu0  ;;  %v5647_v53 = vpop.f32.mrf.mxu1  ;;  %v4803_v49 = vadd.f32 %v11227_v18, %v10452_v32 }
 0xc8a   :  { %v7003_v6 = vmul.f32 -1.442695, %v5654_v0  ;;  %v5655_v33 = vadd.f32 %v5604_v24, %v4692_v63  ;;  %v5657_v55 = vadd.f32 %v5647_v53, %v4805_v46  ;;  %v11228_v63 = vld [vmem:[#allocation13_spill] sm:$0xff] }
 0xc8b   :  { %v5606_v59 = vpop.f32.mrf.mxu0  ;;  %v5649_v9 = vpop.f32.mrf.mxu1  ;;  %v4809_v0 = vadd.f32 %v11228_v63, %v10448_v1  ;;  %v5656_v24 = vadd.f32 %v5645_v52, %v4803_v49 }
 0xc8c   :  { %7985 = vpow2.f32 %v7003_v6  ;;  %v7005_v25 = vmul.f32 -1.442695, %v5655_v33  ;;  %v5658_v43 = vadd.f32 %v5606_v59, %v4694_v14  ;;  %v4807_v14 = vadd.f32 %v11229_v12, %v10452_v32 }
 0xc8d   :  { %v5608_v54 = vpop.f32.mrf.mxu0  ;;  %v5651_v23 = vpop.f32.mrf.mxu1  ;;  %v7007_v6 = vmul.f32 -1.442695, %v5657_v55 }
 0xc8e   :  { %7987 = vpow2.f32 %v7005_v25  ;;  %v7004_v28 = vmul.f32 -1.442695, %v5658_v43  ;;  %v5659_v11 = vadd.f32 %v5608_v54, %v4696_v42  ;;  %v5661_v33 = vadd.f32 %v5651_v23, %v4809_v0 }
 0xc8f   :  { %v5660_v44 = vadd.f32 %v5649_v9, %v4807_v14 }
 0xc90   :  { %7989 = vpow2.f32 %v7004_v28  ;;  %v7006_v15 = vmul.f32 -1.442695, %v5659_v11  ;;  %v7008_v53 = vmul.f32 -1.442695, %v5661_v33 }
 0xc92   :  { %7991 = vpow2.f32 %v7006_v15 }
 0xc93   :  { %7993 = vtanh.f32 %v5656_v24 }
 0xc94   :  { %7995 = vpow2.f32 %v7007_v6 }
 0xc99   :  { %v7986_v59 = vpop.eup %7985 }
 0xc9a   :  { %v5668_v42 = vadd.f32 1.0, %v7986_v59 }
 0xc9b   :  { %v7988_v25 = vpop.eup %7987 }
 0xc9c   :  { %7997 = vrcp.f32 %v5668_v42  ;;  %v5680_v43 = vadd.f32 1.0, %v7988_v25 }
 0xc9d   :  { %v7990_v54 = vpop.eup %7989  ;;  %7999 = vtanh.f32 %v5660_v44 }
 0xc9e   :  { %8001 = vrcp.f32 %v5680_v43  ;;  %v5669_v28 = vadd.f32 1.0, %v7990_v54 }
 0xc9f   :  { %v7992_v11 = vpop.eup %7991  ;;  %8003 = vpow2.f32 %v7008_v53 }
 0xca0   :  { %8005 = vrcp.f32 %v5669_v28  ;;  %v5681_v52 = vadd.f32 1.0, %v7992_v11  ;;  %v7994_v15 = vpop.eup %7993 }
 0xca1   :  { %v7996_v29 = vpop.eup %7995 }
 0xca2   :  { %8007 = vrcp.f32 %v5681_v52  ;;  %v5694_v0 = vadd.f32 1.0, %v7996_v29  ;;  %v11231_v52 = vld [vmem:[#allocation17_spill] sm:$0xff] }
 0xca4   :  { %8009 = vrcp.f32 %v5694_v0  ;;  %v11233_v0 = vld [vmem:[#allocation45_spill] sm:$0xff] }
 0xca9   :  { %v7998_v46 = vpop.eup %7997 }
 0xcaa   :  { %v8000_v9 = vpop.eup %7999  ;;  %v5702_v55 = vmul.f32 %v7998_v46, %v7994_v15  ;;  %v4702_v15 = vadd.f32 %v11231_v52, %v10432_v60 }
 0xcab   :  { %v8002_v18 = vpop.eup %8001 }
 0xcac   :  { %v8004_v49 = vpop.eup %8003  ;;  %v5700_v23 = vmul.f32 %v8002_v18, %v10577_v13 }
 0xcad   :  { %v8006_v63 = vpop.eup %8005  ;;  %v5695_v6 = vadd.f32 1.0, %v8004_v49 }
 0xcae   :  { %v10795_v24 = vadd.f32 %v5702_v55, %v5700_v23  ;;  %v5703_v12 = vmul.f32 %v8006_v63, %v8000_v9  ;;  %v11232_v55 = vld [vmem:[#allocation43_spill] sm:$0xff] }
 0xcaf   :  { %v8008_v14 = vpop.eup %8007  ;;  %v4704_v18 = vadd.f32 %v11232_v55, %v10424_v62  ;;  %v11237_v55 = vld [vmem:[#allocation46_spill] sm:$0xff] }
 0xcb0   :  { %v5701_v33 = vmul.f32 %v8008_v14, %v10581_v50  ;;  %8011 = vtanh.f32 %v10795_v24  ;;  %v11230_v50 = vld [vmem:[#allocation14_spill] sm:$0xff] }
 0xcb1   :  { %8013 = vrcp.f32 %v5695_v6  ;;  %v8010_v44 = vpop.eup %8009  ;;  %v4700_v28 = vadd.f32 %v11230_v50, %v10424_v62 }
 0xcb2   :  { %v10799_v59 = vadd.f32 %v5703_v12, %v5701_v33  ;;  %v4706_v12 = vadd.f32 %v11233_v0, %v10432_v60 }
 0xcb4   :  { %8015 = vtanh.f32 %v10799_v59 }
 0xcbd   :  { %v8012_v42 = vpop.eup %8011 }
 0xcbe   :  { %v8014_v13 = vpop.eup %8013  ;;  %v5708_v53 = vmul.f32 %v8012_v42, %v8010_v44 }
 0xcc1   :  { %v8016_v25 = vpop.eup %8015 }
 0xcc2   :  { %v5709_v43 = vmul.f32 %v8016_v25, %v8014_v13 }
 0xcc4   :  { %v5718_v54 = vpack.c.bf16 %v5709_v43, %v5708_v53  ;;  %v11234_v43 = vld [vmem:[#allocation44_spill] sm:$0xff] }
 0xcc6   :  { %5752 = vmatmul.mubr.bf16.vlgmr.msra.gmra.mxu0 %v5718_v54  ;;  %5795 = vmatmul.mubr.bf16.vlgmr.msra.gmra.mxu1 %v5718_v54  ;;  %v4815_v54 = vadd.f32 %v11234_v43, %v10448_v1 }
 0xcc7   :  { %5871 = vmatpush1.bf16.msra.mxu0 %v10587_v16  ;;  %5914 = vmatpush1.bf16.msra.mxu1 %v10593_v26 }
 0xcc8   :  { %5872 = vmatprep.subr.bf16.mxu0 %v10599_v5  ;;  %5915 = vmatprep.subr.bf16.mxu1 %v10605_v7 }
 0xcc9   :  { %5902 = vmatprep.mubr.bf16.mxu0 %v11098_v47  ;;  %5945 = vmatprep.mubr.bf16.mxu1 %v11098_v47 }
 0xccb   :  { %5873 = vmatpush1.bf16.msra.mxu0 %v10613_v8  ;;  %5916 = vmatpush1.bf16.msra.mxu1 %v10619_v48 }
 0xccc   :  { %5874 = vmatprep.subr.bf16.mxu0 %v10625_v17  ;;  %5917 = vmatprep.subr.bf16.mxu1 %v10631_v40 }
 0xccf   :  { %5875 = vmatpush1.bf16.msra.mxu0 %v10637_v56  ;;  %5918 = vmatpush1.bf16.msra.mxu1 %v10643_v39 }
 0xcd0   :  { %5876 = vmatprep.subr.bf16.mxu0 %v10649_v51  ;;  %5919 = vmatprep.subr.bf16.mxu1 %v10655_v38 }
 0xcd3   :  { %5877 = vmatpush1.bf16.msra.mxu0 %v10661_v31  ;;  %5920 = vmatpush1.bf16.msra.mxu1 %v10667_v61 }
 0xcd4   :  { %5878 = vmatprep.subr.bf16.mxu0 %v10673_v30  ;;  %5921 = vmatprep.subr.bf16.mxu1 %v10679_v36 }
 0xcd7   :  { %5879 = vmatpush1.bf16.msra.mxu0 %v10685_v20  ;;  %5922 = vmatpush1.bf16.msra.mxu1 %v10691_v34 }
 0xcd8   :  { %5880 = vmatprep.subr.bf16.mxu0 %v10697_v37  ;;  %5923 = vmatprep.subr.bf16.mxu1 %v10703_v3 }
 0xcdb   :  { %5881 = vmatpush1.bf16.msra.mxu0 %v10709_v21  ;;  %5924 = vmatpush1.bf16.msra.mxu1 %v10715_v19 }
 0xcdc   :  { %5882 = vmatprep.subr.bf16.mxu0 %v10721_v35  ;;  %5925 = vmatprep.subr.bf16.mxu1 %v10727_v22 }
 0xcdf   :  { %5883 = vmatpush1.bf16.msra.mxu0 %v10733_v57  ;;  %5926 = vmatpush1.bf16.msra.mxu1 %v10739_v10 }
 0xce0   :  { %5884 = vmatprep.subr.bf16.mxu0 %v10745_v27  ;;  %5927 = vmatprep.subr.bf16.mxu1 %v10751_v45 }
 0xce3   :  { %5885 = vmatpush1.bf16.msra.mxu0 %v10757_v4  ;;  %5928 = vmatpush1.bf16.msra.mxu1 %v10763_v2 }
 0xce4   :  { %6021 = vmatprep.subr.bf16.mxu0 %v10769_v58  ;;  %6064 = vmatprep.subr.bf16.mxu1 %v10775_v41 }
 0xd86   :  { %v5753_v11 = vpop.f32.mrf.mxu0  ;;  %v5796_v46 = vpop.f32.mrf.mxu1 }
 0xd87   :  { %v5805_v29 = vadd.f32 %v5753_v11, %v4700_v28  ;;  %v11235_v28 = vld [vmem:[#allocation16_spill] sm:$0xff] }
 0xd88   :  { %v5755_v9 = vpop.f32.mrf.mxu0  ;;  %v5798_v6 = vpop.f32.mrf.mxu1  ;;  %v4813_v11 = vadd.f32 %v11235_v28, %v10452_v32 }
 0xd89   :  { %v7009_v49 = vmul.f32 -1.442695, %v5805_v29  ;;  %v5806_v23 = vadd.f32 %v5755_v9, %v4702_v15  ;;  %v5808_v50 = vadd.f32 %v5798_v6, %v4815_v54  ;;  %v11236_v15 = vld [vmem:[#allocation20_spill] sm:$0xff] }
 0xd8a   :  { %v5757_v63 = vpop.f32.mrf.mxu0  ;;  %v5800_v25 = vpop.f32.mrf.mxu1  ;;  %v4819_v29 = vadd.f32 %v11236_v15, %v10448_v1  ;;  %v5807_v9 = vadd.f32 %v5796_v46, %v4813_v11 }
 0xd8b   :  { %8017 = vpow2.f32 %v7009_v49  ;;  %v7011_v14 = vmul.f32 -1.442695, %v5806_v23  ;;  %v5809_v33 = vadd.f32 %v5757_v63, %v4704_v18  ;;  %v4817_v18 = vadd.f32 %v11237_v55, %v10452_v32 }
 0xd8c   :  { %v5759_v44 = vpop.f32.mrf.mxu0  ;;  %v5802_v52 = vpop.f32.mrf.mxu1  ;;  %v7013_v49 = vmul.f32 -1.442695, %v5808_v50 }
 0xd8d   :  { %8019 = vpow2.f32 %v7011_v14  ;;  %v7010_v42 = vmul.f32 -1.442695, %v5809_v33  ;;  %v5810_v13 = vadd.f32 %v5759_v44, %v4706_v12  ;;  %v5812_v23 = vadd.f32 %v5802_v52, %v4819_v29 }
 0xd8e   :  { %v5811_v0 = vadd.f32 %v5800_v25, %v4817_v18 }
 0xd8f   :  { %8021 = vpow2.f32 %v7010_v42  ;;  %v7012_v53 = vmul.f32 -1.442695, %v5810_v13  ;;  %v7014_v6 = vmul.f32 -1.442695, %v5812_v23 }
 0xd91   :  { %8023 = vpow2.f32 %v7012_v53 }
 0xd92   :  { %8025 = vtanh.f32 %v5807_v9 }
 0xd93   :  { %8027 = vpow2.f32 %v7013_v49 }
 0xd98   :  { %v8018_v63 = vpop.eup %8017 }
 0xd99   :  { %v5819_v12 = vadd.f32 1.0, %v8018_v63 }
 0xd9a   :  { %v8020_v14 = vpop.eup %8019 }
 0xd9b   :  { %8029 = vrcp.f32 %v5819_v12  ;;  %v5831_v33 = vadd.f32 1.0, %v8020_v14 }
 0xd9c   :  { %v8022_v44 = vpop.eup %8021  ;;  %8031 = vtanh.f32 %v5811_v0 }
 0xd9d   :  { %8033 = vrcp.f32 %v5831_v33  ;;  %v5820_v42 = vadd.f32 1.0, %v8022_v44 }
 0xd9e   :  { %v8024_v13 = vpop.eup %8023  ;;  %8035 = vpow2.f32 %v7014_v6 }
 0xd9f   :  { %8037 = vrcp.f32 %v5820_v42  ;;  %v5832_v46 = vadd.f32 1.0, %v8024_v13  ;;  %v8026_v53 = vpop.eup %8025 }
 0xda0   :  { %v8028_v43 = vpop.eup %8027 }
 0xda1   :  { %8039 = vrcp.f32 %v5832_v46  ;;  %v5845_v29 = vadd.f32 1.0, %v8028_v43  ;;  %v11239_v46 = vld [vmem:[#allocation21_spill] sm:$0xff] }
 0xda3   :  { %8041 = vrcp.f32 %v5845_v29 }
 0xda8   :  { %v8030_v54 = vpop.eup %8029 }
 0xda9   :  { %v8032_v25 = vpop.eup %8031  ;;  %v5853_v50 = vmul.f32 %v8030_v54, %v8026_v53  ;;  %v4712_v53 = vadd.f32 %v11239_v46, %v10432_v60 }
 0xdaa   :  { %v8034_v28 = vpop.eup %8033 }
 0xdab   :  { %v8036_v11 = vpop.eup %8035  ;;  %v5851_v52 = vmul.f32 %v8034_v28, %v10795_v24 }
 0xdac   :  { %v8038_v15 = vpop.eup %8037  ;;  %v5846_v49 = vadd.f32 1.0, %v8036_v11 }
 0xdad   :  { %v10853_v9 = vadd.f32 %v5853_v50, %v5851_v52  ;;  %v5854_v55 = vmul.f32 %v8038_v15, %v8032_v25  ;;  %v11240_v50 = vld [vmem:[#allocation48_spill] sm:$0xff] }
 0xdae   :  { %v8040_v18 = vpop.eup %8039  ;;  %v4714_v28 = vadd.f32 %v11240_v50, %v10424_v62 }
 0xdaf   :  { %v5852_v23 = vmul.f32 %v8040_v18, %v10799_v59  ;;  %8043 = vtanh.f32 %v10853_v9  ;;  %v11238_v59 = vld [vmem:[#allocation18_spill] sm:$0xff] }
 0xdb0   :  { %8045 = vrcp.f32 %v5846_v49  ;;  %v8042_v0 = vpop.eup %8041  ;;  %v4710_v42 = vadd.f32 %v11238_v59, %v10424_v62 }
 0xdb1   :  { %v10857_v63 = vadd.f32 %v5854_v55, %v5852_v23 }
 0xdb3   :  { %8047 = vtanh.f32 %v10857_v63 }
 0xdbc   :  { %v8044_v12 = vpop.eup %8043 }
 0xdbd   :  { %v8046_v24 = vpop.eup %8045  ;;  %v5859_v6 = vmul.f32 %v8044_v12, %v8042_v0 }
 0xdc0   :  { %v8048_v14 = vpop.eup %8047 }
 0xdc1   :  { %v5860_v33 = vmul.f32 %v8048_v14, %v8046_v24  ;;  %v11242_v14 = vld [vmem:[#allocation22_spill] sm:$0xff] }
 0xdc3   :  { %v5869_v44 = vpack.c.bf16 %v5860_v33, %v5859_v6  ;;  %v4825_v6 = vadd.f32 %v11242_v14, %v10448_v1 }
 0xdc5   :  { %5903 = vmatmul.mubr.bf16.vlgmr.msra.gmra.mxu0 %v5869_v44  ;;  %5946 = vmatmul.mubr.bf16.vlgmr.msra.gmra.mxu1 %v5869_v44  ;;  %v11243_v44 = vld [vmem:[#allocation19_spill] sm:$0xff] }
 0xdc6   :  { %6022 = vmatpush1.bf16.msra.mxu0 %v10587_v16  ;;  %6065 = vmatpush1.bf16.msra.mxu1 %v10593_v26  ;;  %v4823_v59 = vadd.f32 %v11243_v44, %v10452_v32 }
 0xdc7   :  { %6023 = vmatprep.subr.bf16.mxu0 %v10599_v5  ;;  %6066 = vmatprep.subr.bf16.mxu1 %v10605_v7 }
 0xdc8   :  { %6053 = vmatprep.mubr.bf16.mxu0 %v11098_v47  ;;  %6096 = vmatprep.mubr.bf16.mxu1 %v11098_v47 }
 0xdca   :  { %6024 = vmatpush1.bf16.msra.mxu0 %v10613_v8  ;;  %6067 = vmatpush1.bf16.msra.mxu1 %v10619_v48 }
 0xdcb   :  { %6025 = vmatprep.subr.bf16.mxu0 %v10625_v17  ;;  %6068 = vmatprep.subr.bf16.mxu1 %v10631_v40 }
 0xdce   :  { %6026 = vmatpush1.bf16.msra.mxu0 %v10637_v56  ;;  %6069 = vmatpush1.bf16.msra.mxu1 %v10643_v39 }
 0xdcf   :  { %6027 = vmatprep.subr.bf16.mxu0 %v10649_v51  ;;  %6070 = vmatprep.subr.bf16.mxu1 %v10655_v38 }
 0xdd2   :  { %6028 = vmatpush1.bf16.msra.mxu0 %v10661_v31  ;;  %6071 = vmatpush1.bf16.msra.mxu1 %v10667_v61 }
 0xdd3   :  { %6029 = vmatprep.subr.bf16.mxu0 %v10673_v30  ;;  %6072 = vmatprep.subr.bf16.mxu1 %v10679_v36 }
 0xdd6   :  { %6030 = vmatpush1.bf16.msra.mxu0 %v10685_v20  ;;  %6073 = vmatpush1.bf16.msra.mxu1 %v10691_v34 }
 0xdd7   :  { %6031 = vmatprep.subr.bf16.mxu0 %v10697_v37  ;;  %6074 = vmatprep.subr.bf16.mxu1 %v10703_v3 }
 0xdda   :  { %6032 = vmatpush1.bf16.msra.mxu0 %v10709_v21  ;;  %6075 = vmatpush1.bf16.msra.mxu1 %v10715_v19 }
 0xddb   :  { %6033 = vmatprep.subr.bf16.mxu0 %v10721_v35  ;;  %6076 = vmatprep.subr.bf16.mxu1 %v10727_v22 }
 0xdde   :  { %6034 = vmatpush1.bf16.msra.mxu0 %v10733_v57  ;;  %6077 = vmatpush1.bf16.msra.mxu1 %v10739_v10 }
 0xddf   :  { %6035 = vmatprep.subr.bf16.mxu0 %v10745_v27  ;;  %6078 = vmatprep.subr.bf16.mxu1 %v10751_v45 }
 0xde2   :  { %6036 = vmatpush1.bf16.msra.mxu0 %v10757_v4  ;;  %6079 = vmatpush1.bf16.msra.mxu1 %v10763_v2 }
 0xde3   :  { %6172 = vmatprep.subr.bf16.mxu0 %v10769_v58  ;;  %6215 = vmatprep.subr.bf16.mxu1 %v10775_v41  ;;  %v11241_v58 = vld [vmem:[#allocation50_spill] sm:$0xff] }
 0xde4   :  { %v4716_v29 = vadd.f32 %v11241_v58, %v10432_v60 }
 0xe85   :  { %v5904_v13 = vpop.f32.mrf.mxu0  ;;  %v5947_v54 = vpop.f32.mrf.mxu1 }
 0xe86   :  { %v5956_v43 = vadd.f32 %v5904_v13, %v4710_v42  ;;  %v11244_v13 = vld [vmem:[#allocation49_spill] sm:$0xff] }
 0xe87   :  { %v5906_v25 = vpop.f32.mrf.mxu0  ;;  %v5949_v55 = vpop.f32.mrf.mxu1  ;;  %v4829_v46 = vadd.f32 %v11244_v13, %v10448_v1 }
 0xe88   :  { %v7015_v11 = vmul.f32 -1.442695, %v5956_v43  ;;  %v5957_v52 = vadd.f32 %v5906_v25, %v4712_v53  ;;  %v5959_v33 = vadd.f32 %v5949_v55, %v4825_v6  ;;  %v5958_v53 = vadd.f32 %v5947_v54, %v4823_v59  ;;  %v11245_v43 = vld [vmem:[#allocation47_spill] sm:$0xff] }
 0xe89   :  { %v5908_v15 = vpop.f32.mrf.mxu0  ;;  %v5951_v12 = vpop.f32.mrf.mxu1  ;;  %v4827_v25 = vadd.f32 %v11245_v43, %v10452_v32 }
 0xe8a   :  { %8049 = vpow2.f32 %v7015_v11  ;;  %v7017_v41 = vmul.f32 -1.442695, %v5957_v52  ;;  %v5960_v18 = vadd.f32 %v5908_v15, %v4714_v28  ;;  %v7019_v50 = vmul.f32 -1.442695, %v5959_v33 }
 0xe8b   :  { %v5910_v49 = vpop.f32.mrf.mxu0  ;;  %v5953_v42 = vpop.f32.mrf.mxu1  ;;  %v5962_v52 = vadd.f32 %v5951_v12, %v4827_v25 }
 0xe8c   :  { %8051 = vpow2.f32 %v7017_v41  ;;  %v7016_v23 = vmul.f32 -1.442695, %v5960_v18  ;;  %v5961_v0 = vadd.f32 %v5910_v49, %v4716_v29  ;;  %v5963_v28 = vadd.f32 %v5953_v42, %v4829_v46 }
 0xe8e   :  { %8053 = vpow2.f32 %v7016_v23  ;;  %v7018_v24 = vmul.f32 -1.442695, %v5961_v0  ;;  %v7020_v29 = vmul.f32 -1.442695, %v5963_v28 }
 0xe90   :  { %8055 = vpow2.f32 %v7018_v24 }
 0xe91   :  { %8057 = vtanh.f32 %v5958_v53 }
 0xe92   :  { %8059 = vpow2.f32 %v7019_v50 }
 0xe97   :  { %v8050_v11 = vpop.eup %8049 }
 0xe98   :  { %v5970_v15 = vadd.f32 1.0, %v8050_v11 }
 0xe99   :  { %v8052_v58 = vpop.eup %8051 }
 0xe9a   :  { %8061 = vrcp.f32 %v5970_v15  ;;  %v5982_v41 = vadd.f32 1.0, %v8052_v58 }
 0xe9b   :  { %v8054_v55 = vpop.eup %8053  ;;  %8063 = vtanh.f32 %v5962_v52 }
 0xe9c   :  { %8065 = vrcp.f32 %v5982_v41  ;;  %v5971_v18 = vadd.f32 1.0, %v8054_v55  ;;  %v11253_v41 = vld [vmem:[#allocation52_spill] sm:$0xff] }
 0xe9d   :  { %v8056_v49 = vpop.eup %8055  ;;  %8067 = vpow2.f32 %v7020_v29  ;;  %v4837_v55 = vadd.f32 %v11253_v41, %v10452_v32 }
 0xe9e   :  { %8069 = vrcp.f32 %v5971_v18  ;;  %v5983_v54 = vadd.f32 1.0, %v8056_v49  ;;  %v8058_v23 = vpop.eup %8057 }
 0xe9f   :  { %v8060_v0 = vpop.eup %8059 }
 0xea0   :  { %8071 = vrcp.f32 %v5983_v54  ;;  %v5996_v42 = vadd.f32 1.0, %v8060_v0 }
 0xea2   :  { %8073 = vrcp.f32 %v5996_v42 }
 0xea7   :  { %v8062_v24 = vpop.eup %8061 }
 0xea8   :  { %v8064_v12 = vpop.eup %8063  ;;  %v6004_v14 = vmul.f32 %v8062_v24, %v8058_v23 }
 0xea9   :  { %v8066_v6 = vpop.eup %8065 }
 0xeaa   :  { %v8068_v33 = vpop.eup %8067  ;;  %v6002_v44 = vmul.f32 %v8066_v6, %v10853_v9 }
 0xeab   :  { %v8070_v59 = vpop.eup %8069  ;;  %v5997_v43 = vadd.f32 1.0, %v8068_v33 }
 0xeac   :  { %v10911_v13 = vadd.f32 %v6004_v14, %v6002_v44  ;;  %v6005_v46 = vmul.f32 %v8070_v59, %v8064_v12 }
 0xead   :  { %v8072_v53 = vpop.eup %8071 }
 0xeae   :  { %v6003_v25 = vmul.f32 %v8072_v53, %v10857_v63  ;;  %8075 = vtanh.f32 %v10911_v13 }
 0xeaf   :  { %8077 = vrcp.f32 %v5997_v43  ;;  %v8074_v28 = vpop.eup %8073 }
 0xeb0   :  { %v10915_v50 = vadd.f32 %v6005_v46, %v6003_v25 }
 0xeb2   :  { %8079 = vtanh.f32 %v10915_v50 }
 0xebb   :  { %v8076_v11 = vpop.eup %8075 }
 0xebc   :  { %v8078_v9 = vpop.eup %8077  ;;  %v6010_v15 = vmul.f32 %v8076_v11, %v8074_v28 }
 0xebf   :  { %v8080_v52 = vpop.eup %8079 }
 0xec0   :  { %v6011_v58 = vmul.f32 %v8080_v52, %v8078_v9 }
 0xec2   :  { %v6020_v29 = vpack.c.bf16 %v6011_v58, %v6010_v15 }
 0xec4   :  { %6054 = vmatmul.mubr.bf16.vlgmr.msra.gmra.mxu0 %v6020_v29  ;;  %6097 = vmatmul.mubr.bf16.vlgmr.msra.gmra.mxu1 %v6020_v29 }
 0xec5   :  { %6173 = vmatpush1.bf16.msra.mxu0 %v10587_v16  ;;  %6216 = vmatpush1.bf16.msra.mxu1 %v10593_v26 }
 0xec6   :  { %6174 = vmatprep.subr.bf16.mxu0 %v10599_v5  ;;  %6217 = vmatprep.subr.bf16.mxu1 %v10605_v7  ;;  %v11247_v5 = vld [vmem:[#allocation24_spill] sm:$0xff] }
 0xec7   :  { %6204 = vmatprep.mubr.bf16.mxu0 %v11098_v47  ;;  %6247 = vmatprep.mubr.bf16.mxu1 %v11098_v47  ;;  %v11246_v47 = vld [vmem:[#allocation25_spill] sm:$0xff]  ;;  %v4722_v7 = vadd.f32 %v11247_v5, %v10432_v60 }
 0xec8   :  { %v4720_v16 = vadd.f32 %v11246_v47, %v10424_v62 }
 0xec9   :  { %6175 = vmatpush1.bf16.msra.mxu0 %v10613_v8  ;;  %6218 = vmatpush1.bf16.msra.mxu1 %v10619_v48 }
 0xeca   :  { %6176 = vmatprep.subr.bf16.mxu0 %v10625_v17  ;;  %6219 = vmatprep.subr.bf16.mxu1 %v10631_v40  ;;  %v11248_v40 = vld [vmem:[#allocation27_spill] sm:$0xff] }
 0xecd   :  { %6177 = vmatpush1.bf16.msra.mxu0 %v10637_v56  ;;  %6220 = vmatpush1.bf16.msra.mxu1 %v10643_v39  ;;  %v4724_v56 = vadd.f32 %v11248_v40, %v10424_v62 }
 0xece   :  { %6178 = vmatprep.subr.bf16.mxu0 %v10649_v51  ;;  %6221 = vmatprep.subr.bf16.mxu1 %v10655_v38 }
 0xed1   :  { %6179 = vmatpush1.bf16.msra.mxu0 %v10661_v31  ;;  %6222 = vmatpush1.bf16.msra.mxu1 %v10667_v61  ;;  %v11249_v31 = vld [vmem:[#allocation51_spill] sm:$0xff] }
 0xed2   :  { %6180 = vmatprep.subr.bf16.mxu0 %v10673_v30  ;;  %6223 = vmatprep.subr.bf16.mxu1 %v10679_v36  ;;  %v4726_v61 = vadd.f32 %v11249_v31, %v10432_v60  ;;  %v7628_v31 = vld [vmem:[%s11032_s7 + $0x20] sm:$0xff]  }
 0xed5   :  { %6181 = vmatpush1.bf16.msra.mxu0 %v10685_v20  ;;  %6224 = vmatpush1.bf16.msra.mxu1 %v10691_v34 }
 0xed6   :  { %6182 = vmatprep.subr.bf16.mxu0 %v10697_v37  ;;  %6225 = vmatprep.subr.bf16.mxu1 %v10703_v3 }
 0xed9   :  { %6183 = vmatpush1.bf16.msra.mxu0 %v10709_v21  ;;  %6226 = vmatpush1.bf16.msra.mxu1 %v10715_v19 }
 0xeda   :  { %6184 = vmatprep.subr.bf16.mxu0 %v10721_v35  ;;  %6227 = vmatprep.subr.bf16.mxu1 %v10727_v22  ;;  %v11250_v35 = vld [vmem:[#allocation26_spill] sm:$0xff] }
 0xedb   :  { %v4835_v22 = vadd.f32 %v11250_v35, %v10448_v1 }
 0xedd   :  { %6185 = vmatpush1.bf16.msra.mxu0 %v10733_v57  ;;  %6228 = vmatpush1.bf16.msra.mxu1 %v10739_v10  ;;  %v11251_v10 = vld [vmem:[#allocation23_spill] sm:$0xff] }
 0xede   :  { %6186 = vmatprep.subr.bf16.mxu0 %v10745_v27  ;;  %6229 = vmatprep.subr.bf16.mxu1 %v10751_v45  ;;  %v4833_v27 = vadd.f32 %v11251_v10, %v10452_v32  ;;  %v11256_v10 = vld [vmem:[#allocation31_spill] sm:$0xff] }
 0xee1   :  { %6187 = vmatpush1.bf16.msra.mxu0 %v10757_v4  ;;  %6230 = vmatpush1.bf16.msra.mxu1 %v10763_v2  ;;  %v11252_v4 = vld [vmem:[#allocation54_spill] sm:$0xff] }
 0xee2   :  { %v4839_v2 = vadd.f32 %v11252_v4, %v10448_v1 }
 0xf84   :  { %v6055_v26 = vpop.f32.mrf.mxu0  ;;  %v6098_v48 = vpop.f32.mrf.mxu1 }
 0xf85   :  { %v6107_v8 = vadd.f32 %v6055_v26, %v4720_v16  ;;  %v6109_v63 = vadd.f32 %v6098_v48, %v4833_v27  ;;  %v4734_v27 = vadd.f32 %v11256_v10, %v10424_v62 }
 0xf86   :  { %v6057_v17 = vpop.f32.mrf.mxu0  ;;  %v6100_v36 = vpop.f32.mrf.mxu1 }
 0xf87   :  { %v7021_v39 = vmul.f32 -1.442695, %v6107_v8  ;;  %v6108_v51 = vadd.f32 %v6057_v17, %v4722_v7  ;;  %v6110_v57 = vadd.f32 %v6100_v36, %v4835_v22  ;;  %v7631_v36 = vld [vmem:[%s11032_s7 + $0x8] sm:$0xff]  }
 0xf88   :  { %v6059_v38 = vpop.f32.mrf.mxu0  ;;  %v6102_v21 = vpop.f32.mrf.mxu1 }
 0xf89   :  { %8081 = vpow2.f32 %v7021_v39  ;;  %v7023_v30 = vmul.f32 -1.442695, %v6108_v51  ;;  %v6111_v20 = vadd.f32 %v6059_v38, %v4724_v56  ;;  %v7025_v18 = vmul.f32 -1.442695, %v6110_v57  ;;  %v7626_v51 = vld [vmem:[%s11032_s7 + $0x30] sm:$0xff]   ;;  %v7627_v38 = vld [vmem:[%s11032_s7 + $0x28] sm:$0xff]  }
 0xf8a   :  { %v6061_v34 = vpop.f32.mrf.mxu0  ;;  %v6104_v45 = vpop.f32.mrf.mxu1  ;;  %v6113_v23 = vadd.f32 %v6102_v21, %v4837_v55  ;;  %v8178_v39 = vmov 0.0   ;;  %v11255_v21 = vld [vmem:[#allocation28_spill] sm:$0xff] }
 0xf8b   :  { %8083 = vpow2.f32 %v7023_v30  ;;  %v7022_v37 = vmul.f32 -1.442695, %v6111_v20  ;;  %v6112_v3 = vadd.f32 %v6061_v34, %v4726_v61  ;;  %v6114_v49 = vadd.f32 %v6104_v45, %v4839_v2  ;;  %7114 = vmatprep.subr.bf16.mxu0 %v8178_v39  ;;  %v7629_v61 = vld [vmem:[%s11032_s7 + $0x18] sm:$0xff]   ;;  %v7630_v30 = vld [vmem:[%s11032_s7 + $0x10] sm:$0xff]   ;;  %v7632_v20 = vld [vmem:[%s11032_s7] sm:$0xff]  }
 0xf8c   :  { %v11254_v34 = vld [vmem:[#allocation53_spill] sm:$0xff] }
 0xf8d   :  { %8085 = vpow2.f32 %v7022_v37  ;;  %v7024_v19 = vmul.f32 -1.442695, %v6112_v3  ;;  %v7026_v12 = vmul.f32 -1.442695, %v6114_v49  ;;  %v4730_v37 = vadd.f32 %v11254_v34, %v10424_v62 }
 0xf8f   :  { %8087 = vpow2.f32 %v7024_v19  ;;  %v4732_v19 = vadd.f32 %v11255_v21, %v10432_v60 }
 0xf90   :  { %8089 = vtanh.f32 %v6109_v63  ;;  %v11257_v63 = vld [vmem:[#allocation56_spill] sm:$0xff] }
 0xf91   :  { %8091 = vpow2.f32 %v7025_v18  ;;  %v4736_v41 = vadd.f32 %v11257_v63, %v10432_v60 }
 0xf96   :  { %v8082_v54 = vpop.eup %8081 }
 0xf97   :  { %v6121_v0 = vadd.f32 1.0, %v8082_v54 }
 0xf98   :  { %v8084_v24 = vpop.eup %8083 }
 0xf99   :  { %8093 = vrcp.f32 %v6121_v0  ;;  %v6133_v14 = vadd.f32 1.0, %v8084_v24 }
 0xf9a   :  { %v8086_v6 = vpop.eup %8085  ;;  %8095 = vtanh.f32 %v6113_v23 }
 0xf9b   :  { %8097 = vrcp.f32 %v6133_v14  ;;  %v6122_v33 = vadd.f32 1.0, %v8086_v6  ;;  %v11258_v14 = vld [vmem:[#allocation29_spill] sm:$0xff] }
 0xf9c   :  { %v8088_v44 = vpop.eup %8087  ;;  %8099 = vpow2.f32 %v7026_v12  ;;  %v4845_v62 = vadd.f32 %v11258_v14, %v10448_v1 }
 0xf9d   :  { %8101 = vrcp.f32 %v6122_v33  ;;  %v6134_v59 = vadd.f32 1.0, %v8088_v44  ;;  %v8090_v42 = vpop.eup %8089  ;;  %v11259_v33 = vld [vmem:[#allocation30_spill] sm:$0xff] }
 0xf9e   :  { %v8092_v46 = vpop.eup %8091  ;;  %v4843_v44 = vadd.f32 %v11259_v33, %v10452_v32 }
 0xf9f   :  { %8103 = vrcp.f32 %v6134_v59  ;;  %v6147_v15 = vadd.f32 1.0, %v8092_v46  ;;  %v11260_v59 = vld [vmem:[#allocation55_spill] sm:$0xff] }
 0xfa1   :  { %8105 = vrcp.f32 %v6147_v15 }
 0xfa6   :  { %v8094_v53 = vpop.eup %8093 }
 0xfa7   :  { %v8096_v43 = vpop.eup %8095  ;;  %v6155_v25 = vmul.f32 %v8094_v53, %v8090_v42  ;;  %v4849_v42 = vadd.f32 %v11260_v59, %v10448_v1  ;;  %v11261_v53 = vld [vmem:[#allocation32_spill] sm:$0xff] }
 0xfa8   :  { %v8098_v28 = vpop.eup %8097 }
 0xfa9   :  { %v8100_v11 = vpop.eup %8099  ;;  %v6153_v9 = vmul.f32 %v8098_v28, %v10911_v13 }
 0xfaa   :  { %v8102_v52 = vpop.eup %8101  ;;  %v6148_v16 = vadd.f32 1.0, %v8100_v11 }
 0xfab   :  { %v10967_v58 = vadd.f32 %v6155_v25, %v6153_v9  ;;  %v6156_v29 = vmul.f32 %v8102_v52, %v8096_v43  ;;  %v4847_v43 = vadd.f32 %v11261_v53, %v10452_v32 }
 0xfac   :  { %v8104_v47 = vpop.eup %8103 }
 0xfad   :  { %v6154_v26 = vmul.f32 %v8104_v47, %v10915_v50  ;;  %8107 = vtanh.f32 %v10967_v58  ;;  %v7625_v50 = vld [vmem:[%s11032_s7 + $0x38] sm:$0xff]  }
 0xfae   :  { %8109 = vrcp.f32 %v6148_v16  ;;  %v8106_v7 = vpop.eup %8105 }
 0xfaf   :  { %v10971_v5 = vadd.f32 %v6156_v29, %v6154_v26 }
 0xfb1   :  { %8111 = vtanh.f32 %v10971_v5 }
 0xfba   :  { %v8108_v8 = vpop.eup %8107 }
 0xfbb   :  { %v8110_v13 = vpop.eup %8109  ;;  %v6161_v17 = vmul.f32 %v8108_v8, %v8106_v7 }
 0xfbe   :  { %v8112_v48 = vpop.eup %8111 }
 0xfbf   :  { %v6162_v40 = vmul.f32 %v8112_v48, %v8110_v13 }
 0xfc1   :  { %v6171_v56 = vpack.c.bf16 %v6162_v40, %v6161_v17 }
 0xfc3   :  { %6205 = vmatmul.mubr.bf16.vlgmr.msra.gmra.mxu0 %v6171_v56  ;;  %6248 = vmatmul.mubr.bf16.vlgmr.msra.gmra.mxu1 %v6171_v56 }
 0xfc4   :  { %7115 = vmatpush3.bf16.msra.mxu0 %v7625_v50  ;;  %7130 = vmatprep.mubr.msk.bf16.mxu0 %vm8179_vm0, %v8178_v39 }
 0xfc5   :  { %7116 = vmatprep.subr.bf16.mxu0 %v8178_v39 }
 0xfc8   :  { %7117 = vmatpush3.bf16.msra.mxu0 %v7626_v51 }
 0xfc9   :  { %7118 = vmatprep.subr.bf16.mxu0 %v8178_v39 }
 0xfcc   :  { %7119 = vmatpush3.bf16.msra.mxu0 %v7627_v38 }
 0xfcd   :  { %7120 = vmatprep.subr.bf16.mxu0 %v8178_v39 }
 0xfd0   :  { %7121 = vmatpush3.bf16.msra.mxu0 %v7628_v31 }
 0xfd1   :  { %7122 = vmatprep.subr.bf16.mxu0 %v8178_v39 }
 0xfd4   :  { %7123 = vmatpush3.bf16.msra.mxu0 %v7629_v61 }
 0xfd5   :  { %7124 = vmatprep.subr.bf16.mxu0 %v8178_v39 }
 0xfd8   :  { %7125 = vmatpush3.bf16.msra.mxu0 %v7630_v30 }
 0xfd9   :  { %7126 = vmatprep.subr.bf16.mxu0 %v8178_v39 }
 0xfdc   :  { %7127 = vmatpush3.bf16.msra.mxu0 %v7631_v36 }
 0xfdd   :  { %7128 = vmatprep.subr.bf16.mxu0 %v8178_v39 }
 0xfe0   :  { %7129 = vmatpush3.bf16.msra.mxu0 %v7632_v20 }
0x1083   :  { %v6206_v3 = vpop.f32.mrf.mxu0  ;;  %v6249_v22 = vpop.f32.mrf.mxu1 }
0x1084   :  { %v6258_v35 = vadd.f32 %v6206_v3, %v4730_v37  ;;  %v6260_v46 = vadd.f32 %v6249_v22, %v4843_v44 }
0x1085   :  { %v6208_v57 = vpop.f32.mrf.mxu0  ;;  %v6251_v18 = vpop.f32.mrf.mxu1 }
0x1086   :  { %v7027_v45 = vmul.f32 -1.442695, %v6258_v35  ;;  %v6259_v4 = vadd.f32 %v6208_v57, %v4732_v19  ;;  %v6261_v6 = vadd.f32 %v6251_v18, %v4845_v62 }
0x1087   :  { %v6210_v2 = vpop.f32.mrf.mxu0  ;;  %v6253_v24 = vpop.f32.mrf.mxu1 }
0x1088   :  { %8113 = vpow2.f32 %v7027_v45  ;;  %v7029_v55 = vmul.f32 -1.442695, %v6259_v4  ;;  %v6262_v49 = vadd.f32 %v6210_v2, %v4734_v27  ;;  %v7031_v25 = vmul.f32 -1.442695, %v6261_v6 }
0x1089   :  { %v6212_v54 = vpop.f32.mrf.mxu0  ;;  %v6255_v60 = vpop.f32.mrf.mxu1  ;;  %v6264_v9 = vadd.f32 %v6253_v24, %v4847_v43 }
0x108a   :  { %8115 = vpow2.f32 %v7029_v55  ;;  %v7028_v23 = vmul.f32 -1.442695, %v6262_v49  ;;  %v6263_v0 = vadd.f32 %v6212_v54, %v4736_v41  ;;  %v6265_v28 = vadd.f32 %v6255_v60, %v4849_v42 }
0x108c   :  { %8117 = vpow2.f32 %v7028_v23  ;;  %v7030_v12 = vmul.f32 -1.442695, %v6263_v0  ;;  %v7032_v29 = vmul.f32 -1.442695, %v6265_v28 }
0x108e   :  { %8119 = vpow2.f32 %v7030_v12 }
0x108f   :  { %8121 = vtanh.f32 %v6260_v46 }
0x1090   :  { %8123 = vpow2.f32 %v7031_v25 }
0x1095   :  { %v8114_v11 = vpop.eup %8113 }
0x1096   :  { %v6272_v52 = vadd.f32 1.0, %v8114_v11 }
0x1097   :  { %v8116_v15 = vpop.eup %8115 }
0x1098   :  { %8125 = vrcp.f32 %v6272_v52  ;;  %v6284_v47 = vadd.f32 1.0, %v8116_v15 }
0x1099   :  { %v8118_v16 = vpop.eup %8117  ;;  %8127 = vtanh.f32 %v6264_v9 }
0x109a   :  { %8129 = vrcp.f32 %v6284_v47  ;;  %v6273_v26 = vadd.f32 1.0, %v8118_v16 }
0x109b   :  { %v8120_v1 = vpop.eup %8119  ;;  %8131 = vpow2.f32 %v7032_v29 }
0x109c   :  { %8133 = vrcp.f32 %v6273_v26  ;;  %v6285_v7 = vadd.f32 1.0, %v8120_v1  ;;  %v8122_v32 = vpop.eup %8121 }
0x109d   :  { %v8124_v8 = vpop.eup %8123 }
0x109e   :  { %8135 = vrcp.f32 %v6285_v7  ;;  %v6298_v56 = vadd.f32 1.0, %v8124_v8 }
0x10a0   :  { %8137 = vrcp.f32 %v6298_v56 }
0x10a5   :  { %v8126_v13 = vpop.eup %8125 }
0x10a6   :  { %v8128_v48 = vpop.eup %8127  ;;  %v6306_v17 = vmul.f32 %v8126_v13, %v8122_v32 }
0x10a7   :  { %v8130_v40 = vpop.eup %8129 }
0x10a8   :  { %v8132_v50 = vpop.eup %8131  ;;  %v6304_v39 = vmul.f32 %v8130_v40, %v10967_v58  ;;  %v7033_v58 = vld [vmem:[%s11033_s8] ss:$0 sm:$0xff] }
0x10a9   :  { %v8134_v51 = vpop.eup %8133  ;;  %v6299_v30 = vadd.f32 1.0, %v8132_v50 }
0x10aa   :  { %v6308_v38 = vadd.f32 %v6306_v17, %v6304_v39  ;;  %v6307_v31 = vmul.f32 %v8134_v51, %v8128_v48 }
0x10ab   :  { %v8136_v61 = vpop.eup %8135 }
0x10ac   :  { %8139 = vtanh.f32 %v6308_v38  ;;  %v6305_v36 = vmul.f32 %v8136_v61, %v10971_v5 }
0x10ad   :  { %8141 = vrcp.f32 %v6299_v30  ;;  %v8138_v34 = vpop.eup %8137 }
0x10ae   :  { %v6309_v20 = vadd.f32 %v6307_v31, %v6305_v36 }
0x10b0   :  { %8143 = vtanh.f32 %v6309_v20 }
0x10b9   :  { %v8140_v37 = vpop.eup %8139 }
0x10ba   :  { %v6312_v3 = vmul.f32 %v8140_v37, %v8138_v34  ;;  %v8142_v21 = vpop.eup %8141 }
0x10bd   :  { %v8144_v19 = vpop.eup %8143 }
0x10be   :  { %v6313_v35 = vmul.f32 %v8144_v19, %v8142_v21 }
0x10c0   :  { %v6314_v22 = vpack.c.bf16 %v6313_v35, %v6312_v3 }
0x10c2   :  { %7131 = vmatmul.mubr.bf16.vlgmr.msra.gmra.mxu0 %v6314_v22 }
0x1182   :  { %v6420_v57 = vpop.f32.mrf.mxu0 }
0x1183   :  { %v6421_v10 = vadd.f32 %v7033_v58, %v6420_v57 }
0x1184   :  { %v7132_v27 = vpop.f32.mrf.mxu0 }
0x1185   :  { %6427 = vst [vmem:[%s11034_s9] sm:$0xff] %v6421_v10 }
0x1186   :  { %v6423_v5 = vpop.f32.mrf.mxu0 }
0x1187   :  { %v6424_v45 = vadd.f32 %v7033_v58, %v6423_v5 }
0x1188   :  { %v7133_v4 = vpop.f32.mrf.mxu0 }
0x1189   :  { %6428 = vst [vmem:[%s11034_s9 + $0x8] sm:$0xff] %v6424_v45 }

</bundles_post_ra>
